<compile_context>
chip_gen: v6e
topology: v6e:2x2x1
jax: 0.10.0
libtpu: 0.0.40
codegen_flags: <defaults>
</compile_context>

<pallas_src>
import functools

import jax
import jax.numpy as jnp
import numpy as np
from jax.experimental import pallas as pl
from jax.experimental.pallas import tpu as pltpu

LRELU_SLOPE = 0.01   # nn.LeakyReLU default negative_slope
CIN_PAD = 16         # input-channel segment padded to a sublane/bf16-friendly size


# --------------------------------------------------------------------------- #
# Fused Pallas kernel: whole dense block for one batch element
# --------------------------------------------------------------------------- #
def _rdb_kernel(mask_ref, x_ref, w1, w2, w3, w4, w5,
                b1, b2, b3, b4, b5, o_ref, act_ref, *, H, W, cin_pad, cout):
    # mask_ref : (1, P)   f32   1.0 at interior (valid) padded positions, 0.0 at border
    # x_ref    : (1, cin_pad, P) f32   zero-padded (spatial + channel) input, flattened
    # w_k      : (9*Cout_k, C_k) bf16  tap-major packed conv weights (C_k = cin_pad+(k-1)*32)
    # b_k      : (Cout_k, 1) f32
    # o_ref    : (1, cout, P) f32      conv5 output on the padded/flattened grid
    # act_ref  : (cin_pad + 4*32, P) f32 VMEM scratch holding [x | x1 | x2 | x3 | x4]
    Hp, Wp = H + 2, W + 2
    P = Hp * Wp

    mask = mask_ref[...]                                   # (1, P)

    # place the network input as the first channel segment of the activation buffer
    act_ref[0:cin_pad, :] = x_ref[0]

    # flat-index offset of each of the 9 taps of a 3x3 conv on the padded grid
    shifts = tuple((kh - 1) * Wp + (kw - 1) for kh in range(3) for kw in range(3))

    def shift_lanes(z, d):
        # out[:, q] = z[:, (q + d) mod P]; wrapped entries only land on masked border pixels
        dd = d % P
        if dd == 0:
            return z
        return jnp.concatenate([z[:, dd:], z[:, :dd]], axis=1)

    def conv3x3(c_in, w_ref, b_ref, n_out, apply_lrelu):
        rhs = act_ref[0:c_in, :].astype(jnp.bfloat16)                      # (c_in, P)
        # one MXU matmul for all 9 taps: rows of z are tap-major blocks of size n_out
        z = jnp.dot(w_ref[...], rhs, preferred_element_type=jnp.float32)   # (9*n_out, P)
        y = shift_lanes(z[0:n_out, :], shifts[0])
        for t in range(1, 9):
            y = y + shift_lanes(z[t * n_out:(t + 1) * n_out, :], shifts[t])
        y = y + b_ref[...]                                                 # (n_out, P)
        if apply_lrelu:
            y = jnp.where(y >= 0, y, LRELU_SLOPE * y)
        return y * mask   # zero the border -> acts as the zero padding of the next conv

    o1 = cin_pad
    y = conv3x3(o1, w1, b1, 32, True)
    act_ref[o1:o1 + 32, :] = y
    o2 = o1 + 32
    y = conv3x3(o2, w2, b2, 32, True)
    act_ref[o2:o2 + 32, :] = y
    o3 = o2 + 32
    y = conv3x3(o3, w3, b3, 32, True)
    act_ref[o3:o3 + 32, :] = y
    o4 = o3 + 32
    y = conv3x3(o4, w4, b4, 32, True)
    act_ref[o4:o4 + 32, :] = y
    o5 = o4 + 32
    y5 = conv3x3(o5, w5, b5, cout, False)                                  # (cout, P)
    o_ref[0] = y5.astype(o_ref.dtype)


# --------------------------------------------------------------------------- #
# Host-side weight packing and wrapper
# --------------------------------------------------------------------------- #
def _pack_conv_weight(w_hwio, cin_real, cin_pad):
    # w_hwio: (3, 3, Ct, Cout) with concat-channel order [x(cin_real), x1, x2, ...]
    # -> (9*Cout, cin_pad + (Ct - cin_real)) bf16, tap-major rows, padded-channel columns
    K = w_hwio.shape[0]
    cout = w_hwio.shape[-1]
    first = jnp.pad(w_hwio[:, :, :cin_real, :],
                    ((0, 0), (0, 0), (0, cin_pad - cin_real), (0, 0)))
    rest = w_hwio[:, :, cin_real:, :]
    w_pad = jnp.concatenate([first, rest], axis=2)                  # (3,3,Cpad,Cout)
    w_pk = jnp.transpose(w_pad, (0, 1, 3, 2)).reshape(K * K * cout, -1)
    return w_pk.astype(jnp.bfloat16)


def residual_dense_block_pallas(x_nchw, params):
    N, cin, H, W = x_nchw.shape
    Hp, Wp = H + 2, W + 2
    P = Hp * Wp
    cout = params["w5"].shape[-1]

    # pad input once (channels -> CIN_PAD, spatial halo of 1) and flatten spatial
    xp = jnp.pad(x_nchw, ((0, 0), (0, CIN_PAD - cin), (1, 1), (1, 1)))
    xp = xp.reshape(N, CIN_PAD, P).astype(jnp.float32)

    # interior mask over the padded/flattened grid
    idx = jnp.arange(P)
    row, col = idx // Wp, idx % Wp
    mask = (((row >= 1) & (row <= H) & (col >= 1) & (col <= W))
            .astype(jnp.float32).reshape(1, P))

    ws = [_pack_conv_weight(params[f"w{k}"], cin, CIN_PAD) for k in range(1, 6)]
    bs = [params[f"b{k}"].reshape(-1, 1).astype(jnp.float32) for k in range(1, 6)]

    c_all = CIN_PAD + 4 * 32
    kern = functools.partial(_rdb_kernel, H=H, W=W, cin_pad=CIN_PAD, cout=cout)

    w_specs = [pl.BlockSpec(w.shape, lambda n: (0, 0)) for w in ws]
    b_specs = [pl.BlockSpec(b.shape, lambda n: (0, 0)) for b in bs]

    out = pl.pallas_call(
        kern,
        out_shape=jax.ShapeDtypeStruct((N, cout, P), jnp.float32),
        grid=(N,),
        in_specs=[pl.BlockSpec((1, P), lambda n: (0, 0)),               # mask
                  pl.BlockSpec((1, CIN_PAD, P), lambda n: (n, 0, 0)),   # x
                  *w_specs, *b_specs],
        out_specs=pl.BlockSpec((1, cout, P), lambda n: (n, 0, 0)),
        scratch_shapes=[pltpu.VMEM((c_all, P), jnp.float32)],
        compiler_params=pltpu.CompilerParams(
            dimension_semantics=("parallel",)),
    )(mask, xp, *ws, *bs)

    # strip the spatial padding -> (N, Cout, H, W)
    return out.reshape(N, cout, Hp, Wp)[:, :, 1:H + 1, 1:W + 1]


# --------------------------------------------------------------------------- #
# Pure-JAX reference (f32) for the correctness check
# --------------------------------------------------------------------------- #
def ref_forward(x, params):
    def conv(v, w, b):
        y = jax.lax.conv_general_dilated(
            v, w, (1, 1), ((1, 1), (1, 1)),
            dimension_numbers=("NCHW", "HWIO", "NCHW"))
        return y + b[None, :, None, None]

    def lrelu(v):
        return jnp.where(v >= 0, v, LRELU_SLOPE * v)

    x1 = lrelu(conv(x, params["w1"], params["b1"]))
    x2 = lrelu(conv(jnp.concatenate([x, x1], 1), params["w2"], params["b2"]))
    x3 = lrelu(conv(jnp.concatenate([x, x1, x2], 1), params["w3"], params["b3"]))
    x4 = lrelu(conv(jnp.concatenate([x, x1, x2, x3], 1), params["w4"], params["b4"]))
    x5 = conv(jnp.concatenate([x, x1, x2, x3, x4], 1), params["w5"], params["b5"])
    return x5


# --------------------------------------------------------------------------- #
# Deterministic parameter construction (HWIO, concat-channel order [x, x1, x2, ...])
# --------------------------------------------------------------------------- #
def make_params(key, cin, cout):
    keys = iter(jax.random.split(key, 10))

    def rnd(shape, scale=0.05):
        return scale * jax.random.normal(next(keys), shape, dtype=jnp.float32)

    return dict(
        w1=rnd((3, 3, cin, 32)),            b1=rnd((32,)),
        w2=rnd((3, 3, cin + 32, 32)),       b2=rnd((32,)),
        w3=rnd((3, 3, cin + 2 * 32, 32)),   b3=rnd((32,)),
        w4=rnd((3, 3, cin + 3 * 32, 32)),   b4=rnd((32,)),
        w5=rnd((3, 3, cin + 4 * 32, cout)), b5=rnd((cout,)),
    )


# --------------------------------------------------------------------------- #
if __name__ == "__main__":
    key = jax.random.PRNGKey(0)
    k_x, k_p = jax.random.split(key)

    N, CIN, COUT, H, W = 2, 4, 8, 16, 16
    x = jax.random.normal(k_x, (N, CIN, H, W), dtype=jnp.float32)   # NCHW (PyTorch layout)
    params = make_params(k_p, CIN, COUT)

    out = jax.jit(residual_dense_block_pallas)(x, params)
    out = jax.block_until_ready(out)

    ref = jax.jit(ref_forward)(x, params)
    ref = jax.block_until_ready(ref)

    assert out.shape == (N, COUT, H, W), out.shape
    np.testing.assert_allclose(np.asarray(out), np.asarray(ref), rtol=5e-2, atol=5e-2)

    print("KERNEL_OK")
</pallas_src>

<mosaic_0001>
module attributes {stable_mosaic.version = 11 : i64} {
  func.func @_rdb_kernel(%arg0: i32, %arg1: memref<1x324xf32, #tpu.memory_space<vmem>>, %arg2: memref<1x16x324xf32, #tpu.memory_space<vmem>>, %arg3: memref<288x16xbf16, #tpu.memory_space<vmem>>, %arg4: memref<288x48xbf16, #tpu.memory_space<vmem>>, %arg5: memref<288x80xbf16, #tpu.memory_space<vmem>>, %arg6: memref<288x112xbf16, #tpu.memory_space<vmem>>, %arg7: memref<72x144xbf16, #tpu.memory_space<vmem>>, %arg8: memref<32x1xf32, #tpu.memory_space<vmem>>, %arg9: memref<32x1xf32, #tpu.memory_space<vmem>>, %arg10: memref<32x1xf32, #tpu.memory_space<vmem>>, %arg11: memref<32x1xf32, #tpu.memory_space<vmem>>, %arg12: memref<8x1xf32, #tpu.memory_space<vmem>>, %arg13: memref<1x8x324xf32, #tpu.memory_space<vmem>>, %arg14: memref<144x324xf32, #tpu.memory_space<vmem>>) attributes {dimension_semantics = [#tpu.dimension_semantics<parallel>], iteration_bounds = array<i64: 2>, scalar_prefetch = 0 : i64, scratch_operands = 1 : i64, tpu.core_type = #tpu.core_type<tc>, window_params = [{pipeline_mode = #tpu.pipeline_mode<synchronous>, transform_indices = @transform_0, window_bounds = array<i64: 1, 324>}, {transform_indices = @transform_1, window_bounds = array<i64: 1, 16, 324>}, {pipeline_mode = #tpu.pipeline_mode<synchronous>, transform_indices = @transform_2, window_bounds = array<i64: 288, 16>}, {pipeline_mode = #tpu.pipeline_mode<synchronous>, transform_indices = @transform_3, window_bounds = array<i64: 288, 48>}, {pipeline_mode = #tpu.pipeline_mode<synchronous>, transform_indices = @transform_4, window_bounds = array<i64: 288, 80>}, {pipeline_mode = #tpu.pipeline_mode<synchronous>, transform_indices = @transform_5, window_bounds = array<i64: 288, 112>}, {pipeline_mode = #tpu.pipeline_mode<synchronous>, transform_indices = @transform_6, window_bounds = array<i64: 72, 144>}, {pipeline_mode = #tpu.pipeline_mode<synchronous>, transform_indices = @transform_7, window_bounds = array<i64: 32, 1>}, {pipeline_mode = #tpu.pipeline_mode<synchronous>, transform_indices = @transform_8, window_bounds = array<i64: 32, 1>}, {pipeline_mode = #tpu.pipeline_mode<synchronous>, transform_indices = @transform_9, window_bounds = array<i64: 32, 1>}, {pipeline_mode = #tpu.pipeline_mode<synchronous>, transform_indices = @transform_10, window_bounds = array<i64: 32, 1>}, {pipeline_mode = #tpu.pipeline_mode<synchronous>, transform_indices = @transform_11, window_bounds = array<i64: 8, 1>}, {transform_indices = @transform_12, window_bounds = array<i64: 1, 8, 324>}]} {
    %c0 = arith.constant 0 : index
    %c0_0 = arith.constant 0 : index
    %0 = vector.load %arg1[%c0, %c0_0] : memref<1x324xf32, #tpu.memory_space<vmem>>, vector<1x324xf32>
    %c0_1 = arith.constant 0 : index
    %c0_2 = arith.constant 0 : index
    %c0_3 = arith.constant 0 : index
    %1 = vector.load %arg2[%c0_1, %c0_2, %c0_3] : memref<1x16x324xf32, #tpu.memory_space<vmem>>, vector<1x16x324xf32>
    %2 = vector.shape_cast %1 : vector<1x16x324xf32> to vector<16x324xf32>
    %c0_4 = arith.constant 0 : index
    %c0_5 = arith.constant 0 : index
    %3 = vector.load %arg14[%c0_4, %c0_5] : memref<144x324xf32, #tpu.memory_space<vmem>>, vector<16x324xf32>
    tpu.vector_store %arg14[%c0_4, %c0_5], %2 {strides = array<i32>} : memref<144x324xf32, #tpu.memory_space<vmem>>, vector<16x324xf32>,
    %c0_6 = arith.constant 0 : index
    %c0_7 = arith.constant 0 : index
    %4 = vector.load %arg14[%c0_6, %c0_7] : memref<144x324xf32, #tpu.memory_space<vmem>>, vector<16x324xf32>
    %5 = arith.truncf %4 : vector<16x324xf32> to vector<16x324xbf16>
    %c0_8 = arith.constant 0 : index
    %c0_9 = arith.constant 0 : index
    %6 = vector.load %arg3[%c0_8, %c0_9] : memref<288x16xbf16, #tpu.memory_space<vmem>>, vector<288x16xbf16>
    %cst = arith.constant dense<0.000000e+00> : vector<288x324xf32>
    %7 = tpu.matmul %6, %5, %cst {dimension_numbers = #tpu.dot_dimension_numbers<[1], [0], [0], [1], [0, 0, 1, 1], [], []>} : vector<288x16xbf16>, vector<16x324xbf16>, vector<288x324xf32> -> vector<288x324xf32>
    %8 = vector.extract_strided_slice %7 {offsets = [0, 0], sizes = [32, 324], strides = [1, 1]} : vector<288x324xf32> to vector<32x324xf32>
    %9 = vector.extract_strided_slice %8 {offsets = [0, 305], sizes = [32, 19], strides = [1, 1]} : vector<32x324xf32> to vector<32x19xf32>
    %10 = vector.extract_strided_slice %8 {offsets = [0, 0], sizes = [32, 305], strides = [1, 1]} : vector<32x324xf32> to vector<32x305xf32>
    %11 = tpu.concatenate %9, %10 in 1 : vector<32x19xf32>, vector<32x305xf32> -> vector<32x324xf32>
    %12 = vector.extract_strided_slice %7 {offsets = [32, 0], sizes = [32, 324], strides = [1, 1]} : vector<288x324xf32> to vector<32x324xf32>
    %13 = vector.extract_strided_slice %12 {offsets = [0, 306], sizes = [32, 18], strides = [1, 1]} : vector<32x324xf32> to vector<32x18xf32>
    %14 = vector.extract_strided_slice %12 {offsets = [0, 0], sizes = [32, 306], strides = [1, 1]} : vector<32x324xf32> to vector<32x306xf32>
    %15 = tpu.concatenate %13, %14 in 1 : vector<32x18xf32>, vector<32x306xf32> -> vector<32x324xf32>
    %16 = arith.addf %11, %15 : vector<32x324xf32>
    %17 = vector.extract_strided_slice %7 {offsets = [64, 0], sizes = [32, 324], strides = [1, 1]} : vector<288x324xf32> to vector<32x324xf32>
    %18 = vector.extract_strided_slice %17 {offsets = [0, 307], sizes = [32, 17], strides = [1, 1]} : vector<32x324xf32> to vector<32x17xf32>
    %19 = vector.extract_strided_slice %17 {offsets = [0, 0], sizes = [32, 307], strides = [1, 1]} : vector<32x324xf32> to vector<32x307xf32>
    %20 = tpu.concatenate %18, %19 in 1 : vector<32x17xf32>, vector<32x307xf32> -> vector<32x324xf32>
    %21 = arith.addf %16, %20 : vector<32x324xf32>
    %22 = vector.extract_strided_slice %7 {offsets = [96, 0], sizes = [32, 324], strides = [1, 1]} : vector<288x324xf32> to vector<32x324xf32>
    %23 = vector.extract_strided_slice %22 {offsets = [0, 323], sizes = [32, 1], strides = [1, 1]} : vector<32x324xf32> to vector<32x1xf32>
    %24 = vector.extract_strided_slice %22 {offsets = [0, 0], sizes = [32, 323], strides = [1, 1]} : vector<32x324xf32> to vector<32x323xf32>
    %25 = tpu.concatenate %23, %24 in 1 : vector<32x1xf32>, vector<32x323xf32> -> vector<32x324xf32>
    %26 = arith.addf %21, %25 : vector<32x324xf32>
    %27 = vector.extract_strided_slice %7 {offsets = [128, 0], sizes = [32, 324], strides = [1, 1]} : vector<288x324xf32> to vector<32x324xf32>
    %28 = arith.addf %26, %27 : vector<32x324xf32>
    %29 = vector.extract_strided_slice %7 {offsets = [160, 0], sizes = [32, 324], strides = [1, 1]} : vector<288x324xf32> to vector<32x324xf32>
    %30 = vector.extract_strided_slice %29 {offsets = [0, 1], sizes = [32, 323], strides = [1, 1]} : vector<32x324xf32> to vector<32x323xf32>
    %31 = vector.extract_strided_slice %29 {offsets = [0, 0], sizes = [32, 1], strides = [1, 1]} : vector<32x324xf32> to vector<32x1xf32>
    %32 = tpu.concatenate %30, %31 in 1 : vector<32x323xf32>, vector<32x1xf32> -> vector<32x324xf32>
    %33 = arith.addf %28, %32 : vector<32x324xf32>
    %34 = vector.extract_strided_slice %7 {offsets = [192, 0], sizes = [32, 324], strides = [1, 1]} : vector<288x324xf32> to vector<32x324xf32>
    %35 = vector.extract_strided_slice %34 {offsets = [0, 17], sizes = [32, 307], strides = [1, 1]} : vector<32x324xf32> to vector<32x307xf32>
    %36 = vector.extract_strided_slice %34 {offsets = [0, 0], sizes = [32, 17], strides = [1, 1]} : vector<32x324xf32> to vector<32x17xf32>
    %37 = tpu.concatenate %35, %36 in 1 : vector<32x307xf32>, vector<32x17xf32> -> vector<32x324xf32>
    %38 = arith.addf %33, %37 : vector<32x324xf32>
    %39 = vector.extract_strided_slice %7 {offsets = [224, 0], sizes = [32, 324], strides = [1, 1]} : vector<288x324xf32> to vector<32x324xf32>
    %40 = vector.extract_strided_slice %39 {offsets = [0, 18], sizes = [32, 306], strides = [1, 1]} : vector<32x324xf32> to vector<32x306xf32>
    %41 = vector.extract_strided_slice %39 {offsets = [0, 0], sizes = [32, 18], strides = [1, 1]} : vector<32x324xf32> to vector<32x18xf32>
    %42 = tpu.concatenate %40, %41 in 1 : vector<32x306xf32>, vector<32x18xf32> -> vector<32x324xf32>
    %43 = arith.addf %38, %42 : vector<32x324xf32>
    %44 = vector.extract_strided_slice %7 {offsets = [256, 0], sizes = [32, 324], strides = [1, 1]} : vector<288x324xf32> to vector<32x324xf32>
    %45 = vector.extract_strided_slice %44 {offsets = [0, 19], sizes = [32, 305], strides = [1, 1]} : vector<32x324xf32> to vector<32x305xf32>
    %46 = vector.extract_strided_slice %44 {offsets = [0, 0], sizes = [32, 19], strides = [1, 1]} : vector<32x324xf32> to vector<32x19xf32>
    %47 = tpu.concatenate %45, %46 in 1 : vector<32x305xf32>, vector<32x19xf32> -> vector<32x324xf32>
    %48 = arith.addf %43, %47 : vector<32x324xf32>
    %c0_10 = arith.constant 0 : index
    %c0_11 = arith.constant 0 : index
    %49 = vector.load %arg8[%c0_10, %c0_11] : memref<32x1xf32, #tpu.memory_space<vmem>>, vector<32x1xf32>
    %50 = vector.broadcast %49 : vector<32x1xf32> to vector<32x324xf32>
    %51 = arith.addf %48, %50 : vector<32x324xf32>
    %cst_12 = arith.constant 0.000000e+00 : f32
    %52 = vector.broadcast %cst_12 : f32 to vector<32x324xf32>
    %53 = arith.cmpf oge, %51, %52 : vector<32x324xf32>
    %cst_13 = arith.constant 0.00999999977 : f32
    %54 = vector.broadcast %cst_13 : f32 to vector<32x324xf32>
    %55 = arith.mulf %54, %51 : vector<32x324xf32>
    %56 = arith.select %53, %51, %55 : vector<32x324xi1>, vector<32x324xf32>
    %57 = vector.broadcast %0 : vector<1x324xf32> to vector<32x324xf32>
    %58 = arith.mulf %56, %57 : vector<32x324xf32>
    %c16 = arith.constant 16 : index
    %c0_14 = arith.constant 0 : index
    %59 = vector.load %arg14[%c16, %c0_14] : memref<144x324xf32, #tpu.memory_space<vmem>>, vector<32x324xf32>
    tpu.vector_store %arg14[%c16, %c0_14], %58 {strides = array<i32>} : memref<144x324xf32, #tpu.memory_space<vmem>>, vector<32x324xf32>,
    %c0_15 = arith.constant 0 : index
    %c0_16 = arith.constant 0 : index
    %60 = vector.load %arg14[%c0_15, %c0_16] : memref<144x324xf32, #tpu.memory_space<vmem>>, vector<48x324xf32>
    %61 = arith.truncf %60 : vector<48x324xf32> to vector<48x324xbf16>
    %c0_17 = arith.constant 0 : index
    %c0_18 = arith.constant 0 : index
    %62 = vector.load %arg4[%c0_17, %c0_18] : memref<288x48xbf16, #tpu.memory_space<vmem>>, vector<288x48xbf16>
    %cst_19 = arith.constant dense<0.000000e+00> : vector<288x324xf32>
    %63 = tpu.matmul %62, %61, %cst_19 {dimension_numbers = #tpu.dot_dimension_numbers<[1], [0], [0], [1], [0, 0, 1, 1], [], []>} : vector<288x48xbf16>, vector<48x324xbf16>, vector<288x324xf32> -> vector<288x324xf32>
    %64 = vector.extract_strided_slice %63 {offsets = [0, 0], sizes = [32, 324], strides = [1, 1]} : vector<288x324xf32> to vector<32x324xf32>
    %65 = vector.extract_strided_slice %64 {offsets = [0, 305], sizes = [32, 19], strides = [1, 1]} : vector<32x324xf32> to vector<32x19xf32>
    %66 = vector.extract_strided_slice %64 {offsets = [0, 0], sizes = [32, 305], strides = [1, 1]} : vector<32x324xf32> to vector<32x305xf32>
    %67 = tpu.concatenate %65, %66 in 1 : vector<32x19xf32>, vector<32x305xf32> -> vector<32x324xf32>
    %68 = vector.extract_strided_slice %63 {offsets = [32, 0], sizes = [32, 324], strides = [1, 1]} : vector<288x324xf32> to vector<32x324xf32>
    %69 = vector.extract_strided_slice %68 {offsets = [0, 306], sizes = [32, 18], strides = [1, 1]} : vector<32x324xf32> to vector<32x18xf32>
    %70 = vector.extract_strided_slice %68 {offsets = [0, 0], sizes = [32, 306], strides = [1, 1]} : vector<32x324xf32> to vector<32x306xf32>
    %71 = tpu.concatenate %69, %70 in 1 : vector<32x18xf32>, vector<32x306xf32> -> vector<32x324xf32>
    %72 = arith.addf %67, %71 : vector<32x324xf32>
    %73 = vector.extract_strided_slice %63 {offsets = [64, 0], sizes = [32, 324], strides = [1, 1]} : vector<288x324xf32> to vector<32x324xf32>
    %74 = vector.extract_strided_slice %73 {offsets = [0, 307], sizes = [32, 17], strides = [1, 1]} : vector<32x324xf32> to vector<32x17xf32>
    %75 = vector.extract_strided_slice %73 {offsets = [0, 0], sizes = [32, 307], strides = [1, 1]} : vector<32x324xf32> to vector<32x307xf32>
    %76 = tpu.concatenate %74, %75 in 1 : vector<32x17xf32>, vector<32x307xf32> -> vector<32x324xf32>
    %77 = arith.addf %72, %76 : vector<32x324xf32>
    %78 = vector.extract_strided_slice %63 {offsets = [96, 0], sizes = [32, 324], strides = [1, 1]} : vector<288x324xf32> to vector<32x324xf32>
    %79 = vector.extract_strided_slice %78 {offsets = [0, 323], sizes = [32, 1], strides = [1, 1]} : vector<32x324xf32> to vector<32x1xf32>
    %80 = vector.extract_strided_slice %78 {offsets = [0, 0], sizes = [32, 323], strides = [1, 1]} : vector<32x324xf32> to vector<32x323xf32>
    %81 = tpu.concatenate %79, %80 in 1 : vector<32x1xf32>, vector<32x323xf32> -> vector<32x324xf32>
    %82 = arith.addf %77, %81 : vector<32x324xf32>
    %83 = vector.extract_strided_slice %63 {offsets = [128, 0], sizes = [32, 324], strides = [1, 1]} : vector<288x324xf32> to vector<32x324xf32>
    %84 = arith.addf %82, %83 : vector<32x324xf32>
    %85 = vector.extract_strided_slice %63 {offsets = [160, 0], sizes = [32, 324], strides = [1, 1]} : vector<288x324xf32> to vector<32x324xf32>
    %86 = vector.extract_strided_slice %85 {offsets = [0, 1], sizes = [32, 323], strides = [1, 1]} : vector<32x324xf32> to vector<32x323xf32>
    %87 = vector.extract_strided_slice %85 {offsets = [0, 0], sizes = [32, 1], strides = [1, 1]} : vector<32x324xf32> to vector<32x1xf32>
    %88 = tpu.concatenate %86, %87 in 1 : vector<32x323xf32>, vector<32x1xf32> -> vector<32x324xf32>
    %89 = arith.addf %84, %88 : vector<32x324xf32>
    %90 = vector.extract_strided_slice %63 {offsets = [192, 0], sizes = [32, 324], strides = [1, 1]} : vector<288x324xf32> to vector<32x324xf32>
    %91 = vector.extract_strided_slice %90 {offsets = [0, 17], sizes = [32, 307], strides = [1, 1]} : vector<32x324xf32> to vector<32x307xf32>
    %92 = vector.extract_strided_slice %90 {offsets = [0, 0], sizes = [32, 17], strides = [1, 1]} : vector<32x324xf32> to vector<32x17xf32>
    %93 = tpu.concatenate %91, %92 in 1 : vector<32x307xf32>, vector<32x17xf32> -> vector<32x324xf32>
    %94 = arith.addf %89, %93 : vector<32x324xf32>
    %95 = vector.extract_strided_slice %63 {offsets = [224, 0], sizes = [32, 324], strides = [1, 1]} : vector<288x324xf32> to vector<32x324xf32>
    %96 = vector.extract_strided_slice %95 {offsets = [0, 18], sizes = [32, 306], strides = [1, 1]} : vector<32x324xf32> to vector<32x306xf32>
    %97 = vector.extract_strided_slice %95 {offsets = [0, 0], sizes = [32, 18], strides = [1, 1]} : vector<32x324xf32> to vector<32x18xf32>
    %98 = tpu.concatenate %96, %97 in 1 : vector<32x306xf32>, vector<32x18xf32> -> vector<32x324xf32>
    %99 = arith.addf %94, %98 : vector<32x324xf32>
    %100 = vector.extract_strided_slice %63 {offsets = [256, 0], sizes = [32, 324], strides = [1, 1]} : vector<288x324xf32> to vector<32x324xf32>
    %101 = vector.extract_strided_slice %100 {offsets = [0, 19], sizes = [32, 305], strides = [1, 1]} : vector<32x324xf32> to vector<32x305xf32>
    %102 = vector.extract_strided_slice %100 {offsets = [0, 0], sizes = [32, 19], strides = [1, 1]} : vector<32x324xf32> to vector<32x19xf32>
    %103 = tpu.concatenate %101, %102 in 1 : vector<32x305xf32>, vector<32x19xf32> -> vector<32x324xf32>
    %104 = arith.addf %99, %103 : vector<32x324xf32>
    %c0_20 = arith.constant 0 : index
    %c0_21 = arith.constant 0 : index
    %105 = vector.load %arg9[%c0_20, %c0_21] : memref<32x1xf32, #tpu.memory_space<vmem>>, vector<32x1xf32>
    %106 = vector.broadcast %105 : vector<32x1xf32> to vector<32x324xf32>
    %107 = arith.addf %104, %106 : vector<32x324xf32>
    %cst_22 = arith.constant 0.000000e+00 : f32
    %108 = vector.broadcast %cst_22 : f32 to vector<32x324xf32>
    %109 = arith.cmpf oge, %107, %108 : vector<32x324xf32>
    %cst_23 = arith.constant 0.00999999977 : f32
    %110 = vector.broadcast %cst_23 : f32 to vector<32x324xf32>
    %111 = arith.mulf %110, %107 : vector<32x324xf32>
    %112 = arith.select %109, %107, %111 : vector<32x324xi1>, vector<32x324xf32>
    %113 = vector.broadcast %0 : vector<1x324xf32> to vector<32x324xf32>
    %114 = arith.mulf %112, %113 : vector<32x324xf32>
    %c48 = arith.constant 48 : index
    %c0_24 = arith.constant 0 : index
    %115 = vector.load %arg14[%c48, %c0_24] : memref<144x324xf32, #tpu.memory_space<vmem>>, vector<32x324xf32>
    tpu.vector_store %arg14[%c48, %c0_24], %114 {strides = array<i32>} : memref<144x324xf32, #tpu.memory_space<vmem>>, vector<32x324xf32>,
    %c0_25 = arith.constant 0 : index
    %c0_26 = arith.constant 0 : index
    %116 = vector.load %arg14[%c0_25, %c0_26] : memref<144x324xf32, #tpu.memory_space<vmem>>, vector<80x324xf32>
    %117 = arith.truncf %116 : vector<80x324xf32> to vector<80x324xbf16>
    %c0_27 = arith.constant 0 : index
    %c0_28 = arith.constant 0 : index
    %118 = vector.load %arg5[%c0_27, %c0_28] : memref<288x80xbf16, #tpu.memory_space<vmem>>, vector<288x80xbf16>
    %cst_29 = arith.constant dense<0.000000e+00> : vector<288x324xf32>
    %119 = tpu.matmul %118, %117, %cst_29 {dimension_numbers = #tpu.dot_dimension_numbers<[1], [0], [0], [1], [0, 0, 1, 1], [], []>} : vector<288x80xbf16>, vector<80x324xbf16>, vector<288x324xf32> -> vector<288x324xf32>
    %120 = vector.extract_strided_slice %119 {offsets = [0, 0], sizes = [32, 324], strides = [1, 1]} : vector<288x324xf32> to vector<32x324xf32>
    %121 = vector.extract_strided_slice %120 {offsets = [0, 305], sizes = [32, 19], strides = [1, 1]} : vector<32x324xf32> to vector<32x19xf32>
    %122 = vector.extract_strided_slice %120 {offsets = [0, 0], sizes = [32, 305], strides = [1, 1]} : vector<32x324xf32> to vector<32x305xf32>
    %123 = tpu.concatenate %121, %122 in 1 : vector<32x19xf32>, vector<32x305xf32> -> vector<32x324xf32>
    %124 = vector.extract_strided_slice %119 {offsets = [32, 0], sizes = [32, 324], strides = [1, 1]} : vector<288x324xf32> to vector<32x324xf32>
    %125 = vector.extract_strided_slice %124 {offsets = [0, 306], sizes = [32, 18], strides = [1, 1]} : vector<32x324xf32> to vector<32x18xf32>
    %126 = vector.extract_strided_slice %124 {offsets = [0, 0], sizes = [32, 306], strides = [1, 1]} : vector<32x324xf32> to vector<32x306xf32>
    %127 = tpu.concatenate %125, %126 in 1 : vector<32x18xf32>, vector<32x306xf32> -> vector<32x324xf32>
    %128 = arith.addf %123, %127 : vector<32x324xf32>
    %129 = vector.extract_strided_slice %119 {offsets = [64, 0], sizes = [32, 324], strides = [1, 1]} : vector<288x324xf32> to vector<32x324xf32>
    %130 = vector.extract_strided_slice %129 {offsets = [0, 307], sizes = [32, 17], strides = [1, 1]} : vector<32x324xf32> to vector<32x17xf32>
    %131 = vector.extract_strided_slice %129 {offsets = [0, 0], sizes = [32, 307], strides = [1, 1]} : vector<32x324xf32> to vector<32x307xf32>
    %132 = tpu.concatenate %130, %131 in 1 : vector<32x17xf32>, vector<32x307xf32> -> vector<32x324xf32>
    %133 = arith.addf %128, %132 : vector<32x324xf32>
    %134 = vector.extract_strided_slice %119 {offsets = [96, 0], sizes = [32, 324], strides = [1, 1]} : vector<288x324xf32> to vector<32x324xf32>
    %135 = vector.extract_strided_slice %134 {offsets = [0, 323], sizes = [32, 1], strides = [1, 1]} : vector<32x324xf32> to vector<32x1xf32>
    %136 = vector.extract_strided_slice %134 {offsets = [0, 0], sizes = [32, 323], strides = [1, 1]} : vector<32x324xf32> to vector<32x323xf32>
    %137 = tpu.concatenate %135, %136 in 1 : vector<32x1xf32>, vector<32x323xf32> -> vector<32x324xf32>
    %138 = arith.addf %133, %137 : vector<32x324xf32>
    %139 = vector.extract_strided_slice %119 {offsets = [128, 0], sizes = [32, 324], strides = [1, 1]} : vector<288x324xf32> to vector<32x324xf32>
    %140 = arith.addf %138, %139 : vector<32x324xf32>
    %141 = vector.extract_strided_slice %119 {offsets = [160, 0], sizes = [32, 324], strides = [1, 1]} : vector<288x324xf32> to vector<32x324xf32>
    %142 = vector.extract_strided_slice %141 {offsets = [0, 1], sizes = [32, 323], strides = [1, 1]} : vector<32x324xf32> to vector<32x323xf32>
    %143 = vector.extract_strided_slice %141 {offsets = [0, 0], sizes = [32, 1], strides = [1, 1]} : vector<32x324xf32> to vector<32x1xf32>
    %144 = tpu.concatenate %142, %143 in 1 : vector<32x323xf32>, vector<32x1xf32> -> vector<32x324xf32>
    %145 = arith.addf %140, %144 : vector<32x324xf32>
    %146 = vector.extract_strided_slice %119 {offsets = [192, 0], sizes = [32, 324], strides = [1, 1]} : vector<288x324xf32> to vector<32x324xf32>
    %147 = vector.extract_strided_slice %146 {offsets = [0, 17], sizes = [32, 307], strides = [1, 1]} : vector<32x324xf32> to vector<32x307xf32>
    %148 = vector.extract_strided_slice %146 {offsets = [0, 0], sizes = [32, 17], strides = [1, 1]} : vector<32x324xf32> to vector<32x17xf32>
    %149 = tpu.concatenate %147, %148 in 1 : vector<32x307xf32>, vector<32x17xf32> -> vector<32x324xf32>
    %150 = arith.addf %145, %149 : vector<32x324xf32>
    %151 = vector.extract_strided_slice %119 {offsets = [224, 0], sizes = [32, 324], strides = [1, 1]} : vector<288x324xf32> to vector<32x324xf32>
    %152 = vector.extract_strided_slice %151 {offsets = [0, 18], sizes = [32, 306], strides = [1, 1]} : vector<32x324xf32> to vector<32x306xf32>
    %153 = vector.extract_strided_slice %151 {offsets = [0, 0], sizes = [32, 18], strides = [1, 1]} : vector<32x324xf32> to vector<32x18xf32>
    %154 = tpu.concatenate %152, %153 in 1 : vector<32x306xf32>, vector<32x18xf32> -> vector<32x324xf32>
    %155 = arith.addf %150, %154 : vector<32x324xf32>
    %156 = vector.extract_strided_slice %119 {offsets = [256, 0], sizes = [32, 324], strides = [1, 1]} : vector<288x324xf32> to vector<32x324xf32>
    %157 = vector.extract_strided_slice %156 {offsets = [0, 19], sizes = [32, 305], strides = [1, 1]} : vector<32x324xf32> to vector<32x305xf32>
    %158 = vector.extract_strided_slice %156 {offsets = [0, 0], sizes = [32, 19], strides = [1, 1]} : vector<32x324xf32> to vector<32x19xf32>
    %159 = tpu.concatenate %157, %158 in 1 : vector<32x305xf32>, vector<32x19xf32> -> vector<32x324xf32>
    %160 = arith.addf %155, %159 : vector<32x324xf32>
    %c0_30 = arith.constant 0 : index
    %c0_31 = arith.constant 0 : index
    %161 = vector.load %arg10[%c0_30, %c0_31] : memref<32x1xf32, #tpu.memory_space<vmem>>, vector<32x1xf32>
    %162 = vector.broadcast %161 : vector<32x1xf32> to vector<32x324xf32>
    %163 = arith.addf %160, %162 : vector<32x324xf32>
    %cst_32 = arith.constant 0.000000e+00 : f32
    %164 = vector.broadcast %cst_32 : f32 to vector<32x324xf32>
    %165 = arith.cmpf oge, %163, %164 : vector<32x324xf32>
    %cst_33 = arith.constant 0.00999999977 : f32
    %166 = vector.broadcast %cst_33 : f32 to vector<32x324xf32>
    %167 = arith.mulf %166, %163 : vector<32x324xf32>
    %168 = arith.select %165, %163, %167 : vector<32x324xi1>, vector<32x324xf32>
    %169 = vector.broadcast %0 : vector<1x324xf32> to vector<32x324xf32>
    %170 = arith.mulf %168, %169 : vector<32x324xf32>
    %c80 = arith.constant 80 : index
    %c0_34 = arith.constant 0 : index
    %171 = vector.load %arg14[%c80, %c0_34] : memref<144x324xf32, #tpu.memory_space<vmem>>, vector<32x324xf32>
    tpu.vector_store %arg14[%c80, %c0_34], %170 {strides = array<i32>} : memref<144x324xf32, #tpu.memory_space<vmem>>, vector<32x324xf32>,
    %c0_35 = arith.constant 0 : index
    %c0_36 = arith.constant 0 : index
    %172 = vector.load %arg14[%c0_35, %c0_36] : memref<144x324xf32, #tpu.memory_space<vmem>>, vector<112x324xf32>
    %173 = arith.truncf %172 : vector<112x324xf32> to vector<112x324xbf16>
    %c0_37 = arith.constant 0 : index
    %c0_38 = arith.constant 0 : index
    %174 = vector.load %arg6[%c0_37, %c0_38] : memref<288x112xbf16, #tpu.memory_space<vmem>>, vector<288x112xbf16>
    %cst_39 = arith.constant dense<0.000000e+00> : vector<288x324xf32>
    %175 = tpu.matmul %174, %173, %cst_39 {dimension_numbers = #tpu.dot_dimension_numbers<[1], [0], [0], [1], [0, 0, 1, 1], [], []>} : vector<288x112xbf16>, vector<112x324xbf16>, vector<288x324xf32> -> vector<288x324xf32>
    %176 = vector.extract_strided_slice %175 {offsets = [0, 0], sizes = [32, 324], strides = [1, 1]} : vector<288x324xf32> to vector<32x324xf32>
    %177 = vector.extract_strided_slice %176 {offsets = [0, 305], sizes = [32, 19], strides = [1, 1]} : vector<32x324xf32> to vector<32x19xf32>
    %178 = vector.extract_strided_slice %176 {offsets = [0, 0], sizes = [32, 305], strides = [1, 1]} : vector<32x324xf32> to vector<32x305xf32>
    %179 = tpu.concatenate %177, %178 in 1 : vector<32x19xf32>, vector<32x305xf32> -> vector<32x324xf32>
    %180 = vector.extract_strided_slice %175 {offsets = [32, 0], sizes = [32, 324], strides = [1, 1]} : vector<288x324xf32> to vector<32x324xf32>
    %181 = vector.extract_strided_slice %180 {offsets = [0, 306], sizes = [32, 18], strides = [1, 1]} : vector<32x324xf32> to vector<32x18xf32>
    %182 = vector.extract_strided_slice %180 {offsets = [0, 0], sizes = [32, 306], strides = [1, 1]} : vector<32x324xf32> to vector<32x306xf32>
    %183 = tpu.concatenate %181, %182 in 1 : vector<32x18xf32>, vector<32x306xf32> -> vector<32x324xf32>
    %184 = arith.addf %179, %183 : vector<32x324xf32>
    %185 = vector.extract_strided_slice %175 {offsets = [64, 0], sizes = [32, 324], strides = [1, 1]} : vector<288x324xf32> to vector<32x324xf32>
    %186 = vector.extract_strided_slice %185 {offsets = [0, 307], sizes = [32, 17], strides = [1, 1]} : vector<32x324xf32> to vector<32x17xf32>
    %187 = vector.extract_strided_slice %185 {offsets = [0, 0], sizes = [32, 307], strides = [1, 1]} : vector<32x324xf32> to vector<32x307xf32>
    %188 = tpu.concatenate %186, %187 in 1 : vector<32x17xf32>, vector<32x307xf32> -> vector<32x324xf32>
    %189 = arith.addf %184, %188 : vector<32x324xf32>
    %190 = vector.extract_strided_slice %175 {offsets = [96, 0], sizes = [32, 324], strides = [1, 1]} : vector<288x324xf32> to vector<32x324xf32>
    %191 = vector.extract_strided_slice %190 {offsets = [0, 323], sizes = [32, 1], strides = [1, 1]} : vector<32x324xf32> to vector<32x1xf32>
    %192 = vector.extract_strided_slice %190 {offsets = [0, 0], sizes = [32, 323], strides = [1, 1]} : vector<32x324xf32> to vector<32x323xf32>
    %193 = tpu.concatenate %191, %192 in 1 : vector<32x1xf32>, vector<32x323xf32> -> vector<32x324xf32>
    %194 = arith.addf %189, %193 : vector<32x324xf32>
    %195 = vector.extract_strided_slice %175 {offsets = [128, 0], sizes = [32, 324], strides = [1, 1]} : vector<288x324xf32> to vector<32x324xf32>
    %196 = arith.addf %194, %195 : vector<32x324xf32>
    %197 = vector.extract_strided_slice %175 {offsets = [160, 0], sizes = [32, 324], strides = [1, 1]} : vector<288x324xf32> to vector<32x324xf32>
    %198 = vector.extract_strided_slice %197 {offsets = [0, 1], sizes = [32, 323], strides = [1, 1]} : vector<32x324xf32> to vector<32x323xf32>
    %199 = vector.extract_strided_slice %197 {offsets = [0, 0], sizes = [32, 1], strides = [1, 1]} : vector<32x324xf32> to vector<32x1xf32>
    %200 = tpu.concatenate %198, %199 in 1 : vector<32x323xf32>, vector<32x1xf32> -> vector<32x324xf32>
    %201 = arith.addf %196, %200 : vector<32x324xf32>
    %202 = vector.extract_strided_slice %175 {offsets = [192, 0], sizes = [32, 324], strides = [1, 1]} : vector<288x324xf32> to vector<32x324xf32>
    %203 = vector.extract_strided_slice %202 {offsets = [0, 17], sizes = [32, 307], strides = [1, 1]} : vector<32x324xf32> to vector<32x307xf32>
    %204 = vector.extract_strided_slice %202 {offsets = [0, 0], sizes = [32, 17], strides = [1, 1]} : vector<32x324xf32> to vector<32x17xf32>
    %205 = tpu.concatenate %203, %204 in 1 : vector<32x307xf32>, vector<32x17xf32> -> vector<32x324xf32>
    %206 = arith.addf %201, %205 : vector<32x324xf32>
    %207 = vector.extract_strided_slice %175 {offsets = [224, 0], sizes = [32, 324], strides = [1, 1]} : vector<288x324xf32> to vector<32x324xf32>
    %208 = vector.extract_strided_slice %207 {offsets = [0, 18], sizes = [32, 306], strides = [1, 1]} : vector<32x324xf32> to vector<32x306xf32>
    %209 = vector.extract_strided_slice %207 {offsets = [0, 0], sizes = [32, 18], strides = [1, 1]} : vector<32x324xf32> to vector<32x18xf32>
    %210 = tpu.concatenate %208, %209 in 1 : vector<32x306xf32>, vector<32x18xf32> -> vector<32x324xf32>
    %211 = arith.addf %206, %210 : vector<32x324xf32>
    %212 = vector.extract_strided_slice %175 {offsets = [256, 0], sizes = [32, 324], strides = [1, 1]} : vector<288x324xf32> to vector<32x324xf32>
    %213 = vector.extract_strided_slice %212 {offsets = [0, 19], sizes = [32, 305], strides = [1, 1]} : vector<32x324xf32> to vector<32x305xf32>
    %214 = vector.extract_strided_slice %212 {offsets = [0, 0], sizes = [32, 19], strides = [1, 1]} : vector<32x324xf32> to vector<32x19xf32>
    %215 = tpu.concatenate %213, %214 in 1 : vector<32x305xf32>, vector<32x19xf32> -> vector<32x324xf32>
    %216 = arith.addf %211, %215 : vector<32x324xf32>
    %c0_40 = arith.constant 0 : index
    %c0_41 = arith.constant 0 : index
    %217 = vector.load %arg11[%c0_40, %c0_41] : memref<32x1xf32, #tpu.memory_space<vmem>>, vector<32x1xf32>
    %218 = vector.broadcast %217 : vector<32x1xf32> to vector<32x324xf32>
    %219 = arith.addf %216, %218 : vector<32x324xf32>
    %cst_42 = arith.constant 0.000000e+00 : f32
    %220 = vector.broadcast %cst_42 : f32 to vector<32x324xf32>
    %221 = arith.cmpf oge, %219, %220 : vector<32x324xf32>
    %cst_43 = arith.constant 0.00999999977 : f32
    %222 = vector.broadcast %cst_43 : f32 to vector<32x324xf32>
    %223 = arith.mulf %222, %219 : vector<32x324xf32>
    %224 = arith.select %221, %219, %223 : vector<32x324xi1>, vector<32x324xf32>
    %225 = vector.broadcast %0 : vector<1x324xf32> to vector<32x324xf32>
    %226 = arith.mulf %224, %225 : vector<32x324xf32>
    %c112 = arith.constant 112 : index
    %c0_44 = arith.constant 0 : index
    %227 = vector.load %arg14[%c112, %c0_44] : memref<144x324xf32, #tpu.memory_space<vmem>>, vector<32x324xf32>
    tpu.vector_store %arg14[%c112, %c0_44], %226 {strides = array<i32>} : memref<144x324xf32, #tpu.memory_space<vmem>>, vector<32x324xf32>,
    %c0_45 = arith.constant 0 : index
    %c0_46 = arith.constant 0 : index
    %228 = vector.load %arg14[%c0_45, %c0_46] : memref<144x324xf32, #tpu.memory_space<vmem>>, vector<144x324xf32>
    %229 = arith.truncf %228 : vector<144x324xf32> to vector<144x324xbf16>
    %c0_47 = arith.constant 0 : index
    %c0_48 = arith.constant 0 : index
    %230 = vector.load %arg7[%c0_47, %c0_48] : memref<72x144xbf16, #tpu.memory_space<vmem>>, vector<72x144xbf16>
    %cst_49 = arith.constant dense<0.000000e+00> : vector<72x324xf32>
    %231 = tpu.matmul %230, %229, %cst_49 {dimension_numbers = #tpu.dot_dimension_numbers<[1], [0], [0], [1], [0, 0, 1, 1], [], []>} : vector<72x144xbf16>, vector<144x324xbf16>, vector<72x324xf32> -> vector<72x324xf32>
    %232 = vector.extract_strided_slice %231 {offsets = [0, 0], sizes = [8, 324], strides = [1, 1]} : vector<72x324xf32> to vector<8x324xf32>
    %233 = vector.extract_strided_slice %232 {offsets = [0, 305], sizes = [8, 19], strides = [1, 1]} : vector<8x324xf32> to vector<8x19xf32>
    %234 = vector.extract_strided_slice %232 {offsets = [0, 0], sizes = [8, 305], strides = [1, 1]} : vector<8x324xf32> to vector<8x305xf32>
    %235 = tpu.concatenate %233, %234 in 1 : vector<8x19xf32>, vector<8x305xf32> -> vector<8x324xf32>
    %236 = vector.extract_strided_slice %231 {offsets = [8, 0], sizes = [8, 324], strides = [1, 1]} : vector<72x324xf32> to vector<8x324xf32>
    %237 = vector.extract_strided_slice %236 {offsets = [0, 306], sizes = [8, 18], strides = [1, 1]} : vector<8x324xf32> to vector<8x18xf32>
    %238 = vector.extract_strided_slice %236 {offsets = [0, 0], sizes = [8, 306], strides = [1, 1]} : vector<8x324xf32> to vector<8x306xf32>
    %239 = tpu.concatenate %237, %238 in 1 : vector<8x18xf32>, vector<8x306xf32> -> vector<8x324xf32>
    %240 = arith.addf %235, %239 : vector<8x324xf32>
    %241 = vector.extract_strided_slice %231 {offsets = [16, 0], sizes = [8, 324], strides = [1, 1]} : vector<72x324xf32> to vector<8x324xf32>
    %242 = vector.extract_strided_slice %241 {offsets = [0, 307], sizes = [8, 17], strides = [1, 1]} : vector<8x324xf32> to vector<8x17xf32>
    %243 = vector.extract_strided_slice %241 {offsets = [0, 0], sizes = [8, 307], strides = [1, 1]} : vector<8x324xf32> to vector<8x307xf32>
    %244 = tpu.concatenate %242, %243 in 1 : vector<8x17xf32>, vector<8x307xf32> -> vector<8x324xf32>
    %245 = arith.addf %240, %244 : vector<8x324xf32>
    %246 = vector.extract_strided_slice %231 {offsets = [24, 0], sizes = [8, 324], strides = [1, 1]} : vector<72x324xf32> to vector<8x324xf32>
    %247 = vector.extract_strided_slice %246 {offsets = [0, 323], sizes = [8, 1], strides = [1, 1]} : vector<8x324xf32> to vector<8x1xf32>
    %248 = vector.extract_strided_slice %246 {offsets = [0, 0], sizes = [8, 323], strides = [1, 1]} : vector<8x324xf32> to vector<8x323xf32>
    %249 = tpu.concatenate %247, %248 in 1 : vector<8x1xf32>, vector<8x323xf32> -> vector<8x324xf32>
    %250 = arith.addf %245, %249 : vector<8x324xf32>
    %251 = vector.extract_strided_slice %231 {offsets = [32, 0], sizes = [8, 324], strides = [1, 1]} : vector<72x324xf32> to vector<8x324xf32>
    %252 = arith.addf %250, %251 : vector<8x324xf32>
    %253 = vector.extract_strided_slice %231 {offsets = [40, 0], sizes = [8, 324], strides = [1, 1]} : vector<72x324xf32> to vector<8x324xf32>
    %254 = vector.extract_strided_slice %253 {offsets = [0, 1], sizes = [8, 323], strides = [1, 1]} : vector<8x324xf32> to vector<8x323xf32>
    %255 = vector.extract_strided_slice %253 {offsets = [0, 0], sizes = [8, 1], strides = [1, 1]} : vector<8x324xf32> to vector<8x1xf32>
    %256 = tpu.concatenate %254, %255 in 1 : vector<8x323xf32>, vector<8x1xf32> -> vector<8x324xf32>
    %257 = arith.addf %252, %256 : vector<8x324xf32>
    %258 = vector.extract_strided_slice %231 {offsets = [48, 0], sizes = [8, 324], strides = [1, 1]} : vector<72x324xf32> to vector<8x324xf32>
    %259 = vector.extract_strided_slice %258 {offsets = [0, 17], sizes = [8, 307], strides = [1, 1]} : vector<8x324xf32> to vector<8x307xf32>
    %260 = vector.extract_strided_slice %258 {offsets = [0, 0], sizes = [8, 17], strides = [1, 1]} : vector<8x324xf32> to vector<8x17xf32>
    %261 = tpu.concatenate %259, %260 in 1 : vector<8x307xf32>, vector<8x17xf32> -> vector<8x324xf32>
    %262 = arith.addf %257, %261 : vector<8x324xf32>
    %263 = vector.extract_strided_slice %231 {offsets = [56, 0], sizes = [8, 324], strides = [1, 1]} : vector<72x324xf32> to vector<8x324xf32>
    %264 = vector.extract_strided_slice %263 {offsets = [0, 18], sizes = [8, 306], strides = [1, 1]} : vector<8x324xf32> to vector<8x306xf32>
    %265 = vector.extract_strided_slice %263 {offsets = [0, 0], sizes = [8, 18], strides = [1, 1]} : vector<8x324xf32> to vector<8x18xf32>
    %266 = tpu.concatenate %264, %265 in 1 : vector<8x306xf32>, vector<8x18xf32> -> vector<8x324xf32>
    %267 = arith.addf %262, %266 : vector<8x324xf32>
    %268 = vector.extract_strided_slice %231 {offsets = [64, 0], sizes = [8, 324], strides = [1, 1]} : vector<72x324xf32> to vector<8x324xf32>
    %269 = vector.extract_strided_slice %268 {offsets = [0, 19], sizes = [8, 305], strides = [1, 1]} : vector<8x324xf32> to vector<8x305xf32>
    %270 = vector.extract_strided_slice %268 {offsets = [0, 0], sizes = [8, 19], strides = [1, 1]} : vector<8x324xf32> to vector<8x19xf32>
    %271 = tpu.concatenate %269, %270 in 1 : vector<8x305xf32>, vector<8x19xf32> -> vector<8x324xf32>
    %272 = arith.addf %267, %271 : vector<8x324xf32>
    %c0_50 = arith.constant 0 : index
    %c0_51 = arith.constant 0 : index
    %273 = vector.load %arg12[%c0_50, %c0_51] : memref<8x1xf32, #tpu.memory_space<vmem>>, vector<8x1xf32>
    %274 = vector.broadcast %273 : vector<8x1xf32> to vector<8x324xf32>
    %275 = arith.addf %272, %274 : vector<8x324xf32>
    %276 = vector.broadcast %0 : vector<1x324xf32> to vector<8x324xf32>
    %277 = arith.mulf %275, %276 : vector<8x324xf32>
    %c0_52 = arith.constant 0 : index
    %c0_53 = arith.constant 0 : index
    %c0_54 = arith.constant 0 : index
    %278 = vector.load %arg13[%c0_52, %c0_53, %c0_54] : memref<1x8x324xf32, #tpu.memory_space<vmem>>, vector<1x8x324xf32>
    %279 = vector.shape_cast %278 : vector<1x8x324xf32> to vector<8x324xf32>
    %280 = vector.shape_cast %277 : vector<8x324xf32> to vector<1x8x324xf32>
    tpu.vector_store %arg13[%c0_52, %c0_53, %c0_54], %280 {strides = array<i32>} : memref<1x8x324xf32, #tpu.memory_space<vmem>>, vector<1x8x324xf32>,
    return
  }
  func.func @transform_0(%arg0: i32) -> (i32, i32) {
    %c0_i32 = arith.constant 0 : i32
    %c0_i32_0 = arith.constant 0 : i32
    %c0_i32_1 = arith.constant 0 : i32
    return %c0_i32, %c0_i32_0 : i32, i32
  }
  func.func @transform_1(%arg0: i32) -> (i32, i32, i32) {
    %c0_i32 = arith.constant 0 : i32
    %c0_i32_0 = arith.constant 0 : i32
    %c0_i32_1 = arith.constant 0 : i32
    return %arg0, %c0_i32, %c0_i32_0 : i32, i32, i32
  }
  func.func @transform_2(%arg0: i32) -> (i32, i32) {
    %c0_i32 = arith.constant 0 : i32
    %c0_i32_0 = arith.constant 0 : i32
    %c0_i32_1 = arith.constant 0 : i32
    return %c0_i32, %c0_i32_0 : i32, i32
  }
  func.func @transform_3(%arg0: i32) -> (i32, i32) {
    %c0_i32 = arith.constant 0 : i32
    %c0_i32_0 = arith.constant 0 : i32
    %c0_i32_1 = arith.constant 0 : i32
    return %c0_i32, %c0_i32_0 : i32, i32
  }
  func.func @transform_4(%arg0: i32) -> (i32, i32) {
    %c0_i32 = arith.constant 0 : i32
    %c0_i32_0 = arith.constant 0 : i32
    %c0_i32_1 = arith.constant 0 : i32
    return %c0_i32, %c0_i32_0 : i32, i32
  }
  func.func @transform_5(%arg0: i32) -> (i32, i32) {
    %c0_i32 = arith.constant 0 : i32
    %c0_i32_0 = arith.constant 0 : i32
    %c0_i32_1 = arith.constant 0 : i32
    return %c0_i32, %c0_i32_0 : i32, i32
  }
  func.func @transform_6(%arg0: i32) -> (i32, i32) {
    %c0_i32 = arith.constant 0 : i32
    %c0_i32_0 = arith.constant 0 : i32
    %c0_i32_1 = arith.constant 0 : i32
    return %c0_i32, %c0_i32_0 : i32, i32
  }
  func.func @transform_7(%arg0: i32) -> (i32, i32) {
    %c0_i32 = arith.constant 0 : i32
    %c0_i32_0 = arith.constant 0 : i32
    %c0_i32_1 = arith.constant 0 : i32
    return %c0_i32, %c0_i32_0 : i32, i32
  }
  func.func @transform_8(%arg0: i32) -> (i32, i32) {
    %c0_i32 = arith.constant 0 : i32
    %c0_i32_0 = arith.constant 0 : i32
    %c0_i32_1 = arith.constant 0 : i32
    return %c0_i32, %c0_i32_0 : i32, i32
  }
  func.func @transform_9(%arg0: i32) -> (i32, i32) {
    %c0_i32 = arith.constant 0 : i32
    %c0_i32_0 = arith.constant 0 : i32
    %c0_i32_1 = arith.constant 0 : i32
    return %c0_i32, %c0_i32_0 : i32, i32
  }
  func.func @transform_10(%arg0: i32) -> (i32, i32) {
    %c0_i32 = arith.constant 0 : i32
    %c0_i32_0 = arith.constant 0 : i32
    %c0_i32_1 = arith.constant 0 : i32
    return %c0_i32, %c0_i32_0 : i32, i32
  }
  func.func @transform_11(%arg0: i32) -> (i32, i32) {
    %c0_i32 = arith.constant 0 : i32
    %c0_i32_0 = arith.constant 0 : i32
    %c0_i32_1 = arith.constant 0 : i32
    return %c0_i32, %c0_i32_0 : i32, i32
  }
  func.func @transform_12(%arg0: i32) -> (i32, i32, i32) {
    %c0_i32 = arith.constant 0 : i32
    %c0_i32_0 = arith.constant 0 : i32
    %c0_i32_1 = arith.constant 0 : i32
    return %arg0, %c0_i32, %c0_i32_0 : i32, i32, i32
  }
}

</mosaic_0001>

<bundles_post_ra>
// kernel: residual_dense_block_pallas.1
= control target key start
LH: loop header
LB: loop body
LE: loop exit
PB: predicated region body
PF: predicated region fallthrough
CT: control target
= control target key end

     0   :  { %s7209_s21 = smov 0   ;;  %s11042_s0 = inlined_call_operand.vmem [shape: f32[1,324], index: 0, kind: input, shape index: {}]   ;;  %s11043_s1 = inlined_call_operand.vmem [shape: f32[2,16,324], index: 1, kind: input, shape index: {}]   ;;  %s11044_s2 = inlined_call_operand.vmem [shape: bf16[288,16], index: 2, kind: input, shape index: {}]   ;;  %s11045_s3 = inlined_call_operand.vmem [shape: bf16[288,48], index: 3, kind: input, shape index: {}]   ;;  %s11046_s4 = inlined_call_operand.vmem [shape: bf16[288,80], index: 4, kind: input, shape index: {}]   ;;  %s11047_s5 = inlined_call_operand.vmem [shape: bf16[288,112], index: 5, kind: input, shape index: {}]   ;;  %s11048_s6 = inlined_call_operand.vmem [shape: bf16[72,144], index: 6, kind: input, shape index: {}]   ;;  %s11049_s7 = inlined_call_operand.vmem [shape: f32[32,1], index: 7, kind: input, shape index: {}]   ;;  %s11050_s8 = inlined_call_operand.vmem [shape: f32[32,1], index: 8, kind: input, shape index: {}]   ;;  %s11051_s9 = inlined_call_operand.vmem [shape: f32[32,1], index: 9, kind: input, shape index: {}]   ;;  %s11052_s10 = inlined_call_operand.vmem [shape: f32[32,1], index: 10, kind: input, shape index: {}]   ;;  %s11053_s11 = inlined_call_operand.vmem [shape: f32[8,1], index: 11, kind: input, shape index: {}]   ;;  %s11054_s12 = inlined_call_operand.vmem [shape: f32[2,8,324], index: 12, kind: output, shape index: {}]  }
   0x1   :  { %11187 = sst [smem:[#allocation55_spill]] %s11042_s0 }
   0x2   :  { %11188 = sst [smem:[#allocation56_spill]] %s11043_s1 }
   0x3   :  { %11189 = sst [smem:[#allocation57_spill]] %s11044_s2 }
   0x4   :  { %11190 = sst [smem:[#allocation58_spill]] %s11045_s3 }
   0x5   :  { %11191 = sst [smem:[#allocation59_spill]] %s11046_s4 }
   0x6   :  { %11192 = sst [smem:[#allocation60_spill]] %s11047_s5 }
   0x7   :  { %11193 = sst [smem:[#allocation61_spill]] %s11049_s7 }
   0x8 LB: > { %s6495_s22 = sadd.s32 4294967295, %s7125_s21   ;;  %p6499_p0 = scmp.ge.s32.totalorder %s7125_s21, 1  ;;  %s7125_s21 = sphi %s7209_s21, %s22_s21  }
   0x9   : > { %p362_p1 = scmp.lt.s32.totalorder %s7125_s21, 3 }
   0xb   : > { %p363_p2 = pnand %p6499_p0, %p362_p1 }
   0xd   : > { %366 = sbr.rel (%p363_p2) target bundleno = 2812 (0xafc), region = 68 }
  0x12   : > { %p404_p3 = scmp.lt.s32.totalorder %s6495_s22, 1  ;;  %s11194_s2 = sld [smem:[#allocation57_spill]]  ;;  %v11055_v1 = vmov 0   ;;  %vm11094_vm0 = vcmask 130048   ;;  %vm424_vm1 = vcmask 556032   ;;  %vm1057_vm2 = vcmask 154624  }
  0x13   : > { %651 = vmatprep.mubr.bf16.mxu0 %v11055_v1  ;;  %7032 = vset.pattern.permute.xlu1 %v11055_v1  ;;  %s11195_s1 = sld [smem:[#allocation56_spill]]  ;;  %s11154_s23 = smov 19   ;;  %vm1130_vm3 = vcmask 146432   ;;  %vm1215_vm4 = vcmask 138240   ;;  %vm1300_vm5 = vcmask 7168   ;;  %vm11175_vm6 = vcmask 1039360  }
  0x14   : > { %s11626_s22 = smov (!%p404_p3, %s6495_s22), 1  ;;  %7031 = vset.pattern.permute.xlu0 %v11055_v1  ;;  %s11196_s7 = sld [smem:[#allocation61_spill]]  ;;  %vm1958_vm7 = vcmask 392192   ;;  %vm1471_vm8 = vcmask 908288   ;;  %vm11137_vm9 = vcmask 900096   ;;  %vm1643_vm10 = vcmask 891904  }
  0x15   : > { %s7004_s25 = smul.u32 48, %s11626_s22  ;;  %s11152_s24 = smov 79  }
  0x16   : > { %s11119_s26 = smov 77   ;;  %s11117_s27 = smov 18  }
  0x17   : > { %s11113_s29 = smov 17   ;;  %s11111_s30 = smov 127  }
  0x18   : > { %v7033_v0 = vld [vmem:[%s11194_s2] sm:$0xff]   ;;  %v7034_v13 = vld [vmem:[%s11194_s2 + $0x8] sm:$0xff]   ;;  %v7035_v14 = vld [vmem:[%s11194_s2 + $0x10] sm:$0xff]   ;;  %s11109_s13 = smov 1   ;;  %s11074_s14 = smov 111  }
  0x19   : > { %6830 = vmatprep.mubr.msk.bf16.mxu1 %vm11094_vm0, %v7033_v0  ;;  %s408_s28 = scalar_lea.vmem %s11195_s1, %s7004_s25  ;;  %v7036_v19 = vld [vmem:[%s11194_s2 + $0x18] sm:$0xff]   ;;  %v7037_v20 = vld [vmem:[%s11194_s2 + $0x20] sm:$0xff]   ;;  %v7038_v21 = vld [vmem:[%s11194_s2 + $0x28] sm:$0xff]   ;;  %s11150_s25 = smov 78  }
  0x1a   : > { %v417_v2 = vld [vmem:[%s408_s28 + $0x8] sm:$0xff]  ;;  %v420_v3 = vld [vmem:[%s408_s28 + $0x20] sm:$0xff]  ;;  %v418_v4 = vld [vmem:[%s408_s28 + $0x10] sm:$0xff]  ;;  %s11072_s15 = smov 110   ;;  %s11068_s16 = smov 109  }
  0x1b   : > { %423 = vst [vmem:[#allocation2 + $0x8] sm:$0xff] %v417_v2  ;;  %427 = vst [vmem:[#allocation2 + $0x20] sm:$0xff] %v420_v3  ;;  %v436_v5 = vpack.c.bf16 %v420_v3, %v417_v2  ;;  %v421_v6 = vld [vmem:[%s408_s28 + $0x28] sm:$0xff]  ;;  %v416_v7 = vld [vmem:[%s408_s28] sm:$0xff]  ;;  %s11066_s17 = smov 67   ;;  %s11064_s18 = smov 51  }
  0x1c   : > { %425 = vst.msk [vmem:[#allocation2 + $0x10] sm:$0xff] %vm424_vm1, %v418_v4  ;;  %v419_v8 = vld [vmem:[%s408_s28 + $0x18] sm:$0xff]  ;;  %428 = vst.msk [vmem:[#allocation2 + $0x28] sm:$0xff] %vm424_vm1, %v421_v6  ;;  %v1695_v16 = vld [vmem:[%s11196_s7 + $0x10] sm:$0xff]  ;;  %s11115_s28 = smov 61   ;;  %s11070_s19 = smov 50  }
  0x1d   : > { %422 = vst [vmem:[#allocation2] sm:$0xff] %v416_v7  ;;  %426 = vst [vmem:[#allocation2 + $0x18] sm:$0xff] %v419_v8  ;;  %v435_v9 = vpack.c.bf16 %v419_v8, %v416_v7  ;;  %633 = vmatprep.subr.bf16.mxu0 %v436_v5  ;;  %v1696_v15 = vld [vmem:[%s11196_s7 + $0x18] sm:$0xff]  ;;  %v1693_v17 = vld [vmem:[%s11196_s7] sm:$0xff]  ;;  %1709 = vperm.xlu0 %7031, %v1695_v16   ;;  %s11186_s20 = smov 49   ;;  %s11244_s3 = sld [smem:[#allocation58_spill]] }
  0x1e   : > { %1714 = vperm.xlu1 %7032, %v1696_v15   ;;  %v1694_v18 = vld [vmem:[%s11196_s7 + $0x8] sm:$0xff]  ;;  %v7039_v22 = vld [vmem:[%s11194_s2 + $0x30] sm:$0xff]   ;;  %v7040_v23 = vld [vmem:[%s11194_s2 + $0x38] sm:$0xff]   ;;  %s11259_s0 = sld [smem:[#allocation55_spill]]  ;;  %s7005_s7 = smul.u32 24, %s11626_s22 }
  0x1f   : > { %634 = vmatpush1.bf16.msra.mxu0 %v435_v9  ;;  %v7041_v24 = vld [vmem:[%s11194_s2 + $0x40] sm:$0xff]   ;;  %v7042_v25 = vld [vmem:[%s11194_s2 + $0x48] sm:$0xff]   ;;  %v7043_v26 = vld [vmem:[%s11194_s2 + $0x50] sm:$0xff]   ;;  %s11358_s4 = sld [smem:[#allocation59_spill]] }
  0x20   : > { %v7044_v27 = vld [vmem:[%s11194_s2 + $0x58] sm:$0xff]   ;;  %v7045_v28 = vld [vmem:[%s11194_s2 + $0x60] sm:$0xff]   ;;  %v7046_v29 = vld [vmem:[%s11194_s2 + $0x68] sm:$0xff]   ;;  %s11468_s5 = sld [smem:[#allocation60_spill]] }
  0x21   : > { %1704 = vperm.xlu0 %7031, %v1694_v18   ;;  %v7047_v30 = vld [vmem:[%s11194_s2 + $0x70] sm:$0xff]   ;;  %v7048_v31 = vld [vmem:[%s11194_s2 + $0x78] sm:$0xff]   ;;  %v7049_v32 = vld [vmem:[%s11194_s2 + $0x80] sm:$0xff]  }
  0x22   : > { %6520 = vmatmul.mubr.msk.bf16.vlgmr.msra.gmra.mxu0 %vm11094_vm0, %v7033_v0  ;;  %1699 = vperm.xlu1 %7032, %v1693_v17   ;;  %v7050_v33 = vld [vmem:[%s11194_s2 + $0x88] sm:$0xff]  }
  0x23   : > { %v431_v10 = vld [vmem:[#allocation2 + $0x10] sm:$0xff]  ;;  %661 = vmatprep.mubr.bf16.mxu0 %v11055_v1  ;;  %v434_v11 = vld [vmem:[#allocation2 + $0x28] sm:$0xff] }
  0x24   : > { %v437_v12 = vpack.c.bf16 %v434_v11, %v431_v10 }
  0x26   : > { %6828 = vmatprep.subr.bf16.mxu1 %v437_v12 }
  0x27   : > { %6829 = vmatpush3.bf16.msra.mxu1 %v437_v12 }
  0x2a   : > { %6521 = vmatmul.mubr.msk.bf16.gmra.mxu0 %vm11094_vm0, %v7034_v13  ;;  %6831 = vmatmul.mubr.msk.bf16.vlgmr.msra.gmra.mxu1 %vm11094_vm0, %v7034_v13 }
  0x2b   : > { %671 = vmatprep.mubr.bf16.mxu0 %v11055_v1  ;;  %6834 = vmatprep.mubr.msk.bf16.mxu1 %vm11094_vm0, %v7035_v14 }
  0x32   : > { %6522 = vmatmul.mubr.msk.bf16.gmra.mxu0 %vm11094_vm0, %v7035_v14  ;;  %6835 = vmatmul.mubr.msk.bf16.gmra.mxu1 %vm11094_vm0, %v7036_v19 }
  0x33   : > { %681 = vmatprep.mubr.bf16.mxu0 %v11055_v1  ;;  %6838 = vmatprep.mubr.msk.bf16.mxu1 %vm11094_vm0, %v7037_v20 }
  0x3a   : > { %6523 = vmatmul.mubr.msk.bf16.gmra.mxu0 %vm11094_vm0, %v7036_v19  ;;  %6839 = vmatmul.mubr.msk.bf16.gmra.mxu1 %vm11094_vm0, %v7038_v21 }
  0x3b   : > { %691 = vmatprep.mubr.bf16.mxu0 %v11055_v1  ;;  %6842 = vmatprep.mubr.msk.bf16.mxu1 %vm11094_vm0, %v7039_v22 }
  0x42   : > { %6524 = vmatmul.mubr.msk.bf16.gmra.mxu0 %vm11094_vm0, %v7037_v20  ;;  %6843 = vmatmul.mubr.msk.bf16.gmra.mxu1 %vm11094_vm0, %v7040_v23 }
  0x43   : > { %701 = vmatprep.mubr.bf16.mxu0 %v11055_v1  ;;  %6846 = vmatprep.mubr.msk.bf16.mxu1 %vm11094_vm0, %v7041_v24 }
  0x4a   : > { %6525 = vmatmul.mubr.msk.bf16.gmra.mxu0 %vm11094_vm0, %v7038_v21  ;;  %6847 = vmatmul.mubr.msk.bf16.gmra.mxu1 %vm11094_vm0, %v7042_v25 }
  0x4b   : > { %711 = vmatprep.mubr.bf16.mxu0 %v11055_v1  ;;  %6850 = vmatprep.mubr.msk.bf16.mxu1 %vm11094_vm0, %v7043_v26 }
  0x52   : > { %6526 = vmatmul.mubr.msk.bf16.gmra.mxu0 %vm11094_vm0, %v7039_v22  ;;  %6851 = vmatmul.mubr.msk.bf16.gmra.mxu1 %vm11094_vm0, %v7044_v27 }
  0x53   : > { %721 = vmatprep.mubr.bf16.mxu0 %v11055_v1  ;;  %6854 = vmatprep.mubr.msk.bf16.mxu1 %vm11094_vm0, %v7045_v28 }
  0x5a   : > { %6527 = vmatmul.mubr.msk.bf16.gmra.mxu0 %vm11094_vm0, %v7040_v23  ;;  %6855 = vmatmul.mubr.msk.bf16.gmra.mxu1 %vm11094_vm0, %v7046_v29 }
  0x5b   : > { %731 = vmatprep.mubr.bf16.mxu0 %v11055_v1  ;;  %6858 = vmatprep.mubr.msk.bf16.mxu1 %vm11094_vm0, %v7047_v30 }
  0x62   : > { %6528 = vmatmul.mubr.msk.bf16.gmra.mxu0 %vm11094_vm0, %v7041_v24  ;;  %6859 = vmatmul.mubr.msk.bf16.gmra.mxu1 %vm11094_vm0, %v7048_v31 }
  0x63   : > { %741 = vmatprep.mubr.bf16.mxu0 %v11055_v1  ;;  %6862 = vmatprep.mubr.msk.bf16.mxu1 %vm11094_vm0, %v7049_v32 }
  0x6a   : > { %6529 = vmatmul.mubr.msk.bf16.gmra.mxu0 %vm11094_vm0, %v7042_v25  ;;  %6863 = vmatmul.mubr.msk.bf16.gmra.mxu1 %vm11094_vm0, %v7050_v33 }
  0x6b   : > { %751 = vmatprep.mubr.bf16.mxu0 %v11055_v1  ;;  %2045 = vmatprep.mubr.bf16.mxu1 %v11055_v1 }
  0x72   : > { %6530 = vmatmul.mubr.msk.bf16.gmra.mxu0 %vm11094_vm0, %v7043_v26 }
  0x73   : > { %761 = vmatprep.mubr.bf16.mxu0 %v11055_v1 }
  0x7a   : > { %6531 = vmatmul.mubr.msk.bf16.gmra.mxu0 %vm11094_vm0, %v7044_v27 }
  0x7b   : > { %771 = vmatprep.mubr.bf16.mxu0 %v11055_v1 }
  0x82   : > { %6532 = vmatmul.mubr.msk.bf16.gmra.mxu0 %vm11094_vm0, %v7045_v28 }
  0x83   : > { %781 = vmatprep.mubr.bf16.mxu0 %v11055_v1 }
  0x8a   : > { %6533 = vmatmul.mubr.msk.bf16.gmra.mxu0 %vm11094_vm0, %v7046_v29 }
  0x8b   : > { %791 = vmatprep.mubr.bf16.mxu0 %v11055_v1 }
  0x92   : > { %6534 = vmatmul.mubr.msk.bf16.gmra.mxu0 %vm11094_vm0, %v7047_v30 }
  0x93   : > { %801 = vmatprep.mubr.bf16.mxu0 %v11055_v1 }
  0x9a   : > { %6535 = vmatmul.mubr.msk.bf16.gmra.mxu0 %vm11094_vm0, %v7048_v31 }
  0x9b   : > { %811 = vmatprep.mubr.bf16.mxu0 %v11055_v1 }
  0xa2   : > { %6536 = vmatmul.mubr.msk.bf16.gmra.mxu0 %vm11094_vm0, %v7049_v32 }
  0xa3   : > { %821 = vmatprep.mubr.bf16.mxu0 %v11055_v1 }
  0xaa   : > { %6537 = vmatmul.mubr.msk.bf16.gmra.mxu0 %vm11094_vm0, %v7050_v33 }
  0xe2   : > { %v653_v34 = vpop.f32.mrf.mxu0 }
  0xe4   : > { %v655_v35 = vpop.f32.mrf.mxu0 }
  0xe5   : > { %1035 = vrot.lane.b32.xlu1 %v655_v35, %s11154_s23 }
  0xe6   : > { %v657_v36 = vpop.f32.mrf.mxu0 }
  0xe8   : > { %v659_v37 = vpop.f32.mrf.mxu0 }
  0xea   : > { %v663_v38 = vpop.f32.mrf.mxu0  ;;  %v7349_v39 = vpop.f32.mrf.mxu1 }
  0xeb   : > { %1017 = vrot.lane.b32.xlu0 %v7349_v39, %s11152_s24 }
  0xec   : > { %v665_v40 = vpop.f32.mrf.mxu0  ;;  %v7353_v41 = vpop.f32.mrf.mxu1 }
  0xee   : > { %v667_v42 = vpop.f32.mrf.mxu0  ;;  %v7355_v43 = vpop.f32.mrf.mxu1 }
  0xef   : > { %1033 = vrot.lane.b32.xlu0 %v653_v34, %s11154_s23  ;;  %1019 = vrot.lane.b32.xlu1 %v7355_v43, %s11152_s24 }
  0xf0   : > { %v669_v44 = vpop.f32.mrf.mxu0  ;;  %v7360_v45 = vpop.f32.mrf.mxu1 }
  0xf2   : > { %v673_v46 = vpop.f32.mrf.mxu0  ;;  %v7362_v47 = vpop.f32.mrf.mxu1 }
  0xf3   : > { %1013 = vrot.lane.b32.xlu0 %v7353_v41, %s11152_s24  ;;  %1041 = vrot.lane.b32.xlu1 %v659_v37, %s11154_s23 }
  0xf4   : > { %v675_v48 = vpop.f32.mrf.mxu0  ;;  %v7367_v50 = vpop.f32.mrf.mxu1 }
  0xf6   : > { %v677_v49 = vpop.f32.mrf.mxu0  ;;  %v7372_v53 = vpop.f32.mrf.mxu1 }
  0xf7   : > { %1039 = vrot.lane.b32.xlu0 %v657_v36, %s11154_s23  ;;  %1015 = vrot.lane.b32.xlu1 %v7360_v45, %s11152_s24 }
  0xf8   : > { %v679_v51 = vpop.f32.mrf.mxu0  ;;  %v7376_v56 = vpop.f32.mrf.mxu1 }
  0xfa   : > { %v683_v52 = vpop.f32.mrf.mxu0  ;;  %v7382_v58 = vpop.f32.mrf.mxu1 }
  0xfb   : > { %1045 = vrot.lane.b32.xlu0 %v663_v38, %s11154_s23  ;;  %1051 = vrot.lane.b32.xlu1 %v667_v42, %s11154_s23 }
  0xfc   : > { %v685_v54 = vpop.f32.mrf.mxu0  ;;  %v7386_v61 = vpop.f32.mrf.mxu1 }
  0xfe   : > { %v687_v55 = vpop.f32.mrf.mxu0  ;;  %v7392_v0 = vpop.f32.mrf.mxu1 }
  0xff   : > { %1090 = vrot.lane.b32.xlu0 %v7362_v47, %s11150_s25  ;;  %1092 = vrot.lane.b32.xlu1 %v7372_v53, %s11150_s25 }
 0x100   : > { %v689_v57 = vpop.f32.mrf.mxu0  ;;  %v7397_v4 = vpop.f32.mrf.mxu1 }
 0x102   : > { %v693_v59 = vpop.f32.mrf.mxu0  ;;  %v7399_v6 = vpop.f32.mrf.mxu1 }
 0x103   : > { %1047 = vrot.lane.b32.xlu0 %v665_v40, %s11154_s23  ;;  %1053 = vrot.lane.b32.xlu1 %v669_v44, %s11154_s23 }
 0x104   : > { %v695_v60 = vpop.f32.mrf.mxu0  ;;  %v7406_v9 = vpop.f32.mrf.mxu1 }
 0x106   : > { %v697_v62 = vpop.f32.mrf.mxu0  ;;  %v7413_v12 = vpop.f32.mrf.mxu1 }
 0x107   : > { %1086 = vrot.lane.b32.xlu0 %v7367_v50, %s11150_s25  ;;  %1088 = vrot.lane.b32.xlu1 %v7376_v56, %s11150_s25 }
 0x108   : > { %v699_v63 = vpop.f32.mrf.mxu0  ;;  %v7422_v15 = vpop.f32.mrf.mxu1 }
 0x10a   : > { %v703_v2 = vpop.f32.mrf.mxu0  ;;  %v7428_v17 = vpop.f32.mrf.mxu1 }
 0x10b   : > { %1175 = vrot.lane.b32.xlu0 %v7382_v58, %s11119_s26  ;;  %1108 = vrot.lane.b32.xlu1 %v675_v48, %s11117_s27  ;;  %11197 = vst [vmem:[#allocation3_spill] sm:$0xff] %v7428_v17 }
 0x10c   : > { %v705_v3 = vpop.f32.mrf.mxu0  ;;  %v7438_v20 = vpop.f32.mrf.mxu1 }
 0x10d   : > { %11198 = vst [vmem:[#allocation4_spill] sm:$0xff] %v7438_v20 }
 0x10e   : > { %v707_v5 = vpop.f32.mrf.mxu0  ;;  %v7447_v23 = vpop.f32.mrf.mxu1 }
 0x10f   : > { %1106 = vrot.lane.b32.xlu0 %v673_v46, %s11117_s27  ;;  %1177 = vrot.lane.b32.xlu1 %v7392_v0, %s11119_s26  ;;  %11201 = vst [vmem:[#allocation7_spill] sm:$0xff] %v7447_v23 }
 0x110   : > { %v7404_v7 = vpop.f32.mrf.mxu0  ;;  %v7456_v26 = vpop.f32.mrf.mxu1 }
 0x111   : > { %11204 = vst [vmem:[#allocation10_spill] sm:$0xff] %v7456_v26 }
 0x112   : > { %v713_v8 = vpop.f32.mrf.mxu0  ;;  %v6852_v29 = vpop.f32.mrf.mxu1 }
 0x113   : > { %1171 = vrot.lane.b32.xlu0 %v7386_v61, %s11119_s26  ;;  %1114 = vrot.lane.b32.xlu1 %v679_v51, %s11117_s27 }
 0x114   : > { %v7411_v10 = vpop.f32.mrf.mxu0  ;;  %v946_v32 = vpop.f32.mrf.mxu1 }
 0x116   : > { %v717_v11 = vpop.f32.mrf.mxu0  ;;  %v6853_v35 = vpop.f32.mrf.mxu1 }
 0x117   : > { %1112 = vrot.lane.b32.xlu0 %v677_v49, %s11117_s27  ;;  %1173 = vrot.lane.b32.xlu1 %v7397_v4, %s11119_s26 }
 0x118   : > { %v7418_v13 = vpop.f32.mrf.mxu0  ;;  %v949_v38 = vpop.f32.mrf.mxu1 }
 0x11a   : > { %v7420_v14 = vpop.f32.mrf.mxu0  ;;  %v6856_v42 = vpop.f32.mrf.mxu1 }
 0x11b   : > { %1118 = vrot.lane.b32.xlu0 %v683_v52, %s11117_s27  ;;  %1120 = vrot.lane.b32.xlu1 %v685_v54, %s11117_s27 }
 0x11c   : > { %v7426_v16 = vpop.f32.mrf.mxu0  ;;  %v962_v48 = vpop.f32.mrf.mxu1 }
 0x11e   : > { %v7430_v18 = vpop.f32.mrf.mxu0  ;;  %v6857_v51 = vpop.f32.mrf.mxu1 }
 0x11f   : > { %1260 = vrot.lane.b32.xlu0 %v7399_v6, %s11115_s28  ;;  %1262 = vrot.lane.b32.xlu1 %v7413_v12, %s11115_s28 }
 0x120   : > { %v7436_v19 = vpop.f32.mrf.mxu0  ;;  %v965_v54 = vpop.f32.mrf.mxu1 }
 0x122   : > { %v7440_v21 = vpop.f32.mrf.mxu0 }
 0x123   : > { %11199 = vst [vmem:[#allocation5_spill] sm:$0xff] %v7440_v21  ;;  %1256 = vrot.lane.b32.xlu0 %v7406_v9, %s11115_s28  ;;  %1126 = vrot.lane.b32.xlu1 %v689_v57, %s11117_s27  ;;  %v6860_v57 = vpop.f32.mrf.mxu1 }
 0x124   : > { %v7445_v22 = vpop.f32.mrf.mxu0 }
 0x125   : > { %11200 = vst [vmem:[#allocation6_spill] sm:$0xff] %v7445_v22 }
 0x126   : > { %v7449_v24 = vpop.f32.mrf.mxu0 }
 0x127   : > { %11202 = vst [vmem:[#allocation8_spill] sm:$0xff] %v7449_v24  ;;  %1124 = vrot.lane.b32.xlu0 %v687_v55, %s11117_s27  ;;  %1258 = vrot.lane.b32.xlu1 %v7422_v15, %s11115_s28 }
 0x128   : > { %v7454_v25 = vpop.f32.mrf.mxu0 }
 0x129   : > { %11203 = vst [vmem:[#allocation9_spill] sm:$0xff] %v7454_v25 }
 0x12a   : > { %v7458_v27 = vpop.f32.mrf.mxu0 }
 0x12b   : > { %11205 = vst [vmem:[#allocation11_spill] sm:$0xff] %v7458_v27  ;;  %1191 = vrot.lane.b32.xlu0 %v693_v59, %s11113_s29  ;;  %1193 = vrot.lane.b32.xlu1 %v695_v60, %s11113_s29  ;;  %v978_v60 = vpop.f32.mrf.mxu1 }
 0x12c   : > { %v7462_v28 = vpop.f32.mrf.mxu0 }
 0x12d   : > { %11206 = vst [vmem:[#allocation12_spill] sm:$0xff] %v7462_v28 }
 0x12e   : > { %v7464_v30 = vpop.f32.mrf.mxu0 }
 0x12f   : > { %11207 = vst [vmem:[#allocation13_spill] sm:$0xff] %v7464_v30  ;;  %1197 = vrot.lane.b32.xlu0 %v697_v62, %s11113_s29  ;;  %1199 = vrot.lane.b32.xlu1 %v699_v63, %s11113_s29  ;;  %v6861_v63 = vpop.f32.mrf.mxu1 }
 0x130   : > { %v7468_v31 = vpop.f32.mrf.mxu0 }
 0x131   : > { %11208 = vst [vmem:[#allocation14_spill] sm:$0xff] %v7468_v31 }
 0x132   : > { %v7470_v33 = vpop.f32.mrf.mxu0 }
 0x133   : > { %1203 = vrot.lane.b32.xlu0 %v703_v2, %s11113_s29  ;;  %1377 = vrot.lane.b32.xlu1 %v6852_v29, %s11111_s30 }
 0x134   : > { %v7474_v34 = vpop.f32.mrf.mxu0 }
 0x136   : > { %v7476_v36 = vpop.f32.mrf.mxu0 }
 0x137   : > { %1209 = vrot.lane.b32.xlu0 %v707_v5, %s11113_s29  ;;  %1205 = vrot.lane.b32.xlu1 %v705_v3, %s11113_s29  ;;  %v7513_v3 = vpop.permute.xlu1 %1714  ;;  %v7515_v5 = vpop.permute.xlu0 %1709 }
 0x138   : > { %v7480_v37 = vpop.f32.mrf.mxu0  ;;  %11209 = vst [vmem:[#allocation15_spill] sm:$0xff] %v7513_v3  ;;  %11210 = vst [vmem:[#allocation16_spill] sm:$0xff] %v7515_v5 }
 0x13a   : > { %v7482_v40 = vpop.f32.mrf.mxu0 }
 0x13b   : > { %1276 = vrot.lane.b32.xlu0 %v713_v8, %s11109_s13  ;;  %1365 = vrot.lane.b32.xlu1 %v946_v32, %s11111_s30 }
 0x13c   : > { %v7486_v44 = vpop.f32.mrf.mxu0 }
 0x13e   : > { %v7488_v46 = vpop.f32.mrf.mxu0 }
 0x13f   : > { %1451 = vrot.lane.b32.xlu0 %v962_v48, %s11074_s14  ;;  %1383 = vrot.lane.b32.xlu1 %v6853_v35, %s11111_s30 }
 0x140   : > { %v7492_v49 = vpop.f32.mrf.mxu0 }
 0x142   : > { %v7494_v52 = vpop.f32.mrf.mxu0 }
 0x143   : > { %1282 = vrot.lane.b32.xlu0 %v717_v11, %s11109_s13  ;;  %1211 = vrot.lane.b32.xlu1 %v7404_v7, %s11113_s29  ;;  %v981_v7 = vpop.f32.mrf.mxu1  ;;  %v7527_v11 = vpop.permute.xlu0 %1704 }
 0x144   : > { %v7499_v55 = vpop.f32.mrf.mxu0  ;;  %11212 = vst [vmem:[#allocation18_spill] sm:$0xff] %v7527_v11 }
 0x146   : > { %v7503_v59 = vpop.f32.mrf.mxu0 }
 0x147   : > { %1457 = vrot.lane.b32.xlu0 %v965_v54, %s11074_s14  ;;  %1371 = vrot.lane.b32.xlu1 %v949_v38, %s11111_s30 }
 0x148   : > { %v779_v62 = vpop.f32.mrf.mxu0 }
 0x14a   : > { %v7511_v2 = vpop.f32.mrf.mxu0 }
 0x14b   : > { %1288 = vrot.lane.b32.xlu0 %v7420_v14, %s11109_s13  ;;  %1463 = vrot.lane.b32.xlu1 %v6856_v42, %s11074_s14  ;;  %v6864_v14 = vpop.f32.mrf.mxu1 }
 0x14c   : > { %v7520_v8 = vpop.f32.mrf.mxu0 }
 0x14d   : > { %v994_v35 = vpop.f32.mrf.mxu1 }
 0x14e   : > { %v7529_v29 = vpop.f32.mrf.mxu0 }
 0x14f   : > { %1537 = vrot.lane.b32.xlu0 %v978_v60, %s11072_s15  ;;  %1278 = vrot.lane.b32.xlu1 %v7411_v10, %s11109_s13  ;;  %v7525_v10 = vpop.permute.xlu1 %1699  ;;  %v6865_v48 = vpop.f32.mrf.mxu1 }
 0x150   : > { %11211 = vst [vmem:[#allocation17_spill] sm:$0xff] %v7525_v10  ;;  %v789_v38 = vpop.f32.mrf.mxu0 }
 0x153   : > { %1294 = vrot.lane.b32.xlu0 %v7430_v18, %s11109_s13  ;;  %1469 = vrot.lane.b32.xlu1 %v6857_v51, %s11074_s14  ;;  %v7544_v51 = vpop.f32.mrf.mxu0 }
 0x155   : > { %v795_v60 = vpop.f32.mrf.mxu0 }
 0x157   : > { %1543 = vrot.lane.b32.xlu0 %v981_v7, %s11072_s15  ;;  %1284 = vrot.lane.b32.xlu1 %v7418_v13, %s11109_s13  ;;  %v7535_v32 = vpop.permute.xlu1 %1035 }
 0x158   : > { %11213 = vst [vmem:[#allocation19_spill] sm:$0xff] %v7535_v32 }
 0x15b   : > { %1635 = vrot.lane.b32.xlu0 %v6864_v14, %s11068_s16  ;;  %1549 = vrot.lane.b32.xlu1 %v6860_v57, %s11072_s15  ;;  %v7560_v14 = vpop.f32.mrf.mxu0 }
 0x15d   : > { %v7533_v18 = vpop.permute.xlu0 %1017 }
 0x15f   : > { %1623 = vrot.lane.b32.xlu0 %v994_v35, %s11068_s16  ;;  %1290 = vrot.lane.b32.xlu1 %v7426_v16, %s11109_s13 }
 0x161   : > { %v7540_v13 = vpop.permute.xlu0 %1033  ;;  %v7542_v42 = vpop.permute.xlu1 %1019 }
 0x163   : > { %1641 = vrot.lane.b32.xlu0 %v6865_v48, %s11068_s16  ;;  %1555 = vrot.lane.b32.xlu1 %v6861_v63, %s11072_s15 }
 0x165   : > { %v7548_v54 = vpop.permute.xlu0 %1013  ;;  %v7550_v57 = vpop.permute.xlu1 %1041 }
 0x166   : > { %11214 = vst [vmem:[#allocation20_spill] sm:$0xff] %v7550_v57 }
 0x167   : > { %1363 = vrot.lane.b32.xlu0 %v7474_v34, %s11111_s30  ;;  %1296 = vrot.lane.b32.xlu1 %v7436_v19, %s11109_s13  ;;  %v799_v34 = vpop.f32.mrf.mxu0 }
 0x169   : > { %v7556_v16 = vpop.permute.xlu0 %1039  ;;  %v7558_v7 = vpop.permute.xlu1 %1015 }
 0x16a   : > { %v7578_v1 = vpop.f32.mrf.mxu0 }
 0x16b   : > { %1367 = vrot.lane.b32.xlu0 %v7476_v36, %s11111_s30  ;;  %1361 = vrot.lane.b32.xlu1 %v7470_v33, %s11111_s30 }
 0x16d   : > { %v7566_v63 = vpop.permute.xlu0 %1045  ;;  %v7568_v35 = vpop.permute.xlu1 %1051 }
 0x16f   : > { %1369 = vrot.lane.b32.xlu0 %v7480_v37, %s11111_s30  ;;  %1379 = vrot.lane.b32.xlu1 %v7488_v46, %s11111_s30  ;;  %v805_v37 = vpop.f32.mrf.mxu0 }
 0x171   : > { %v7574_v19 = vpop.permute.xlu0 %1090  ;;  %v7576_v48 = vpop.permute.xlu1 %1092 }
 0x172   : > { %11215 = vst [vmem:[#allocation21_spill] sm:$0xff] %v7576_v48  ;;  %v7596_v11 = vpop.f32.mrf.mxu0 }
 0x173   : > { %1373 = vrot.lane.b32.xlu0 %v7482_v40, %s11111_s30  ;;  %1447 = vrot.lane.b32.xlu1 %v7494_v52, %s11074_s14 }
 0x174   : > { %v809_v10 = vpop.f32.mrf.mxu0 }
 0x175   : > { %v7584_v20 = vpop.permute.xlu0 %1047  ;;  %v7586_v26 = vpop.permute.xlu1 %1053 }
 0x176   : > { %11216 = vst [vmem:[#allocation22_spill] sm:$0xff] %v7584_v20  ;;  %11217 = vst [vmem:[#allocation23_spill] sm:$0xff] %v7586_v26  ;;  %v7613_v31 = vpop.f32.mrf.mxu0 }
 0x177   : > { %1375 = vrot.lane.b32.xlu0 %v7486_v44, %s11111_s30  ;;  %1449 = vrot.lane.b32.xlu1 %v7499_v55, %s11074_s14 }
 0x178   : > { %v815_v28 = vpop.f32.mrf.mxu0 }
 0x179   : > { %v7592_v17 = vpop.permute.xlu0 %1086  ;;  %v7594_v23 = vpop.permute.xlu1 %1088 }
 0x17a   : > { %v7630_v27 = vpop.f32.mrf.mxu0 }
 0x17b   : > { %1381 = vrot.lane.b32.xlu0 %v7492_v49, %s11111_s30  ;;  %1455 = vrot.lane.b32.xlu1 %v779_v62, %s11074_s14 }
 0x17c   : > { %v819_v22 = vpop.f32.mrf.mxu0 }
 0x17d   : > { %v7601_v3 = vpop.permute.xlu0 %1175  ;;  %v7603_v5 = vpop.permute.xlu1 %1108 }
 0x17e   : > { %11218 = vst [vmem:[#allocation24_spill] sm:$0xff] %v7601_v3  ;;  %11219 = vst [vmem:[#allocation25_spill] sm:$0xff] %v7603_v5 }
 0x17f   : > { %1453 = vrot.lane.b32.xlu0 %v7503_v59, %s11074_s14  ;;  %1465 = vrot.lane.b32.xlu1 %v7529_v29, %s11074_s14 }
 0x181   : > { %v7609_v44 = vpop.permute.xlu0 %1106  ;;  %v7611_v55 = vpop.permute.xlu1 %1177 }
 0x182   : > { %11220 = vst [vmem:[#allocation26_spill] sm:$0xff] %v7611_v55  ;;  %v7646_v55 = vpop.f32.mrf.mxu0 }
 0x183   : > { %1459 = vrot.lane.b32.xlu0 %v7511_v2, %s11074_s14  ;;  %1533 = vrot.lane.b32.xlu1 %v7544_v51, %s11072_s15 }
 0x184   : > { %v825_v3 = vpop.f32.mrf.mxu0 }
 0x185   : > { %v7619_v49 = vpop.permute.xlu0 %1171  ;;  %v7621_v62 = vpop.permute.xlu1 %1114 }
 0x186   : > { %11221 = vst [vmem:[#allocation27_spill] sm:$0xff] %v7619_v49  ;;  %11222 = vst [vmem:[#allocation28_spill] sm:$0xff] %v7621_v62 }
 0x187   : > { %1461 = vrot.lane.b32.xlu0 %v7520_v8, %s11074_s14  ;;  %1535 = vrot.lane.b32.xlu1 %v795_v60, %s11072_s15 }
 0x189   : > { %v7626_v25 = vpop.permute.xlu0 %1112  ;;  %v7628_v30 = vpop.permute.xlu1 %1173 }
 0x18a   : > { %11223 = vst [vmem:[#allocation29_spill] sm:$0xff] %v7628_v30  ;;  %v7662_v30 = vpop.f32.mrf.mxu0 }
 0x18b   : > { %1467 = vrot.lane.b32.xlu0 %v789_v38, %s11074_s14  ;;  %1541 = vrot.lane.b32.xlu1 %v799_v34, %s11072_s15  ;;  %s11346_s14 = smov 51  }
 0x18d   : > { %v7634_v24 = vpop.permute.xlu0 %1118  ;;  %v7636_v21 = vpop.permute.xlu1 %1120 }
 0x18e   : > { %11224 = vst [vmem:[#allocation30_spill] sm:$0xff] %v7636_v21 }
 0x18f   : > { %1539 = vrot.lane.b32.xlu0 %v7560_v14, %s11072_s15  ;;  %1545 = vrot.lane.b32.xlu1 %v7578_v1, %s11072_s15 }
 0x191   : > { %v7642_v8 = vpop.permute.xlu0 %1260  ;;  %v7644_v60 = vpop.permute.xlu1 %1262 }
 0x192   : > { %11225 = vst [vmem:[#allocation31_spill] sm:$0xff] %v7642_v8  ;;  %11226 = vst [vmem:[#allocation32_spill] sm:$0xff] %v7644_v60 }
 0x193   : > { %1547 = vrot.lane.b32.xlu0 %v805_v37, %s11072_s15  ;;  %1621 = vrot.lane.b32.xlu1 %v815_v28, %s11068_s16 }
 0x195   : > { %v7650_v38 = vpop.permute.xlu0 %1256  ;;  %v7652_v34 = vpop.permute.xlu1 %1126 }
 0x196   : > { %11227 = vst [vmem:[#allocation33_spill] sm:$0xff] %v7650_v38  ;;  %11228 = vst [vmem:[#allocation34_spill] sm:$0xff] %v7652_v34  ;;  %v829_v38 = vpop.f32.mrf.mxu0 }
 0x197   : > { %1551 = vrot.lane.b32.xlu0 %v7596_v11, %s11072_s15  ;;  %1631 = vrot.lane.b32.xlu1 %v7646_v55, %s11068_s16 }
 0x199   : > { %v7658_v8 = vpop.permute.xlu0 %1124  ;;  %v7660_v60 = vpop.permute.xlu1 %1258 }
 0x19a   : > { %11229 = vst [vmem:[#allocation35_spill] sm:$0xff] %v7660_v60  ;;  %v997_v60 = vpop.f32.mrf.mxu1 }
 0x19b   : > { %1553 = vrot.lane.b32.xlu0 %v809_v10, %s11072_s15  ;;  %1633 = vrot.lane.b32.xlu1 %v825_v3, %s11068_s16  ;;  %s11349_s15 = smov 50  }
 0x19d   : > { %v7666_v28 = vpop.permute.xlu0 %1191  ;;  %v7668_v37 = vpop.permute.xlu1 %1193 }
 0x19e   : > { %11230 = vst [vmem:[#allocation36_spill] sm:$0xff] %v7668_v37 }
 0x19f   : > { %1637 = vrot.lane.b32.xlu0 %v7662_v30, %s11068_s16  ;;  %1639 = vrot.lane.b32.xlu1 %v829_v38, %s11068_s16 }
 0x1a1   : > { %v7673_v49 = vpop.permute.xlu0 %1197  ;;  %v7675_v48 = vpop.permute.xlu1 %1199 }
 0x1a2   : > { %11231 = vst [vmem:[#allocation37_spill] sm:$0xff] %v7673_v49  ;;  %11232 = vst [vmem:[#allocation38_spill] sm:$0xff] %v7675_v48 }
 0x1a3   : > { %1629 = vrot.lane.b32.xlu0 %v997_v60, %s11068_s16  ;;  %1627 = vrot.lane.b32.xlu1 %v819_v22, %s11068_s16 }
 0x1a5   : > { %v7679_v3 = vpop.permute.xlu0 %1203  ;;  %v7681_v10 = vpop.permute.xlu1 %1377 }
 0x1a6   : > { %11233 = vst [vmem:[#allocation39_spill] sm:$0xff] %v7681_v10 }
 0x1a7   : > { %1625 = vrot.lane.b32.xlu0 %v7630_v27, %s11068_s16  ;;  %1619 = vrot.lane.b32.xlu1 %v7613_v31, %s11068_s16  ;;  %s11313_s16 = smov 111  }
 0x1a9   : > { %v7687_v38 = vpop.permute.xlu0 %1209  ;;  %v7689_v49 = vpop.permute.xlu1 %1205 }
 0x1aa   : > { %11234 = vst [vmem:[#allocation40_spill] sm:$0xff] %v7687_v38 }
 0x1ab   : > { %1055 = vrot.lane.b32.xlu0 %v7355_v43, %s11154_s23  ;;  %1049 = vrot.lane.b32.xlu1 %v7349_v39, %s11154_s23 }
 0x1ad   : > { %v7695_v22 = vpop.permute.xlu0 %1276  ;;  %v7697_v60 = vpop.permute.xlu1 %1365 }
 0x1af   : > { %1128 = vrot.lane.b32.xlu0 %v7372_v53, %s11117_s27  ;;  %1122 = vrot.lane.b32.xlu1 %v7362_v47, %s11117_s27 }
 0x1b1   : > { %v7703_v10 = vpop.permute.xlu0 %1451  ;;  %v7705_v38 = vpop.permute.xlu1 %1383 }
 0x1b3   : > { %1213 = vrot.lane.b32.xlu0 %v7392_v0, %s11113_s29  ;;  %1207 = vrot.lane.b32.xlu1 %v7382_v58, %s11113_s29 }
 0x1b5   : > { %v7711_v39 = vpop.permute.xlu0 %1282  ;;  %v7713_v43 = vpop.permute.xlu1 %1211 }
 0x1b7   : > { %1043 = vrot.lane.b32.xlu0 %v7360_v45, %s11154_s23  ;;  %1037 = vrot.lane.b32.xlu1 %v7353_v41, %s11154_s23 }
 0x1b9   : > { %v7719_v47 = vpop.permute.xlu0 %1457  ;;  %v7721_v53 = vpop.permute.xlu1 %1371 }
 0x1bb   : > { %1116 = vrot.lane.b32.xlu0 %v7376_v56, %s11117_s27  ;;  %1110 = vrot.lane.b32.xlu1 %v7367_v50, %s11117_s27 }
 0x1bd   : > { %v7727_v58 = vpop.permute.xlu0 %1288  ;;  %v7729_v0 = vpop.permute.xlu1 %1463 }
 0x1bf   : > { %1298 = vrot.lane.b32.xlu0 %v7413_v12, %s11109_s13  ;;  %1292 = vrot.lane.b32.xlu1 %v7399_v6, %s11109_s13 }
 0x1c1   : > { %v7735_v41 = vpop.permute.xlu0 %1537  ;;  %v7737_v45 = vpop.permute.xlu1 %1278 }
 0x1c2   : > { %11235 = vst [vmem:[#allocation41_spill] sm:$0xff] %v7737_v45 }
 0x1c3   : > { %1201 = vrot.lane.b32.xlu0 %v7397_v4, %s11113_s29  ;;  %1195 = vrot.lane.b32.xlu1 %v7386_v61, %s11113_s29 }
 0x1c5   : > { %v7743_v50 = vpop.permute.xlu0 %1294  ;;  %v7745_v56 = vpop.permute.xlu1 %1469 }
 0x1c6   : > { %11236 = vst [vmem:[#allocation42_spill] sm:$0xff] %v7745_v56  ;;  %v1078_v56 = vsel %vm1057_vm2, %v7548_v54, %v7540_v13  ;;  %v1152_v54 = vsel %vm1130_vm3, %v7594_v23, %v7626_v25 }
 0x1c7   : > { %1286 = vrot.lane.b32.xlu0 %v7422_v15, %s11109_s13  ;;  %1280 = vrot.lane.b32.xlu1 %v7406_v9, %s11109_s13 }
 0x1c9   : > { %v7751_v6 = vpop.permute.xlu0 %1543  ;;  %v7753_v12 = vpop.permute.xlu1 %1284 }
 0x1ca   : > { %11237 = vst [vmem:[#allocation43_spill] sm:$0xff] %v7751_v6  ;;  %v3075_v6 = vld [vmem:[%s11050_s8] sm:$0xff] }
 0x1cb   : > { %1412 = vrot.lane.b32.xlu0 %v7488_v46, %s11066_s17  ;;  %1410 = vrot.lane.b32.xlu1 %v7482_v40, %s11066_s17 }
 0x1cd   : > { %v7759_v61 = vpop.permute.xlu0 %1635  ;;  %v7761_v4 = vpop.permute.xlu1 %1549 }
 0x1ce   : > { %11238 = vst [vmem:[#allocation44_spill] sm:$0xff] %v7759_v61  ;;  %v1766_v61 = vlaneseq }
 0x1cf   : > { %1498 = vrot.lane.b32.xlu0 %v7529_v29, %s11064_s18  ;;  %1496 = vrot.lane.b32.xlu1 %v7511_v2, %s11064_s18 }
 0x1d1   : > { %v7767_v9 = vpop.permute.xlu0 %1623  ;;  %v7769_v15 = vpop.permute.xlu1 %1290 }
 0x1d3   : > { %1408 = vrot.lane.b32.xlu0 %v7476_v36, %s11066_s17  ;;  %1406 = vrot.lane.b32.xlu1 %v7470_v33, %s11066_s17  ;;  %s11325_s17 = smov 109  }
 0x1d5   : > { %v7775_v40 = vpop.permute.xlu0 %1641  ;;  %v7777_v46 = vpop.permute.xlu1 %1555 }
 0x1d6   : > { %11239 = vst [vmem:[#allocation45_spill] sm:$0xff] %v7775_v40  ;;  %11240 = vst [vmem:[#allocation46_spill] sm:$0xff] %v7777_v46 }
 0x1d7   : > { %1584 = vrot.lane.b32.xlu0 %v7596_v11, %s11070_s19  ;;  %1582 = vrot.lane.b32.xlu1 %v7578_v1, %s11070_s19 }
 0x1d9   : > { %v7783_v2 = vpop.permute.xlu0 %1363  ;;  %v7785_v29 = vpop.permute.xlu1 %1296 }
 0x1db   : > { %1494 = vrot.lane.b32.xlu0 %v7503_v59, %s11064_s18  ;;  %1492 = vrot.lane.b32.xlu1 %v7494_v52, %s11064_s18  ;;  %s11345_s18 = smov 67  }
 0x1dd   : > { %v7791_v33 = vpop.permute.xlu0 %1367  ;;  %v7793_v36 = vpop.permute.xlu1 %1361 }
 0x1df   : > { %1670 = vrot.lane.b32.xlu0 %v7662_v30, %s11186_s20  ;;  %1668 = vrot.lane.b32.xlu1 %v7646_v55, %s11186_s20  ;;  %v3078_v30 = vld [vmem:[%s11050_s8 + $0x18] sm:$0xff] }
 0x1e1   : > { %v7799_v1 = vpop.permute.xlu0 %1369  ;;  %v7801_v11 = vpop.permute.xlu1 %1379 }
 0x1e3   : > { %1580 = vrot.lane.b32.xlu0 %v7560_v14, %s11070_s19  ;;  %1578 = vrot.lane.b32.xlu1 %v7544_v51, %s11070_s19  ;;  %v3077_v51 = vld [vmem:[%s11050_s8 + $0x10] sm:$0xff]  ;;  %s11319_s19 = smov 110  }
 0x1e5   : > { %v7807_v52 = vpop.permute.xlu0 %1373  ;;  %v7809_v59 = vpop.permute.xlu1 %1447 }
 0x1e7   : > { %1666 = vrot.lane.b32.xlu0 %v7630_v27, %s11186_s20  ;;  %1664 = vrot.lane.b32.xlu1 %v7613_v31, %s11186_s20  ;;  %v3076_v27 = vld [vmem:[%s11050_s8 + $0x8] sm:$0xff] }
 0x1e9   : > { %v7818_v55 = vpop.permute.xlu0 %1375  ;;  %v7820_v14 = vpop.permute.xlu1 %1449 }
 0x1eb   : > { %3096 = vperm.xlu0 %7031, %v3078_v30   ;;  %3091 = vperm.xlu1 %7032, %v3077_v51   ;;  %v1058_v51 = vsel %vm1057_vm2, %v7540_v13, %v7535_v32  ;;  %v1131_v32 = vsel %vm1130_vm3, %v7609_v44, %v7603_v5  ;;  %v1133_v13 = vsel %vm1130_vm3, %v7626_v25, %v7621_v62 }
 0x1ec   : > { %v1062_v5 = vsel %vm1057_vm2, %v7566_v63, %v7584_v20  ;;  %v1135_v20 = vsel %vm1130_vm3, %v7634_v24, %v7636_v21 }
 0x1ed   : > { %v7828_v40 = vpop.permute.xlu0 %1381  ;;  %v7830_v31 = vpop.permute.xlu1 %1455 }
 0x1ee   : > { %11241 = vst [vmem:[#allocation47_spill] sm:$0xff] %v7830_v31 }
 0x1ef   : > { %3086 = vperm.xlu0 %7031, %v3076_v27   ;;  %3081 = vperm.xlu1 %7032, %v3075_v6   ;;  %v1060_v27 = vsel %vm1057_vm2, %v7556_v16, %v7550_v57  ;;  %v1151_v6 = vsel %vm1130_vm3, %v7592_v17, %v7609_v44  ;;  %v7865_v17 = vshrl.u32 %v1766_v61, 7  ;;  %v1079_v57 = vsel %vm1057_vm2, %v7558_v7, %v7556_v16 }
 0x1f0   : > { %v1081_v44 = vsel %vm1057_vm2, %v7542_v42, %v7568_v35  ;;  %v1155_v16 = vadd.f32 %v1151_v6, %v1078_v56  ;;  %v1153_v42 = vsel %vm1130_vm3, %v7574_v19, %v7634_v24  ;;  %v1216_v7 = vsel %vm1215_vm4, %v7666_v28, %v7668_v37  ;;  %v11247_v56 = vld [vmem:[#allocation21_spill] sm:$0xff] }
 0x1f1   : > { %v7835_v46 = vpop.permute.xlu0 %1453  ;;  %v7837_v30 = vpop.permute.xlu1 %1465  ;;  %v1158_v61 = vadd.f32 %v1152_v54, %v1079_v57  ;;  %v1159_v62 = vadd.f32 %v1133_v13, %v1060_v27  ;;  %v1154_v19 = vsel %vm1130_vm3, %v11247_v56, %v7658_v8  ;;  %v1301_v6 = vsel %vm1300_vm5, %v7695_v22, %v7737_v45  ;;  %v11249_v13 = vld [vmem:[#allocation37_spill] sm:$0xff]  ;;  %v11252_v45 = vld [vmem:[#allocation40_spill] sm:$0xff] }
 0x1f2   : > { %11242 = vst [vmem:[#allocation48_spill] sm:$0xff] %v7835_v46  ;;  %11243 = vst [vmem:[#allocation49_spill] sm:$0xff] %v7837_v30  ;;  %v7854_v46 = vld [vmem:[%s11244_s3] sm:$0xff]   ;;  %v1080_v30 = vsel %vm1057_vm2, %v7533_v18, %v7566_v63  ;;  %v1064_v18 = vsel %vm1057_vm2, %v7568_v35, %v7586_v26  ;;  %v1156_v63 = vadd.f32 %v1131_v32, %v1058_v51  ;;  %v1772_v32 = vsub.s32 1, %v7865_v17  ;;  %v11248_v51 = vld [vmem:[#allocation27_spill] sm:$0xff] }
 0x1f3   : > { %11245 = vst [vmem:[#allocation50_spill] sm:$0xff] %v7854_v46  ;;  %6872 = vmatprep.mubr.msk.bf16.mxu0 %vm1958_vm7, %v7854_v46  ;;  %v1137_v35 = vsel %vm1130_vm3, %v7658_v8, %v7652_v34  ;;  %v1161_v57 = vadd.f32 %v1153_v42, %v1080_v30  ;;  %v1236_v24 = vsel %vm1215_vm4, %v11248_v51, %v7666_v28  ;;  %v11250_v54 = vld [vmem:[#allocation29_spill] sm:$0xff]  ;;  %v11251_v30 = vld [vmem:[#allocation24_spill] sm:$0xff]  ;;  %v11253_v28 = vld [vmem:[#allocation26_spill] sm:$0xff]  ;;  %v1768_v34 = vsub.s32 0, %v7865_v17 }
 0x1f4   : > { %v1241_v27 = vadd.f32 %v1216_v7, %v1156_v63  ;;  %v1237_v37 = vsel %vm1215_vm4, %v11250_v54, %v11249_v13  ;;  %v1162_v8 = vadd.f32 %v1135_v20, %v1062_v5  ;;  %v1218_v56 = vsel %vm1215_vm4, %v11249_v13, %v7675_v48  ;;  %v11254_v5 = vld [vmem:[#allocation33_spill] sm:$0xff] }
 0x1f5   : > { %v7879_v23 = vpop.permute.xlu0 %1459  ;;  %v7881_v25 = vpop.permute.xlu1 %1533  ;;  %v1238_v42 = vsel %vm1215_vm4, %v11251_v30, %v7679_v3  ;;  %v1239_v7 = vsel %vm1215_vm4, %v11253_v28, %v11252_v45  ;;  %v1164_v63 = vadd.f32 %v1154_v19, %v1081_v44  ;;  %v1165_v51 = vadd.f32 %v1137_v35, %v1064_v18  ;;  %v11255_v28 = vld [vmem:[#allocation35_spill] sm:$0xff] }
 0x1f6   : > { %11246 = vst [vmem:[#allocation51_spill] sm:$0xff] %v7881_v25  ;;  %v1326_v54 = vadd.f32 %v1301_v6, %v1241_v27  ;;  %v1240_v46 = vadd.f32 %v1236_v24, %v1155_v16  ;;  %v1243_v25 = vadd.f32 %v1237_v37, %v1158_v61  ;;  %v1220_v20 = vsel %vm1215_vm4, %v7679_v3, %v7689_v49  ;;  %v11256_v3 = vld [vmem:[#allocation31_spill] sm:$0xff]  ;;  %v11258_v24 = vld [vmem:[#allocation6_spill] sm:$0xff] }
 0x1f7   : > { %v1321_v13 = vsel %vm1300_vm5, %v11254_v5, %v7695_v22  ;;  %v1244_v30 = vadd.f32 %v1218_v56, %v1159_v62  ;;  %v1246_v48 = vadd.f32 %v1238_v42, %v1161_v57  ;;  %v1249_v31 = vadd.f32 %v1239_v7, %v1164_v63  ;;  %v11257_v62 = vld [vmem:[#allocation32_spill] sm:$0xff] }
 0x1f8   : > { %v1322_v44 = vsel %vm1300_vm5, %v11255_v28, %v7711_v39  ;;  %v1222_v37 = vsel %vm1215_vm4, %v11252_v45, %v7713_v43  ;;  %v1323_v16 = vsel %vm1300_vm5, %v11256_v3, %v7727_v58  ;;  %v1324_v22 = vsel %vm1300_vm5, %v11257_v62, %v7743_v50  ;;  %v11261_v3 = vld [vmem:[#allocation5_spill] sm:$0xff]  ;;  %v11264_v62 = vld [vmem:[#allocation11_spill] sm:$0xff] }
 0x1f9   : > { %v7913_v26 = vpop.permute.xlu0 %1461  ;;  %v7915_v21 = vpop.permute.xlu1 %1535  ;;  %v1387_v61 = vsel %vm11175_vm6, %v7783_v2, %v7697_v60  ;;  %v1247_v19 = vadd.f32 %v1220_v20, %v1162_v8  ;;  %v1325_v6 = vadd.f32 %v1321_v13, %v1240_v46  ;;  %v1303_v57 = vsel %vm1300_vm5, %v7711_v39, %v7753_v12  ;;  %v7968_v46 = vld [vmem:[%s11259_s0] sm:$0x7]  ;;  %s11522_s0 = smov 19  }
 0x1fa   : > { %v1338_v45 = vadd.f32 %v1326_v54, %v11258_v24  ;;  %v1328_v27 = vadd.f32 %v1322_v44, %v1243_v25  ;;  %v1305_v56 = vsel %vm1300_vm5, %v7727_v58, %v7769_v15  ;;  %v1307_v42 = vsel %vm1300_vm5, %v7743_v50, %v7785_v29  ;;  %v11266_v24 = vld [vmem:[#allocation9_spill] sm:$0xff] }
 0x1fb   : > { %v1473_v8 = vsel %vm1471_vm8, %v7820_v14, %v7703_v10  ;;  %v1250_v39 = vadd.f32 %v1222_v37, %v1165_v51  ;;  %v1331_v7 = vadd.f32 %v1323_v16, %v1246_v48  ;;  %v1334_v25 = vadd.f32 %v1324_v22, %v1249_v31  ;;  %v11262_v31 = vld [vmem:[#allocation8_spill] sm:$0xff] }
 0x1fc   : > { %v1424_v63 = vadd.f32 %v1387_v61, %v1338_v45  ;;  %v1329_v20 = vadd.f32 %v1303_v57, %v1244_v30  ;;  %v1559_v50 = vsel %vm11137_vm9, %v7915_v21, %v7735_v41  ;;  %v1332_v5 = vadd.f32 %v1305_v56, %v1247_v19  ;;  %v11265_v61 = vld [vmem:[#allocation13_spill] sm:$0xff] }
 0x1fd   : > { %v7936_v18 = vpop.permute.xlu0 %1467  ;;  %v7938_v35 = vpop.permute.xlu1 %1541  ;;  %v1335_v13 = vadd.f32 %v1307_v42, %v1250_v39  ;;  %v7976_v44 = vrot.slane %v7968_v46, %v1772_v32  ;;  %v1337_v51 = vadd.f32 %v1325_v6, %v11261_v3  ;;  %v1386_v48 = vsel %vm11175_vm6, %v7793_v36, %v7783_v2  ;;  %v11268_v42 = vld [vmem:[#allocation12_spill] sm:$0xff]  ;;  %v11269_v39 = vld [vmem:[#allocation14_spill] sm:$0xff] }
 0x1fe   : > { %v1510_v28 = vadd.f32 %v1473_v8, %v1424_v63  ;;  %v1340_v37 = vadd.f32 %v1328_v27, %v11262_v31  ;;  %v7984_v30 = vrot.slane %v7968_v46, %v1768_v34  ;;  %v1389_v16 = vsel %vm11175_vm6, %v7799_v1, %v7721_v53  ;;  %v11267_v34 = vld [vmem:[#allocation39_spill] sm:$0xff] }
 0x1ff   : > { %11260 = vst [vmem:[#allocation21_spill] sm:$0xff] %v7976_v44  ;;  %v1343_v22 = vadd.f32 %v1331_v7, %v11264_v62  ;;  %v1346_v32 = vadd.f32 %v1334_v25, %v11265_v61  ;;  %v1341_v45 = vadd.f32 %v1329_v20, %v11266_v24  ;;  %v1390_v2 = vsel %vm11175_vm6, %v7807_v52, %v7818_v55 }
 0x200   : > { %11263 = vst [vmem:[#allocation27_spill] sm:$0xff] %v7984_v30  ;;  %v1596_v19 = vadd.f32 %v1559_v50, %v1510_v28  ;;  %v1391_v36 = vsel %vm11175_vm6, %v7818_v55, %v11267_v34  ;;  %v1423_v56 = vadd.f32 %v1386_v48, %v1337_v51  ;;  %v1344_v8 = vadd.f32 %v1332_v5, %v11268_v42  ;;  %v11274_v42 = vld [vmem:[#allocation46_spill] sm:$0xff] }
 0x201   : > { %v7970_v54 = vpop.permute.xlu0 %1539  ;;  %v1546_v58 = vpop.permute.xlu1 %1545  ;;  %v1347_v7 = vadd.f32 %v1335_v13, %v11269_v39  ;;  %v1388_v63 = vsel %vm11175_vm6, %v7791_v33, %v7799_v1  ;;  %v1427_v20 = vadd.f32 %v1389_v16, %v1341_v45  ;;  %v1476_v52 = vsel %vm1471_vm8, %v7879_v23, %v7913_v26  ;;  %v11270_v13 = vld [vmem:[#allocation17_spill] sm:$0xff] }
 0x202   : > { %v1477_v55 = vsel %vm1471_vm8, %v7913_v26, %v7729_v0  ;;  %v1429_v50 = vadd.f32 %v1390_v2, %v1343_v22  ;;  %v1430_v28 = vadd.f32 %v1391_v36, %v1344_v8  ;;  %v1392_v5 = vsel %vm11175_vm6, %v7801_v11, %v7828_v40  ;;  %v11271_v22 = vld [vmem:[#allocation47_spill] sm:$0xff] }
 0x203   : > { %v1472_v33 = vsel %vm1471_vm8, %v7809_v59, %v7820_v14  ;;  %v1393_v1 = vsel %vm11175_vm6, %v7828_v40, %v7705_v38  ;;  %v1432_v62 = vadd.f32 %v1392_v5, %v1346_v32  ;;  %v1475_v61 = vsel %vm1471_vm8, %v11271_v22, %v7719_v47  ;;  %v11272_v59 = vld [vmem:[#allocation49_spill] sm:$0xff] }
 0x204   : > { %v1515_v31 = vadd.f32 %v1476_v52, %v1429_v50  ;;  %v1516_v16 = vadd.f32 %v1477_v55, %v1430_v28  ;;  %v1478_v14 = vsel %vm1471_vm8, %v11272_v59, %v7936_v18  ;;  %v11275_v55 = vld [vmem:[#allocation44_spill] sm:$0xff]  ;;  %v1426_v50 = vadd.f32 %v1388_v63, %v1340_v37  ;;  %v11279_v63 = vld [vmem:[#allocation45_spill] sm:$0xff] }
 0x205   : > { %v1548_v57 = vpop.permute.xlu0 %1547  ;;  %v7991_v6 = vpop.permute.xlu1 %1621  ;;  %v1509_v28 = vadd.f32 %v1472_v33, %v1423_v56  ;;  %v1513_v5 = vadd.f32 %v1475_v61, %v1427_v20 }
 0x206   : > { %v1645_v27 = vsel %vm1643_vm10, %v7991_v6, %v7767_v9  ;;  %v1562_v26 = vsel %vm11137_vm9, %v1546_v58, %v1548_v57  ;;  %v1563_v23 = vsel %vm11137_vm9, %v1548_v57, %v7761_v4  ;;  %v1433_v58 = vadd.f32 %v1393_v1, %v1347_v7  ;;  %v11276_v1 = vld [vmem:[#allocation48_spill] sm:$0xff] }
 0x207   : > { %v1682_v25 = vadd.f32 %v1645_v27, %v1596_v19  ;;  %v11273_v19 = vld [vmem:[#allocation42_spill] sm:$0xff]  ;;  %v1601_v24 = vadd.f32 %v1562_v26, %v1515_v31  ;;  %v1602_v57 = vadd.f32 %v1563_v23, %v1516_v16  ;;  %v11277_v31 = vld [vmem:[#allocation16_spill] sm:$0xff] }
 0x208   : > { %v1479_v40 = vsel %vm1471_vm8, %v7936_v18, %v11273_v19 }
 0x209   : > { %v1718_v3 = vadd.f32 %v11270_v13, %v1682_v25  ;;  %v1552_v51 = vpop.permute.xlu0 %1551  ;;  %v1632_v48 = vpop.permute.xlu1 %1631  ;;  %v1518_v25 = vadd.f32 %v1478_v14, %v1432_v62  ;;  %v1519_v52 = vadd.f32 %v1479_v40, %v1433_v58  ;;  %v11278_v62 = vld [vmem:[#allocation43_spill] sm:$0xff] }
 0x20a   : > { %v1561_v59 = vsel %vm11137_vm9, %v7938_v35, %v11278_v62  ;;  %v11280_v40 = vld [vmem:[#allocation51_spill] sm:$0xff] }
 0x20b   : > { %vm1730_vm11 = vcmp.ge.f32.partialorder %v1718_v3, 0.0  ;;  %v1742_v11 = vmul.f32 0.01, %v1718_v3  ;;  %v1558_v58 = vsel %vm11137_vm9, %v11280_v40, %v7915_v21 }
 0x20d   : > { %v1754_v45 = vsel %vm1730_vm11, %v1718_v3, %v1742_v11  ;;  %v1554_v2 = vpop.permute.xlu0 %1553  ;;  %v1634_v36 = vpop.permute.xlu1 %1633 }
 0x20e   : > { %v8037_v32 = vmul.f32 %v7976_v44, %v1754_v45  ;;  %v1564_v27 = vsel %vm11137_vm9, %v1552_v51, %v1554_v2  ;;  %v1565_v8 = vsel %vm11137_vm9, %v1554_v2, %v11274_v42  ;;  %v1648_v39 = vsel %vm1643_vm10, %v1632_v48, %v1634_v36  ;;  %v11281_v2 = vld [vmem:[#allocation15_spill] sm:$0xff] }
 0x20f   : > { %v1649_v18 = vsel %vm1643_vm10, %v1634_v36, %v11275_v55  ;;  %v1687_v7 = vadd.f32 %v1648_v39, %v1601_v24  ;;  %v1474_v51 = vsel %vm1471_vm8, %v11276_v1, %v11271_v22  ;;  %v1604_v26 = vadd.f32 %v1564_v27, %v1518_v25 }
 0x210   : > { %1794 = vst [vmem:[#allocation2 + $0x38] sm:$0xff] %v8037_v32  ;;  %v1688_v3 = vadd.f32 %v1649_v18, %v1602_v57  ;;  %v1605_v23 = vadd.f32 %v1565_v8, %v1519_v52  ;;  %v1512_v14 = vadd.f32 %v1474_v51, %v1426_v50  ;;  %v1599_v57 = vadd.f32 %v1561_v59, %v1513_v5 }
 0x211   : > { %v1723_v48 = vadd.f32 %v11277_v31, %v1687_v7  ;;  %v1638_v16 = vpop.permute.xlu0 %1637  ;;  %v1640_v11 = vpop.permute.xlu1 %1639  ;;  %v1560_v25 = vsel %vm11137_vm9, %v7970_v54, %v7938_v35  ;;  %v1595_v1 = vadd.f32 %v1558_v58, %v1509_v28 }
 0x212   : > { %v1724_v37 = vadd.f32 %v11277_v31, %v1688_v3  ;;  %v1650_v56 = vsel %vm1643_vm10, %v1638_v16, %v1640_v11  ;;  %v1651_v20 = vsel %vm1643_vm10, %v1640_v11, %v11279_v63  ;;  %v1598_v51 = vadd.f32 %v1560_v25, %v1512_v14  ;;  %v11282_v16 = vld [vmem:[#allocation18_spill] sm:$0xff] }
 0x213   : > { %vm1735_vm12 = vcmp.ge.f32.partialorder %v1723_v48, 0.0  ;;  %v1747_v33 = vmul.f32 0.01, %v1723_v48  ;;  %v1690_v22 = vadd.f32 %v1650_v56, %v1604_v26  ;;  %v1691_v61 = vadd.f32 %v1651_v20, %v1605_v23 }
 0x214   : > { %vm1736_vm13 = vcmp.ge.f32.partialorder %v1724_v37, 0.0  ;;  %v1748_v24 = vmul.f32 0.01, %v1724_v37 }
 0x215   : > { %v1759_v45 = vsel %vm1735_vm12, %v1723_v48, %v1747_v33  ;;  %v1726_v36 = vadd.f32 %v11281_v2, %v1690_v22  ;;  %v1727_v27 = vadd.f32 %v11281_v2, %v1691_v61  ;;  %v8062_v8 = vpop.permute.xlu0 %1629  ;;  %v1628_v39 = vpop.permute.xlu1 %1627 }
 0x216   : > { %v1760_v52 = vsel %vm1736_vm13, %v1724_v37, %v1748_v24  ;;  %v1787_v18 = vmul.f32 %v7984_v30, %v1759_v45  ;;  %v1647_v21 = vsel %vm1643_vm10, %v1628_v39, %v8062_v8 }
 0x217   : > { %v1788_v7 = vmul.f32 %v7976_v44, %v1760_v52  ;;  %vm1738_vm14 = vcmp.ge.f32.partialorder %v1726_v36, 0.0  ;;  %vm1739_vm15 = vcmp.ge.f32.partialorder %v1727_v27, 0.0  ;;  %v1750_v50 = vmul.f32 0.01, %v1726_v36 }
 0x218   : > { %1799 = vst [vmem:[#allocation2 + $0x60] sm:$0xff] %v1787_v18  ;;  %v1751_v5 = vmul.f32 0.01, %v1727_v27  ;;  %v1685_v3 = vadd.f32 %v1647_v21, %v1599_v57  ;;  %v1809_v21 = vld [vmem:[#allocation2 + $0x20] sm:$0xff] }
 0x219   : > { %1800 = vst [vmem:[#allocation2 + $0x68] sm:$0xff] %v1788_v7  ;;  %v1762_v26 = vsel %vm1738_vm14, %v1726_v36, %v1750_v50  ;;  %v1626_v23 = vpop.permute.xlu0 %1625  ;;  %v1620_v35 = vpop.permute.xlu1 %1619  ;;  %vm1418_vm14 = vcmask 547840  }
 0x21a   : > { %v1763_v54 = vsel %vm1739_vm15, %v1727_v27, %v1751_v5  ;;  %v1790_v48 = vmul.f32 %v7984_v30, %v1762_v26  ;;  %v1721_v11 = vadd.f32 %v11282_v16, %v1685_v3  ;;  %v1646_v59 = vsel %vm1643_vm10, %v1626_v23, %v1628_v39 }
 0x21b   : > { %v1791_v37 = vmul.f32 %v7976_v44, %v1763_v54  ;;  %v1684_v56 = vadd.f32 %v1646_v59, %v1598_v51  ;;  %v1644_v20 = vsel %vm1643_vm10, %v1620_v35, %v7991_v6  ;;  %v1808_v51 = vld [vmem:[#allocation2 + $0x18] sm:$0xff]  ;;  %vm1504_vm15 = vcmask 416768  }
 0x21c   : > { %1802 = vst [vmem:[#allocation2 + $0x78] sm:$0xff] %v1790_v48  ;;  %vm1733_vm11 = vcmp.ge.f32.partialorder %v1721_v11, 0.0  ;;  %v1745_v28 = vmul.f32 0.01, %v1721_v11  ;;  %v1681_v33 = vadd.f32 %v1644_v20, %v1595_v1  ;;  %v1829_v22 = vpack.c.bf16 %v1790_v48, %v1787_v18  ;;  %v1806_v18 = vld [vmem:[#allocation2 + $0x8] sm:$0xff]  ;;  %v1805_v1 = vld [vmem:[#allocation2] sm:$0xff] }
 0x21d   : > { %1803 = vst [vmem:[#allocation2 + $0x80] sm:$0xff] %v1791_v37  ;;  %v1720_v61 = vadd.f32 %v11282_v16, %v1684_v56  ;;  %v1056_v14 = vpop.permute.xlu0 %1055  ;;  %v1050_v40 = vpop.permute.xlu1 %1049  ;;  %v1830_v58 = vpack.c.bf16 %v1791_v37, %v1788_v7  ;;  %v1824_v3 = vpack.c.bf16 %v1809_v21, %v1806_v18  ;;  %v1823_v54 = vpack.c.bf16 %v1808_v51, %v1805_v1  ;;  %v11283_v37 = vld [vmem:[#allocation50_spill] sm:$0xff] }
 0x21e   : > { %v1757_v24 = vsel %vm1733_vm11, %v1721_v11, %v1745_v28  ;;  %v1717_v57 = vadd.f32 %v11270_v13, %v1681_v33  ;;  %v11284_v56 = vmov 0   ;;  %v8089_v33 = vld [vmem:[%s11244_s3 + $0x8] sm:$0xff]   ;;  %vm1590_vm11 = vcmask 408576  }
 0x21f   : > { %v1785_v45 = vmul.f32 %v7976_v44, %v1757_v24  ;;  %vm1732_vm12 = vcmp.ge.f32.partialorder %v1720_v61, 0.0  ;;  %v1744_v36 = vmul.f32 0.01, %v1720_v61  ;;  %2023 = vmatprep.subr.bf16.mxu1 %v1830_v58 }
 0x220   : > { %vm1729_vm13 = vcmp.ge.f32.partialorder %v1717_v57, 0.0  ;;  %v1741_v6 = vmul.f32 0.01, %v1717_v57  ;;  %2024 = vmatpush1.bf16.msra.mxu1 %v1829_v22 }
 0x221   : > { %1797 = vst [vmem:[#allocation2 + $0x50] sm:$0xff] %v1785_v45  ;;  %v1756_v27 = vsel %vm1732_vm12, %v1720_v61, %v1744_v36  ;;  %v1129_v39 = vpop.permute.xlu0 %1128  ;;  %v1123_v25 = vpop.permute.xlu1 %1122  ;;  %v1827_v52 = vpack.c.bf16 %v1785_v45, %v8037_v32  ;;  %vm1676_vm12 = vcmask 400384  }
 0x222   : > { %v1784_v7 = vmul.f32 %v7984_v30, %v1756_v27  ;;  %v1753_v50 = vsel %vm1729_vm13, %v1717_v57, %v1741_v6  ;;  %v8097_v57 = vld [vmem:[%s11244_s3 + $0x10] sm:$0xff]   ;;  %v11285_v6 = vld [vmem:[#allocation34_spill] sm:$0xff] }
 0x223   : > { %v1781_v5 = vmul.f32 %v7984_v30, %v1753_v50  ;;  %2025 = vmatprep.subr.bf16.mxu1 %v1827_v52  ;;  %v1138_v27 = vsel %vm1130_vm3, %v11285_v6, %v1129_v39  ;;  %v11286_v52 = vld [vmem:[#allocation30_spill] sm:$0xff]  ;;  %v11287_v50 = vld [vmem:[#allocation23_spill] sm:$0xff] }
 0x224   : > { %1796 = vst [vmem:[#allocation2 + $0x48] sm:$0xff] %v1784_v7  ;;  %v1136_v18 = vsel %vm1130_vm3, %v11286_v52, %v1123_v25 }
 0x225   : > { %1793 = vst [vmem:[#allocation2 + $0x30] sm:$0xff] %v1781_v5  ;;  %v1214_v26 = vpop.permute.xlu0 %1213  ;;  %v1208_v23 = vpop.permute.xlu1 %1207  ;;  %v1826_v35 = vpack.c.bf16 %v1784_v7, %v1781_v5  ;;  %v1065_v5 = vsel %vm1057_vm2, %v11287_v50, %v1056_v14  ;;  %v8121_v14 = vld [vmem:[%s11244_s3 + $0x18] sm:$0xff]  }
 0x226   : > { %v1223_v51 = vsel %vm1215_vm4, %v7713_v43, %v1214_v26 }
 0x227   : > { %2026 = vmatpush1.bf16.msra.mxu1 %v1826_v35  ;;  %v1221_v35 = vsel %vm1215_vm4, %v7689_v49, %v1208_v23  ;;  %v11289_v49 = vld [vmem:[#allocation28_spill] sm:$0xff] }
 0x228   : > { %2027 = vmatprep.subr.bf16.mxu1 %v1824_v3  ;;  %v11288_v3 = vld [vmem:[#allocation22_spill] sm:$0xff] }
 0x229   : > { %v1044_v32 = vpop.permute.xlu0 %1043  ;;  %v1038_v48 = vpop.permute.xlu1 %1037  ;;  %v1063_v1 = vsel %vm1057_vm2, %v11288_v3, %v1050_v40 }
 0x22b   : > { %2028 = vmatpush1.bf16.msra.mxu1 %v1823_v54  ;;  %v1166_v54 = vadd.f32 %v1138_v27, %v1065_v5  ;;  %v11293_v5 = vld [vmem:[#allocation38_spill] sm:$0xff] }
 0x22d   : > { %v1117_v11 = vpop.permute.xlu0 %1116  ;;  %v1111_v59 = vpop.permute.xlu1 %1110  ;;  %v1251_v40 = vadd.f32 %v1223_v51, %v1166_v54 }
 0x22e   : > { %6574 = vmatmul.mubr.msk.bf16.vlgmr.msra.gmra.mxu1 %vm1958_vm7, %v11283_v37  ;;  %v1163_v37 = vadd.f32 %v1136_v18, %v1063_v1  ;;  %v1134_v26 = vsel %vm1130_vm3, %v11289_v49, %v1117_v11  ;;  %v11292_v18 = vld [vmem:[#allocation19_spill] sm:$0xff]  ;;  %v11294_v1 = vld [vmem:[#allocation36_spill] sm:$0xff] }
 0x22f   : > { %2055 = vmatprep.mubr.bf16.mxu1 %v11284_v56  ;;  %v1059_v50 = vsel %vm1057_vm2, %v11292_v18, %v1038_v48  ;;  %v11295_v48 = vld [vmem:[#allocation41_spill] sm:$0xff] }
 0x230   : > { %v1248_v6 = vadd.f32 %v1221_v35, %v1163_v37 }
 0x231   : > { %v1299_v20 = vpop.permute.xlu0 %1298  ;;  %v1293_v28 = vpop.permute.xlu1 %1292 }
 0x232   : > { %v1308_v39 = vsel %vm1300_vm5, %v7785_v29, %v1299_v20  ;;  %v1306_v25 = vsel %vm1300_vm5, %v7769_v15, %v1293_v28  ;;  %v11290_v29 = vld [vmem:[#allocation25_spill] sm:$0xff]  ;;  %v11291_v28 = vld [vmem:[#allocation20_spill] sm:$0xff] }
 0x233   : > { %v1132_v23 = vsel %vm1130_vm3, %v11290_v29, %v1111_v59  ;;  %v1336_v15 = vadd.f32 %v1308_v39, %v1251_v40  ;;  %v1333_v20 = vadd.f32 %v1306_v25, %v1248_v6  ;;  %v1061_v27 = vsel %vm1057_vm2, %v11291_v28, %v1044_v32  ;;  %v11297_v6 = vld [vmem:[#allocation3_spill] sm:$0xff] }
 0x234   : > { %v1160_v35 = vadd.f32 %v1134_v26, %v1061_v27  ;;  %v1157_v54 = vadd.f32 %v1132_v23, %v1059_v50  ;;  %v11298_v50 = vld [vmem:[#allocation10_spill] sm:$0xff] }
 0x235   : > { %v1202_v22 = vpop.permute.xlu0 %1201  ;;  %v1196_v61 = vpop.permute.xlu1 %1195 }
 0x236   : > { %6575 = vmatmul.mubr.msk.bf16.gmra.mxu1 %vm1958_vm7, %v8089_v33  ;;  %v1219_v3 = vsel %vm1215_vm4, %v11293_v5, %v1202_v22  ;;  %v1217_v11 = vsel %vm1215_vm4, %v11294_v1, %v1196_v61  ;;  %v11296_v22 = vld [vmem:[#allocation7_spill] sm:$0xff]  ;;  %v1345_v61 = vadd.f32 %v11297_v6, %v1333_v20 }
 0x237   : > { %2065 = vmatprep.mubr.bf16.mxu1 %v11284_v56  ;;  %v1348_v40 = vadd.f32 %v11296_v22, %v1336_v15  ;;  %v1245_v49 = vadd.f32 %v1219_v3, %v1160_v35  ;;  %v1242_v29 = vadd.f32 %v1217_v11, %v1157_v54  ;;  %v11299_v3 = vld [vmem:[#allocation4_spill] sm:$0xff]  ;;  %v8182_v35 = vld [vmem:[%s11244_s3 + $0x28] sm:$0xff]  }
 0x239   : > { %v1287_v58 = vpop.permute.xlu0 %1286  ;;  %v1281_v24 = vpop.permute.xlu1 %1280 }
 0x23a   : > { %v1304_v32 = vsel %vm1300_vm5, %v7753_v12, %v1287_v58  ;;  %v1302_v25 = vsel %vm1300_vm5, %v11295_v48, %v1281_v24 }
 0x23b   : > { %v1327_v23 = vadd.f32 %v1302_v25, %v1242_v29 }
 0x23d   : > { %v1413_v45 = vpop.permute.xlu0 %1412  ;;  %v1411_v36 = vpop.permute.xlu1 %1410  ;;  %v1339_v1 = vadd.f32 %v1327_v23, %v11299_v3  ;;  %v7067_v3 = vld [vmem:[%s11244_s3 + $0x80] sm:$0xff]  }
 0x23e   : > { %6576 = vmatmul.mubr.msk.bf16.gmra.mxu1 %vm1958_vm7, %v8097_v57  ;;  %v1422_v37 = vsel %vm1418_vm14, %v7705_v38, %v1413_v45  ;;  %v1421_v39 = vsel %vm1418_vm14, %v11267_v34, %v1411_v36  ;;  %v8155_v34 = vld [vmem:[%s11244_s3 + $0x20] sm:$0xff]   ;;  %v1330_v36 = vadd.f32 %v1304_v32, %v1245_v49 }
 0x23f   : > { %2075 = vmatprep.mubr.bf16.mxu1 %v11284_v56  ;;  %v1434_v12 = vadd.f32 %v1422_v37, %v1348_v40  ;;  %v1431_v58 = vadd.f32 %v1421_v39, %v1345_v61 }
 0x240   : > { %v1342_v5 = vadd.f32 %v1330_v36, %v11298_v50  ;;  %v7061_v50 = vld [vmem:[%s11244_s3 + $0x50] sm:$0xff]  }
 0x241   : > { %v1499_v21 = vpop.permute.xlu0 %1498  ;;  %v1497_v7 = vpop.permute.xlu1 %1496 }
 0x242   : > { %v1508_v26 = vsel %vm1504_vm15, %v11273_v19, %v1499_v21  ;;  %v1507_v38 = vsel %vm1504_vm15, %v7729_v0, %v1497_v7  ;;  %v1776_v7 = vsub.s32 2, %v7865_v17 }
 0x243   : > { %v1520_v0 = vadd.f32 %v1508_v26, %v1434_v12  ;;  %v1517_v21 = vadd.f32 %v1507_v38, %v1431_v58  ;;  %v7057_v12 = vld [vmem:[%s11244_s3 + $0x30] sm:$0xff]  }
 0x245   : > { %v1409_v52 = vpop.permute.xlu0 %1408  ;;  %v1407_v43 = vpop.permute.xlu1 %1406 }
 0x246   : > { %6577 = vmatmul.mubr.msk.bf16.gmra.mxu1 %vm1958_vm7, %v8121_v14  ;;  %v1420_v20 = vsel %vm1418_vm14, %v7721_v53, %v1409_v52  ;;  %v1419_v28 = vsel %vm1418_vm14, %v7697_v60, %v1407_v43 }
 0x247   : > { %2085 = vmatprep.mubr.bf16.mxu1 %v11284_v56 }
 0x249   : > { %v1585_v51 = vpop.permute.xlu0 %1584  ;;  %v1583_v59 = vpop.permute.xlu1 %1582 }
 0x24a   : > { %v1594_v15 = vsel %vm1590_vm11, %v11274_v42, %v1585_v51  ;;  %v1593_v19 = vsel %vm1590_vm11, %v7761_v4, %v1583_v59  ;;  %v1428_v51 = vadd.f32 %v1420_v20, %v1342_v5  ;;  %v1425_v59 = vadd.f32 %v1419_v28, %v1339_v1  ;;  %v7066_v5 = vld [vmem:[%s11244_s3 + $0x78] sm:$0xff]   ;;  %v7068_v1 = vld [vmem:[%s11244_s3 + $0x88] sm:$0xff]  }
 0x24b   : > { %v1606_v42 = vadd.f32 %v1594_v15, %v1520_v0  ;;  %v1603_v27 = vadd.f32 %v1593_v19, %v1517_v21  ;;  %v1807_v21 = vld [vmem:[#allocation2 + $0x10] sm:$0xff] }
 0x24d   : > { %v1495_v24 = vpop.permute.xlu0 %1494  ;;  %v1493_v45 = vpop.permute.xlu1 %1492 }
 0x24e   : > { %6578 = vmatmul.mubr.msk.bf16.gmra.mxu1 %vm1958_vm7, %v8155_v34  ;;  %v1506_v53 = vsel %vm1504_vm15, %v7719_v47, %v1495_v24  ;;  %v1505_v60 = vsel %vm1504_vm15, %v7703_v10, %v1493_v45 }
 0x24f   : > { %2095 = vmatprep.mubr.bf16.mxu1 %v11284_v56  ;;  %v1514_v39 = vadd.f32 %v1506_v53, %v1428_v51  ;;  %v1511_v10 = vadd.f32 %v1505_v60, %v1425_v59 }
 0x251   : > { %v1671_v18 = vpop.permute.xlu0 %1670  ;;  %v1669_v4 = vpop.permute.xlu1 %1668 }
 0x252   : > { %v1680_v11 = vsel %vm1676_vm12, %v11279_v63, %v1671_v18  ;;  %v1679_v17 = vsel %vm1676_vm12, %v11275_v55, %v1669_v4  ;;  %v8185_v63 = vrot.slane %v7968_v46, %v1776_v7  ;;  %v1810_v7 = vld [vmem:[#allocation2 + $0x28] sm:$0xff]  ;;  %v7059_v18 = vld [vmem:[%s11244_s3 + $0x40] sm:$0xff]  }
 0x253   : > { %v1692_v52 = vadd.f32 %v1680_v11, %v1606_v42  ;;  %v1689_v43 = vadd.f32 %v1679_v17, %v1603_v27  ;;  %v1825_v27 = vpack.c.bf16 %v1810_v7, %v1807_v21  ;;  %v7060_v4 = vld [vmem:[%s11244_s3 + $0x48] sm:$0xff]  }
 0x254   : > { %11300 = vst [vmem:[#allocation37_spill] sm:$0xff] %v8185_v63 }
 0x255   : > { %v1728_v55 = vadd.f32 %v11281_v2, %v1692_v52  ;;  %v1725_v54 = vadd.f32 %v11277_v31, %v1689_v43  ;;  %v1581_v47 = vpop.permute.xlu0 %1580  ;;  %v1579_v37 = vpop.permute.xlu1 %1578 }
 0x256   : > { %v1592_v32 = vsel %vm1590_vm11, %v11278_v62, %v1581_v47  ;;  %v1591_v48 = vsel %vm1590_vm11, %v7735_v41, %v1579_v37  ;;  %6579 = vmatmul.mubr.msk.bf16.gmra.mxu1 %vm1958_vm7, %v8182_v35 }
 0x257   : > { %vm1740_vm13 = vcmp.ge.f32.partialorder %v1728_v55, 0.0  ;;  %v1752_v46 = vmul.f32 0.01, %v1728_v55  ;;  %vm1737_vm0 = vcmp.ge.f32.partialorder %v1725_v54, 0.0  ;;  %v1749_v25 = vmul.f32 0.01, %v1725_v54  ;;  %2105 = vmatprep.mubr.bf16.mxu1 %v11284_v56 }
 0x258   : > { %v1600_v22 = vadd.f32 %v1592_v32, %v1514_v39  ;;  %v1597_v40 = vadd.f32 %v1591_v48, %v1511_v10 }
 0x259   : > { %v1764_v31 = vsel %vm1740_vm13, %v1728_v55, %v1752_v46  ;;  %v1761_v2 = vsel %vm1737_vm0, %v1725_v54, %v1749_v25  ;;  %v1667_v6 = vpop.permute.xlu0 %1666  ;;  %v1665_v61 = vpop.permute.xlu1 %1664 }
 0x25a   : > { %v1792_v62 = vmul.f32 %v8185_v63, %v1764_v31  ;;  %v1789_v49 = vmul.f32 %v8185_v63, %v1761_v2  ;;  %v1678_v41 = vsel %vm1676_vm12, %v8062_v8, %v1667_v6  ;;  %v1677_v29 = vsel %vm1676_vm12, %v7767_v9, %v1665_v61 }
 0x25b   : > { %v1686_v26 = vadd.f32 %v1678_v41, %v1600_v22  ;;  %v1683_v38 = vadd.f32 %v1677_v29, %v1597_v40 }
 0x25c   : > { %1804 = vst.msk [vmem:[#allocation2 + $0x88] sm:$0xff] %vm424_vm1, %v1792_v62  ;;  %1801 = vst.msk [vmem:[#allocation2 + $0x70] sm:$0xff] %vm424_vm1, %v1789_v49 }
 0x25d   : > { %v1722_v58 = vadd.f32 %v11282_v16, %v1686_v26  ;;  %v1719_v24 = vadd.f32 %v11270_v13, %v1683_v38  ;;  %v7058_v16 = vld [vmem:[%s11244_s3 + $0x38] sm:$0xff]  }
 0x25e   : > { %6580 = vmatmul.mubr.msk.bf16.gmra.mxu1 %vm1958_vm7, %v7057_v12 }
 0x25f   : > { %vm1734_vm0 = vcmp.ge.f32.partialorder %v1722_v58, 0.0  ;;  %v1746_v8 = vmul.f32 0.01, %v1722_v58  ;;  %vm1731_vm13 = vcmp.ge.f32.partialorder %v1719_v24, 0.0  ;;  %v1743_v9 = vmul.f32 0.01, %v1719_v24  ;;  %2115 = vmatprep.mubr.bf16.mxu1 %v11284_v56 }
 0x261   : > { %v1758_v45 = vsel %vm1734_vm0, %v1722_v58, %v1746_v8  ;;  %v1755_v36 = vsel %vm1731_vm13, %v1719_v24, %v1743_v9 }
 0x262   : > { %v1786_v23 = vmul.f32 %v8185_v63, %v1758_v45  ;;  %v1783_v15 = vmul.f32 %v8185_v63, %v1755_v36 }
 0x263   : > { %v1819_v19 = vld [vmem:[#allocation2 + $0x70] sm:$0xff]  ;;  %v1822_v0 = vld [vmem:[#allocation2 + $0x88] sm:$0xff] }
 0x264   : > { %1798 = vst.msk [vmem:[#allocation2 + $0x58] sm:$0xff] %vm424_vm1, %v1786_v23  ;;  %1795 = vst.msk [vmem:[#allocation2 + $0x40] sm:$0xff] %vm424_vm1, %v1783_v15  ;;  %v1831_v13 = vpack.c.bf16 %v1822_v0, %v1819_v19 }
 0x266   : > { %6866 = vmatprep.subr.bf16.mxu0 %v1831_v13  ;;  %6581 = vmatmul.mubr.msk.bf16.gmra.mxu1 %vm1958_vm7, %v7058_v16 }
 0x267   : > { %6867 = vmatpush3.bf16.msra.mxu0 %v1831_v13  ;;  %2125 = vmatprep.mubr.bf16.mxu1 %v11284_v56 }
 0x26b   : > { %v1813_v20 = vld [vmem:[#allocation2 + $0x40] sm:$0xff]  ;;  %v1816_v28 = vld [vmem:[#allocation2 + $0x58] sm:$0xff] }
 0x26c   : > { %v1828_v42 = vpack.c.bf16 %v1816_v28, %v1813_v20 }
 0x26e   : > { %6868 = vmatprep.subr.bf16.mxu0 %v1828_v42  ;;  %6582 = vmatmul.mubr.msk.bf16.gmra.mxu1 %vm1958_vm7, %v7059_v18 }
 0x26f   : > { %6869 = vmatpush3.bf16.msra.mxu0 %v1828_v42  ;;  %2135 = vmatprep.mubr.bf16.mxu1 %v11284_v56 }
 0x270   : > { %6870 = vmatprep.subr.bf16.mxu0 %v1825_v27 }
 0x273   : > { %6871 = vmatpush3.bf16.msra.mxu0 %v1825_v27 }
 0x276   : > { %6873 = vmatmul.mubr.msk.bf16.vlgmr.msra.gmra.mxu0 %vm1958_vm7, %v8089_v33  ;;  %6583 = vmatmul.mubr.msk.bf16.gmra.mxu1 %vm1958_vm7, %v7060_v4  ;;  %v7062_v33 = vld [vmem:[%s11244_s3 + $0x58] sm:$0xff]  }
 0x277   : > { %6876 = vmatprep.mubr.msk.bf16.mxu0 %vm1958_vm7, %v8097_v57  ;;  %2145 = vmatprep.mubr.bf16.mxu1 %v11284_v56  ;;  %v7063_v57 = vld [vmem:[%s11244_s3 + $0x60] sm:$0xff]  }
 0x27e   : > { %6877 = vmatmul.mubr.msk.bf16.gmra.mxu0 %vm1958_vm7, %v8121_v14  ;;  %6584 = vmatmul.mubr.msk.bf16.gmra.mxu1 %vm1958_vm7, %v7061_v50  ;;  %v7064_v14 = vld [vmem:[%s11244_s3 + $0x68] sm:$0xff]  }
 0x27f   : > { %6880 = vmatprep.mubr.msk.bf16.mxu0 %vm1958_vm7, %v8155_v34  ;;  %2155 = vmatprep.mubr.bf16.mxu1 %v11284_v56  ;;  %v7065_v34 = vld [vmem:[%s11244_s3 + $0x70] sm:$0xff]  }
 0x286   : > { %6881 = vmatmul.mubr.msk.bf16.gmra.mxu0 %vm1958_vm7, %v8182_v35  ;;  %6585 = vmatmul.mubr.msk.bf16.gmra.mxu1 %vm1958_vm7, %v7062_v33 }
 0x287   : > { %6884 = vmatprep.mubr.msk.bf16.mxu0 %vm1958_vm7, %v7057_v12  ;;  %2165 = vmatprep.mubr.bf16.mxu1 %v11284_v56 }
 0x28e   : > { %6885 = vmatmul.mubr.msk.bf16.gmra.mxu0 %vm1958_vm7, %v7058_v16  ;;  %6586 = vmatmul.mubr.msk.bf16.gmra.mxu1 %vm1958_vm7, %v7063_v57 }
 0x28f   : > { %6888 = vmatprep.mubr.msk.bf16.mxu0 %vm1958_vm7, %v7059_v18  ;;  %2175 = vmatprep.mubr.bf16.mxu1 %v11284_v56 }
 0x296   : > { %6889 = vmatmul.mubr.msk.bf16.gmra.mxu0 %vm1958_vm7, %v7060_v4  ;;  %6587 = vmatmul.mubr.msk.bf16.gmra.mxu1 %vm1958_vm7, %v7064_v14 }
 0x297   : > { %6892 = vmatprep.mubr.msk.bf16.mxu0 %vm1958_vm7, %v7061_v50  ;;  %2185 = vmatprep.mubr.bf16.mxu1 %v11284_v56 }
 0x29e   : > { %6893 = vmatmul.mubr.msk.bf16.gmra.mxu0 %vm1958_vm7, %v7062_v33  ;;  %6588 = vmatmul.mubr.msk.bf16.gmra.mxu1 %vm1958_vm7, %v7065_v34 }
 0x29f   : > { %6896 = vmatprep.mubr.msk.bf16.mxu0 %vm1958_vm7, %v7063_v57  ;;  %2195 = vmatprep.mubr.bf16.mxu1 %v11284_v56 }
 0x2a6   : > { %6897 = vmatmul.mubr.msk.bf16.gmra.mxu0 %vm1958_vm7, %v7064_v14  ;;  %6589 = vmatmul.mubr.msk.bf16.gmra.mxu1 %vm1958_vm7, %v7066_v5 }
 0x2a7   : > { %6900 = vmatprep.mubr.msk.bf16.mxu0 %vm1958_vm7, %v7065_v34  ;;  %2205 = vmatprep.mubr.bf16.mxu1 %v11284_v56 }
 0x2ae   : > { %6901 = vmatmul.mubr.msk.bf16.gmra.mxu0 %vm1958_vm7, %v7066_v5  ;;  %6590 = vmatmul.mubr.msk.bf16.gmra.mxu1 %vm1958_vm7, %v7067_v3 }
 0x2af   : > { %6904 = vmatprep.mubr.msk.bf16.mxu0 %vm1958_vm7, %v7067_v3  ;;  %2215 = vmatprep.mubr.bf16.mxu1 %v11284_v56 }
 0x2b6   : > { %6905 = vmatmul.mubr.msk.bf16.gmra.mxu0 %vm1958_vm7, %v7068_v1  ;;  %6591 = vmatmul.mubr.msk.bf16.gmra.mxu1 %vm1958_vm7, %v7068_v1  ;;  %vm3342_vm7 = vcmask 654336  }
 0x2b7   : > { %3429 = vmatprep.mubr.bf16.mxu0 %v11284_v56 }
 0x2ee   : > { %v2047_v11 = vpop.f32.mrf.mxu1 }
 0x2f0   : > { %v2049_v17 = vpop.f32.mrf.mxu1 }
 0x2f2   : > { %v2051_v53 = vpop.f32.mrf.mxu1 }
 0x2f4   : > { %v2053_v60 = vpop.f32.mrf.mxu1 }
 0x2f6   : > { %v2057_v52 = vpop.f32.mrf.mxu1 }
 0x2f8   : > { %v2059_v43 = vpop.f32.mrf.mxu1 }
 0x2fa   : > { %v2061_v51 = vpop.f32.mrf.mxu1 }
 0x2fc   : > { %v2063_v59 = vpop.f32.mrf.mxu1 }
 0x2fe   : > { %v2067_v35 = vpop.f32.mrf.mxu1 }
 0x300   : > { %v2069_v55 = vpop.f32.mrf.mxu1 }
 0x302   : > { %v2071_v54 = vpop.f32.mrf.mxu1 }
 0x304   : > { %v2073_v47 = vpop.f32.mrf.mxu1 }
 0x306   : > { %v8292_v37 = vpop.f32.mrf.mxu1 }
 0x308   : > { %v2079_v39 = vpop.f32.mrf.mxu1 }
 0x30a   : > { %v8294_v10 = vpop.f32.mrf.mxu1 }
 0x30c   : > { %v8296_v32 = vpop.f32.mrf.mxu1 }
 0x30e   : > { %v8298_v48 = vpop.f32.mrf.mxu1 }
 0x310   : > { %v8300_v46 = vpop.f32.mrf.mxu1 }
 0x312   : > { %v8302_v25 = vpop.f32.mrf.mxu1 }
 0x314   : > { %v8304_v31 = vpop.f32.mrf.mxu1 }
 0x316   : > { %v8306_v2 = vpop.f32.mrf.mxu1 }
 0x318   : > { %v8308_v22 = vpop.f32.mrf.mxu1 }
 0x31a   : > { %v8310_v40 = vpop.f32.mrf.mxu1 }
 0x31c   : > { %v8312_v6 = vpop.f32.mrf.mxu1 }
 0x31e   : > { %v8320_v49 = vpop.f32.mrf.mxu1 }
 0x320   : > { %v8327_v29 = vpop.f32.mrf.mxu1 }
 0x322   : > { %v8332_v26 = vpop.f32.mrf.mxu1 }
 0x324   : > { %v8341_v58 = vpop.f32.mrf.mxu1 }
 0x326   : > { %v8348_v8 = vpop.f32.mrf.mxu1 }
 0x328   : > { %v8354_v45 = vpop.f32.mrf.mxu1 }
 0x32a   : > { %v8362_v23 = vpop.f32.mrf.mxu1 }
 0x32c   : > { %v8369_v19 = vpop.f32.mrf.mxu1 }
 0x32e   : > { %v8376_v13 = vpop.f32.mrf.mxu1 }
 0x32f   : > { %11301 = vst [vmem:[#allocation29_spill] sm:$0xff] %v8376_v13 }
 0x330   : > { %v8383_v21 = vpop.f32.mrf.mxu1 }
 0x331   : > { %11302 = vst [vmem:[#allocation24_spill] sm:$0xff] %v8383_v21 }
 0x332   : > { %v8388_v7 = vpop.f32.mrf.mxu1 }
 0x333   : > { %11303 = vst [vmem:[#allocation40_spill] sm:$0xff] %v8388_v7 }
 0x334   : > { %v8397_v42 = vpop.f32.mrf.mxu1 }
 0x335   : > { %11304 = vst [vmem:[#allocation26_spill] sm:$0xff] %v8397_v42 }
 0x336   : > { %v8314_v61 = vpop.f32.mrf.mxu0  ;;  %v8404_v18 = vpop.f32.mrf.mxu1 }
 0x337   : > { %2411 = vrot.lane.b32.xlu1 %v8314_v61, %s11152_s24  ;;  %11305 = vst [vmem:[#allocation33_spill] sm:$0xff] %v8404_v18 }
 0x338   : > { %v8318_v62 = vpop.f32.mrf.mxu0  ;;  %v8411_v50 = vpop.f32.mrf.mxu1 }
 0x339   : > { %11306 = vst [vmem:[#allocation35_spill] sm:$0xff] %v8411_v50 }
 0x33a   : > { %v8322_v41 = vpop.f32.mrf.mxu0  ;;  %v8419_v57 = vpop.f32.mrf.mxu1 }
 0x33b   : > { %2427 = vrot.lane.b32.xlu1 %v2047_v11, %s11154_s23  ;;  %2413 = vrot.lane.b32.xlu0 %v8322_v41, %s11152_s24  ;;  %11307 = vst [vmem:[#allocation31_spill] sm:$0xff] %v8419_v57 }
 0x33c   : > { %v8334_v38 = vpop.f32.mrf.mxu0  ;;  %v8427_v34 = vpop.f32.mrf.mxu1 }
 0x33d   : > { %11309 = vst [vmem:[#allocation6_spill] sm:$0xff] %v8427_v34 }
 0x33e   : > { %v8339_v12 = vpop.f32.mrf.mxu0  ;;  %v8435_v3 = vpop.f32.mrf.mxu1 }
 0x33f   : > { %2407 = vrot.lane.b32.xlu1 %v8318_v62, %s11152_s24  ;;  %2429 = vrot.lane.b32.xlu0 %v2049_v17, %s11154_s23 }
 0x340   : > { %v8346_v24 = vpop.f32.mrf.mxu0  ;;  %v2149_v11 = vpop.f32.mrf.mxu1 }
 0x342   : > { %v8352_v9 = vpop.f32.mrf.mxu0 }
 0x343   : > { %2433 = vrot.lane.b32.xlu1 %v2051_v53, %s11154_s23  ;;  %2409 = vrot.lane.b32.xlu0 %v8334_v38, %s11152_s24  ;;  %v8449_v53 = vpop.f32.mrf.mxu1 }
 0x344   : > { %v8360_v36 = vpop.f32.mrf.mxu0 }
 0x346   : > { %v8364_v15 = vpop.f32.mrf.mxu0 }
 0x347   : > { %2435 = vrot.lane.b32.xlu0 %v2053_v60, %s11154_s23  ;;  %2483 = vrot.lane.b32.xlu1 %v8339_v12, %s11150_s25 }
 0x348   : > { %v8371_v0 = vpop.f32.mrf.mxu0 }
 0x34a   : > { %v8378_v16 = vpop.f32.mrf.mxu0 }
 0x34b   : > { %2441 = vrot.lane.b32.xlu0 %v2059_v43, %s11154_s23  ;;  %2439 = vrot.lane.b32.xlu1 %v2057_v52, %s11154_s23  ;;  %v2153_v52 = vpop.f32.mrf.mxu1 }
 0x34c   : > { %v8390_v20 = vpop.f32.mrf.mxu0 }
 0x34e   : > { %v8395_v28 = vpop.f32.mrf.mxu0 }
 0x34f   : > { %2479 = vrot.lane.b32.xlu1 %v8346_v24, %s11150_s25  ;;  %2485 = vrot.lane.b32.xlu0 %v8352_v9, %s11150_s25 }
 0x350   : > { %v8402_v27 = vpop.f32.mrf.mxu0 }
 0x352   : > { %v8409_v4 = vpop.f32.mrf.mxu0 }
 0x353   : > { %2445 = vrot.lane.b32.xlu1 %v2061_v51, %s11154_s23  ;;  %2481 = vrot.lane.b32.xlu0 %v8360_v36, %s11150_s25  ;;  %v8454_v51 = vpop.f32.mrf.mxu1 }
 0x354   : > { %v8417_v33 = vpop.f32.mrf.mxu0 }
 0x356   : > { %v8421_v14 = vpop.f32.mrf.mxu0 }
 0x357   : > { %2447 = vrot.lane.b32.xlu0 %v2063_v59, %s11154_s23  ;;  %2567 = vrot.lane.b32.xlu1 %v8364_v15, %s11119_s26  ;;  %11308 = vst [vmem:[#allocation32_spill] sm:$0xff] %v8421_v14  ;;  %v2159_v59 = vpop.f32.mrf.mxu1 }
 0x358   : > { %v8429_v5 = vpop.f32.mrf.mxu0 }
 0x359   : > { %11310 = vst [vmem:[#allocation5_spill] sm:$0xff] %v8429_v5 }
 0x35a   : > { %v8437_v1 = vpop.f32.mrf.mxu0 }
 0x35b   : > { %2499 = vrot.lane.b32.xlu1 %v2067_v35, %s11117_s27  ;;  %2569 = vrot.lane.b32.xlu0 %v8378_v16, %s11119_s26  ;;  %11311 = vst [vmem:[#allocation8_spill] sm:$0xff] %v8437_v1 }
 0x35c   : > { %v8443_v17 = vpop.f32.mrf.mxu0 }
 0x35d   : > { %11312 = vst [vmem:[#allocation11_spill] sm:$0xff] %v8443_v17 }
 0x35e   : > { %v6894_v60 = vpop.f32.mrf.mxu0 }
 0x35f   : > { %2563 = vrot.lane.b32.xlu1 %v8371_v0, %s11119_s26  ;;  %2501 = vrot.lane.b32.xlu0 %v2069_v55, %s11117_s27  ;;  %v8463_v55 = vpop.f32.mrf.mxu1 }
 0x360   : > { %v2340_v43 = vpop.f32.mrf.mxu0 }
 0x362   : > { %v6895_v35 = vpop.f32.mrf.mxu0 }
 0x363   : > { %2505 = vrot.lane.b32.xlu1 %v2071_v54, %s11117_s27  ;;  %2565 = vrot.lane.b32.xlu0 %v8390_v20, %s11119_s26  ;;  %s11406_s26 = smov 77  }
 0x364   : > { %v2343_v54 = vpop.f32.mrf.mxu0 }
 0x367   : > { %2507 = vrot.lane.b32.xlu0 %v2073_v47, %s11117_s27  ;;  %2651 = vrot.lane.b32.xlu1 %v8395_v28, %s11115_s28  ;;  %v2163_v47 = vpop.f32.mrf.mxu1 }
 0x36b   : > { %2513 = vrot.lane.b32.xlu0 %v2079_v39, %s11117_s27  ;;  %2511 = vrot.lane.b32.xlu1 %v8292_v37, %s11117_s27  ;;  %v8471_v37 = vpop.f32.mrf.mxu1 }
 0x36d   : > { %v2169_v39 = vpop.f32.mrf.mxu1 }
 0x36f   : > { %2647 = vrot.lane.b32.xlu1 %v8402_v27, %s11115_s28  ;;  %2653 = vrot.lane.b32.xlu0 %v8409_v4, %s11115_s28 }
 0x373   : > { %2517 = vrot.lane.b32.xlu1 %v8294_v10, %s11117_s27  ;;  %2649 = vrot.lane.b32.xlu0 %v8417_v33, %s11115_s28  ;;  %v6898_v10 = vpop.f32.mrf.mxu0  ;;  %s11410_s28 = smov 61  }
 0x377   : > { %2583 = vrot.lane.b32.xlu1 %v8298_v48, %s11113_s29  ;;  %2519 = vrot.lane.b32.xlu0 %v8296_v32, %s11117_s27  ;;  %v8479_v32 = vpop.f32.mrf.mxu1  ;;  %v2356_v48 = vpop.f32.mrf.mxu0 }
 0x37b   : > { %2589 = vrot.lane.b32.xlu1 %v8302_v25, %s11113_s29  ;;  %2585 = vrot.lane.b32.xlu0 %v8300_v46, %s11113_s29  ;;  %v8481_v46 = vpop.permute.xlu1 %3091  ;;  %v2173_v25 = vpop.f32.mrf.mxu1 }
 0x37c   : > { %11314 = vst [vmem:[#allocation13_spill] sm:$0xff] %v8481_v46 }
 0x37f   : > { %2595 = vrot.lane.b32.xlu1 %v8306_v2, %s11113_s29  ;;  %2591 = vrot.lane.b32.xlu0 %v8304_v31, %s11113_s29  ;;  %v8485_v31 = vpop.f32.mrf.mxu1  ;;  %v8487_v2 = vpop.permute.xlu0 %3096 }
 0x380   : > { %11315 = vst [vmem:[#allocation9_spill] sm:$0xff] %v8487_v2 }
 0x383   : > { %2601 = vrot.lane.b32.xlu1 %v8310_v40, %s11113_s29  ;;  %2767 = vrot.lane.b32.xlu0 %v6894_v60, %s11111_s30  ;;  %v6899_v40 = vpop.f32.mrf.mxu0 }
 0x387   : > { %2667 = vrot.lane.b32.xlu1 %v8320_v49, %s11109_s13  ;;  %2755 = vrot.lane.b32.xlu0 %v2340_v43, %s11111_s30  ;;  %v8497_v49 = vpop.permute.xlu0 %3086 }
 0x388   : > { %11317 = vst [vmem:[#allocation12_spill] sm:$0xff] %v8497_v49 }
 0x38b   : > { %2673 = vrot.lane.b32.xlu1 %v8332_v26, %s11109_s13  ;;  %2597 = vrot.lane.b32.xlu0 %v8308_v22, %s11113_s29  ;;  %v8493_v22 = vpop.permute.xlu1 %3081 }
 0x38c   : > { %11316 = vst [vmem:[#allocation39_spill] sm:$0xff] %v8493_v22 }
 0x38f   : > { %2679 = vrot.lane.b32.xlu1 %v8348_v8, %s11109_s13  ;;  %2773 = vrot.lane.b32.xlu0 %v6895_v35, %s11111_s30  ;;  %v2359_v8 = vpop.f32.mrf.mxu0 }
 0x391   : > { %v6902_v35 = vpop.f32.mrf.mxu0 }
 0x393   : > { %2685 = vrot.lane.b32.xlu1 %v8362_v23, %s11109_s13  ;;  %2761 = vrot.lane.b32.xlu0 %v2343_v54, %s11111_s30 }
 0x397   : > { %2751 = vrot.lane.b32.xlu1 %v8435_v3, %s11111_s30  ;;  %2603 = vrot.lane.b32.xlu0 %v8312_v6, %s11113_s29  ;;  %v2179_v6 = vpop.f32.mrf.mxu1 }
 0x399   : > { %v8501_v23 = vpop.f32.mrf.mxu1 }
 0x39b   : > { %2753 = vrot.lane.b32.xlu1 %v2149_v11, %s11111_s30  ;;  %2851 = vrot.lane.b32.xlu0 %v6898_v10, %s11313_s16  ;;  %v2183_v60 = vpop.f32.mrf.mxu1 }
 0x39f   : > { %2759 = vrot.lane.b32.xlu1 %v2153_v52, %s11111_s30  ;;  %2839 = vrot.lane.b32.xlu0 %v2356_v48, %s11313_s16  ;;  %v8513_v52 = vpop.f32.mrf.mxu1  ;;  %v2372_v48 = vpop.f32.mrf.mxu0 }
 0x3a1   : > { %v2189_v54 = vpop.f32.mrf.mxu1 }
 0x3a3   : > { %2763 = vrot.lane.b32.xlu1 %v8454_v51, %s11111_s30  ;;  %2669 = vrot.lane.b32.xlu0 %v8327_v29, %s11109_s13 }
 0x3a7   : > { %2765 = vrot.lane.b32.xlu1 %v2159_v59, %s11111_s30  ;;  %2857 = vrot.lane.b32.xlu0 %v6899_v40, %s11313_s16 }
 0x3a9   : > { %v8499_v26 = vpop.permute.xlu1 %2411 }
 0x3ab   : > { %2771 = vrot.lane.b32.xlu1 %v2163_v47, %s11111_s30  ;;  %2845 = vrot.lane.b32.xlu0 %v2359_v8, %s11313_s16 }
 0x3ad   : > { %v8505_v29 = vpop.permute.xlu0 %2413  ;;  %v8507_v11 = vpop.permute.xlu1 %2427 }
 0x3af   : > { %2835 = vrot.lane.b32.xlu1 %v8471_v37, %s11313_s16  ;;  %2675 = vrot.lane.b32.xlu0 %v8341_v58, %s11109_s13  ;;  %v8527_v58 = vpop.f32.mrf.mxu1 }
 0x3b1   : > { %v8515_v43 = vpop.permute.xlu0 %2429  ;;  %v8517_v59 = vpop.permute.xlu1 %2407 }
 0x3b2   : > { %11318 = vst [vmem:[#allocation14_spill] sm:$0xff] %v8515_v43 }
 0x3b3   : > { %2837 = vrot.lane.b32.xlu1 %v2169_v39, %s11313_s16  ;;  %2935 = vrot.lane.b32.xlu0 %v6902_v35, %s11319_s19  ;;  %v2193_v39 = vpop.f32.mrf.mxu1 }
 0x3b5   : > { %v8521_v47 = vpop.permute.xlu0 %2409  ;;  %v8523_v10 = vpop.permute.xlu1 %2433 }
 0x3b6   : > { %v8541_v17 = vpop.f32.mrf.mxu1 }
 0x3b7   : > { %2843 = vrot.lane.b32.xlu1 %v2173_v25, %s11313_s16  ;;  %2923 = vrot.lane.b32.xlu0 %v2372_v48, %s11319_s19  ;;  %v6903_v25 = vpop.f32.mrf.mxu0 }
 0x3b8   : > { %v2199_v14 = vpop.f32.mrf.mxu1 }
 0x3b9   : > { %v8529_v40 = vpop.permute.xlu0 %2435  ;;  %v8531_v8 = vpop.permute.xlu1 %2483 }
 0x3ba   : > { %11320 = vst [vmem:[#allocation17_spill] sm:$0xff] %v8529_v40  ;;  %v2375_v1 = vpop.f32.mrf.mxu0  ;;  %v8555_v49 = vpop.f32.mrf.mxu1 }
 0x3bb   : > { %2847 = vrot.lane.b32.xlu1 %v8485_v31, %s11313_s16  ;;  %2681 = vrot.lane.b32.xlu0 %v8354_v45, %s11109_s13 }
 0x3bc   : > { %v6906_v2 = vpop.f32.mrf.mxu0 }
 0x3bd   : > { %v8537_v35 = vpop.permute.xlu0 %2441  ;;  %v8539_v63 = vpop.permute.xlu1 %2439 }
 0x3be   : > { %11321 = vst [vmem:[#allocation47_spill] sm:$0xff] %v8537_v35  ;;  %v2388_v46 = vpop.f32.mrf.mxu0 }
 0x3bf   : > { %2849 = vrot.lane.b32.xlu1 %v2179_v6, %s11313_s16  ;;  %2941 = vrot.lane.b32.xlu0 %v6903_v25, %s11319_s19 }
 0x3c0   : > { %v6907_v42 = vpop.f32.mrf.mxu0 }
 0x3c1   : > { %v8545_v48 = vpop.permute.xlu0 %2485  ;;  %v8547_v5 = vpop.permute.xlu1 %2479 }
 0x3c2   : > { %11322 = vst [vmem:[#allocation49_spill] sm:$0xff] %v8545_v48 }
 0x3c3   : > { %2855 = vrot.lane.b32.xlu1 %v2183_v60, %s11313_s16  ;;  %2929 = vrot.lane.b32.xlu0 %v2375_v1, %s11319_s19  ;;  %v2203_v60 = vpop.f32.mrf.mxu1 }
 0x3c5   : > { %v8551_v45 = vpop.permute.xlu0 %2481  ;;  %v8553_v56 = vpop.permute.xlu1 %2445 }
 0x3c6   : > { %v8571_v44 = vpop.f32.mrf.mxu1 }
 0x3c7   : > { %2919 = vrot.lane.b32.xlu1 %v8513_v52, %s11319_s19  ;;  %2687 = vrot.lane.b32.xlu0 %v8369_v19, %s11109_s13 }
 0x3c8   : > { %v2209_v22 = vpop.f32.mrf.mxu1 }
 0x3c9   : > { %v8561_v6 = vpop.permute.xlu0 %2447  ;;  %v8563_v25 = vpop.permute.xlu1 %2567 }
 0x3ca   : > { %11323 = vst [vmem:[#allocation42_spill] sm:$0xff] %v8561_v6  ;;  %11324 = vst [vmem:[#allocation46_spill] sm:$0xff] %v8563_v25  ;;  %v8586_v7 = vpop.f32.mrf.mxu1 }
 0x3cb   : > { %2921 = vrot.lane.b32.xlu1 %v2189_v54, %s11319_s19  ;;  %3019 = vrot.lane.b32.xlu0 %v6906_v2, %s11325_s17 }
 0x3cc   : > { %v2213_v34 = vpop.f32.mrf.mxu1 }
 0x3cd   : > { %v8567_v1 = vpop.permute.xlu0 %2569  ;;  %v8569_v30 = vpop.permute.xlu1 %2499 }
 0x3ce   : > { %11326 = vst [vmem:[#allocation44_spill] sm:$0xff] %v8567_v1  ;;  %v8602_v13 = vpop.f32.mrf.mxu1 }
 0x3cf   : > { %2927 = vrot.lane.b32.xlu1 %v2193_v39, %s11319_s19  ;;  %3007 = vrot.lane.b32.xlu0 %v2388_v46, %s11325_s17 }
 0x3d0   : > { %v2219_v1 = vpop.f32.mrf.mxu1 }
 0x3d1   : > { %v8575_v19 = vpop.permute.xlu0 %2501  ;;  %v8577_v57 = vpop.permute.xlu1 %2563 }
 0x3d2   : > { %11327 = vst [vmem:[#allocation48_spill] sm:$0xff] %v8575_v19  ;;  %11328 = vst [vmem:[#allocation16_spill] sm:$0xff] %v8577_v57  ;;  %v8619_v25 = vpop.f32.mrf.mxu1 }
 0x3d3   : > { %2931 = vrot.lane.b32.xlu1 %v8541_v17, %s11319_s19  ;;  %3025 = vrot.lane.b32.xlu0 %v6907_v42, %s11325_s17 }
 0x3d5   : > { %v8582_v2 = vpop.permute.xlu0 %2565  ;;  %v8584_v54 = vpop.permute.xlu1 %2505 }
 0x3d6   : > { %11329 = vst [vmem:[#allocation43_spill] sm:$0xff] %v8582_v2  ;;  %v2391_v2 = vpop.f32.mrf.mxu0 }
 0x3d7   : > { %2933 = vrot.lane.b32.xlu1 %v2199_v14, %s11319_s19  ;;  %2757 = vrot.lane.b32.xlu0 %v8449_v53, %s11111_s30 }
 0x3d9   : > { %v8591_v46 = vpop.permute.xlu0 %2507  ;;  %v8593_v39 = vpop.permute.xlu1 %2651 }
 0x3da   : > { %11330 = vst [vmem:[#allocation45_spill] sm:$0xff] %v8591_v46  ;;  %11331 = vst [vmem:[#allocation51_spill] sm:$0xff] %v8593_v39 }
 0x3db   : > { %2939 = vrot.lane.b32.xlu1 %v2203_v60, %s11319_s19  ;;  %2769 = vrot.lane.b32.xlu0 %v8463_v55, %s11111_s30  ;;  %s11422_s30 = smov 127  }
 0x3dd   : > { %v8598_v42 = vpop.permute.xlu0 %2513  ;;  %v8600_v18 = vpop.permute.xlu1 %2511 }
 0x3df   : > { %3005 = vrot.lane.b32.xlu1 %v2209_v22, %s11325_s17  ;;  %2841 = vrot.lane.b32.xlu0 %v8479_v32, %s11313_s16 }
 0x3e1   : > { %v8607_v14 = vpop.permute.xlu0 %2653  ;;  %v8609_v50 = vpop.permute.xlu1 %2647 }
 0x3e2   : > { %11332 = vst [vmem:[#allocation15_spill] sm:$0xff] %v8607_v14  ;;  %11333 = vst [vmem:[#allocation18_spill] sm:$0xff] %v8609_v50  ;;  %v2223_v50 = vpop.f32.mrf.mxu1 }
 0x3e3   : > { %3015 = vrot.lane.b32.xlu1 %v8602_v13, %s11325_s17  ;;  %2853 = vrot.lane.b32.xlu0 %v8501_v23, %s11313_s16 }
 0x3e5   : > { %v8615_v60 = vpop.permute.xlu0 %2649  ;;  %v8617_v39 = vpop.permute.xlu1 %2517 }
 0x3e6   : > { %11334 = vst [vmem:[#allocation50_spill] sm:$0xff] %v8615_v60 }
 0x3e7   : > { %3017 = vrot.lane.b32.xlu1 %v2219_v1, %s11325_s17  ;;  %2925 = vrot.lane.b32.xlu0 %v8527_v58, %s11319_s19 }
 0x3e9   : > { %v8624_v22 = vpop.permute.xlu0 %2519  ;;  %v8626_v14 = vpop.permute.xlu1 %2583 }
 0x3ea   : > { %11335 = vst [vmem:[#allocation34_spill] sm:$0xff] %v8624_v22 }
 0x3eb   : > { %3023 = vrot.lane.b32.xlu1 %v2223_v50, %s11325_s17  ;;  %2937 = vrot.lane.b32.xlu0 %v8555_v49, %s11319_s19 }
 0x3ed   : > { %v8631_v60 = vpop.permute.xlu0 %2585  ;;  %v8633_v48 = vpop.permute.xlu1 %2589 }
 0x3ee   : > { %11336 = vst [vmem:[#allocation30_spill] sm:$0xff] %v8631_v60 }
 0x3ef   : > { %3011 = vrot.lane.b32.xlu1 %v2213_v34, %s11325_s17  ;;  %3021 = vrot.lane.b32.xlu0 %v8619_v25, %s11325_s17 }
 0x3f1   : > { %v8638_v1 = vpop.permute.xlu0 %2591  ;;  %v8640_v21 = vpop.permute.xlu1 %2595 }
 0x3f2   : > { %11337 = vst [vmem:[#allocation23_spill] sm:$0xff] %v8638_v1 }
 0x3f3   : > { %3013 = vrot.lane.b32.xlu0 %v2391_v2, %s11325_s17  ;;  %3003 = vrot.lane.b32.xlu1 %v8571_v44, %s11325_s17 }
 0x3f5   : > { %v8645_v50 = vpop.permute.xlu0 %2767  ;;  %v8647_v57 = vpop.permute.xlu1 %2601 }
 0x3f6   : > { %11338 = vst [vmem:[#allocation22_spill] sm:$0xff] %v8645_v50 }
 0x3f7   : > { %3009 = vrot.lane.b32.xlu0 %v8586_v7, %s11325_s17  ;;  %2443 = vrot.lane.b32.xlu1 %v8314_v61, %s11154_s23 }
 0x3f9   : > { %v8653_v34 = vpop.permute.xlu0 %2755  ;;  %v8655_v1 = vpop.permute.xlu1 %2667 }
 0x3fa   : > { %11339 = vst [vmem:[#allocation28_spill] sm:$0xff] %v8653_v34 }
 0x3fb   : > { %2449 = vrot.lane.b32.xlu0 %v8322_v41, %s11154_s23  ;;  %2515 = vrot.lane.b32.xlu1 %v8339_v12, %s11117_s27 }
 0x3fd   : > { %v8661_v2 = vpop.permute.xlu0 %2597  ;;  %v8663_v50 = vpop.permute.xlu1 %2673 }
 0x3fe   : > { %11340 = vst [vmem:[#allocation25_spill] sm:$0xff] %v8661_v2 }
 0x3ff   : > { %2521 = vrot.lane.b32.xlu0 %v8352_v9, %s11117_s27  ;;  %2599 = vrot.lane.b32.xlu1 %v8364_v15, %s11113_s29 }
 0x401   : > { %v8669_v61 = vpop.permute.xlu0 %2773  ;;  %v8671_v34 = vpop.permute.xlu1 %2679 }
 0x403   : > { %2605 = vrot.lane.b32.xlu0 %v8378_v16, %s11113_s29  ;;  %2431 = vrot.lane.b32.xlu1 %v8318_v62, %s11154_s23 }
 0x405   : > { %v8677_v41 = vpop.permute.xlu0 %2761  ;;  %v8679_v12 = vpop.permute.xlu1 %2685 }
 0x406   : > { %11341 = vst [vmem:[#allocation20_spill] sm:$0xff] %v8677_v41 }
 0x407   : > { %2437 = vrot.lane.b32.xlu0 %v8334_v38, %s11154_s23  ;;  %2503 = vrot.lane.b32.xlu1 %v8346_v24, %s11117_s27 }
 0x409   : > { %v8685_v9 = vpop.permute.xlu0 %2603  ;;  %v8687_v15 = vpop.permute.xlu1 %2751 }
 0x40b   : > { %2509 = vrot.lane.b32.xlu0 %v8360_v36, %s11117_s27  ;;  %2683 = vrot.lane.b32.xlu1 %v8395_v28, %s11109_s13  ;;  %s11407_s27 = smov 18  }
 0x40d   : > { %v8693_v62 = vpop.permute.xlu0 %2851  ;;  %v8695_v16 = vpop.permute.xlu1 %2753 }
 0x40f   : > { %2689 = vrot.lane.b32.xlu0 %v8409_v4, %s11109_s13  ;;  %2587 = vrot.lane.b32.xlu1 %v8371_v0, %s11113_s29 }
 0x411   : > { %v8701_v38 = vpop.permute.xlu0 %2839  ;;  %v8703_v24 = vpop.permute.xlu1 %2759 }
 0x412   : > { %11342 = vst [vmem:[#allocation19_spill] sm:$0xff] %v8701_v38  ;;  %11343 = vst [vmem:[#allocation38_spill] sm:$0xff] %v8703_v24 }
 0x413   : > { %2593 = vrot.lane.b32.xlu0 %v8390_v20, %s11113_s29  ;;  %2671 = vrot.lane.b32.xlu1 %v8402_v27, %s11109_s13  ;;  %s11417_s29 = smov 17  }
 0x415   : > { %v8709_v36 = vpop.permute.xlu0 %2669  ;;  %v8711_v28 = vpop.permute.xlu1 %2763 }
 0x416   : > { %11344 = vst [vmem:[#allocation36_spill] sm:$0xff] %v8709_v36  ;;  %v2691_v41 = vsel %vm1300_vm5, %v8655_v1, %v8709_v36  ;;  %v2527_v36 = vsel %vm1130_vm3, %v8600_v18, %v8598_v42 }
 0x417   : > { %2677 = vrot.lane.b32.xlu0 %v8417_v33, %s11109_s13  ;;  %2799 = vrot.lane.b32.xlu1 %v8454_v51, %s11345_s18  ;;  %s11423_s13 = smov 1  }
 0x419   : > { %v8717_v0 = vpop.permute.xlu0 %2857  ;;  %v8719_v4 = vpop.permute.xlu1 %2765 }
 0x41b   : > { %2801 = vrot.lane.b32.xlu0 %v8463_v55, %s11345_s18  ;;  %2883 = vrot.lane.b32.xlu1 %v8485_v31, %s11346_s14 }
 0x41d   : > { %v8725_v20 = vpop.permute.xlu0 %2845  ;;  %v8727_v27 = vpop.permute.xlu1 %2771 }
 0x41e   : > { %11347 = vst [vmem:[#allocation41_spill] sm:$0xff] %v8725_v20  ;;  %v2523_v20 = vsel %vm1130_vm3, %v8569_v30, %v8575_v19 }
 0x41f   : > { %2885 = vrot.lane.b32.xlu0 %v8501_v23, %s11346_s14  ;;  %2795 = vrot.lane.b32.xlu1 %v8435_v3, %s11345_s18 }
 0x421   : > { %v8733_v33 = vpop.permute.xlu0 %2675  ;;  %v8735_v51 = vpop.permute.xlu1 %2835 }
 0x422   : > { %11348 = vst [vmem:[#allocation7_spill] sm:$0xff] %v8735_v51  ;;  %v2451_v51 = vsel %vm1057_vm2, %v8507_v11, %v8515_v43  ;;  %v2472_v43 = vsel %vm1057_vm2, %v8521_v47, %v8523_v10  ;;  %v2544_v47 = vsel %vm1130_vm3, %v8551_v45, %v8584_v54 }
 0x423   : > { %2797 = vrot.lane.b32.xlu0 %v8449_v53, %s11345_s18  ;;  %2967 = vrot.lane.b32.xlu1 %v8541_v17, %s11349_s15 }
 0x425   : > { %v8741_v55 = vpop.permute.xlu0 %2935  ;;  %v8743_v31 = vpop.permute.xlu1 %2837 }
 0x427   : > { %2969 = vrot.lane.b32.xlu0 %v8555_v49, %s11349_s15  ;;  %2879 = vrot.lane.b32.xlu1 %v8471_v37, %s11346_s14 }
 0x429   : > { %v8749_v3 = vpop.permute.xlu0 %2923  ;;  %v8751_v23 = vpop.permute.xlu1 %2843 }
 0x42a   : > { %11350 = vst [vmem:[#allocation3_spill] sm:$0xff] %v8751_v23 }
 0x42b   : > { %2881 = vrot.lane.b32.xlu0 %v8479_v32, %s11346_s14  ;;  %3051 = vrot.lane.b32.xlu1 %v8602_v13, %s11186_s20  ;;  %v4461_v13 = vld [vmem:[%s11051_s9 + $0x10] sm:$0xff] }
 0x42d   : > { %v8757_v17 = vpop.permute.xlu0 %2681  ;;  %v8759_v53 = vpop.permute.xlu1 %2847 }
 0x42f   : > { %3053 = vrot.lane.b32.xlu0 %v8619_v25, %s11186_s20  ;;  %2963 = vrot.lane.b32.xlu1 %v8513_v52, %s11349_s15  ;;  %v4462_v52 = vld [vmem:[%s11051_s9 + $0x18] sm:$0xff] }
 0x431   : > { %v8765_v37 = vpop.permute.xlu0 %2941  ;;  %v8767_v49 = vpop.permute.xlu1 %2849 }
 0x433   : > { %2965 = vrot.lane.b32.xlu0 %v8527_v58, %s11349_s15  ;;  %3047 = vrot.lane.b32.xlu1 %v8571_v44, %s11186_s20  ;;  %v4459_v44 = vld [vmem:[%s11051_s9] sm:$0xff] }
 0x435   : > { %v8776_v32 = vpop.permute.xlu0 %2929  ;;  %v8778_v25 = vpop.permute.xlu1 %2855 }
 0x436   : > { %11351 = vst [vmem:[#allocation10_spill] sm:$0xff] %v8776_v32  ;;  %v4460_v32 = vld [vmem:[%s11051_s9 + $0x8] sm:$0xff] }
 0x437   : > { %3049 = vrot.lane.b32.xlu0 %v8586_v7, %s11186_s20  ;;  %4475 = vperm.xlu1 %7032, %v4461_v13  }
 0x439   : > { %v8788_v58 = vpop.permute.xlu0 %2687  ;;  %v8790_v23 = vpop.permute.xlu1 %2919 }
 0x43a   : > { %11352 = vst [vmem:[#allocation4_spill] sm:$0xff] %v8790_v23 }
 0x43b   : > { %4480 = vperm.xlu0 %7031, %v4462_v52   ;;  %4465 = vperm.xlu1 %7032, %v4459_v44   ;;  %v2607_v52 = vsel %vm1215_vm4, %v8626_v14, %v8631_v60  ;;  %v2548_v44 = vadd.f32 %v2523_v20, %v2451_v51  ;;  %v2453_v20 = vsel %vm1057_vm2, %v8523_v10, %v8529_v40 }
 0x43c   : > { %v2455_v51 = vsel %vm1057_vm2, %v8539_v63, %v8537_v35  ;;  %v2474_v40 = vsel %vm1057_vm2, %v8505_v29, %v8553_v56  ;;  %v2529_v29 = vsel %vm1130_vm3, %v8617_v39, %v8624_v22  ;;  %v2695_v60 = vsel %vm1300_vm5, %v8671_v34, %v8757_v17 }
 0x43d   : > { %v8795_v7 = vpop.permute.xlu0 %3019  ;;  %v8797_v13 = vpop.permute.xlu1 %2921  ;;  %v2632_v19 = vadd.f32 %v2607_v52, %v2548_v44  ;;  %v2554_v45 = vadd.f32 %v2527_v36, %v2455_v51 }
 0x43f   : > { %4470 = vperm.xlu0 %7031, %v4460_v32   ;;  %v2471_v32 = vsel %vm1057_vm2, %v8517_v59, %v8507_v11  ;;  %v2473_v11 = vsel %vm1057_vm2, %v8499_v26, %v8539_v63  ;;  %v2543_v59 = vsel %vm1130_vm3, %v8547_v5, %v8569_v30  ;;  %v2716_v10 = vadd.f32 %v2691_v41, %v2632_v19  ;;  %v11353_v19 = vld [vmem:[#allocation16_spill] sm:$0xff] }
 0x440   : > { %v2525_v63 = vsel %vm1130_vm3, %v8584_v54, %v8591_v46  ;;  %v2545_v30 = vsel %vm1130_vm3, %v8531_v8, %v8600_v18  ;;  %v2611_v5 = vsel %vm1215_vm4, %v8640_v21, %v8661_v2  ;;  %v2457_v26 = vsel %vm1057_vm2, %v8553_v56, %v8561_v6  ;;  %v11354_v18 = vld [vmem:[#allocation43_spill] sm:$0xff]  ;;  %v11355_v6 = vld [vmem:[#allocation24_spill] sm:$0xff] }
 0x441   : > { %v8808_v23 = vpop.permute.xlu0 %3007  ;;  %v8810_v24 = vpop.permute.xlu1 %2927  ;;  %v2627_v54 = vsel %vm1215_vm4, %v11353_v19, %v8626_v14  ;;  %v2547_v41 = vadd.f32 %v2543_v59, %v2471_v32  ;;  %v2550_v46 = vadd.f32 %v2544_v47, %v2472_v43  ;;  %v2628_v8 = vsel %vm1215_vm4, %v11354_v18, %v8633_v48  ;;  %v11356_v14 = vld [vmem:[#allocation49_spill] sm:$0xff]  ;;  %v11357_v47 = vld [vmem:[#allocation46_spill] sm:$0xff] }
 0x442   : > { %v2551_v56 = vadd.f32 %v2525_v63, %v2453_v20  ;;  %v2553_v36 = vadd.f32 %v2545_v30, %v2473_v11  ;;  %v2638_v51 = vadd.f32 %v2611_v5, %v2554_v45  ;;  %v2728_v2 = vadd.f32 %v2716_v10, %v11355_v6  ;;  %v8885_v6 = vld [vmem:[%s11358_s4] sm:$0xff]   ;;  %v11360_v63 = vld [vmem:[#allocation51_spill] sm:$0xff] }
 0x443   : > { %v2546_v43 = vsel %vm1130_vm3, %v11356_v14, %v8617_v39  ;;  %v2557_v32 = vadd.f32 %v2529_v29, %v2457_v26  ;;  %v2631_v59 = vadd.f32 %v2627_v54, %v2547_v41  ;;  %v2629_v19 = vsel %vm1215_vm4, %v11357_v47, %v8640_v21  ;;  %v11359_v39 = vld [vmem:[#allocation18_spill] sm:$0xff]  ;;  %v11362_v5 = vld [vmem:[#allocation23_spill] sm:$0xff]  ;;  %6918 = vmatprep.mubr.msk.bf16.mxu1 %vm3342_vm7, %v8885_v6  ;;  %v11363_v41 = vld [vmem:[#allocation44_spill] sm:$0xff] }
 0x444   : > { %v2634_v18 = vadd.f32 %v2628_v8, %v2550_v46  ;;  %v2613_v20 = vsel %vm1215_vm4, %v8647_v57, %v8685_v9  ;;  %v2722_v11 = vadd.f32 %v2695_v60, %v2638_v51  ;;  %v2711_v10 = vsel %vm1300_vm5, %v11359_v39, %v8655_v1  ;;  %v11361_v46 = vld [vmem:[#allocation28_spill] sm:$0xff]  ;;  %v11364_v51 = vld [vmem:[#allocation50_spill] sm:$0xff]  ;;  %v11365_v39 = vld [vmem:[#allocation35_spill] sm:$0xff] }
 0x445   : > { %v8839_v52 = vpop.permute.xlu0 %3025  ;;  %v8841_v44 = vpop.permute.xlu1 %2931  ;;  %v2713_v21 = vsel %vm1300_vm5, %v11360_v63, %v8671_v34  ;;  %v2776_v30 = vsel %vm11175_vm6, %v8695_v16, %v11361_v46  ;;  %v2860_v60 = vsel %vm1471_vm8, %v8743_v31, %v8701_v38  ;;  %v2609_v26 = vsel %vm1215_vm4, %v8633_v48, %v11362_v5 }
 0x446   : > { %v2637_v45 = vadd.f32 %v2629_v19, %v2553_v36  ;;  %v2812_v29 = vadd.f32 %v2776_v30, %v2728_v2  ;;  %v2697_v1 = vsel %vm1300_vm5, %v8679_v12, %v8788_v58  ;;  %v2630_v8 = vsel %vm1215_vm4, %v11363_v41, %v8647_v57  ;;  %v11366_v57 = vld [vmem:[#allocation15_spill] sm:$0xff] }
 0x447   : > { %v2712_v48 = vsel %vm1300_vm5, %v11364_v51, %v8663_v50  ;;  %v2641_v36 = vadd.f32 %v2613_v20, %v2557_v32  ;;  %v2944_v2 = vsel %vm11137_vm9, %v8797_v13, %v8749_v3  ;;  %v2715_v14 = vadd.f32 %v2711_v10, %v2631_v59 }
 0x448   : > { %v2721_v47 = vadd.f32 %v2713_v21, %v2637_v45  ;;  %v2896_v19 = vadd.f32 %v2860_v60, %v2812_v29  ;;  %v2734_v63 = vadd.f32 %v2722_v11, %v11365_v39  ;;  %v2556_v30 = vadd.f32 %v2546_v43, %v2474_v40  ;;  %v11369_v11 = vld [vmem:[#allocation33_spill] sm:$0xff] }
 0x449   : > { %v8871_v22 = vpop.permute.xlu0 %2757  ;;  %v2934_v35 = vpop.permute.xlu1 %2933  ;;  %v2635_v38 = vadd.f32 %v2609_v26, %v2551_v56  ;;  %v2725_v46 = vadd.f32 %v2697_v1, %v2641_v36  ;;  %v2718_v5 = vadd.f32 %v2712_v48, %v2634_v18  ;;  %v2714_v41 = vsel %vm1300_vm5, %v11366_v57, %v8679_v12  ;;  %v11367_v56 = vld [vmem:[#allocation22_spill] sm:$0xff]  ;;  %v11368_v18 = vld [vmem:[#allocation29_spill] sm:$0xff]  ;;  %v11371_v36 = vld [vmem:[#allocation40_spill] sm:$0xff] }
 0x44a   : > { %v2693_v32 = vsel %vm1300_vm5, %v8663_v50, %v8733_v33  ;;  %v2980_v20 = vadd.f32 %v2944_v2, %v2896_v19  ;;  %v2640_v10 = vadd.f32 %v2630_v8, %v2556_v30  ;;  %v2779_v40 = vsel %vm11175_vm6, %v8711_v28, %v8719_v4  ;;  %v11370_v1 = vld [vmem:[#allocation6_spill] sm:$0xff] }
 0x44b   : > { %v2780_v43 = vsel %vm11175_vm6, %v8719_v4, %v11367_v56  ;;  %v2727_v50 = vadd.f32 %v2715_v14, %v11368_v18  ;;  %v2733_v21 = vadd.f32 %v2721_v47, %v11369_v11  ;;  %v2719_v29 = vadd.f32 %v2693_v32, %v2635_v38  ;;  %v11372_v14 = vld [vmem:[#allocation39_spill] sm:$0xff]  ;;  %v11373_v57 = vld [vmem:[#allocation26_spill] sm:$0xff]  ;;  %v11375_v11 = vld [vmem:[#allocation21_spill] sm:$0xff] }
 0x44c   : > { %v2818_v60 = vadd.f32 %v2780_v43, %v2734_v63  ;;  %v2724_v45 = vadd.f32 %v2714_v41, %v2640_v10  ;;  %v2863_v28 = vsel %vm1471_vm8, %v8759_v53, %v8767_v49  ;;  %v2737_v8 = vadd.f32 %v2725_v46, %v11370_v1  ;;  %v11374_v32 = vld [vmem:[#allocation31_spill] sm:$0xff] }
 0x44d   : > { %v2770_v54 = vpop.permute.xlu0 %2769  ;;  %v8905_v34 = vpop.permute.xlu1 %2939  ;;  %v2775_v4 = vsel %vm11175_vm6, %v8687_v15, %v8695_v16  ;;  %v2817_v48 = vadd.f32 %v2779_v40, %v2733_v21  ;;  %v8948_v2 = vadd.f32 %v2718_v5, %v11371_v36  ;;  %v2782_v38 = vsel %vm11175_vm6, %v8727_v27, %v8669_v61 }
 0x44e   : > { %v2864_v53 = vsel %vm1471_vm8, %v8767_v49, %v8693_v62  ;;  %v2947_v46 = vsel %vm11137_vm9, %v8841_v44, %v2934_v35  ;;  %v2948_v15 = vsel %vm11137_vm9, %v2934_v35, %v8741_v55  ;;  %v2811_v30 = vadd.f32 %v2775_v4, %v2727_v50 }
 0x44f   : > { %v2901_v16 = vadd.f32 %v2863_v28, %v2817_v48  ;;  %v2902_v5 = vadd.f32 %v2864_v53, %v2818_v60  ;;  %v2731_v41 = vadd.f32 %v2719_v29, %v11373_v57  ;;  %v2821_v10 = vadd.f32 %v2782_v38, %v2737_v8  ;;  %v11376_v29 = vld [vmem:[#allocation20_spill] sm:$0xff]  ;;  %v11377_v28 = vld [vmem:[#allocation38_spill] sm:$0xff]  ;;  %v11378_v8 = vld [vmem:[#allocation7_spill] sm:$0xff] }
 0x450   : > { %v2781_v49 = vsel %vm11175_vm6, %v2770_v54, %v8727_v27  ;;  %v2866_v35 = vsel %vm1471_vm8, %v8778_v25, %v8717_v0  ;;  %v2778_v1 = vsel %vm11175_vm6, %v11377_v28, %v11376_v29  ;;  %v2859_v4 = vsel %vm1471_vm8, %v11378_v8, %v8743_v31  ;;  %v11380_v38 = vld [vmem:[#allocation3_spill] sm:$0xff] }
 0x451   : > { %v8925_v51 = vpop.permute.xlu0 %2841  ;;  %v8927_v59 = vpop.permute.xlu1 %3005  ;;  %v2985_v40 = vadd.f32 %v2947_v46, %v2901_v16  ;;  %v2986_v43 = vadd.f32 %v2948_v15, %v2902_v5  ;;  %v2905_v36 = vadd.f32 %v2866_v35, %v2821_v10 }
 0x452   : > { %v3028_v12 = vsel %vm1643_vm10, %v8927_v59, %v8808_v23 }
 0x453   : > { %v3064_v26 = vadd.f32 %v3028_v12, %v2980_v20  ;;  %v2736_v20 = vadd.f32 %v2724_v45, %v11374_v32 }
 0x455   : > { %v3100_v47 = vadd.f32 %v11372_v14, %v3064_v26  ;;  %v2854_v19 = vpop.permute.xlu0 %2853  ;;  %v3016_v39 = vpop.permute.xlu1 %3015  ;;  %v2950_v26 = vsel %vm11137_vm9, %v8905_v34, %v8765_v37  ;;  %v2820_v48 = vadd.f32 %v2781_v49, %v2736_v20  ;;  %v11382_v20 = vld [vmem:[#allocation4_spill] sm:$0xff]  ;;  %v2777_v49 = vsel %vm11175_vm6, %v8871_v22, %v11377_v28 }
 0x456   : > { %v2865_v27 = vsel %vm1471_vm8, %v2854_v19, %v8778_v25  ;;  %v11381_v25 = vld [vmem:[#allocation13_spill] sm:$0xff]  ;;  %v2989_v5 = vadd.f32 %v2950_v26, %v2905_v36  ;;  %v2943_v10 = vsel %vm11137_vm9, %v11382_v20, %v8797_v13  ;;  %v2814_v28 = vadd.f32 %v2777_v49, %v8948_v2  ;;  %v11386_v20 = vld [vmem:[#allocation12_spill] sm:$0xff] }
 0x457   : > { %vm3112_vm0 = vcmp.ge.f32.partialorder %v3100_v47, 0.0  ;;  %v3124_v63 = vmul.f32 0.01, %v3100_v47 }
 0x459   : > { %v3136_v12 = vsel %vm3112_vm0, %v3100_v47, %v3124_v63  ;;  %v2926_v44 = vpop.permute.xlu0 %2925  ;;  %v3018_v18 = vpop.permute.xlu1 %3017  ;;  %v2815_v47 = vadd.f32 %v2778_v1, %v2731_v41  ;;  %v2904_v63 = vadd.f32 %v2865_v27, %v2820_v48  ;;  %v11384_v27 = vld [vmem:[#allocation27_spill] sm:$0xff]  ;;  %v2895_v48 = vadd.f32 %v2859_v4, %v2811_v30 }
 0x45a   : > { %v8969_v21 = vmul.f32 %v3136_v12, %v11375_v11  ;;  %v3031_v50 = vsel %vm1643_vm10, %v3016_v39, %v3018_v18  ;;  %v3032_v60 = vsel %vm1643_vm10, %v3018_v18, %v8795_v7  ;;  %v11379_v39 = vld [vmem:[#allocation41_spill] sm:$0xff]  ;;  %v2861_v12 = vsel %vm1471_vm8, %v8925_v51, %v11380_v38 }
 0x45b   : > { %v3069_v54 = vadd.f32 %v3031_v50, %v2985_v40  ;;  %v3070_v45 = vadd.f32 %v3032_v60, %v2986_v43  ;;  %v2862_v53 = vsel %vm1471_vm8, %v11380_v38, %v11379_v39  ;;  %v11383_v40 = vld [vmem:[#allocation10_spill] sm:$0xff]  ;;  %v2979_v38 = vadd.f32 %v2943_v10, %v2895_v48 }
 0x45c   : > { %3160 = vst [vmem:[#allocation2 + $0x98] sm:$0xff] %v8969_v21  ;;  %v2946_v43 = vsel %vm11137_vm9, %v8810_v24, %v11383_v40  ;;  %v2899_v22 = vadd.f32 %v2862_v53, %v2815_v47 }
 0x45d   : > { %v3105_v19 = vadd.f32 %v11381_v25, %v3069_v54  ;;  %v3106_v46 = vadd.f32 %v11381_v25, %v3070_v45  ;;  %v2938_v15 = vpop.permute.xlu0 %2937  ;;  %v3024_v16 = vpop.permute.xlu1 %3023  ;;  %v11385_v45 = vld [vmem:[#allocation9_spill] sm:$0xff] }
 0x45e   : > { %v2949_v31 = vsel %vm11137_vm9, %v2938_v15, %v8905_v34  ;;  %v3034_v57 = vsel %vm1643_vm10, %v3024_v16, %v8839_v52 }
 0x45f   : > { %vm3117_vm13 = vcmp.ge.f32.partialorder %v3105_v19, 0.0  ;;  %vm3118_vm0 = vcmp.ge.f32.partialorder %v3106_v46, 0.0  ;;  %v3129_v41 = vmul.f32 0.01, %v3105_v19  ;;  %v3130_v32 = vmul.f32 0.01, %v3106_v46 }
 0x460   : > { %v3073_v34 = vadd.f32 %v3034_v57, %v2989_v5  ;;  %v2988_v50 = vadd.f32 %v2949_v31, %v2904_v63 }
 0x461   : > { %v3141_v18 = vsel %vm3117_vm13, %v3105_v19, %v3129_v41  ;;  %v3142_v35 = vsel %vm3118_vm0, %v3106_v46, %v3130_v32  ;;  %v3022_v60 = vpop.permute.xlu0 %3021  ;;  %v3012_v26 = vpop.permute.xlu1 %3011  ;;  %v2983_v19 = vadd.f32 %v2946_v43, %v2899_v22  ;;  %v2898_v46 = vadd.f32 %v2861_v12, %v2814_v28 }
 0x462   : > { %v3153_v13 = vmul.f32 %v3141_v18, %v11384_v27  ;;  %v3154_v54 = vmul.f32 %v3142_v35, %v11375_v11  ;;  %v3109_v1 = vadd.f32 %v11385_v45, %v3073_v34  ;;  %v3033_v8 = vsel %vm1643_vm10, %v3022_v60, %v3024_v16 }
 0x463   : > { %v3072_v36 = vadd.f32 %v3033_v8, %v2988_v50  ;;  %v2945_v16 = vsel %vm11137_vm9, %v2926_v44, %v8810_v24 }
 0x464   : > { %3165 = vst [vmem:[#allocation2 + $0xc0] sm:$0xff] %v3153_v13  ;;  %3166 = vst [vmem:[#allocation2 + $0xc8] sm:$0xff] %v3154_v54  ;;  %vm3121_vm13 = vcmp.ge.f32.partialorder %v3109_v1, 0.0  ;;  %v3133_v51 = vmul.f32 0.01, %v3109_v1  ;;  %v2982_v41 = vadd.f32 %v2945_v16, %v2898_v46  ;;  %v3187_v46 = vld [vmem:[#allocation2 + $0x80] sm:$0xff] }
 0x465   : > { %v3108_v15 = vadd.f32 %v11385_v45, %v3072_v36  ;;  %v9013_v5 = vpop.permute.xlu0 %3013  ;;  %v3004_v63 = vpop.permute.xlu1 %3003 }
 0x466   : > { %v3145_v30 = vsel %vm3121_vm13, %v3109_v1, %v3133_v51  ;;  %v3030_v2 = vsel %vm1643_vm10, %v3012_v26, %v9013_v5  ;;  %v3027_v4 = vsel %vm1643_vm10, %v3004_v63, %v8927_v59  ;;  %v3184_v63 = vld [vmem:[#allocation2 + $0x68] sm:$0xff] }
 0x467   : > { %v3157_v47 = vmul.f32 %v3145_v30, %v11375_v11  ;;  %vm3120_vm0 = vcmp.ge.f32.partialorder %v3108_v15, 0.0  ;;  %v3132_v53 = vmul.f32 0.01, %v3108_v15  ;;  %v3067_v31 = vadd.f32 %v3030_v2, %v2983_v19 }
 0x468   : > { %v3063_v57 = vadd.f32 %v3027_v4, %v2979_v38  ;;  %v3208_v2 = vpack.c.bf16 %v3187_v46, %v3184_v63  ;;  %v3186_v4 = vld [vmem:[#allocation2 + $0x78] sm:$0xff] }
 0x469   : > { %3169 = vst [vmem:[#allocation2 + $0xe0] sm:$0xff] %v3157_v47  ;;  %v3144_v32 = vsel %vm3120_vm0, %v3108_v15, %v3132_v53  ;;  %v3103_v10 = vadd.f32 %v11386_v20, %v3067_v31  ;;  %v3010_v43 = vpop.permute.xlu0 %3009  ;;  %v9023_v24 = vpop.permute.xlu1 %2443  ;;  %v3214_v44 = vpack.c.bf16 %v3157_v47, %v3154_v54  ;;  %v3181_v47 = vld [vmem:[#allocation2 + $0x50] sm:$0xff]  ;;  %v3183_v53 = vld [vmem:[#allocation2 + $0x60] sm:$0xff]  ;;  %v3178_v31 = vld [vmem:[#allocation2 + $0x38] sm:$0xff] }
 0x46a   : > { %v3156_v49 = vmul.f32 %v3144_v32, %v11384_v27  ;;  %v3099_v34 = vadd.f32 %v11372_v14, %v3063_v57  ;;  %v3029_v59 = vsel %vm1643_vm10, %v3010_v43, %v3012_v26  ;;  %v3172_v57 = vld [vmem:[#allocation2 + $0x8] sm:$0xff]  ;;  %v3205_v43 = vpack.c.bf16 %v3181_v47, %v3178_v31 }
 0x46b   : > { %vm3115_vm13 = vcmp.ge.f32.partialorder %v3103_v10, 0.0  ;;  %v3127_v12 = vmul.f32 0.01, %v3103_v10  ;;  %v3066_v18 = vadd.f32 %v3029_v59, %v2982_v41  ;;  %3403 = vmatprep.subr.bf16.mxu0 %v3214_v44  ;;  %v3175_v41 = vld [vmem:[#allocation2 + $0x20] sm:$0xff]  ;;  %v3177_v44 = vld [vmem:[#allocation2 + $0x30] sm:$0xff] }
 0x46c   : > { %3168 = vst [vmem:[#allocation2 + $0xd8] sm:$0xff] %v3156_v49  ;;  %vm3111_vm9 = vcmp.ge.f32.partialorder %v3099_v34, 0.0  ;;  %v3123_v35 = vmul.f32 0.01, %v3099_v34  ;;  %v3213_v50 = vpack.c.bf16 %v3156_v49, %v3153_v13  ;;  %v3180_v49 = vld [vmem:[#allocation2 + $0x48] sm:$0xff]  ;;  %v3171_v59 = vld [vmem:[#allocation2] sm:$0xff] }
 0x46d   : > { %v3139_v60 = vsel %vm3115_vm13, %v3103_v10, %v3127_v12  ;;  %v3102_v1 = vadd.f32 %v11386_v20, %v3066_v18  ;;  %v9029_v8 = vpop.permute.xlu0 %2449  ;;  %v2516_v54 = vpop.permute.xlu1 %2515  ;;  %v3174_v12 = vld [vmem:[#allocation2 + $0x18] sm:$0xff]  ;;  %v3204_v18 = vpack.c.bf16 %v3180_v49, %v3177_v44 }
 0x46e   : > { %v3151_v48 = vmul.f32 %v3139_v60, %v11375_v11  ;;  %v3135_v22 = vsel %vm3111_vm9, %v3099_v34, %v3123_v35  ;;  %3404 = vmatpush1.bf16.msra.mxu0 %v3213_v50  ;;  %v3202_v34 = vpack.c.bf16 %v3175_v41, %v3172_v57  ;;  %v3201_v60 = vpack.c.bf16 %v3174_v12, %v3171_v59 }
 0x46f   : > { %v3147_v26 = vmul.f32 %v3135_v22, %v11384_v27  ;;  %vm3114_vm0 = vcmp.ge.f32.partialorder %v3102_v1, 0.0  ;;  %v3126_v28 = vmul.f32 0.01, %v3102_v1  ;;  %v2528_v46 = vsel %vm1130_vm3, %v8598_v42, %v2516_v54 }
 0x470   : > { %3163 = vst [vmem:[#allocation2 + $0xb0] sm:$0xff] %v3151_v48  ;;  %v3211_v36 = vpack.c.bf16 %v3151_v48, %v8969_v21  ;;  %v3207_v21 = vpack.c.bf16 %v3186_v4, %v3183_v53  ;;  %v11389_v4 = vld [vmem:[#allocation25_spill] sm:$0xff] }
 0x471   : > { %3159 = vst [vmem:[#allocation2 + $0x90] sm:$0xff] %v3147_v26  ;;  %v3138_v51 = vsel %vm3114_vm0, %v3102_v1, %v3126_v28  ;;  %v2522_v13 = vpop.permute.xlu0 %2521  ;;  %v2600_v38 = vpop.permute.xlu1 %2599  ;;  %v11387_v28 = vmov 0  }
 0x472   : > { %v3150_v19 = vmul.f32 %v3138_v51, %v11384_v27  ;;  %3405 = vmatprep.subr.bf16.mxu0 %v3211_v36  ;;  %v2612_v47 = vsel %vm1215_vm4, %v11389_v4, %v2600_v38 }
 0x474   : > { %3162 = vst [vmem:[#allocation2 + $0xa8] sm:$0xff] %v3150_v19  ;;  %v3210_v15 = vpack.c.bf16 %v3150_v19, %v3147_v26  ;;  %v9041_v19 = vld [vmem:[%s11358_s4 + $0x8] sm:$0xff]  }
 0x475   : > { %v2606_v16 = vpop.permute.xlu0 %2605  ;;  %v2432_v30 = vpop.permute.xlu1 %2431 }
 0x476   : > { %3406 = vmatpush1.bf16.msra.mxu0 %v3210_v15 }
 0x477   : > { %3407 = vmatprep.subr.bf16.mxu0 %v3208_v2  ;;  %v11388_v2 = vld [vmem:[#allocation47_spill] sm:$0xff] }
 0x479   : > { %v2438_v32 = vpop.permute.xlu0 %2437  ;;  %v2504_v10 = vpop.permute.xlu1 %2503 }
 0x47a   : > { %3408 = vmatpush1.bf16.msra.mxu0 %v3207_v21  ;;  %v11390_v21 = vld [vmem:[#allocation34_spill] sm:$0xff] }
 0x47b   : > { %3409 = vmatprep.subr.bf16.mxu0 %v3205_v43  ;;  %v2530_v31 = vsel %vm1130_vm3, %v11390_v21, %v2522_v13  ;;  %v11391_v43 = vld [vmem:[#allocation42_spill] sm:$0xff]  ;;  %v11392_v13 = vld [vmem:[#allocation48_spill] sm:$0xff]  ;;  %v11398_v21 = vld [vmem:[#allocation17_spill] sm:$0xff] }
 0x47c   : > { %v2458_v44 = vsel %vm1057_vm2, %v11391_v43, %v9029_v8 }
 0x47d   : > { %v2510_v35 = vpop.permute.xlu0 %2509  ;;  %v2684_v50 = vpop.permute.xlu1 %2683  ;;  %v2558_v38 = vadd.f32 %v2530_v31, %v2458_v44 }
 0x47e   : > { %3410 = vmatpush1.bf16.msra.mxu0 %v3204_v18  ;;  %v2696_v42 = vsel %vm1300_vm5, %v8757_v17, %v2684_v50  ;;  %v2524_v17 = vsel %vm1130_vm3, %v11392_v13, %v2504_v10 }
 0x47f   : > { %3411 = vmatprep.subr.bf16.mxu0 %v3202_v34  ;;  %v9065_v34 = vld [vmem:[%s11358_s4 + $0x10] sm:$0xff]  }
 0x481   : > { %v2690_v1 = vpop.permute.xlu0 %2689  ;;  %v2588_v48 = vpop.permute.xlu1 %2587 }
 0x482   : > { %3412 = vmatpush1.bf16.msra.mxu0 %v3201_v60  ;;  %v2698_v59 = vsel %vm1300_vm5, %v8788_v58, %v2690_v1 }
 0x485   : > { %v2594_v22 = vpop.permute.xlu0 %2593  ;;  %v2672_v26 = vpop.permute.xlu1 %2671  ;;  %6628 = vmatmul.mubr.msk.bf16.vlgmr.msra.gmra.mxu0 %vm3342_vm7, %v8885_v6  ;;  %v2456_v6 = vsel %vm1057_vm2, %v11388_v2, %v9023_v24  ;;  %v2614_v24 = vsel %vm1215_vm4, %v8685_v9, %v2606_v16  ;;  %v11393_v9 = vld [vmem:[#allocation14_spill] sm:$0xff]  ;;  %v11395_v2 = vld [vmem:[#allocation45_spill] sm:$0xff] }
 0x486   : > { %3439 = vmatprep.mubr.bf16.mxu0 %v11387_v28  ;;  %v2555_v53 = vadd.f32 %v2528_v46, %v2456_v6  ;;  %v2642_v12 = vadd.f32 %v2614_v24, %v2558_v38  ;;  %v2452_v8 = vsel %vm1057_vm2, %v11393_v9, %v2432_v30  ;;  %v11394_v16 = vld [vmem:[#allocation30_spill] sm:$0xff]  ;;  %v2526_v58 = vsel %vm1130_vm3, %v11395_v2, %v2510_v35  ;;  %v11396_v6 = vld [vmem:[#allocation32_spill] sm:$0xff] }
 0x487   : > { %v2608_v60 = vsel %vm1215_vm4, %v11394_v16, %v2588_v48  ;;  %v2549_v10 = vadd.f32 %v2524_v17, %v2452_v8  ;;  %v2454_v48 = vsel %vm1057_vm2, %v11398_v21, %v2438_v32  ;;  %v11403_v16 = vld [vmem:[#allocation19_spill] sm:$0xff] }
 0x488   : > { %v2639_v54 = vadd.f32 %v2612_v47, %v2555_v53  ;;  %v2726_v1 = vadd.f32 %v2698_v59, %v2642_v12  ;;  %v11397_v47 = vld [vmem:[#allocation36_spill] sm:$0xff]  ;;  %v2552_v35 = vadd.f32 %v2526_v58, %v2454_v48 }
 0x489   : > { %v2678_v36 = vpop.permute.xlu0 %2677  ;;  %v2800_v51 = vpop.permute.xlu1 %2799  ;;  %v2692_v53 = vsel %vm1300_vm5, %v11397_v47, %v2672_v26  ;;  %v2633_v31 = vadd.f32 %v2608_v60, %v2549_v10 }
 0x48a   : > { %v2723_v49 = vadd.f32 %v2696_v42, %v2639_v54  ;;  %v2809_v46 = vsel %vm1418_vm14, %v11367_v56, %v2800_v51  ;;  %v11399_v56 = vld [vmem:[#allocation23_spill] sm:$0xff] }
 0x48b   : > { %v2610_v51 = vsel %vm1215_vm4, %v11399_v56, %v2594_v22  ;;  %v2717_v24 = vadd.f32 %v2692_v53, %v2633_v31  ;;  %v9101_v22 = vld [vmem:[%s11358_s4 + $0x18] sm:$0xff]  }
 0x48c   : > { %v2735_v4 = vadd.f32 %v11396_v6, %v2723_v49  ;;  %v2636_v49 = vadd.f32 %v2610_v51, %v2552_v35 }
 0x48d   : > { %v2802_v15 = vpop.permute.xlu0 %2801  ;;  %v2884_v63 = vpop.permute.xlu1 %2883  ;;  %6629 = vmatmul.mubr.msk.bf16.gmra.mxu0 %vm3342_vm7, %v9041_v19 }
 0x48e   : > { %3449 = vmatprep.mubr.bf16.mxu0 %v11387_v28  ;;  %v2893_v30 = vsel %vm1504_vm15, %v8693_v62, %v2884_v63  ;;  %v2819_v42 = vadd.f32 %v2809_v46, %v2735_v4  ;;  %v2810_v44 = vsel %vm1418_vm14, %v8669_v61, %v2802_v15  ;;  %v2694_v62 = vsel %vm1300_vm5, %v8733_v33, %v2678_v36  ;;  %v11400_v63 = vld [vmem:[#allocation8_spill] sm:$0xff] }
 0x48f   : > { %v2738_v32 = vadd.f32 %v11400_v63, %v2726_v1  ;;  %v2720_v33 = vadd.f32 %v2694_v62, %v2636_v49  ;;  %v11401_v36 = vld [vmem:[#allocation28_spill] sm:$0xff]  ;;  %v11404_v1 = vld [vmem:[#allocation11_spill] sm:$0xff] }
 0x490   : > { %v2903_v38 = vadd.f32 %v2893_v30, %v2819_v42 }
 0x491   : > { %v2886_v57 = vpop.permute.xlu0 %2885  ;;  %v2796_v41 = vpop.permute.xlu1 %2795  ;;  %v2822_v61 = vadd.f32 %v2810_v44, %v2738_v32  ;;  %v7074_v32 = vld [vmem:[%s11358_s4 + $0x28] sm:$0xff]  }
 0x492   : > { %v2894_v13 = vsel %vm1504_vm15, %v8717_v0, %v2886_v57  ;;  %v2807_v59 = vsel %vm1418_vm14, %v11401_v36, %v2796_v41  ;;  %v11402_v57 = vld [vmem:[#allocation5_spill] sm:$0xff]  ;;  %v3188_v36 = vld [vmem:[#allocation2 + $0x88] sm:$0xff] }
 0x493   : > { %v2906_v0 = vadd.f32 %v2894_v13, %v2822_v61  ;;  %v2729_v9 = vadd.f32 %v2717_v24, %v11402_v57 }
 0x495   : > { %v2798_v18 = vpop.permute.xlu0 %2797  ;;  %v2968_v50 = vpop.permute.xlu1 %2967  ;;  %6630 = vmatmul.mubr.msk.bf16.gmra.mxu0 %vm3342_vm7, %v9065_v34  ;;  %v2813_v46 = vadd.f32 %v2807_v59, %v2729_v9  ;;  %v3179_v9 = vld [vmem:[#allocation2 + $0x40] sm:$0xff] }
 0x496   : > { %3459 = vmatprep.mubr.bf16.mxu0 %v11387_v28  ;;  %v2977_v26 = vsel %vm1590_vm11, %v8741_v55, %v2968_v50 }
 0x497   : > { %v2987_v15 = vadd.f32 %v2977_v26, %v2903_v38 }
 0x499   : > { %v2970_v54 = vpop.permute.xlu0 %2969  ;;  %v2880_v43 = vpop.permute.xlu1 %2879 }
 0x49a   : > { %v2978_v12 = vsel %vm1590_vm11, %v8765_v37, %v2970_v54  ;;  %v2891_v60 = vsel %vm1504_vm15, %v11403_v16, %v2880_v43  ;;  %v2732_v37 = vadd.f32 %v2720_v33, %v11404_v1  ;;  %v3185_v33 = vld [vmem:[#allocation2 + $0x70] sm:$0xff] }
 0x49b   : > { %v2990_v10 = vadd.f32 %v2978_v12, %v2906_v0  ;;  %v2897_v47 = vadd.f32 %v2891_v60, %v2813_v46  ;;  %v3209_v57 = vpack.c.bf16 %v3188_v36, %v3185_v33  ;;  %v3173_v16 = vld [vmem:[#allocation2 + $0x10] sm:$0xff]  ;;  %v3176_v60 = vld [vmem:[#allocation2 + $0x28] sm:$0xff] }
 0x49c   : > { %v7083_v1 = vld [vmem:[%s11358_s4 + $0x70] sm:$0xff]  }
 0x49d   : > { %v2882_v17 = vpop.permute.xlu0 %2881  ;;  %v3052_v55 = vpop.permute.xlu1 %3051  ;;  %6631 = vmatmul.mubr.msk.bf16.gmra.mxu0 %vm3342_vm7, %v9101_v22 }
 0x49e   : > { %v3061_v50 = vsel %vm1676_vm12, %v8795_v7, %v3052_v55  ;;  %3469 = vmatprep.mubr.bf16.mxu0 %v11387_v28  ;;  %v2808_v7 = vsel %vm1418_vm14, %v11376_v29, %v2798_v18  ;;  %v2892_v21 = vsel %vm1504_vm15, %v11379_v39, %v2882_v17  ;;  %v7075_v55 = vld [vmem:[%s11358_s4 + $0x30] sm:$0xff]  }
 0x49f   : > { %v3071_v8 = vadd.f32 %v3061_v50, %v2987_v15  ;;  %v2816_v48 = vadd.f32 %v2808_v7, %v2732_v37  ;;  %v7076_v50 = vld [vmem:[%s11358_s4 + $0x38] sm:$0xff]   ;;  %v7085_v7 = vld [vmem:[%s11358_s4 + $0x80] sm:$0xff]  }
 0x4a0   : > { %v7084_v37 = vld [vmem:[%s11358_s4 + $0x78] sm:$0xff]  }
 0x4a1   : > { %v3107_v2 = vadd.f32 %v11381_v25, %v3071_v8  ;;  %v3054_v41 = vpop.permute.xlu0 %3053  ;;  %v2964_v58 = vpop.permute.xlu1 %2963  ;;  %v9128_v25 = vld [vmem:[%s11358_s4 + $0x20] sm:$0xff]   ;;  %v2900_v39 = vadd.f32 %v2892_v21, %v2816_v48  ;;  %v3182_v8 = vld [vmem:[#allocation2 + $0x58] sm:$0xff] }
 0x4a2   : > { %v3062_v6 = vsel %vm1676_vm12, %v8839_v52, %v3054_v41  ;;  %v2975_v4 = vsel %vm1590_vm11, %v8749_v3, %v2964_v58  ;;  %v11405_v3 = vld [vmem:[#allocation37_spill] sm:$0xff]  ;;  %v3206_v46 = vpack.c.bf16 %v3182_v8, %v3179_v9  ;;  %v7078_v41 = vld [vmem:[%s11358_s4 + $0x48] sm:$0xff]   ;;  %v7079_v58 = vld [vmem:[%s11358_s4 + $0x50] sm:$0xff]  }
 0x4a3   : > { %vm3119_vm9 = vcmp.ge.f32.partialorder %v3107_v2, 0.0  ;;  %v3131_v53 = vmul.f32 0.01, %v3107_v2  ;;  %v3074_v30 = vadd.f32 %v3062_v6, %v2990_v10  ;;  %v2981_v52 = vadd.f32 %v2975_v4, %v2897_v47  ;;  %v7077_v10 = vld [vmem:[%s11358_s4 + $0x40] sm:$0xff]   ;;  %v7086_v6 = vld [vmem:[%s11358_s4 + $0x88] sm:$0xff]  }
 0x4a5   : > { %v3143_v29 = vsel %vm3119_vm9, %v3107_v2, %v3131_v53  ;;  %v3110_v18 = vadd.f32 %v11385_v45, %v3074_v30  ;;  %v2966_v31 = vpop.permute.xlu0 %2965  ;;  %v3048_v56 = vpop.permute.xlu1 %3047  ;;  %6632 = vmatmul.mubr.msk.bf16.gmra.mxu0 %vm3342_vm7, %v9128_v25  ;;  %v3203_v2 = vpack.c.bf16 %v3176_v60, %v3173_v16 }
 0x4a6   : > { %v3155_v51 = vmul.f32 %v3143_v29, %v11405_v3  ;;  %v2976_v42 = vsel %vm1590_vm11, %v11383_v40, %v2966_v31  ;;  %v3059_v54 = vsel %vm1676_vm12, %v8808_v23, %v3048_v56  ;;  %3479 = vmatprep.mubr.bf16.mxu0 %v11387_v28 }
 0x4a7   : > { %vm3122_vm13 = vcmp.ge.f32.partialorder %v3110_v18, 0.0  ;;  %v3134_v43 = vmul.f32 0.01, %v3110_v18  ;;  %v3065_v45 = vadd.f32 %v3059_v54, %v2981_v52  ;;  %v2984_v44 = vadd.f32 %v2976_v42, %v2900_v39 }
 0x4a8   : > { %3167 = vst.msk [vmem:[#allocation2 + $0xd0] sm:$0xff] %vm424_vm1, %v3155_v51 }
 0x4a9   : > { %v3146_v35 = vsel %vm3122_vm13, %v3110_v18, %v3134_v43  ;;  %v3101_v26 = vadd.f32 %v11372_v14, %v3065_v45  ;;  %v3050_v24 = vpop.permute.xlu0 %3049  ;;  %vm4744_vm13 = vcmask 916480  }
 0x4aa   : > { %v3158_v62 = vmul.f32 %v3146_v35, %v11405_v3  ;;  %v3060_v40 = vsel %vm1676_vm12, %v9013_v5, %v3050_v24 }
 0x4ab   : > { %vm3113_vm0 = vcmp.ge.f32.partialorder %v3101_v26, 0.0  ;;  %v3125_v23 = vmul.f32 0.01, %v3101_v26  ;;  %v3068_v63 = vadd.f32 %v3060_v40, %v2984_v44 }
 0x4ac   : > { %3170 = vst.msk [vmem:[#allocation2 + $0xe8] sm:$0xff] %vm424_vm1, %v3158_v62 }
 0x4ad   : > { %v3137_v38 = vsel %vm3113_vm0, %v3101_v26, %v3125_v23  ;;  %v3104_v49 = vadd.f32 %v11386_v20, %v3068_v63  ;;  %6633 = vmatmul.mubr.msk.bf16.gmra.mxu0 %vm3342_vm7, %v7074_v32 }
 0x4ae   : > { %v3149_v14 = vmul.f32 %v3137_v38, %v11405_v3  ;;  %3489 = vmatprep.mubr.bf16.mxu0 %v11387_v28 }
 0x4af   : > { %vm3116_vm9 = vcmp.ge.f32.partialorder %v3104_v49, 0.0  ;;  %v3128_v5 = vmul.f32 0.01, %v3104_v49  ;;  %v3197_v15 = vld [vmem:[#allocation2 + $0xd0] sm:$0xff] }
 0x4b0   : > { %3161 = vst.msk [vmem:[#allocation2 + $0xa0] sm:$0xff] %vm424_vm1, %v3149_v14 }
 0x4b1   : > { %v3140_v13 = vsel %vm3116_vm9, %v3104_v49, %v3128_v5 }
 0x4b2   : > { %v3152_v61 = vmul.f32 %v3140_v13, %v11405_v3 }
 0x4b3   : > { %v3200_v17 = vld [vmem:[#allocation2 + $0xe8] sm:$0xff] }
 0x4b4   : > { %3164 = vst.msk [vmem:[#allocation2 + $0xb8] sm:$0xff] %vm424_vm1, %v3152_v61  ;;  %v3215_v20 = vpack.c.bf16 %v3200_v17, %v3197_v15 }
 0x4b5   : > { %6634 = vmatmul.mubr.msk.bf16.gmra.mxu0 %vm3342_vm7, %v7075_v55 }
 0x4b6   : > { %6908 = vmatprep.subr.bf16.mxu1 %v3215_v20  ;;  %3499 = vmatprep.mubr.bf16.mxu0 %v11387_v28 }
 0x4b7   : > { %6909 = vmatpush3.bf16.msra.mxu1 %v3215_v20  ;;  %v3191_v59 = vld [vmem:[#allocation2 + $0xa0] sm:$0xff] }
 0x4bb   : > { %v3194_v12 = vld [vmem:[#allocation2 + $0xb8] sm:$0xff] }
 0x4bc   : > { %v3212_v0 = vpack.c.bf16 %v3194_v12, %v3191_v59 }
 0x4bd   : > { %6635 = vmatmul.mubr.msk.bf16.gmra.mxu0 %vm3342_vm7, %v7076_v50 }
 0x4be   : > { %6910 = vmatprep.subr.bf16.mxu1 %v3212_v0  ;;  %3509 = vmatprep.mubr.bf16.mxu0 %v11387_v28 }
 0x4bf   : > { %6911 = vmatpush3.bf16.msra.mxu1 %v3212_v0 }
 0x4c0   : > { %6912 = vmatprep.subr.bf16.mxu1 %v3209_v57 }
 0x4c3   : > { %6913 = vmatpush3.bf16.msra.mxu1 %v3209_v57 }
 0x4c4   : > { %6914 = vmatprep.subr.bf16.mxu1 %v3206_v46 }
 0x4c5   : > { %6636 = vmatmul.mubr.msk.bf16.gmra.mxu0 %vm3342_vm7, %v7077_v10 }
 0x4c6   : > { %3519 = vmatprep.mubr.bf16.mxu0 %v11387_v28 }
 0x4c7   : > { %6915 = vmatpush3.bf16.msra.mxu1 %v3206_v46 }
 0x4c8   : > { %6916 = vmatprep.subr.bf16.mxu1 %v3203_v2 }
 0x4cb   : > { %6917 = vmatpush3.bf16.msra.mxu1 %v3203_v2 }
 0x4cd   : > { %6637 = vmatmul.mubr.msk.bf16.gmra.mxu0 %vm3342_vm7, %v7078_v41 }
 0x4ce   : > { %6919 = vmatmul.mubr.msk.bf16.vlgmr.msra.gmra.mxu1 %vm3342_vm7, %v9041_v19  ;;  %3529 = vmatprep.mubr.bf16.mxu0 %v11387_v28  ;;  %v7080_v19 = vld [vmem:[%s11358_s4 + $0x58] sm:$0xff]  }
 0x4cf   : > { %6922 = vmatprep.mubr.msk.bf16.mxu1 %vm3342_vm7, %v9065_v34  ;;  %v7081_v34 = vld [vmem:[%s11358_s4 + $0x60] sm:$0xff]  }
 0x4d5   : > { %6638 = vmatmul.mubr.msk.bf16.gmra.mxu0 %vm3342_vm7, %v7079_v58 }
 0x4d6   : > { %6923 = vmatmul.mubr.msk.bf16.gmra.mxu1 %vm3342_vm7, %v9101_v22  ;;  %3539 = vmatprep.mubr.bf16.mxu0 %v11387_v28  ;;  %v7082_v22 = vld [vmem:[%s11358_s4 + $0x68] sm:$0xff]  }
 0x4d7   : > { %6926 = vmatprep.mubr.msk.bf16.mxu1 %vm3342_vm7, %v9128_v25 }
 0x4dd   : > { %6639 = vmatmul.mubr.msk.bf16.gmra.mxu0 %vm3342_vm7, %v7080_v19 }
 0x4de   : > { %6927 = vmatmul.mubr.msk.bf16.gmra.mxu1 %vm3342_vm7, %v7074_v32  ;;  %3549 = vmatprep.mubr.bf16.mxu0 %v11387_v28 }
 0x4df   : > { %6930 = vmatprep.mubr.msk.bf16.mxu1 %vm3342_vm7, %v7075_v55 }
 0x4e5   : > { %6640 = vmatmul.mubr.msk.bf16.gmra.mxu0 %vm3342_vm7, %v7081_v34 }
 0x4e6   : > { %6931 = vmatmul.mubr.msk.bf16.gmra.mxu1 %vm3342_vm7, %v7076_v50  ;;  %3559 = vmatprep.mubr.bf16.mxu0 %v11387_v28 }
 0x4e7   : > { %6934 = vmatprep.mubr.msk.bf16.mxu1 %vm3342_vm7, %v7077_v10 }
 0x4ed   : > { %6641 = vmatmul.mubr.msk.bf16.gmra.mxu0 %vm3342_vm7, %v7082_v22 }
 0x4ee   : > { %6935 = vmatmul.mubr.msk.bf16.gmra.mxu1 %vm3342_vm7, %v7078_v41  ;;  %3569 = vmatprep.mubr.bf16.mxu0 %v11387_v28 }
 0x4ef   : > { %6938 = vmatprep.mubr.msk.bf16.mxu1 %vm3342_vm7, %v7079_v58 }
 0x4f5   : > { %6642 = vmatmul.mubr.msk.bf16.gmra.mxu0 %vm3342_vm7, %v7083_v1 }
 0x4f6   : > { %6939 = vmatmul.mubr.msk.bf16.gmra.mxu1 %vm3342_vm7, %v7080_v19  ;;  %3579 = vmatprep.mubr.bf16.mxu0 %v11387_v28 }
 0x4f7   : > { %6942 = vmatprep.mubr.msk.bf16.mxu1 %vm3342_vm7, %v7081_v34 }
 0x4fd   : > { %6643 = vmatmul.mubr.msk.bf16.gmra.mxu0 %vm3342_vm7, %v7084_v37 }
 0x4fe   : > { %6943 = vmatmul.mubr.msk.bf16.gmra.mxu1 %vm3342_vm7, %v7082_v22  ;;  %3589 = vmatprep.mubr.bf16.mxu0 %v11387_v28 }
 0x4ff   : > { %6946 = vmatprep.mubr.msk.bf16.mxu1 %vm3342_vm7, %v7083_v1 }
 0x505   : > { %6644 = vmatmul.mubr.msk.bf16.gmra.mxu0 %vm3342_vm7, %v7085_v7 }
 0x506   : > { %6947 = vmatmul.mubr.msk.bf16.gmra.mxu1 %vm3342_vm7, %v7084_v37  ;;  %3599 = vmatprep.mubr.bf16.mxu0 %v11387_v28 }
 0x507   : > { %6950 = vmatprep.mubr.msk.bf16.mxu1 %vm3342_vm7, %v7085_v7 }
 0x50d   : > { %6645 = vmatmul.mubr.msk.bf16.gmra.mxu0 %vm3342_vm7, %v7086_v6 }
 0x50e   : > { %6951 = vmatmul.mubr.msk.bf16.gmra.mxu1 %vm3342_vm7, %v7086_v6  ;;  %vm11470_vm7 = vcmask 900096  }
 0x50f   : > { %4831 = vmatprep.mubr.bf16.mxu1 %v11387_v28  ;;  %vm11475_vm0 = vmmov %vm11470_vm7 }
 0x545   : > { %v3431_v4 = vpop.f32.mrf.mxu0 }
 0x547   : > { %v3433_v47 = vpop.f32.mrf.mxu0 }
 0x549   : > { %v3435_v53 = vpop.f32.mrf.mxu0 }
 0x54b   : > { %v3437_v30 = vpop.f32.mrf.mxu0 }
 0x54d   : > { %v3441_v25 = vpop.f32.mrf.mxu0 }
 0x54f   : > { %v3443_v21 = vpop.f32.mrf.mxu0 }
 0x551   : > { %v3445_v48 = vpop.f32.mrf.mxu0 }
 0x553   : > { %v3447_v29 = vpop.f32.mrf.mxu0 }
 0x555   : > { %v3451_v18 = vpop.f32.mrf.mxu0 }
 0x557   : > { %v3453_v52 = vpop.f32.mrf.mxu0 }
 0x559   : > { %v3455_v31 = vpop.f32.mrf.mxu0 }
 0x55b   : > { %v3457_v56 = vpop.f32.mrf.mxu0 }
 0x55d   : > { %v3461_v51 = vpop.f32.mrf.mxu0 }
 0x55f   : > { %v3463_v42 = vpop.f32.mrf.mxu0 }
 0x561   : > { %v9238_v54 = vpop.f32.mrf.mxu0 }
 0x563   : > { %v9240_v39 = vpop.f32.mrf.mxu0 }
 0x565   : > { %v9242_v43 = vpop.f32.mrf.mxu0 }
 0x567   : > { %v9244_v45 = vpop.f32.mrf.mxu0 }
 0x569   : > { %v9246_v35 = vpop.f32.mrf.mxu0 }
 0x56b   : > { %v9248_v44 = vpop.f32.mrf.mxu0 }
 0x56d   : > { %v9250_v26 = vpop.f32.mrf.mxu0 }
 0x56f   : > { %v9252_v24 = vpop.f32.mrf.mxu0 }
 0x571   : > { %v9260_v23 = vpop.f32.mrf.mxu0 }
 0x573   : > { %v9267_v32 = vpop.f32.mrf.mxu0 }
 0x575   : > { %v9272_v38 = vpop.f32.mrf.mxu0 }
 0x577   : > { %v9281_v5 = vpop.f32.mrf.mxu0 }
 0x579   : > { %v9288_v61 = vpop.f32.mrf.mxu0 }
 0x57b   : > { %v9294_v17 = vpop.f32.mrf.mxu0 }
 0x57d   : > { %v3501_v20 = vpop.f32.mrf.mxu0 }
 0x57f   : > { %v9307_v36 = vpop.f32.mrf.mxu0 }
 0x581   : > { %v3505_v12 = vpop.f32.mrf.mxu0 }
 0x583   : > { %v9319_v0 = vpop.f32.mrf.mxu0 }
 0x585   : > { %v9324_v57 = vpop.f32.mrf.mxu0 }
 0x586   : > { %11408 = vst [vmem:[#allocation16_spill] sm:$0xff] %v9324_v57 }
 0x587   : > { %v9333_v16 = vpop.f32.mrf.mxu0 }
 0x588   : > { %11409 = vst [vmem:[#allocation43_spill] sm:$0xff] %v9333_v16 }
 0x589   : > { %v9340_v46 = vpop.f32.mrf.mxu0 }
 0x58a   : > { %11411 = vst [vmem:[#allocation24_spill] sm:$0xff] %v9340_v46 }
 0x58b   : > { %v9346_v2 = vpop.f32.mrf.mxu0 }
 0x58c   : > { %11412 = vst [vmem:[#allocation49_spill] sm:$0xff] %v9346_v2 }
 0x58d   : > { %v9354_v58 = vpop.f32.mrf.mxu0 }
 0x58e   : > { %v9254_v62 = vpop.f32.mrf.mxu1  ;;  %11413 = vst [vmem:[#allocation46_spill] sm:$0xff] %v9354_v58 }
 0x58f   : > { %3795 = vrot.lane.b32.xlu1 %v9254_v62, %s11152_s24  ;;  %v9362_v34 = vpop.f32.mrf.mxu0 }
 0x590   : > { %v9258_v40 = vpop.f32.mrf.mxu1  ;;  %11415 = vst [vmem:[#allocation51_spill] sm:$0xff] %v9362_v34 }
 0x591   : > { %v9370_v1 = vpop.f32.mrf.mxu0 }
 0x592   : > { %v9262_v63 = vpop.f32.mrf.mxu1  ;;  %11418 = vst [vmem:[#allocation50_spill] sm:$0xff] %v9370_v1 }
 0x593   : > { %3811 = vrot.lane.b32.xlu1 %v3431_v4, %s11154_s23  ;;  %3797 = vrot.lane.b32.xlu0 %v9262_v63, %s11152_s24  ;;  %v9378_v7 = vpop.f32.mrf.mxu0 }
 0x594   : > { %v9274_v49 = vpop.f32.mrf.mxu1  ;;  %11420 = vst [vmem:[#allocation15_spill] sm:$0xff] %v9378_v7 }
 0x595   : > { %v9386_v4 = vpop.f32.mrf.mxu0 }
 0x596   : > { %v9279_v14 = vpop.f32.mrf.mxu1 }
 0x597   : > { %3791 = vrot.lane.b32.xlu1 %v9258_v40, %s11152_s24  ;;  %3813 = vrot.lane.b32.xlu0 %v3433_v47, %s11154_s23 }
 0x598   : > { %v9286_v13 = vpop.f32.mrf.mxu1 }
 0x59a   : > { %v9292_v15 = vpop.f32.mrf.mxu1 }
 0x59b   : > { %3817 = vrot.lane.b32.xlu1 %v3435_v53, %s11154_s23  ;;  %3793 = vrot.lane.b32.xlu0 %v9274_v49, %s11152_s24  ;;  %v3533_v53 = vpop.f32.mrf.mxu0  ;;  %s11524_s24 = smov 78  }
 0x59c   : > { %v9300_v55 = vpop.f32.mrf.mxu1 }
 0x59e   : > { %v9302_v33 = vpop.f32.mrf.mxu1 }
 0x59f   : > { %3819 = vrot.lane.b32.xlu0 %v3437_v30, %s11154_s23  ;;  %3867 = vrot.lane.b32.xlu1 %v9279_v14, %s11150_s25 }
 0x5a0   : > { %v9309_v59 = vpop.f32.mrf.mxu1 }
 0x5a2   : > { %v9314_v50 = vpop.f32.mrf.mxu1 }
 0x5a3   : > { %3825 = vrot.lane.b32.xlu0 %v3443_v21, %s11154_s23  ;;  %3823 = vrot.lane.b32.xlu1 %v3441_v25, %s11154_s23  ;;  %v9394_v25 = vpop.f32.mrf.mxu0 }
 0x5a4   : > { %v9326_v9 = vpop.f32.mrf.mxu1 }
 0x5a5   : > { %v3537_v21 = vpop.f32.mrf.mxu0 }
 0x5a6   : > { %v9331_v8 = vpop.f32.mrf.mxu1 }
 0x5a7   : > { %3863 = vrot.lane.b32.xlu1 %v9286_v13, %s11150_s25  ;;  %3869 = vrot.lane.b32.xlu0 %v9292_v15, %s11150_s25 }
 0x5a8   : > { %v9338_v60 = vpop.f32.mrf.mxu1 }
 0x5aa   : > { %v9344_v10 = vpop.f32.mrf.mxu1 }
 0x5ab   : > { %3829 = vrot.lane.b32.xlu1 %v3445_v48, %s11154_s23  ;;  %3865 = vrot.lane.b32.xlu0 %v9300_v55, %s11150_s25 }
 0x5ac   : > { %v9352_v41 = vpop.f32.mrf.mxu1 }
 0x5ae   : > { %v9356_v19 = vpop.f32.mrf.mxu1 }
 0x5af   : > { %3831 = vrot.lane.b32.xlu0 %v3447_v29, %s11154_s23  ;;  %3951 = vrot.lane.b32.xlu1 %v9302_v33, %s11406_s26  ;;  %11414 = vst [vmem:[#allocation18_spill] sm:$0xff] %v9356_v19  ;;  %v9400_v29 = vpop.f32.mrf.mxu0 }
 0x5b0   : > { %v9364_v22 = vpop.f32.mrf.mxu1 }
 0x5b1   : > { %11416 = vst [vmem:[#allocation44_spill] sm:$0xff] %v9364_v22 }
 0x5b2   : > { %v9372_v37 = vpop.f32.mrf.mxu1 }
 0x5b3   : > { %3883 = vrot.lane.b32.xlu1 %v3451_v18, %s11407_s27  ;;  %3953 = vrot.lane.b32.xlu0 %v9314_v50, %s11406_s26  ;;  %11419 = vst [vmem:[#allocation35_spill] sm:$0xff] %v9372_v37 }
 0x5b4   : > { %v9380_v6 = vpop.f32.mrf.mxu1 }
 0x5b5   : > { %11421 = vst [vmem:[#allocation22_spill] sm:$0xff] %v9380_v6 }
 0x5b6   : > { %v6940_v47 = vpop.f32.mrf.mxu1 }
 0x5b7   : > { %3947 = vrot.lane.b32.xlu1 %v9309_v59, %s11406_s26  ;;  %3885 = vrot.lane.b32.xlu0 %v3453_v52, %s11407_s27  ;;  %v3543_v52 = vpop.f32.mrf.mxu0 }
 0x5b8   : > { %v3724_v30 = vpop.f32.mrf.mxu1 }
 0x5ba   : > { %v6941_v48 = vpop.f32.mrf.mxu1 }
 0x5bb   : > { %3889 = vrot.lane.b32.xlu1 %v3455_v31, %s11407_s27  ;;  %3949 = vrot.lane.b32.xlu0 %v9326_v9, %s11406_s26  ;;  %v9406_v31 = vpop.f32.mrf.mxu0 }
 0x5bc   : > { %v3727_v18 = vpop.f32.mrf.mxu1 }
 0x5bf   : > { %3891 = vrot.lane.b32.xlu0 %v3457_v56, %s11407_s27  ;;  %4035 = vrot.lane.b32.xlu1 %v9331_v8, %s11410_s28  ;;  %v6944_v56 = vpop.f32.mrf.mxu1 }
 0x5c3   : > { %3897 = vrot.lane.b32.xlu0 %v3463_v42, %s11407_s27  ;;  %3895 = vrot.lane.b32.xlu1 %v3461_v51, %s11407_s27  ;;  %v3547_v51 = vpop.f32.mrf.mxu0 }
 0x5c5   : > { %v9414_v42 = vpop.f32.mrf.mxu0 }
 0x5c7   : > { %4031 = vrot.lane.b32.xlu1 %v9338_v60, %s11410_s28  ;;  %4037 = vrot.lane.b32.xlu0 %v9344_v10, %s11410_s28 }
 0x5cb   : > { %3901 = vrot.lane.b32.xlu1 %v9238_v54, %s11407_s27  ;;  %4033 = vrot.lane.b32.xlu0 %v9352_v41, %s11410_s28  ;;  %v3740_v54 = vpop.f32.mrf.mxu1 }
 0x5cf   : > { %3967 = vrot.lane.b32.xlu1 %v9242_v43, %s11417_s29  ;;  %3903 = vrot.lane.b32.xlu0 %v9240_v39, %s11407_s27  ;;  %v9416_v39 = vpop.permute.xlu1 %4475  ;;  %v3553_v43 = vpop.f32.mrf.mxu0 }
 0x5d0   : > { %11424 = vst [vmem:[#allocation29_spill] sm:$0xff] %v9416_v39 }
 0x5d3   : > { %3973 = vrot.lane.b32.xlu1 %v9246_v35, %s11417_s29  ;;  %3969 = vrot.lane.b32.xlu0 %v9244_v45, %s11417_s29  ;;  %v9420_v45 = vpop.permute.xlu0 %4480  ;;  %v9426_v35 = vpop.f32.mrf.mxu0 }
 0x5d4   : > { %11425 = vst [vmem:[#allocation33_spill] sm:$0xff] %v9420_v45 }
 0x5d7   : > { %3979 = vrot.lane.b32.xlu1 %v9250_v26, %s11417_s29  ;;  %3975 = vrot.lane.b32.xlu0 %v9248_v44, %s11417_s29  ;;  %v9428_v44 = vpop.permute.xlu1 %4465  ;;  %v6945_v26 = vpop.f32.mrf.mxu1 }
 0x5d8   : > { %11426 = vst [vmem:[#allocation6_spill] sm:$0xff] %v9428_v44 }
 0x5db   : > { %3985 = vrot.lane.b32.xlu1 %v9260_v23, %s11417_s29  ;;  %4151 = vrot.lane.b32.xlu0 %v6940_v47, %s11422_s30  ;;  %v9432_v23 = vpop.permute.xlu0 %4470 }
 0x5dc   : > { %11427 = vst [vmem:[#allocation40_spill] sm:$0xff] %v9432_v23 }
 0x5df   : > { %4051 = vrot.lane.b32.xlu1 %v9272_v38, %s11423_s13  ;;  %4139 = vrot.lane.b32.xlu0 %v3724_v30, %s11422_s30  ;;  %v3743_v38 = vpop.f32.mrf.mxu1 }
 0x5e1   : > { %v6948_v30 = vpop.f32.mrf.mxu1 }
 0x5e3   : > { %4057 = vrot.lane.b32.xlu1 %v9288_v61, %s11423_s13  ;;  %3981 = vrot.lane.b32.xlu0 %v9252_v24, %s11417_s29  ;;  %v3557_v24 = vpop.f32.mrf.mxu0 }
 0x5e5   : > { %v9436_v61 = vpop.f32.mrf.mxu0 }
 0x5e7   : > { %4063 = vrot.lane.b32.xlu1 %v3501_v20, %s11423_s13  ;;  %4157 = vrot.lane.b32.xlu0 %v6941_v48, %s11422_s30 }
 0x5eb   : > { %4069 = vrot.lane.b32.xlu1 %v3505_v12, %s11423_s13  ;;  %4145 = vrot.lane.b32.xlu0 %v3727_v18, %s11422_s30  ;;  %v3563_v12 = vpop.f32.mrf.mxu0 }
 0x5ef   : > { %4135 = vrot.lane.b32.xlu1 %v9386_v4, %s11422_s30  ;;  %3987 = vrot.lane.b32.xlu0 %v9267_v32, %s11417_s29 }
 0x5f3   : > { %4137 = vrot.lane.b32.xlu1 %v3533_v53, %s11422_s30  ;;  %4235 = vrot.lane.b32.xlu0 %v6944_v56, %s11313_s16 }
 0x5f7   : > { %4143 = vrot.lane.b32.xlu1 %v3537_v21, %s11422_s30  ;;  %4223 = vrot.lane.b32.xlu0 %v3740_v54, %s11313_s16  ;;  %v9452_v21 = vpop.f32.mrf.mxu0 }
 0x5f9   : > { %v3567_v56 = vpop.f32.mrf.mxu0 }
 0x5fb   : > { %4147 = vrot.lane.b32.xlu1 %v9400_v29, %s11422_s30  ;;  %4053 = vrot.lane.b32.xlu0 %v9281_v5, %s11423_s13 }
 0x5ff   : > { %4149 = vrot.lane.b32.xlu1 %v3543_v52, %s11422_s30  ;;  %4241 = vrot.lane.b32.xlu0 %v6945_v26, %s11313_s16  ;;  %v3756_v52 = vpop.f32.mrf.mxu1 }
 0x601   : > { %v9434_v32 = vpop.permute.xlu1 %3795 }
 0x603   : > { %4155 = vrot.lane.b32.xlu1 %v3547_v51, %s11422_s30  ;;  %4229 = vrot.lane.b32.xlu0 %v3743_v38, %s11313_s16 }
 0x605   : > { %v9440_v5 = vpop.permute.xlu0 %3797  ;;  %v9442_v20 = vpop.permute.xlu1 %3811 }
 0x607   : > { %4219 = vrot.lane.b32.xlu1 %v9414_v42, %s11313_s16  ;;  %4059 = vrot.lane.b32.xlu0 %v9294_v17, %s11423_s13  ;;  %v9462_v17 = vpop.f32.mrf.mxu0 }
 0x609   : > { %v9448_v47 = vpop.permute.xlu0 %3813  ;;  %v9450_v53 = vpop.permute.xlu1 %3791 }
 0x60a   : > { %11428 = vst [vmem:[#allocation39_spill] sm:$0xff] %v9448_v47 }
 0x60b   : > { %4221 = vrot.lane.b32.xlu1 %v3553_v43, %s11313_s16  ;;  %4319 = vrot.lane.b32.xlu0 %v6948_v30, %s11319_s19  ;;  %v3573_v43 = vpop.f32.mrf.mxu0 }
 0x60d   : > { %v9456_v48 = vpop.permute.xlu0 %3793  ;;  %v9458_v18 = vpop.permute.xlu1 %3817 }
 0x60e   : > { %v9478_v30 = vpop.f32.mrf.mxu0 }
 0x60f   : > { %4227 = vrot.lane.b32.xlu1 %v3557_v24, %s11313_s16  ;;  %4307 = vrot.lane.b32.xlu0 %v3756_v52, %s11319_s19  ;;  %v6949_v24 = vpop.f32.mrf.mxu1 }
 0x611   : > { %v9464_v51 = vpop.permute.xlu0 %3819  ;;  %v9466_v54 = vpop.permute.xlu1 %3867 }
 0x612   : > { %11429 = vst [vmem:[#allocation26_spill] sm:$0xff] %v9464_v51  ;;  %v3759_v6 = vpop.f32.mrf.mxu1 }
 0x613   : > { %4231 = vrot.lane.b32.xlu1 %v9436_v61, %s11313_s16  ;;  %4065 = vrot.lane.b32.xlu0 %v9307_v36, %s11423_s13  ;;  %v3577_v36 = vpop.f32.mrf.mxu0 }
 0x615   : > { %v9472_v26 = vpop.permute.xlu0 %3825  ;;  %v9474_v38 = vpop.permute.xlu1 %3823 }
 0x616   : > { %v9490_v19 = vpop.f32.mrf.mxu0 }
 0x617   : > { %4233 = vrot.lane.b32.xlu1 %v3563_v12, %s11313_s16  ;;  %4325 = vrot.lane.b32.xlu0 %v6949_v24, %s11319_s19 }
 0x618   : > { %v3583_v28 = vpop.f32.mrf.mxu0 }
 0x619   : > { %v9480_v52 = vpop.permute.xlu0 %3869  ;;  %v9482_v3 = vpop.permute.xlu1 %3863 }
 0x61a   : > { %v9506_v39 = vpop.f32.mrf.mxu0 }
 0x61b   : > { %4239 = vrot.lane.b32.xlu1 %v3567_v56, %s11313_s16  ;;  %4313 = vrot.lane.b32.xlu0 %v3759_v6, %s11319_s19  ;;  %v6952_v56 = vpop.f32.mrf.mxu1 }
 0x61c   : > { %v3587_v11 = vpop.f32.mrf.mxu0 }
 0x61d   : > { %v9486_v22 = vpop.permute.xlu0 %3865  ;;  %v9488_v37 = vpop.permute.xlu1 %3829 }
 0x61e   : > { %v3772_v27 = vpop.f32.mrf.mxu1 }
 0x61f   : > { %4303 = vrot.lane.b32.xlu1 %v9462_v17, %s11319_s19  ;;  %4071 = vrot.lane.b32.xlu0 %v9319_v0, %s11423_s13 }
 0x620   : > { %v6953_v1 = vpop.f32.mrf.mxu1 }
 0x621   : > { %v9496_v12 = vpop.permute.xlu0 %3831  ;;  %v9498_v24 = vpop.permute.xlu1 %3951 }
 0x622   : > { %11430 = vst [vmem:[#allocation31_spill] sm:$0xff] %v9496_v12  ;;  %11431 = vst [vmem:[#allocation20_spill] sm:$0xff] %v9498_v24 }
 0x623   : > { %4305 = vrot.lane.b32.xlu1 %v3573_v43, %s11319_s19  ;;  %4403 = vrot.lane.b32.xlu0 %v6952_v56, %s11325_s17  ;;  %v9517_v43 = vpop.f32.mrf.mxu0 }
 0x625   : > { %v9502_v6 = vpop.permute.xlu0 %3953  ;;  %v9504_v45 = vpop.permute.xlu1 %3883 }
 0x626   : > { %11432 = vst [vmem:[#allocation38_spill] sm:$0xff] %v9502_v6 }
 0x627   : > { %4311 = vrot.lane.b32.xlu1 %v3577_v36, %s11319_s19  ;;  %4391 = vrot.lane.b32.xlu0 %v3772_v27, %s11325_s17  ;;  %v3775_v36 = vpop.f32.mrf.mxu1  ;;  %v3593_v27 = vpop.f32.mrf.mxu0 }
 0x629   : > { %v9510_v0 = vpop.permute.xlu0 %3885  ;;  %v9512_v46 = vpop.permute.xlu1 %3947 }
 0x62a   : > { %11433 = vst [vmem:[#allocation7_spill] sm:$0xff] %v9510_v0  ;;  %11434 = vst [vmem:[#allocation41_spill] sm:$0xff] %v9512_v46 }
 0x62b   : > { %4315 = vrot.lane.b32.xlu1 %v9490_v19, %s11319_s19  ;;  %4409 = vrot.lane.b32.xlu0 %v6953_v1, %s11325_s17  ;;  %v9532_v1 = vpop.f32.mrf.mxu0 }
 0x62d   : > { %v9519_v56 = vpop.permute.xlu0 %3949  ;;  %v9521_v23 = vpop.permute.xlu1 %3889 }
 0x62e   : > { %11435 = vst [vmem:[#allocation3_spill] sm:$0xff] %v9519_v56 }
 0x62f   : > { %4317 = vrot.lane.b32.xlu1 %v3583_v28, %s11319_s19  ;;  %4397 = vrot.lane.b32.xlu0 %v3775_v36, %s11325_s17  ;;  %v3597_v28 = vpop.f32.mrf.mxu0 }
 0x631   : > { %v9525_v7 = vpop.permute.xlu0 %3891  ;;  %v9527_v58 = vpop.permute.xlu1 %4035 }
 0x632   : > { %11436 = vst [vmem:[#allocation13_spill] sm:$0xff] %v9525_v7  ;;  %11437 = vst [vmem:[#allocation4_spill] sm:$0xff] %v9527_v58 }
 0x633   : > { %4323 = vrot.lane.b32.xlu1 %v3587_v11, %s11319_s19  ;;  %4141 = vrot.lane.b32.xlu0 %v9394_v25, %s11422_s30  ;;  %v9545_v11 = vpop.f32.mrf.mxu0 }
 0x635   : > { %v9534_v44 = vpop.permute.xlu0 %3897  ;;  %v9536_v57 = vpop.permute.xlu1 %3895 }
 0x637   : > { %4389 = vrot.lane.b32.xlu1 %v3593_v27, %s11325_s17  ;;  %4153 = vrot.lane.b32.xlu0 %v9406_v31, %s11422_s30  ;;  %v3603_v27 = vpop.f32.mrf.mxu0 }
 0x639   : > { %v9541_v36 = vpop.permute.xlu0 %4037  ;;  %v9543_v34 = vpop.permute.xlu1 %4031 }
 0x63a   : > { %11438 = vst [vmem:[#allocation10_spill] sm:$0xff] %v9541_v36  ;;  %11439 = vst [vmem:[#allocation9_spill] sm:$0xff] %v9543_v34  ;;  %v9562_v2 = vpop.f32.mrf.mxu0 }
 0x63b   : > { %4395 = vrot.lane.b32.xlu1 %v3597_v28, %s11325_s17  ;;  %4225 = vrot.lane.b32.xlu0 %v9426_v35, %s11313_s16 }
 0x63c   : > { %v3607_v34 = vpop.f32.mrf.mxu0 }
 0x63d   : > { %v9550_v6 = vpop.permute.xlu0 %4033  ;;  %v9552_v58 = vpop.permute.xlu1 %3901 }
 0x63e   : > { %11440 = vst [vmem:[#allocation12_spill] sm:$0xff] %v9550_v6 }
 0x63f   : > { %4399 = vrot.lane.b32.xlu1 %v9545_v11, %s11325_s17  ;;  %4237 = vrot.lane.b32.xlu0 %v9452_v21, %s11313_s16 }
 0x641   : > { %v9558_v36 = vpop.permute.xlu0 %3903  ;;  %v9560_v56 = vpop.permute.xlu1 %3967 }
 0x642   : > { %11441 = vst [vmem:[#allocation47_spill] sm:$0xff] %v9558_v36 }
 0x643   : > { %4401 = vrot.lane.b32.xlu1 %v3603_v27, %s11325_s17  ;;  %4309 = vrot.lane.b32.xlu0 %v9478_v30, %s11319_s19 }
 0x645   : > { %v9567_v28 = vpop.permute.xlu0 %3969  ;;  %v9569_v6 = vpop.permute.xlu1 %3973 }
 0x646   : > { %11442 = vst [vmem:[#allocation25_spill] sm:$0xff] %v9567_v28 }
 0x647   : > { %4407 = vrot.lane.b32.xlu1 %v3607_v34, %s11325_s17  ;;  %4321 = vrot.lane.b32.xlu0 %v9506_v39, %s11319_s19 }
 0x649   : > { %v9574_v24 = vpop.permute.xlu0 %3975  ;;  %v9576_v16 = vpop.permute.xlu1 %3979 }
 0x64a   : > { %11443 = vst [vmem:[#allocation34_spill] sm:$0xff] %v9574_v24  ;;  %11444 = vst [vmem:[#allocation42_spill] sm:$0xff] %v9576_v16 }
 0x64b   : > { %4405 = vrot.lane.b32.xlu0 %v9562_v2, %s11325_s17  ;;  %4387 = vrot.lane.b32.xlu1 %v9517_v43, %s11325_s17 }
 0x64d   : > { %v9582_v27 = vpop.permute.xlu0 %4151  ;;  %v9584_v46 = vpop.permute.xlu1 %3985 }
 0x64e   : > { %11445 = vst [vmem:[#allocation48_spill] sm:$0xff] %v9582_v27  ;;  %11446 = vst [vmem:[#allocation14_spill] sm:$0xff] %v9584_v46 }
 0x64f   : > { %4393 = vrot.lane.b32.xlu0 %v9532_v1, %s11325_s17  ;;  %3827 = vrot.lane.b32.xlu1 %v9254_v62, %s11154_s23 }
 0x651   : > { %v9590_v34 = vpop.permute.xlu0 %4139  ;;  %v9592_v12 = vpop.permute.xlu1 %4051 }
 0x653   : > { %3833 = vrot.lane.b32.xlu0 %v9262_v63, %s11154_s23  ;;  %3899 = vrot.lane.b32.xlu1 %v9279_v14, %s11407_s27 }
 0x655   : > { %v9598_v16 = vpop.permute.xlu0 %3981  ;;  %v9600_v27 = vpop.permute.xlu1 %4057 }
 0x657   : > { %3905 = vrot.lane.b32.xlu0 %v9292_v15, %s11407_s27  ;;  %3983 = vrot.lane.b32.xlu1 %v9302_v33, %s11417_s29 }
 0x659   : > { %v9606_v62 = vpop.permute.xlu0 %4157  ;;  %v9608_v46 = vpop.permute.xlu1 %4063 }
 0x65b   : > { %3989 = vrot.lane.b32.xlu0 %v9314_v50, %s11417_s29  ;;  %3815 = vrot.lane.b32.xlu1 %v9258_v40, %s11154_s23 }
 0x65d   : > { %v9614_v63 = vpop.permute.xlu0 %4145  ;;  %v9616_v14 = vpop.permute.xlu1 %4069 }
 0x65f   : > { %3821 = vrot.lane.b32.xlu0 %v9274_v49, %s11154_s23  ;;  %3887 = vrot.lane.b32.xlu1 %v9286_v13, %s11407_s27  ;;  %s11523_s23 = smov 79  }
 0x661   : > { %v9622_v15 = vpop.permute.xlu0 %3987  ;;  %v9624_v33 = vpop.permute.xlu1 %4135 }
 0x663   : > { %3893 = vrot.lane.b32.xlu0 %v9300_v55, %s11407_s27  ;;  %4067 = vrot.lane.b32.xlu1 %v9331_v8, %s11423_s13 }
 0x665   : > { %v9630_v40 = vpop.permute.xlu0 %4235  ;;  %v9632_v50 = vpop.permute.xlu1 %4137 }
 0x666   : > { %11447 = vst [vmem:[#allocation30_spill] sm:$0xff] %v9630_v40 }
 0x667   : > { %4073 = vrot.lane.b32.xlu0 %v9344_v10, %s11423_s13  ;;  %3971 = vrot.lane.b32.xlu1 %v9309_v59, %s11417_s29 }
 0x669   : > { %v9638_v49 = vpop.permute.xlu0 %4223  ;;  %v9640_v13 = vpop.permute.xlu1 %4143 }
 0x66b   : > { %3977 = vrot.lane.b32.xlu0 %v9326_v9, %s11417_s29  ;;  %4055 = vrot.lane.b32.xlu1 %v9338_v60, %s11423_s13 }
 0x66d   : > { %v9646_v55 = vpop.permute.xlu0 %4053  ;;  %v9648_v8 = vpop.permute.xlu1 %4147 }
 0x66e   : > { %11448 = vst [vmem:[#allocation45_spill] sm:$0xff] %v9646_v55 }
 0x66f   : > { %4061 = vrot.lane.b32.xlu0 %v9352_v41, %s11423_s13  ;;  %4183 = vrot.lane.b32.xlu1 %v9400_v29, %s11345_s18 }
 0x671   : > { %v9654_v59 = vpop.permute.xlu0 %4241  ;;  %v9656_v10 = vpop.permute.xlu1 %4149 }
 0x672   : > { %11449 = vst [vmem:[#allocation32_spill] sm:$0xff] %v9654_v59 }
 0x673   : > { %4185 = vrot.lane.b32.xlu0 %v9406_v31, %s11345_s18  ;;  %4267 = vrot.lane.b32.xlu1 %v9436_v61, %s11346_s14 }
 0x675   : > { %v9662_v9 = vpop.permute.xlu0 %4229  ;;  %v9664_v60 = vpop.permute.xlu1 %4155 }
 0x676   : > { %11450 = vst [vmem:[#allocation36_spill] sm:$0xff] %v9662_v9  ;;  %11451 = vst [vmem:[#allocation17_spill] sm:$0xff] %v9664_v60 }
 0x677   : > { %4269 = vrot.lane.b32.xlu0 %v9452_v21, %s11346_s14  ;;  %4179 = vrot.lane.b32.xlu1 %v9386_v4, %s11345_s18 }
 0x679   : > { %v9670_v41 = vpop.permute.xlu0 %4059  ;;  %v9672_v29 = vpop.permute.xlu1 %4219 }
 0x67a   : > { %11452 = vst [vmem:[#allocation23_spill] sm:$0xff] %v9670_v41  ;;  %11453 = vst [vmem:[#allocation8_spill] sm:$0xff] %v9672_v29 }
 0x67b   : > { %4181 = vrot.lane.b32.xlu0 %v9394_v25, %s11345_s18  ;;  %4351 = vrot.lane.b32.xlu1 %v9490_v19, %s11349_s15 }
 0x67d   : > { %v9678_v31 = vpop.permute.xlu0 %4319  ;;  %v9680_v61 = vpop.permute.xlu1 %4221 }
 0x67e   : > { %11454 = vst [vmem:[#allocation28_spill] sm:$0xff] %v9678_v31 }
 0x67f   : > { %4353 = vrot.lane.b32.xlu0 %v9506_v39, %s11349_s15  ;;  %4263 = vrot.lane.b32.xlu1 %v9414_v42, %s11346_s14 }
 0x681   : > { %v9686_v4 = vpop.permute.xlu0 %4307  ;;  %v9688_v21 = vpop.permute.xlu1 %4227 }
 0x683   : > { %4265 = vrot.lane.b32.xlu0 %v9426_v35, %s11346_s14  ;;  %4435 = vrot.lane.b32.xlu1 %v9545_v11, %s11186_s20  ;;  %v5861_v35 = vld [vmem:[%s11052_s10] sm:$0xff] }
 0x685   : > { %v9694_v19 = vpop.permute.xlu0 %4065  ;;  %v9696_v25 = vpop.permute.xlu1 %4231 }
 0x687   : > { %4437 = vrot.lane.b32.xlu0 %v9562_v2, %s11186_s20  ;;  %4347 = vrot.lane.b32.xlu1 %v9462_v17, %s11349_s15  ;;  %v5862_v17 = vld [vmem:[%s11052_s10 + $0x8] sm:$0xff] }
 0x689   : > { %v9702_v42 = vpop.permute.xlu0 %4325  ;;  %v9704_v39 = vpop.permute.xlu1 %4233 }
 0x68a   : > { %11455 = vst [vmem:[#allocation5_spill] sm:$0xff] %v9702_v42 }
 0x68b   : > { %4349 = vrot.lane.b32.xlu0 %v9478_v30, %s11349_s15  ;;  %4431 = vrot.lane.b32.xlu1 %v9517_v43, %s11186_s20 }
 0x68d   : > { %v9713_v11 = vpop.permute.xlu0 %4313  ;;  %v9715_v2 = vpop.permute.xlu1 %4239 }
 0x68e   : > { %11456 = vst [vmem:[#allocation19_spill] sm:$0xff] %v9713_v11  ;;  %11457 = vst [vmem:[#allocation11_spill] sm:$0xff] %v9715_v2  ;;  %v3907_v2 = vsel %vm1130_vm3, %v9504_v45, %v9510_v0  ;;  %v4075_v0 = vsel %vm1300_vm5, %v9592_v12, %v9646_v55 }
 0x68f   : > { %4433 = vrot.lane.b32.xlu0 %v9532_v1, %s11186_s20  ;;  %5867 = vperm.xlu1 %7032, %v5861_v35   ;;  %v3835_v1 = vsel %vm1057_vm2, %v9442_v20, %v9448_v47  ;;  %v3991_v35 = vsel %vm1215_vm4, %v9560_v56, %v9567_v28  ;;  %v3837_v47 = vsel %vm1057_vm2, %v9458_v18, %v9464_v51 }
 0x690   : > { %v3932_v29 = vadd.f32 %v3907_v2, %v3835_v1  ;;  %v3993_v2 = vsel %vm1215_vm4, %v9569_v6, %v9574_v24  ;;  %v3855_v1 = vsel %vm1057_vm2, %v9450_v53, %v9442_v20  ;;  %v3857_v24 = vsel %vm1057_vm2, %v9434_v32, %v9474_v38 }
 0x691   : > { %v9722_v30 = vpop.permute.xlu0 %4071  ;;  %v9724_v42 = vpop.permute.xlu1 %4303  ;;  %v4077_v20 = vsel %vm1300_vm5, %v9600_v27, %v9670_v41  ;;  %v3928_v53 = vsel %vm1130_vm3, %v9486_v22, %v9521_v23  ;;  %v3858_v32 = vsel %vm1057_vm2, %v9440_v5, %v9488_v37  ;;  %v3913_v22 = vsel %vm1130_vm3, %v9552_v58, %v9558_v36  ;;  %v11465_v36 = vld [vmem:[#allocation20_spill] sm:$0xff] }
 0x692   : > { %11458 = vst [vmem:[#allocation52_spill] sm:$0xff] %v9724_v42  ;;  %v3909_v42 = vsel %vm1130_vm3, %v9521_v23, %v9525_v7 }
 0x693   : > { %5872 = vperm.xlu0 %7031, %v5862_v17   ;;  %v3935_v28 = vadd.f32 %v3909_v42, %v3837_v47  ;;  %v3927_v47 = vsel %vm1130_vm3, %v9482_v3, %v9504_v45  ;;  %v3930_v3 = vsel %vm1130_vm3, %v9480_v52, %v9552_v58  ;;  %v11461_v45 = vld [vmem:[#allocation31_spill] sm:$0xff]  ;;  %v11464_v58 = vld [vmem:[#allocation42_spill] sm:$0xff] }
 0x694   : > { %v3841_v23 = vsel %vm1057_vm2, %v9488_v37, %v11461_v45  ;;  %v3931_v52 = vadd.f32 %v3927_v47, %v3855_v1  ;;  %v3995_v51 = vsel %vm1215_vm4, %v11464_v58, %v9598_v16  ;;  %v3940_v37 = vadd.f32 %v3930_v3, %v3858_v32  ;;  %v11469_v3 = vld [vmem:[#allocation3_spill] sm:$0xff] }
 0x695   : > { %v9726_v43 = vpop.permute.xlu0 %4403  ;;  %v9728_v59 = vpop.permute.xlu1 %4305  ;;  %v3941_v45 = vadd.f32 %v3913_v22, %v3841_v23  ;;  %v4079_v1 = vsel %vm1300_vm5, %v9608_v46, %v9694_v19  ;;  %v4012_v22 = vsel %vm1215_vm4, %v11469_v3, %v9569_v6  ;;  %v11473_v6 = vld [vmem:[#allocation38_spill] sm:$0xff]  ;;  %v11476_v3 = vld [vmem:[#allocation51_spill] sm:$0xff] }
 0x696   : > { %11459 = vst [vmem:[#allocation53_spill] sm:$0xff] %v9726_v43  ;;  %v4016_v43 = vadd.f32 %v3991_v35, %v3932_v29  ;;  %v3856_v29 = vsel %vm1057_vm2, %v9456_v48, %v9458_v18  ;;  %v3839_v35 = vsel %vm1057_vm2, %v9474_v38, %v9472_v26  ;;  %v3929_v48 = vsel %vm1130_vm3, %v9466_v54, %v9536_v57  ;;  %v11462_v54 = vld [vmem:[#allocation41_spill] sm:$0xff] }
 0x697   : > { %v4019_v18 = vadd.f32 %v3993_v2, %v3935_v28  ;;  %v3911_v38 = vsel %vm1130_vm3, %v9536_v57, %v9534_v44  ;;  %v4011_v5 = vsel %vm1215_vm4, %v11462_v54, %v9560_v56  ;;  %v3934_v2 = vadd.f32 %v3928_v53, %v3856_v29  ;;  %v11466_v29 = vld [vmem:[#allocation9_spill] sm:$0xff]  ;;  %v11472_v54 = vld [vmem:[#allocation14_spill] sm:$0xff] }
 0x698   : > { %v4100_v40 = vadd.f32 %v4075_v0, %v4016_v43  ;;  %v11463_v0 = vld [vmem:[#allocation43_spill] sm:$0xff]  ;;  %v3937_v41 = vadd.f32 %v3929_v48, %v3857_v24  ;;  %v3938_v55 = vadd.f32 %v3911_v38, %v3839_v35  ;;  %v4013_v56 = vsel %vm1215_vm4, %v11465_v36, %v11464_v58  ;;  %v11467_v53 = vld [vmem:[#allocation49_spill] sm:$0xff]  ;;  %v11474_v58 = vld [vmem:[#allocation12_spill] sm:$0xff] }
 0x699   : > { %v9739_v31 = vpop.permute.xlu0 %4391  ;;  %v9741_v17 = vpop.permute.xlu1 %4311  ;;  %v4103_v42 = vadd.f32 %v4077_v20, %v4019_v18  ;;  %v4160_v20 = vsel %vm11175_vm6, %v9632_v50, %v9590_v34  ;;  %v4244_v24 = vsel %vm1471_vm8, %v9680_v61, %v9638_v49  ;;  %v4095_v35 = vsel %vm1300_vm5, %v11466_v29, %v9592_v12  ;;  %v9832_v38 = vld [vmem:[%s11468_s5] sm:$0xff]   ;;  %v11471_v12 = vld [vmem:[#allocation4_spill] sm:$0xff] }
 0x69a   : > { %11460 = vst [vmem:[#allocation54_spill] sm:$0xff] %v9739_v31  ;;  %v4112_v28 = vadd.f32 %v4100_v40, %v11463_v0  ;;  %v4015_v40 = vadd.f32 %v4011_v5, %v3931_v52  ;;  %v4022_v47 = vadd.f32 %v3995_v51, %v3938_v55  ;;  %v4021_v23 = vadd.f32 %v4013_v56, %v3937_v41 }
 0x69b   : > { %v4115_v36 = vadd.f32 %v4103_v42, %v11467_v53  ;;  %v4328_v51 = vsel %vm11470_vm7, %v9728_v59, %v9686_v4  ;;  %v4097_v55 = vsel %vm1300_vm5, %v11471_v12, %v9608_v46  ;;  %v3997_v5 = vsel %vm1215_vm4, %v11472_v54, %v9622_v15  ;;  %6968 = vmatprep.mubr.msk.bf16.mxu0 %vm4744_vm13, %v9832_v38  ;;  %vm11486_vm7 = vmmov %vm11475_vm0 }
 0x69c   : > { %v4196_v48 = vadd.f32 %v4160_v20, %v4112_v28  ;;  %v4106_v28 = vadd.f32 %v4079_v1, %v4022_v47  ;;  %v4014_v41 = vsel %vm1215_vm4, %v11473_v6, %v11472_v54  ;;  %v4099_v42 = vadd.f32 %v4095_v35, %v4015_v40 }
 0x69d   : > { %v9758_v7 = vpop.permute.xlu0 %4409  ;;  %v9760_v60 = vpop.permute.xlu1 %4315  ;;  %v4162_v52 = vsel %vm11175_vm6, %v9640_v13, %v9614_v63  ;;  %v4246_v46 = vsel %vm1471_vm8, %v9688_v21, %v9662_v9  ;;  %v4096_v56 = vsel %vm1300_vm5, %v11474_v58, %v9600_v27  ;;  %v4105_v35 = vadd.f32 %v4097_v55, %v4021_v23 }
 0x69e   : > { %v4280_v0 = vadd.f32 %v4244_v24, %v4196_v48  ;;  %v4199_v20 = vadd.f32 %v4162_v52, %v4115_v36  ;;  %v4081_v24 = vsel %vm1300_vm5, %v9616_v14, %v9722_v30  ;;  %v4025_v47 = vadd.f32 %v3997_v5, %v3941_v45  ;;  %v11478_v45 = vld [vmem:[#allocation10_spill] sm:$0xff] }
 0x69f   : > { %v4330_v53 = vsel %vm11475_vm0, %v9741_v17, %v9713_v11  ;;  %v4018_v27 = vadd.f32 %v4012_v22, %v3934_v2  ;;  %v4118_v12 = vadd.f32 %v4106_v28, %v11476_v3  ;;  %v4024_v6 = vadd.f32 %v4014_v41, %v3940_v37  ;;  %v11479_v5 = vld [vmem:[#allocation6_spill] sm:$0xff]  ;;  %v11481_v28 = vld [vmem:[#allocation48_spill] sm:$0xff] }
 0x6a0   : > { %v4364_v1 = vadd.f32 %v4328_v51, %v4280_v0  ;;  %v4283_v36 = vadd.f32 %v4246_v46, %v4199_v20  ;;  %v11477_v51 = vld [vmem:[#allocation16_spill] sm:$0xff]  ;;  %v4109_v52 = vadd.f32 %v4081_v24, %v4025_v47  ;;  %v4098_v23 = vsel %vm1300_vm5, %v11478_v45, %v9616_v14  ;;  %v11480_v2 = vld [vmem:[#allocation46_spill] sm:$0xff]  ;;  %v11483_v47 = vld [vmem:[#allocation17_spill] sm:$0xff] }
 0x6a1   : > { %v9802_v57 = vpop.permute.xlu0 %4397  ;;  %v9804_v43 = vpop.permute.xlu1 %4317  ;;  %v4111_v0 = vadd.f32 %v4099_v42, %v11477_v51  ;;  %v4102_v58 = vadd.f32 %v4096_v56, %v4018_v27  ;;  %v4117_v22 = vadd.f32 %v4105_v35, %v11480_v2  ;;  %v4163_v37 = vsel %vm11175_vm6, %v9648_v8, %v9656_v10  ;;  %v11484_v27 = vld [vmem:[#allocation40_spill] sm:$0xff]  ;;  %v11488_v51 = vld [vmem:[#allocation21_spill] sm:$0xff] }
 0x6a2   : > { %v4367_v55 = vadd.f32 %v4330_v53, %v4283_v36  ;;  %v4164_v41 = vsel %vm11175_vm6, %v9656_v10, %v11481_v28  ;;  %v4108_v20 = vadd.f32 %v4098_v23, %v4024_v6  ;;  %v4159_v24 = vsel %vm11175_vm6, %v9624_v33, %v9632_v50  ;;  %v11489_v2 = vld [vmem:[#allocation8_spill] sm:$0xff] }
 0x6a3   : > { %v4202_v42 = vadd.f32 %v4164_v41, %v4118_v12  ;;  %v4247_v8 = vsel %vm1471_vm8, %v9696_v25, %v9704_v39  ;;  %v4201_v10 = vadd.f32 %v4163_v37, %v4117_v22  ;;  %v4166_v53 = vsel %vm11175_vm6, %v11483_v47, %v9606_v62  ;;  %v11487_v25 = vld [vmem:[#allocation28_spill] sm:$0xff]  ;;  %v11490_v37 = vld [vmem:[#allocation50_spill] sm:$0xff] }
 0x6a4   : > { %v4331_v50 = vsel %vm11486_vm7, %v9760_v60, %v9804_v43  ;;  %v4332_v6 = vsel %vm11475_vm0, %v9804_v43, %v11487_v25  ;;  %v4120_v41 = vadd.f32 %v4108_v20, %v11490_v37  ;;  %v11493_v20 = vld [vmem:[#allocation53_spill] sm:$0xff]  ;;  %vm11495_vm7 = vmmov %vm11475_vm0 }
 0x6a5   : > { %v9825_v18 = vpop.permute.xlu0 %4141  ;;  %v9827_v32 = vpop.permute.xlu1 %4323 }
 0x6a9   : > { %v4154_v29 = vpop.permute.xlu0 %4153  ;;  %v9863_v40 = vpop.permute.xlu1 %4389 }
 0x6aa   : > { %v4412_v48 = vsel %vm1643_vm10, %v9863_v40, %v9739_v31  ;;  %v4165_v43 = vsel %vm11175_vm6, %v4154_v29, %v11483_v47 }
 0x6ab   : > { %v4448_v54 = vadd.f32 %v4412_v48, %v4364_v1  ;;  %v11482_v1 = vld [vmem:[#allocation15_spill] sm:$0xff] }
 0x6ac   : > { %v4121_v35 = vadd.f32 %v4109_v52, %v11482_v1  ;;  %v11492_v1 = vld [vmem:[#allocation11_spill] sm:$0xff] }
 0x6ad   : > { %v4484_v11 = vadd.f32 %v11479_v5, %v4448_v54  ;;  %v9877_v9 = vpop.permute.xlu0 %4225  ;;  %v9879_v31 = vpop.permute.xlu1 %4395  ;;  %v11485_v54 = vld [vmem:[#allocation30_spill] sm:$0xff] }
 0x6ae   : > { %v4414_v14 = vsel %vm1643_vm10, %v9879_v31, %v9802_v57  ;;  %v4248_v33 = vsel %vm1471_vm8, %v9704_v39, %v11485_v54  ;;  %v4243_v39 = vsel %vm1471_vm8, %v11489_v2, %v9680_v61  ;;  %v4205_v22 = vadd.f32 %v4166_v53, %v4121_v35  ;;  %v11498_v2 = vld [vmem:[#allocation29_spill] sm:$0xff] }
 0x6af   : > { %vm4496_vm9 = vcmp.ge.f32.partialorder %v4484_v11, 0.0  ;;  %v4508_v46 = vmul.f32 0.01, %v4484_v11  ;;  %v4451_v56 = vadd.f32 %v4414_v14, %v4367_v55  ;;  %v4286_v45 = vadd.f32 %v4248_v33, %v4202_v42  ;;  %v11496_v33 = vld [vmem:[#allocation24_spill] sm:$0xff] }
 0x6b0   : > { %v4195_v55 = vadd.f32 %v4159_v24, %v4111_v0 }
 0x6b1   : > { %v4520_v48 = vsel %vm4496_vm9, %v4484_v11, %v4508_v46  ;;  %v4487_v36 = vadd.f32 %v11484_v27, %v4451_v56  ;;  %v4238_v3 = vpop.permute.xlu0 %4237  ;;  %v4400_v12 = vpop.permute.xlu1 %4399  ;;  %v4285_v11 = vadd.f32 %v4247_v8, %v4201_v10  ;;  %v4370_v14 = vadd.f32 %v4332_v6, %v4286_v45  ;;  %v11491_v8 = vld [vmem:[#allocation32_spill] sm:$0xff]  ;;  %v11494_v10 = vld [vmem:[#allocation5_spill] sm:$0xff] }
 0x6b2   : > { %v9912_v52 = vmul.f32 %v4520_v48, %v11488_v51  ;;  %v4250_v0 = vsel %vm1471_vm8, %v11492_v1, %v11491_v8  ;;  %v4334_v53 = vsel %vm11495_vm7, %v9827_v32, %v11494_v10  ;;  %v4249_v29 = vsel %vm1471_vm8, %v4238_v3, %v11492_v1 }
 0x6b3   : > { %vm4499_vm9 = vcmp.ge.f32.partialorder %v4487_v36, 0.0  ;;  %v4511_v23 = vmul.f32 0.01, %v4487_v36  ;;  %v4369_v60 = vadd.f32 %v4331_v50, %v4285_v11  ;;  %v4114_v50 = vadd.f32 %v4102_v58, %v11496_v33 }
 0x6b4   : > { %4544 = vst [vmem:[#allocation2 + $0xf8] sm:$0xff] %v9912_v52  ;;  %v4289_v6 = vadd.f32 %v4250_v0, %v4205_v22  ;;  %v4204_v11 = vadd.f32 %v4165_v43, %v4120_v41 }
 0x6b5   : > { %v4523_v46 = vsel %vm4499_vm9, %v4487_v36, %v4511_v23  ;;  %v4310_v56 = vpop.permute.xlu0 %4309  ;;  %v4402_v42 = vpop.permute.xlu1 %4401  ;;  %v4279_v36 = vadd.f32 %v4243_v39, %v4195_v55  ;;  %v4161_v23 = vsel %vm11175_vm6, %v9825_v18, %v9640_v13  ;;  %vm11499_vm9 = vmmov %vm11475_vm0  ;;  %v4245_v18 = vsel %vm1471_vm8, %v9877_v9, %v9688_v21 }
 0x6b6   : > { %v9925_v24 = vmul.f32 %v4523_v46, %v11488_v51  ;;  %v4415_v61 = vsel %vm1643_vm10, %v4400_v12, %v4402_v42  ;;  %v4416_v35 = vsel %vm1643_vm10, %v4402_v42, %v11493_v20  ;;  %v11497_v12 = vld [vmem:[#allocation52_spill] sm:$0xff]  ;;  %v4373_v39 = vadd.f32 %v4334_v53, %v4289_v6  ;;  %vm11500_vm6 = vmmov %vm11499_vm9  ;;  %v11501_v53 = vld [vmem:[#allocation27_spill] sm:$0xff] }
 0x6b7   : > { %v4453_v47 = vadd.f32 %v4415_v61, %v4369_v60  ;;  %v4454_v48 = vadd.f32 %v4416_v35, %v4370_v14  ;;  %v4327_v45 = vsel %vm11475_vm0, %v11497_v12, %v9728_v59  ;;  %v4288_v58 = vadd.f32 %v4249_v29, %v4204_v11 }
 0x6b8   : > { %4547 = vst [vmem:[#allocation2 + $0x110] sm:$0xff] %v9925_v24  ;;  %v4363_v43 = vadd.f32 %v4327_v45, %v4279_v36  ;;  %v4198_v13 = vadd.f32 %v4161_v23, %v4114_v50  ;;  %v4329_v42 = vsel %vm11500_vm6, %v4310_v56, %v9741_v17 }
 0x6b9   : > { %v4489_v37 = vadd.f32 %v11498_v2, %v4453_v47  ;;  %v4490_v3 = vadd.f32 %v11498_v2, %v4454_v48  ;;  %v4322_v60 = vpop.permute.xlu0 %4321  ;;  %v4408_v55 = vpop.permute.xlu1 %4407  ;;  %v11502_v48 = vld [vmem:[#allocation33_spill] sm:$0xff] }
 0x6ba   : > { %v4333_v22 = vsel %vm11499_vm9, %v4322_v60, %v9827_v32  ;;  %v4418_v41 = vsel %vm1643_vm10, %v4408_v55, %v9758_v7  ;;  %v4282_v50 = vadd.f32 %v4245_v18, %v4198_v13 }
 0x6bb   : > { %vm4501_vm7 = vcmp.ge.f32.partialorder %v4489_v37, 0.0  ;;  %vm4502_vm0 = vcmp.ge.f32.partialorder %v4490_v3, 0.0  ;;  %v4513_v59 = vmul.f32 0.01, %v4489_v37  ;;  %v4514_v14 = vmul.f32 0.01, %v4490_v3 }
 0x6bc   : > { %v4457_v46 = vadd.f32 %v4418_v41, %v4373_v39  ;;  %v4372_v32 = vadd.f32 %v4333_v22, %v4288_v58  ;;  %v4366_v56 = vadd.f32 %v4329_v42, %v4282_v50 }
 0x6bd   : > { %v4525_v1 = vsel %vm4501_vm7, %v4489_v37, %v4513_v59  ;;  %v4526_v0 = vsel %vm4502_vm0, %v4490_v3, %v4514_v14  ;;  %v4406_v61 = vpop.permute.xlu0 %4405  ;;  %v4388_v35 = vpop.permute.xlu1 %4387 }
 0x6be   : > { %v4537_v29 = vmul.f32 %v4525_v1, %v11501_v53  ;;  %v4538_v47 = vmul.f32 %v4526_v0, %v11488_v51  ;;  %v4493_v36 = vadd.f32 %v11502_v48, %v4457_v46  ;;  %v4417_v33 = vsel %vm1643_vm10, %v4406_v61, %v4408_v55 }
 0x6bf   : > { %v4456_v6 = vadd.f32 %v4417_v33, %v4372_v32  ;;  %v4411_v9 = vsel %vm1643_vm10, %v4388_v35, %v9863_v40  ;;  %v4613_v32 = vpack.c.bf16 %v9925_v24, %v9912_v52  ;;  %v4583_v35 = vld [vmem:[#allocation2 + $0xe0] sm:$0xff]  ;;  %v4574_v52 = vld [vmem:[#allocation2 + $0x98] sm:$0xff] }
 0x6c0   : > { %4549 = vst [vmem:[#allocation2 + $0x120] sm:$0xff] %v4537_v29  ;;  %4550 = vst [vmem:[#allocation2 + $0x128] sm:$0xff] %v4538_v47  ;;  %vm4505_vm6 = vcmp.ge.f32.partialorder %v4493_v36, 0.0  ;;  %v4517_v21 = vmul.f32 0.01, %v4493_v36  ;;  %v4447_v17 = vadd.f32 %v4411_v9, %v4363_v43  ;;  %v4577_v9 = vld [vmem:[#allocation2 + $0xb0] sm:$0xff] }
 0x6c1   : > { %v4492_v11 = vadd.f32 %v11502_v48, %v4456_v6  ;;  %v4394_v12 = vpop.permute.xlu0 %4393  ;;  %v9961_v45 = vpop.permute.xlu1 %3827  ;;  %v4582_v6 = vld [vmem:[#allocation2 + $0xd8] sm:$0xff] }
 0x6c2   : > { %v4529_v23 = vsel %vm4505_vm6, %v4493_v36, %v4517_v21  ;;  %v4483_v37 = vadd.f32 %v11479_v5, %v4447_v17  ;;  %v4413_v3 = vsel %vm1643_vm10, %v4394_v12, %v9879_v31  ;;  %v4580_v36 = vld [vmem:[#allocation2 + $0xc8] sm:$0xff]  ;;  %v4579_v21 = vld [vmem:[#allocation2 + $0xc0] sm:$0xff] }
 0x6c3   : > { %v4541_v60 = vmul.f32 %v4529_v23, %v11488_v51  ;;  %vm4504_vm9 = vcmp.ge.f32.partialorder %v4492_v11, 0.0  ;;  %v4516_v40 = vmul.f32 0.01, %v4492_v11  ;;  %v4450_v55 = vadd.f32 %v4413_v3, %v4366_v56  ;;  %v4576_v12 = vld [vmem:[#allocation2 + $0xa8] sm:$0xff]  ;;  %v4571_v23 = vld [vmem:[#allocation2 + $0x80] sm:$0xff] }
 0x6c4   : > { %vm4495_vm7 = vcmp.ge.f32.partialorder %v4483_v37, 0.0  ;;  %v4507_v39 = vmul.f32 0.01, %v4483_v37  ;;  %v4610_v50 = vpack.c.bf16 %v4583_v35, %v4580_v36  ;;  %v4609_v17 = vpack.c.bf16 %v4582_v6, %v4579_v21  ;;  %v4564_v35 = vld [vmem:[#allocation2 + $0x48] sm:$0xff]  ;;  %v4555_v36 = vld [vmem:[#allocation2] sm:$0xff] }
 0x6c5   : > { %4553 = vst [vmem:[#allocation2 + $0x140] sm:$0xff] %v4541_v60  ;;  %v4528_v58 = vsel %vm4504_vm9, %v4492_v11, %v4516_v40  ;;  %v4486_v22 = vadd.f32 %v11484_v27, %v4450_v55  ;;  %v9968_v41 = vpop.permute.xlu0 %3833  ;;  %v9970_v59 = vpop.permute.xlu1 %3899  ;;  %v4616_v14 = vpack.c.bf16 %v4541_v60, %v4538_v47  ;;  %v4607_v11 = vpack.c.bf16 %v4577_v9, %v4574_v52  ;;  %v4568_v60 = vld [vmem:[#allocation2 + $0x68] sm:$0xff] }
 0x6c6   : > { %v4540_v43 = vmul.f32 %v4528_v58, %v11501_v53  ;;  %v4519_v13 = vsel %vm4495_vm7, %v4483_v37, %v4507_v39  ;;  %v4573_v37 = vld [vmem:[#allocation2 + $0x90] sm:$0xff]  ;;  %v4604_v39 = vpack.c.bf16 %v4571_v23, %v4568_v60  ;;  %v4570_v58 = vld [vmem:[#allocation2 + $0x78] sm:$0xff]  ;;  %v3912_v23 = vsel %vm1130_vm3, %v9534_v44, %v9970_v59 }
 0x6c7   : > { %v4531_v31 = vmul.f32 %v4519_v13, %v11501_v53  ;;  %vm4498_vm0 = vcmp.ge.f32.partialorder %v4486_v22, 0.0  ;;  %v4510_v18 = vmul.f32 0.01, %v4486_v22  ;;  %4801 = vmatprep.subr.bf16.mxu1 %v4616_v14  ;;  %v4606_v3 = vpack.c.bf16 %v4576_v12, %v4573_v37  ;;  %v4567_v14 = vld [vmem:[#allocation2 + $0x60] sm:$0xff]  ;;  %v4562_v13 = vld [vmem:[#allocation2 + $0x38] sm:$0xff] }
 0x6c8   : > { %4552 = vst [vmem:[#allocation2 + $0x138] sm:$0xff] %v4540_v43  ;;  %v4615_v46 = vpack.c.bf16 %v4540_v43, %v4537_v29  ;;  %v4603_v43 = vpack.c.bf16 %v4570_v58, %v4567_v14  ;;  %v11503_v12 = vmov 0   ;;  %v3840_v60 = vsel %vm1057_vm2, %v9472_v26, %v9961_v45 }
 0x6c9   : > { %4543 = vst [vmem:[#allocation2 + $0xf0] sm:$0xff] %v4531_v31  ;;  %v4522_v42 = vsel %vm4498_vm0, %v4486_v22, %v4510_v18  ;;  %v9974_v1 = vpop.permute.xlu0 %3905  ;;  %v9976_v0 = vpop.permute.xlu1 %3983  ;;  %v4565_v22 = vld [vmem:[#allocation2 + $0x50] sm:$0xff]  ;;  %v4559_v18 = vld [vmem:[#allocation2 + $0x20] sm:$0xff]  ;;  %v3939_v58 = vadd.f32 %v3912_v23, %v3840_v60 }
 0x6ca   : > { %v4534_v61 = vmul.f32 %v4522_v42, %v11501_v53  ;;  %4802 = vmatpush1.bf16.msra.mxu1 %v4615_v46 }
 0x6cb   : > { %4803 = vmatprep.subr.bf16.mxu1 %v4613_v32  ;;  %v4601_v32 = vpack.c.bf16 %v4565_v22, %v4562_v13  ;;  %v11504_v22 = vld [vmem:[#allocation47_spill] sm:$0xff] }
 0x6cc   : > { %4546 = vst [vmem:[#allocation2 + $0x108] sm:$0xff] %v4534_v61  ;;  %v4612_v47 = vpack.c.bf16 %v4534_v61, %v4531_v31  ;;  %v4556_v31 = vld [vmem:[#allocation2 + $0x8] sm:$0xff]  ;;  %v4561_v61 = vld [vmem:[#allocation2 + $0x30] sm:$0xff]  ;;  %v3914_v44 = vsel %vm1130_vm3, %v11504_v22, %v9974_v1 }
 0x6cd   : > { %v9981_v33 = vpop.permute.xlu0 %3989  ;;  %v9983_v29 = vpop.permute.xlu1 %3815  ;;  %v4600_v6 = vpack.c.bf16 %v4564_v35, %v4561_v61  ;;  %v11505_v13 = vld [vmem:[#allocation31_spill] sm:$0xff]  ;;  %v10014_v1 = vld [vmem:[%s11468_s5 + $0x8] sm:$0xff]   ;;  %v11508_v61 = vld [vmem:[#allocation25_spill] sm:$0xff] }
 0x6ce   : > { %4804 = vmatpush1.bf16.msra.mxu1 %v4612_v47  ;;  %v4598_v47 = vpack.c.bf16 %v4559_v18, %v4556_v31  ;;  %v3842_v26 = vsel %vm1057_vm2, %v11505_v13, %v9968_v41  ;;  %v11506_v31 = vld [vmem:[#allocation7_spill] sm:$0xff] }
 0x6cf   : > { %4805 = vmatprep.subr.bf16.mxu1 %v4610_v50  ;;  %v4558_v50 = vld [vmem:[#allocation2 + $0x18] sm:$0xff]  ;;  %v3942_v45 = vadd.f32 %v3914_v44, %v3842_v26  ;;  %v11515_v13 = vld [vmem:[#allocation35_spill] sm:$0xff] }
 0x6d1   : > { %v9985_v24 = vpop.permute.xlu0 %3821  ;;  %v3888_v56 = vpop.permute.xlu1 %3887 }
 0x6d2   : > { %4806 = vmatpush1.bf16.msra.mxu1 %v4609_v17  ;;  %v4597_v17 = vpack.c.bf16 %v4558_v50, %v4555_v36  ;;  %v11510_v50 = vld [vmem:[#allocation18_spill] sm:$0xff] }
 0x6d3   : > { %4807 = vmatprep.subr.bf16.mxu1 %v4607_v11 }
 0x6d5   : > { %v3894_v40 = vpop.permute.xlu0 %3893  ;;  %v4068_v55 = vpop.permute.xlu1 %4067 }
 0x6d6   : > { %4808 = vmatpush1.bf16.msra.mxu1 %v4606_v3  ;;  %v4080_v59 = vsel %vm1300_vm5, %v9694_v19, %v4068_v55  ;;  %v3908_v19 = vsel %vm1130_vm3, %v11506_v31, %v3888_v56 }
 0x6d7   : > { %4809 = vmatprep.subr.bf16.mxu1 %v4604_v39  ;;  %v3996_v39 = vsel %vm1215_vm4, %v9598_v16, %v9976_v0  ;;  %v3998_v16 = vsel %vm1215_vm4, %v9622_v15, %v9981_v33  ;;  %v11507_v15 = vld [vmem:[#allocation39_spill] sm:$0xff] }
 0x6d8   : > { %v4023_v14 = vadd.f32 %v3996_v39, %v3939_v58  ;;  %v4026_v18 = vadd.f32 %v3998_v16, %v3942_v45  ;;  %v3836_v33 = vsel %vm1057_vm2, %v11507_v15, %v9983_v29 }
 0x6d9   : > { %v4074_v46 = vpop.permute.xlu0 %4073  ;;  %v3972_v42 = vpop.permute.xlu1 %3971  ;;  %v3933_v56 = vadd.f32 %v3908_v19, %v3836_v33 }
 0x6da   : > { %4810 = vmatpush1.bf16.msra.mxu1 %v4603_v43  ;;  %v4107_v0 = vadd.f32 %v4080_v59, %v4023_v14  ;;  %v4082_v55 = vsel %vm1300_vm5, %v9722_v30, %v4074_v46  ;;  %v3992_v35 = vsel %vm1215_vm4, %v11508_v61, %v3972_v42  ;;  %v11509_v30 = vld [vmem:[#allocation13_spill] sm:$0xff]  ;;  %v11512_v42 = vld [vmem:[#allocation26_spill] sm:$0xff] }
 0x6db   : > { %4811 = vmatprep.subr.bf16.mxu1 %v4601_v32  ;;  %v3910_v46 = vsel %vm1130_vm3, %v11509_v30, %v3894_v40  ;;  %v4110_v36 = vadd.f32 %v4082_v55, %v4026_v18  ;;  %v3838_v60 = vsel %vm1057_vm2, %v11512_v42, %v9985_v24 }
 0x6dc   : > { %v3936_v44 = vadd.f32 %v3910_v46, %v3838_v60  ;;  %v11520_v60 = vld [vmem:[#allocation19_spill] sm:$0xff] }
 0x6dd   : > { %v3978_v9 = vpop.permute.xlu0 %3977  ;;  %v4056_v21 = vpop.permute.xlu1 %4055  ;;  %v4122_v24 = vadd.f32 %v11515_v13, %v4110_v36 }
 0x6de   : > { %4812 = vmatpush1.bf16.msra.mxu1 %v4600_v6  ;;  %v4119_v6 = vadd.f32 %v11510_v50, %v4107_v0  ;;  %v11518_v50 = vld [vmem:[#allocation36_spill] sm:$0xff] }
 0x6df   : > { %4813 = vmatprep.subr.bf16.mxu1 %v4598_v47 }
 0x6e1   : > { %v4062_v52 = vpop.permute.xlu0 %4061  ;;  %v4184_v11 = vpop.permute.xlu1 %4183 }
 0x6e2   : > { %4814 = vmatpush1.bf16.msra.mxu1 %v4597_v17  ;;  %v4193_v47 = vsel %vm1418_vm14, %v11481_v28, %v4184_v11  ;;  %v11511_v17 = vld [vmem:[#allocation45_spill] sm:$0xff]  ;;  %v4017_v28 = vadd.f32 %v3992_v35, %v3933_v56  ;;  %v11513_v11 = vld [vmem:[#allocation34_spill] sm:$0xff] }
 0x6e3   : > { %6185 = vmatprep.subr.bf16.mxu1 %v11503_v12  ;;  %v4076_v23 = vsel %vm1300_vm5, %v11511_v17, %v4056_v21  ;;  %v3994_v39 = vsel %vm1215_vm4, %v11513_v11, %v3978_v9  ;;  %v4203_v58 = vadd.f32 %v4193_v47, %v4119_v6  ;;  %v10052_v9 = vld [vmem:[%s11468_s5 + $0x10] sm:$0xff]   ;;  %v11517_v47 = vld [vmem:[#allocation22_spill] sm:$0xff] }
 0x6e4   : > { %v4101_v14 = vadd.f32 %v4076_v23, %v4017_v28  ;;  %v4020_v16 = vadd.f32 %v3994_v39, %v3936_v44  ;;  %v11521_v11 = vld [vmem:[#allocation54_spill] sm:$0xff] }
 0x6e5   : > { %v4186_v37 = vpop.permute.xlu0 %4185  ;;  %v4268_v3 = vpop.permute.xlu1 %4267  ;;  %6682 = vmatmul.mubr.msk.bf16.vlgmr.msra.gmra.mxu1 %vm4744_vm13, %v9832_v38 }
 0x6e6   : > { %4841 = vmatprep.mubr.bf16.mxu1 %v11503_v12  ;;  %v4277_v29 = vsel %vm1504_vm15, %v11485_v54, %v4268_v3  ;;  %v4194_v59 = vsel %vm1418_vm14, %v9606_v62, %v4186_v37  ;;  %v11514_v54 = vld [vmem:[#allocation23_spill] sm:$0xff] }
 0x6e7   : > { %v4078_v3 = vsel %vm1300_vm5, %v11514_v54, %v4062_v52  ;;  %v4287_v26 = vadd.f32 %v4277_v29, %v4203_v58  ;;  %v4206_v62 = vadd.f32 %v4194_v59, %v4122_v24  ;;  %v10100_v24 = vld [vmem:[%s11468_s5 + $0x20] sm:$0xff]  }
 0x6e8   : > { %v4104_v52 = vadd.f32 %v4078_v3, %v4020_v16 }
 0x6e9   : > { %v4270_v38 = vpop.permute.xlu0 %4269  ;;  %v4180_v43 = vpop.permute.xlu1 %4179 }
 0x6ea   : > { %v4278_v45 = vsel %vm1504_vm15, %v11491_v8, %v4270_v38  ;;  %v4191_v31 = vsel %vm1418_vm14, %v9590_v34, %v4180_v43  ;;  %v11516_v38 = vld [vmem:[#allocation44_spill] sm:$0xff] }
 0x6eb   : > { %v4290_v8 = vadd.f32 %v4278_v45, %v4206_v62  ;;  %v4113_v18 = vadd.f32 %v4101_v14, %v11516_v38  ;;  %v4581_v38 = vld [vmem:[#allocation2 + $0xd0] sm:$0xff] }
 0x6ed   : > { %v4182_v32 = vpop.permute.xlu0 %4181  ;;  %v4352_v41 = vpop.permute.xlu1 %4351  ;;  %6683 = vmatmul.mubr.msk.bf16.gmra.mxu1 %vm4744_vm13, %v10014_v1  ;;  %v4197_v33 = vadd.f32 %v4191_v31, %v4113_v18 }
 0x6ee   : > { %4851 = vmatprep.mubr.bf16.mxu1 %v11503_v12  ;;  %v4361_v21 = vsel %vm1590_vm11, %v11487_v25, %v4352_v41 }
 0x6ef   : > { %v4371_v37 = vadd.f32 %v4361_v21, %v4287_v26 }
 0x6f1   : > { %v4354_v22 = vpop.permute.xlu0 %4353  ;;  %v4264_v40 = vpop.permute.xlu1 %4263 }
 0x6f2   : > { %v4362_v19 = vsel %vm1590_vm11, %v11494_v10, %v4354_v22  ;;  %v4275_v15 = vsel %vm1504_vm15, %v9638_v49, %v4264_v40  ;;  %v4116_v10 = vadd.f32 %v4104_v52, %v11517_v47  ;;  %v4584_v52 = vld [vmem:[#allocation2 + $0xe8] sm:$0xff]  ;;  %v4563_v47 = vld [vmem:[#allocation2 + $0x40] sm:$0xff] }
 0x6f3   : > { %v4374_v61 = vadd.f32 %v4362_v19, %v4290_v8  ;;  %v4281_v46 = vadd.f32 %v4275_v15, %v4197_v33  ;;  %v4611_v18 = vpack.c.bf16 %v4584_v52, %v4581_v38  ;;  %v4575_v15 = vld [vmem:[#allocation2 + $0xa0] sm:$0xff] }
 0x6f5   : > { %v4266_v0 = vpop.permute.xlu0 %4265  ;;  %v4436_v25 = vpop.permute.xlu1 %4435  ;;  %6684 = vmatmul.mubr.msk.bf16.gmra.mxu1 %vm4744_vm13, %v10052_v9 }
 0x6f6   : > { %v4445_v55 = vsel %vm1676_vm12, %v11493_v20, %v4436_v25  ;;  %4861 = vmatprep.mubr.bf16.mxu1 %v11503_v12  ;;  %v4192_v20 = vsel %vm1418_vm14, %v9614_v63, %v4182_v32  ;;  %v4276_v6 = vsel %vm1504_vm15, %v11518_v50, %v4266_v0  ;;  %v7097_v50 = vld [vmem:[%s11468_s5 + $0x50] sm:$0xff]  }
 0x6f7   : > { %v4455_v41 = vadd.f32 %v4445_v55, %v4371_v37  ;;  %v4200_v17 = vadd.f32 %v4192_v20, %v4116_v10  ;;  %v7093_v55 = vld [vmem:[%s11468_s5 + $0x30] sm:$0xff]   ;;  %v4566_v10 = vld [vmem:[#allocation2 + $0x58] sm:$0xff] }
 0x6f8   : > { %v4557_v20 = vld [vmem:[#allocation2 + $0x10] sm:$0xff] }
 0x6f9   : > { %v4491_v35 = vadd.f32 %v11498_v2, %v4455_v41  ;;  %v4438_v34 = vpop.permute.xlu0 %4437  ;;  %v4348_v43 = vpop.permute.xlu1 %4347  ;;  %v10079_v2 = vld [vmem:[%s11468_s5 + $0x18] sm:$0xff]   ;;  %v4284_v58 = vadd.f32 %v4276_v6, %v4200_v17  ;;  %v7101_v6 = vld [vmem:[%s11468_s5 + $0x70] sm:$0xff]  }
 0x6fa   : > { %v4446_v56 = vsel %vm1676_vm12, %v9758_v7, %v4438_v34  ;;  %v4359_v30 = vsel %vm1590_vm11, %v9686_v4, %v4348_v43  ;;  %v11519_v4 = vld [vmem:[#allocation37_spill] sm:$0xff]  ;;  %v4578_v41 = vld [vmem:[#allocation2 + $0xb8] sm:$0xff] }
 0x6fb   : > { %vm4503_vm6 = vcmp.ge.f32.partialorder %v4491_v35, 0.0  ;;  %v4515_v49 = vmul.f32 0.01, %v4491_v35  ;;  %v4458_v36 = vadd.f32 %v4446_v56, %v4374_v61  ;;  %v4365_v7 = vadd.f32 %v4359_v30, %v4281_v46  ;;  %v4569_v61 = vld [vmem:[#allocation2 + $0x70] sm:$0xff]  ;;  %v7094_v34 = vld [vmem:[%s11468_s5 + $0x38] sm:$0xff]   ;;  %v4560_v56 = vld [vmem:[#allocation2 + $0x28] sm:$0xff] }
 0x6fc   : > { %v4608_v33 = vpack.c.bf16 %v4578_v41, %v4575_v15  ;;  %v4602_v30 = vpack.c.bf16 %v4566_v10, %v4563_v47  ;;  %v7095_v46 = vld [vmem:[%s11468_s5 + $0x40] sm:$0xff]   ;;  %v7102_v17 = vld [vmem:[%s11468_s5 + $0x78] sm:$0xff]  }
 0x6fd   : > { %v4527_v63 = vsel %vm4503_vm6, %v4491_v35, %v4515_v49  ;;  %v4494_v32 = vadd.f32 %v11502_v48, %v4458_v36  ;;  %v4350_v23 = vpop.permute.xlu0 %4349  ;;  %v4432_v29 = vpop.permute.xlu1 %4431  ;;  %6685 = vmatmul.mubr.msk.bf16.gmra.mxu1 %vm4744_vm13, %v10079_v2  ;;  %v4572_v35 = vld [vmem:[#allocation2 + $0x88] sm:$0xff]  ;;  %v4599_v49 = vpack.c.bf16 %v4560_v56, %v4557_v20 }
 0x6fe   : > { %v4539_v42 = vmul.f32 %v4527_v63, %v11519_v4  ;;  %v4360_v28 = vsel %vm1590_vm11, %v11520_v60, %v4350_v23  ;;  %v4443_v39 = vsel %vm1676_vm12, %v11521_v11, %v4432_v29  ;;  %4871 = vmatprep.mubr.bf16.mxu1 %v11503_v12  ;;  %v4605_v43 = vpack.c.bf16 %v4572_v35, %v4569_v61  ;;  %v7096_v36 = vld [vmem:[%s11468_s5 + $0x48] sm:$0xff]   ;;  %v7103_v63 = vld [vmem:[%s11468_s5 + $0x80] sm:$0xff]  }
 0x6ff   : > { %vm4506_vm9 = vcmp.ge.f32.partialorder %v4494_v32, 0.0  ;;  %v4518_v22 = vmul.f32 0.01, %v4494_v32  ;;  %v4449_v48 = vadd.f32 %v4443_v39, %v4365_v7  ;;  %v4368_v44 = vadd.f32 %v4360_v28, %v4284_v58 }
 0x700   : > { %4551 = vst.msk [vmem:[#allocation2 + $0x130] sm:$0xff] %vm424_vm1, %v4539_v42 }
 0x701   : > { %v4530_v40 = vsel %vm4506_vm9, %v4494_v32, %v4518_v22  ;;  %v4485_v59 = vadd.f32 %v11479_v5, %v4449_v48  ;;  %v4434_v21 = vpop.permute.xlu0 %4433  ;;  %v7104_v32 = vld [vmem:[%s11468_s5 + $0x88] sm:$0xff]   ;;  %vm11560_vm9 = vcmask 130048  }
 0x702   : > { %v4542_v14 = vmul.f32 %v4530_v40, %v11519_v4  ;;  %v4444_v54 = vsel %vm1676_vm12, %v9802_v57, %v4434_v21 }
 0x703   : > { %vm4497_vm7 = vcmp.ge.f32.partialorder %v4485_v59, 0.0  ;;  %v4509_v3 = vmul.f32 0.01, %v4485_v59  ;;  %v4452_v13 = vadd.f32 %v4444_v54, %v4368_v44 }
 0x704   : > { %4554 = vst.msk [vmem:[#allocation2 + $0x148] sm:$0xff] %vm424_vm1, %v4542_v14 }
 0x705   : > { %v4521_v26 = vsel %vm4497_vm7, %v4485_v59, %v4509_v3  ;;  %v4488_v16 = vadd.f32 %v11484_v27, %v4452_v13  ;;  %6686 = vmatmul.mubr.msk.bf16.gmra.mxu1 %vm4744_vm13, %v10100_v24  ;;  %v7092_v27 = vld [vmem:[%s11468_s5 + $0x28] sm:$0xff]   ;;  %vm11561_vm7 = vmmov %vm11560_vm9 }
 0x706   : > { %v4533_v5 = vmul.f32 %v4521_v26, %v11519_v4  ;;  %4881 = vmatprep.mubr.bf16.mxu1 %v11503_v12 }
 0x707   : > { %vm4500_vm0 = vcmp.ge.f32.partialorder %v4488_v16, 0.0  ;;  %v4512_v57 = vmul.f32 0.01, %v4488_v16  ;;  %v4593_v37 = vld [vmem:[#allocation2 + $0x130] sm:$0xff] }
 0x708   : > { %4545 = vst.msk [vmem:[#allocation2 + $0x100] sm:$0xff] %vm424_vm1, %v4533_v5 }
 0x709   : > { %v4524_v45 = vsel %vm4500_vm0, %v4488_v16, %v4512_v57 }
 0x70a   : > { %v4536_v62 = vmul.f32 %v4524_v45, %v11519_v4 }
 0x70b   : > { %v4596_v0 = vld [vmem:[#allocation2 + $0x148] sm:$0xff] }
 0x70c   : > { %4548 = vst.msk [vmem:[#allocation2 + $0x118] sm:$0xff] %vm424_vm1, %v4536_v62  ;;  %v4617_v25 = vpack.c.bf16 %v4596_v0, %v4593_v37 }
 0x70d   : > { %6687 = vmatmul.mubr.msk.bf16.gmra.mxu1 %vm4744_vm13, %v7092_v27 }
 0x70e   : > { %6954 = vmatprep.subr.bf16.mxu0 %v4617_v25  ;;  %4891 = vmatprep.mubr.bf16.mxu1 %v11503_v12 }
 0x70f   : > { %6955 = vmatpush3.bf16.msra.mxu0 %v4617_v25  ;;  %v4587_v31 = vld [vmem:[#allocation2 + $0x100] sm:$0xff] }
 0x713   : > { %v4590_v19 = vld [vmem:[#allocation2 + $0x118] sm:$0xff] }
 0x714   : > { %v4614_v8 = vpack.c.bf16 %v4590_v19, %v4587_v31 }
 0x715   : > { %6688 = vmatmul.mubr.msk.bf16.gmra.mxu1 %vm4744_vm13, %v7093_v55 }
 0x716   : > { %6956 = vmatprep.subr.bf16.mxu0 %v4614_v8  ;;  %4901 = vmatprep.mubr.bf16.mxu1 %v11503_v12 }
 0x717   : > { %6957 = vmatpush3.bf16.msra.mxu0 %v4614_v8 }
 0x718   : > { %6958 = vmatprep.subr.bf16.mxu0 %v4611_v18 }
 0x71b   : > { %6959 = vmatpush3.bf16.msra.mxu0 %v4611_v18 }
 0x71c   : > { %6960 = vmatprep.subr.bf16.mxu0 %v4608_v33 }
 0x71d   : > { %6689 = vmatmul.mubr.msk.bf16.gmra.mxu1 %vm4744_vm13, %v7094_v34 }
 0x71e   : > { %4911 = vmatprep.mubr.bf16.mxu1 %v11503_v12 }
 0x71f   : > { %6961 = vmatpush3.bf16.msra.mxu0 %v4608_v33 }
 0x720   : > { %6962 = vmatprep.subr.bf16.mxu0 %v4605_v43 }
 0x723   : > { %6963 = vmatpush3.bf16.msra.mxu0 %v4605_v43 }
 0x724   : > { %6964 = vmatprep.subr.bf16.mxu0 %v4602_v30 }
 0x725   : > { %6690 = vmatmul.mubr.msk.bf16.gmra.mxu1 %vm4744_vm13, %v7095_v46 }
 0x726   : > { %4921 = vmatprep.mubr.bf16.mxu1 %v11503_v12 }
 0x727   : > { %6965 = vmatpush3.bf16.msra.mxu0 %v4602_v30 }
 0x728   : > { %6966 = vmatprep.subr.bf16.mxu0 %v4599_v49 }
 0x72b   : > { %6967 = vmatpush3.bf16.msra.mxu0 %v4599_v49 }
 0x72d   : > { %6691 = vmatmul.mubr.msk.bf16.gmra.mxu1 %vm4744_vm13, %v7096_v36 }
 0x72e   : > { %6969 = vmatmul.mubr.msk.bf16.vlgmr.msra.gmra.mxu0 %vm4744_vm13, %v10014_v1  ;;  %4931 = vmatprep.mubr.bf16.mxu1 %v11503_v12  ;;  %v7098_v1 = vld [vmem:[%s11468_s5 + $0x58] sm:$0xff]  }
 0x72f   : > { %6972 = vmatprep.mubr.msk.bf16.mxu0 %vm4744_vm13, %v10052_v9  ;;  %v7099_v9 = vld [vmem:[%s11468_s5 + $0x60] sm:$0xff]  }
 0x735   : > { %6692 = vmatmul.mubr.msk.bf16.gmra.mxu1 %vm4744_vm13, %v7097_v50 }
 0x736   : > { %6973 = vmatmul.mubr.msk.bf16.gmra.mxu0 %vm4744_vm13, %v10079_v2  ;;  %4941 = vmatprep.mubr.bf16.mxu1 %v11503_v12  ;;  %v7100_v2 = vld [vmem:[%s11468_s5 + $0x68] sm:$0xff]   ;;  %s11620_s5 = smov 49  }
 0x737   : > { %6976 = vmatprep.mubr.msk.bf16.mxu0 %vm4744_vm13, %v10100_v24 }
 0x73d   : > { %6693 = vmatmul.mubr.msk.bf16.gmra.mxu1 %vm4744_vm13, %v7098_v1 }
 0x73e   : > { %6977 = vmatmul.mubr.msk.bf16.gmra.mxu0 %vm4744_vm13, %v7092_v27  ;;  %4951 = vmatprep.mubr.bf16.mxu1 %v11503_v12 }
 0x73f   : > { %6980 = vmatprep.mubr.msk.bf16.mxu0 %vm4744_vm13, %v7093_v55 }
 0x745   : > { %6694 = vmatmul.mubr.msk.bf16.gmra.mxu1 %vm4744_vm13, %v7099_v9 }
 0x746   : > { %6981 = vmatmul.mubr.msk.bf16.gmra.mxu0 %vm4744_vm13, %v7094_v34  ;;  %4961 = vmatprep.mubr.bf16.mxu1 %v11503_v12 }
 0x747   : > { %6984 = vmatprep.mubr.msk.bf16.mxu0 %vm4744_vm13, %v7095_v46 }
 0x74d   : > { %6695 = vmatmul.mubr.msk.bf16.gmra.mxu1 %vm4744_vm13, %v7100_v2 }
 0x74e   : > { %6985 = vmatmul.mubr.msk.bf16.gmra.mxu0 %vm4744_vm13, %v7096_v36  ;;  %4971 = vmatprep.mubr.bf16.mxu1 %v11503_v12 }
 0x74f   : > { %6988 = vmatprep.mubr.msk.bf16.mxu0 %vm4744_vm13, %v7097_v50 }
 0x755   : > { %6696 = vmatmul.mubr.msk.bf16.gmra.mxu1 %vm4744_vm13, %v7101_v6 }
 0x756   : > { %6989 = vmatmul.mubr.msk.bf16.gmra.mxu0 %vm4744_vm13, %v7098_v1  ;;  %4981 = vmatprep.mubr.bf16.mxu1 %v11503_v12 }
 0x757   : > { %6992 = vmatprep.mubr.msk.bf16.mxu0 %vm4744_vm13, %v7099_v9 }
 0x75d   : > { %6697 = vmatmul.mubr.msk.bf16.gmra.mxu1 %vm4744_vm13, %v7102_v17 }
 0x75e   : > { %6993 = vmatmul.mubr.msk.bf16.gmra.mxu0 %vm4744_vm13, %v7100_v2  ;;  %4991 = vmatprep.mubr.bf16.mxu1 %v11503_v12 }
 0x75f   : > { %6996 = vmatprep.mubr.msk.bf16.mxu0 %vm4744_vm13, %v7101_v6 }
 0x765   : > { %6698 = vmatmul.mubr.msk.bf16.gmra.mxu1 %vm4744_vm13, %v7103_v63 }
 0x766   : > { %6997 = vmatmul.mubr.msk.bf16.gmra.mxu0 %vm4744_vm13, %v7102_v17  ;;  %5001 = vmatprep.mubr.bf16.mxu1 %v11503_v12 }
 0x767   : > { %7000 = vmatprep.mubr.msk.bf16.mxu0 %vm4744_vm13, %v7103_v63 }
 0x76d   : > { %6699 = vmatmul.mubr.msk.bf16.gmra.mxu1 %vm4744_vm13, %v7104_v32 }
 0x76e   : > { %7001 = vmatmul.mubr.msk.bf16.gmra.mxu0 %vm4744_vm13, %v7104_v32  ;;  %vm11558_vm13 = vcmask 1039360  }
 0x76f   : > { %vm11559_vm6 = vmmov %vm11558_vm13 }
 0x770   : > { %vm11562_vm0 = vmmov %vm11559_vm6 }
 0x7a5   : > { %v4833_v7 = vpop.f32.mrf.mxu1 }
 0x7a7   : > { %v4835_v23 = vpop.f32.mrf.mxu1 }
 0x7a8   : > { %5215 = vrot.lane.b32.xlu0 %v4835_v23, %s11522_s0  ;;  %v10298_v23 = vpop.permute.xlu0 %5872 }
 0x7a9   : > { %v4837_v29 = vpop.f32.mrf.mxu1  ;;  %11531 = vst [vmem:[#allocation3_spill] sm:$0xff] %v10298_v23 }
 0x7ab   : > { %v4839_v42 = vpop.f32.mrf.mxu1 }
 0x7ad   : > { %v4843_v60 = vpop.f32.mrf.mxu1 }
 0x7af   : > { %v4845_v28 = vpop.f32.mrf.mxu1 }
 0x7b1   : > { %v4847_v11 = vpop.f32.mrf.mxu1 }
 0x7b3   : > { %v4849_v39 = vpop.f32.mrf.mxu1 }
 0x7b5   : > { %v4853_v58 = vpop.f32.mrf.mxu1 }
 0x7b7   : > { %v4855_v40 = vpop.f32.mrf.mxu1 }
 0x7b9   : > { %v4857_v59 = vpop.f32.mrf.mxu1 }
 0x7bb   : > { %v4859_v21 = vpop.f32.mrf.mxu1 }
 0x7bd   : > { %v10202_v54 = vpop.f32.mrf.mxu1 }
 0x7bf   : > { %v4865_v3 = vpop.f32.mrf.mxu1 }
 0x7c1   : > { %v10208_v24 = vpop.f32.mrf.mxu1 }
 0x7c3   : > { %v10212_v16 = vpop.f32.mrf.mxu1 }
 0x7c5   : > { %v10216_v5 = vpop.f32.mrf.mxu1 }
 0x7c7   : > { %v4875_v45 = vpop.f32.mrf.mxu1 }
 0x7c9   : > { %v4877_v62 = vpop.f32.mrf.mxu1 }
 0x7cb   : > { %v4879_v0 = vpop.f32.mrf.mxu1 }
 0x7cd   : > { %v4883_v27 = vpop.f32.mrf.mxu1 }
 0x7cf   : > { %v10228_v52 = vpop.f32.mrf.mxu1 }
 0x7d1   : > { %v4887_v19 = vpop.f32.mrf.mxu1 }
 0x7d3   : > { %v10234_v8 = vpop.f32.mrf.mxu1 }
 0x7d5   : > { %v4893_v38 = vpop.f32.mrf.mxu1 }
 0x7d7   : > { %v10240_v41 = vpop.f32.mrf.mxu1 }
 0x7d9   : > { %v4897_v15 = vpop.f32.mrf.mxu1 }
 0x7db   : > { %v10246_v61 = vpop.f32.mrf.mxu1 }
 0x7dd   : > { %v4903_v34 = vpop.f32.mrf.mxu1 }
 0x7df   : > { %v10252_v47 = vpop.f32.mrf.mxu1 }
 0x7e1   : > { %v4907_v10 = vpop.f32.mrf.mxu1 }
 0x7e3   : > { %v10258_v56 = vpop.f32.mrf.mxu1 }
 0x7e5   : > { %v10265_v46 = vpop.f32.mrf.mxu1 }
 0x7e6   : > { %11525 = vst [vmem:[#allocation41_spill] sm:$0xff] %v10265_v46 }
 0x7e7   : > { %v10273_v36 = vpop.f32.mrf.mxu1 }
 0x7e9   : > { %v10280_v1 = vpop.f32.mrf.mxu1 }
 0x7ea   : > { %11527 = vst [vmem:[#allocation42_spill] sm:$0xff] %v10280_v1 }
 0x7eb   : > { %v10286_v2 = vpop.f32.mrf.mxu1 }
 0x7ed   : > { %v10290_v17 = vpop.f32.mrf.mxu1 }
 0x7ee   : > { %v6970_v22 = vpop.f32.mrf.mxu0  ;;  %11529 = vst [vmem:[#allocation9_spill] sm:$0xff] %v10290_v17 }
 0x7ef   : > { %5197 = vrot.lane.b32.xlu1 %v6970_v22, %s11523_s23  ;;  %v10294_v32 = vpop.f32.mrf.mxu1 }
 0x7f0   : > { %v5046_v48 = vpop.f32.mrf.mxu0 }
 0x7f2   : > { %v6971_v44 = vpop.f32.mrf.mxu0 }
 0x7f3   : > { %5229 = vrot.lane.b32.xlu1 %v6970_v22, %s11522_s0  ;;  %5199 = vrot.lane.b32.xlu0 %v6971_v44, %s11523_s23 }
 0x7f4   : > { %v5049_v14 = vpop.f32.mrf.mxu0 }
 0x7f6   : > { %v6974_v13 = vpop.f32.mrf.mxu0 }
 0x7f7   : > { %5213 = vrot.lane.b32.xlu1 %v4833_v7, %s11522_s0  ;;  %5235 = vrot.lane.b32.xlu0 %v6971_v44, %s11522_s0  ;;  %v10296_v7 = vpop.permute.xlu1 %5867 }
 0x7f8   : > { %v5062_v26 = vpop.f32.mrf.mxu0  ;;  %11530 = vst [vmem:[#allocation49_spill] sm:$0xff] %v10296_v7 }
 0x7fa   : > { %v6975_v57 = vpop.f32.mrf.mxu0 }
 0x7fb   : > { %5193 = vrot.lane.b32.xlu1 %v5046_v48, %s11523_s23  ;;  %5195 = vrot.lane.b32.xlu0 %v5049_v14, %s11523_s23 }
 0x7fc   : > { %v5065_v37 = vpop.f32.mrf.mxu0 }
 0x7fe   : > { %v6978_v25 = vpop.f32.mrf.mxu0 }
 0x7ff   : > { %5217 = vrot.lane.b32.xlu1 %v5046_v48, %s11522_s0  ;;  %5223 = vrot.lane.b32.xlu0 %v5049_v14, %s11522_s0 }
 0x800   : > { %v5078_v31 = vpop.f32.mrf.mxu0 }
 0x802   : > { %v6979_v55 = vpop.f32.mrf.mxu0 }
 0x803   : > { %5219 = vrot.lane.b32.xlu1 %v4837_v29, %s11522_s0  ;;  %5221 = vrot.lane.b32.xlu0 %v4839_v42, %s11522_s0  ;;  %v10303_v29 = vpop.f32.mrf.mxu1 }
 0x804   : > { %v5081_v18 = vpop.f32.mrf.mxu0  ;;  %11532 = vst [vmem:[#allocation4_spill] sm:$0xff] %v10303_v29 }
 0x806   : > { %v6982_v33 = vpop.f32.mrf.mxu0 }
 0x807   : > { %5227 = vrot.lane.b32.xlu0 %v4845_v28, %s11522_s0  ;;  %5269 = vrot.lane.b32.xlu1 %v6974_v13, %s11524_s24 }
 0x808   : > { %v5094_v35 = vpop.f32.mrf.mxu0 }
 0x80a   : > { %v6983_v43 = vpop.f32.mrf.mxu0 }
 0x80b   : > { %5301 = vrot.lane.b32.xlu1 %v6974_v13, %s11407_s27  ;;  %5271 = vrot.lane.b32.xlu0 %v6975_v57, %s11524_s24 }
 0x80c   : > { %v5097_v20 = vpop.f32.mrf.mxu0 }
 0x80e   : > { %v10260_v30 = vpop.f32.mrf.mxu0 }
 0x80f   : > { %5265 = vrot.lane.b32.xlu1 %v5062_v26, %s11524_s24  ;;  %5307 = vrot.lane.b32.xlu0 %v6975_v57, %s11407_s27 }
 0x810   : > { %v10267_v49 = vpop.f32.mrf.mxu0 }
 0x812   : > { %v10275_v50 = vpop.f32.mrf.mxu0 }
 0x813   : > { %5289 = vrot.lane.b32.xlu1 %v5062_v26, %s11407_s27  ;;  %5267 = vrot.lane.b32.xlu0 %v5065_v37, %s11524_s24  ;;  %11526 = vst [vmem:[#allocation43_spill] sm:$0xff] %v10275_v50 }
 0x814   : > { %v10282_v9 = vpop.f32.mrf.mxu0 }
 0x815   : > { %11528 = vst [vmem:[#allocation20_spill] sm:$0xff] %v10282_v9 }
 0x816   : > { %v6990_v6 = vpop.f32.mrf.mxu0 }
 0x817   : > { %5225 = vrot.lane.b32.xlu1 %v4843_v60, %s11522_s0  ;;  %5295 = vrot.lane.b32.xlu0 %v5065_v37, %s11407_s27 }
 0x818   : > { %v5126_v63 = vpop.f32.mrf.mxu0 }
 0x81a   : > { %v10305_v42 = vpop.permute.xlu0 %5215  ;;  %v6991_v28 = vpop.f32.mrf.mxu0 }
 0x81b   : > { %5231 = vrot.lane.b32.xlu1 %v4847_v11, %s11522_s0  ;;  %5233 = vrot.lane.b32.xlu0 %v4849_v39, %s11522_s0  ;;  %v10311_v11 = vpop.f32.mrf.mxu1 }
 0x81c   : > { %v5129_v22 = vpop.f32.mrf.mxu0 }
 0x81d   : > { %v4933_v48 = vpop.f32.mrf.mxu1 }
 0x81f   : > { %5287 = vrot.lane.b32.xlu0 %v4855_v40, %s11407_s27  ;;  %5353 = vrot.lane.b32.xlu1 %v6978_v25, %s11406_s26 }
 0x823   : > { %5385 = vrot.lane.b32.xlu1 %v6978_v25, %s11417_s29  ;;  %5355 = vrot.lane.b32.xlu0 %v6979_v55, %s11406_s26 }
 0x827   : > { %5285 = vrot.lane.b32.xlu1 %v4853_v58, %s11407_s27  ;;  %5391 = vrot.lane.b32.xlu0 %v6979_v55, %s11417_s29 }
 0x82b   : > { %5349 = vrot.lane.b32.xlu1 %v5078_v31, %s11406_s26  ;;  %5351 = vrot.lane.b32.xlu0 %v5081_v18, %s11406_s26 }
 0x82f   : > { %5373 = vrot.lane.b32.xlu1 %v5078_v31, %s11417_s29  ;;  %5379 = vrot.lane.b32.xlu0 %v5081_v18, %s11417_s29 }
 0x833   : > { %5291 = vrot.lane.b32.xlu1 %v4857_v59, %s11407_s27  ;;  %5293 = vrot.lane.b32.xlu0 %v4859_v21, %s11407_s27  ;;  %v4935_v59 = vpop.f32.mrf.mxu1 }
 0x837   : > { %5299 = vrot.lane.b32.xlu0 %v4865_v3, %s11407_s27  ;;  %5437 = vrot.lane.b32.xlu1 %v6982_v33, %s11410_s28  ;;  %v10332_v3 = vpop.f32.mrf.mxu1 }
 0x83b   : > { %5469 = vrot.lane.b32.xlu1 %v6982_v33, %s11423_s13  ;;  %5439 = vrot.lane.b32.xlu0 %v6983_v43, %s11410_s28 }
 0x83f   : > { %5433 = vrot.lane.b32.xlu1 %v5094_v35, %s11410_s28  ;;  %5475 = vrot.lane.b32.xlu0 %v6983_v43, %s11423_s13 }
 0x843   : > { %5457 = vrot.lane.b32.xlu1 %v5094_v35, %s11423_s13  ;;  %5435 = vrot.lane.b32.xlu0 %v5097_v20, %s11410_s28 }
 0x847   : > { %5297 = vrot.lane.b32.xlu1 %v10202_v54, %s11407_s27  ;;  %5463 = vrot.lane.b32.xlu0 %v5097_v20, %s11423_s13  ;;  %v6994_v54 = vpop.f32.mrf.mxu0 }
 0x849   : > { %v5142_v26 = vpop.f32.mrf.mxu0 }
 0x84b   : > { %5303 = vrot.lane.b32.xlu1 %v10208_v24, %s11407_s27  ;;  %5305 = vrot.lane.b32.xlu0 %v10212_v16, %s11407_s27  ;;  %v4939_v16 = vpop.f32.mrf.mxu1 }
 0x84f   : > { %5369 = vrot.lane.b32.xlu1 %v10216_v5, %s11417_s29  ;;  %5371 = vrot.lane.b32.xlu0 %v4875_v45, %s11417_s29  ;;  %v4943_v45 = vpop.f32.mrf.mxu1 }
 0x853   : > { %5375 = vrot.lane.b32.xlu1 %v4877_v62, %s11417_s29  ;;  %5377 = vrot.lane.b32.xlu0 %v4879_v0, %s11417_s29  ;;  %v6995_v0 = vpop.f32.mrf.mxu0 }
 0x855   : > { %v5145_v31 = vpop.f32.mrf.mxu0 }
 0x857   : > { %5381 = vrot.lane.b32.xlu1 %v4883_v27, %s11417_s29  ;;  %5553 = vrot.lane.b32.xlu0 %v6990_v6, %s11422_s30  ;;  %v4945_v27 = vpop.f32.mrf.mxu1  ;;  %v6998_v18 = vpop.f32.mrf.mxu0 }
 0x859   : > { %v5158_v35 = vpop.f32.mrf.mxu0 }
 0x85b   : > { %5387 = vrot.lane.b32.xlu1 %v4887_v19, %s11417_s29  ;;  %5541 = vrot.lane.b32.xlu0 %v5126_v63, %s11422_s30  ;;  %v10357_v19 = vpop.f32.mrf.mxu1 }
 0x85f   : > { %5453 = vrot.lane.b32.xlu1 %v4893_v38, %s11423_s13  ;;  %5383 = vrot.lane.b32.xlu0 %v10228_v52, %s11417_s29  ;;  %v4949_v38 = vpop.f32.mrf.mxu1 }
 0x861   : > { %v10307_v60 = vpop.permute.xlu1 %5197 }
 0x863   : > { %5459 = vrot.lane.b32.xlu1 %v4897_v15, %s11423_s13  ;;  %5559 = vrot.lane.b32.xlu0 %v6991_v28, %s11422_s30 }
 0x865   : > { %v10313_v39 = vpop.permute.xlu0 %5199  ;;  %v10315_v58 = vpop.permute.xlu1 %5229 }
 0x866   : > { %11533 = vst [vmem:[#allocation14_spill] sm:$0xff] %v10313_v39 }
 0x867   : > { %5465 = vrot.lane.b32.xlu1 %v4903_v34, %s11423_s13  ;;  %5547 = vrot.lane.b32.xlu0 %v5129_v22, %s11422_s30 }
 0x869   : > { %v10319_v40 = vpop.permute.xlu0 %5235  ;;  %v10321_v44 = vpop.permute.xlu1 %5213 }
 0x86a   : > { %11534 = vst [vmem:[#allocation38_spill] sm:$0xff] %v10319_v40  ;;  %11535 = vst [vmem:[#allocation12_spill] sm:$0xff] %v10321_v44 }
 0x86b   : > { %5471 = vrot.lane.b32.xlu1 %v4907_v10, %s11423_s13  ;;  %5389 = vrot.lane.b32.xlu0 %v10234_v8, %s11417_s29 }
 0x86d   : > { %v10326_v21 = vpop.permute.xlu0 %5195  ;;  %v10328_v14 = vpop.permute.xlu1 %5193 }
 0x86e   : > { %11536 = vst [vmem:[#allocation51_spill] sm:$0xff] %v10326_v21  ;;  %11537 = vst [vmem:[#allocation16_spill] sm:$0xff] %v10328_v14 }
 0x86f   : > { %5537 = vrot.lane.b32.xlu1 %v4933_v48, %s11422_s30  ;;  %5637 = vrot.lane.b32.xlu0 %v6994_v54, %s11313_s16 }
 0x871   : > { %v10334_v13 = vpop.permute.xlu0 %5223  ;;  %v10336_v24 = vpop.permute.xlu1 %5217 }
 0x872   : > { %11538 = vst [vmem:[#allocation10_spill] sm:$0xff] %v10334_v13 }
 0x873   : > { %5581 = vrot.lane.b32.xlu1 %v4933_v48, %s11345_s18  ;;  %5625 = vrot.lane.b32.xlu0 %v5142_v26, %s11313_s16 }
 0x875   : > { %v10340_v5 = vpop.permute.xlu0 %5221  ;;  %v10342_v57 = vpop.permute.xlu1 %5219 }
 0x877   : > { %5539 = vrot.lane.b32.xlu1 %v4935_v59, %s11422_s30  ;;  %5455 = vrot.lane.b32.xlu0 %v10240_v41, %s11423_s13  ;;  %v4953_v41 = vpop.f32.mrf.mxu1 }
 0x879   : > { %v10347_v62 = vpop.permute.xlu0 %5227  ;;  %v10349_v37 = vpop.permute.xlu1 %5269 }
 0x87a   : > { %v4955_v34 = vpop.f32.mrf.mxu1 }
 0x87b   : > { %5545 = vrot.lane.b32.xlu1 %v4939_v16, %s11422_s30  ;;  %5643 = vrot.lane.b32.xlu0 %v6995_v0, %s11313_s16 }
 0x87c   : > { %v4957_v20 = vpop.f32.mrf.mxu1 }
 0x87d   : > { %v10353_v25 = vpop.permute.xlu0 %5271  ;;  %v10355_v52 = vpop.permute.xlu1 %5301 }
 0x87e   : > { %11539 = vst [vmem:[#allocation6_spill] sm:$0xff] %v10353_v25  ;;  %v4959_v22 = vpop.f32.mrf.mxu1 }
 0x87f   : > { %5549 = vrot.lane.b32.xlu1 %v4943_v45, %s11422_s30  ;;  %5631 = vrot.lane.b32.xlu0 %v5145_v31, %s11313_s16 }
 0x880   : > { %v10395_v26 = vpop.f32.mrf.mxu1 }
 0x881   : > { %v10361_v55 = vpop.permute.xlu0 %5307  ;;  %v10363_v8 = vpop.permute.xlu1 %5265 }
 0x882   : > { %11540 = vst [vmem:[#allocation46_spill] sm:$0xff] %v10361_v55  ;;  %11541 = vst [vmem:[#allocation48_spill] sm:$0xff] %v10363_v8  ;;  %v5863_v8 = vld [vmem:[%s11052_s10 + $0x10] sm:$0xff] }
 0x883   : > { %5585 = vrot.lane.b32.xlu1 %v4943_v45, %s11345_s18  ;;  %5461 = vrot.lane.b32.xlu0 %v10246_v61, %s11423_s13  ;;  %v10380_v61 = vpop.f32.mrf.mxu0 }
 0x885   : > { %v10368_v15 = vpop.permute.xlu0 %5267  ;;  %v10370_v33 = vpop.permute.xlu1 %5289 }
 0x886   : > { %11542 = vst [vmem:[#allocation15_spill] sm:$0xff] %v10368_v15  ;;  %v5161_v28 = vpop.f32.mrf.mxu0 }
 0x887   : > { %5551 = vrot.lane.b32.xlu1 %v4945_v27, %s11422_s30  ;;  %5721 = vrot.lane.b32.xlu0 %v6998_v18, %s11319_s19 }
 0x888   : > { %v10393_v54 = vpop.f32.mrf.mxu0 }
 0x889   : > { %v10374_v43 = vpop.permute.xlu0 %5295  ;;  %v10376_v10 = vpop.permute.xlu1 %5225 }
 0x88a   : > { %11543 = vst [vmem:[#allocation17_spill] sm:$0xff] %v10374_v43  ;;  %v5174_v0 = vpop.f32.mrf.mxu0 }
 0x88b   : > { %5557 = vrot.lane.b32.xlu1 %v4949_v38, %s11422_s30  ;;  %5709 = vrot.lane.b32.xlu0 %v5158_v35, %s11319_s19 }
 0x88c   : > { %v10410_v38 = vpop.f32.mrf.mxu0 }
 0x88d   : > { %v10382_v6 = vpop.permute.xlu0 %5233  ;;  %v10384_v63 = vpop.permute.xlu1 %5231 }
 0x88f   : > { %5621 = vrot.lane.b32.xlu1 %v4953_v41, %s11313_s16  ;;  %5467 = vrot.lane.b32.xlu0 %v10252_v47, %s11423_s13  ;;  %v4965_v47 = vpop.f32.mrf.mxu1 }
 0x891   : > { %v10389_v48 = vpop.permute.xlu0 %5287  ;;  %v10391_v59 = vpop.permute.xlu1 %5353 }
 0x892   : > { %v10412_v18 = vpop.f32.mrf.mxu1  ;;  %v5310_v25 = vsel %vm1130_vm3, %v10389_v48, %v10370_v33 }
 0x893   : > { %5665 = vrot.lane.b32.xlu1 %v4953_v41, %s11346_s14  ;;  %5715 = vrot.lane.b32.xlu0 %v5161_v28, %s11319_s19 }
 0x894   : > { %v4969_v28 = vpop.f32.mrf.mxu1 }
 0x895   : > { %v10399_v16 = vpop.permute.xlu0 %5355  ;;  %v10401_v45 = vpop.permute.xlu1 %5385 }
 0x896   : > { %11544 = vst [vmem:[#allocation40_spill] sm:$0xff] %v10399_v16 }
 0x897   : > { %5623 = vrot.lane.b32.xlu1 %v4955_v34, %s11313_s16  ;;  %5473 = vrot.lane.b32.xlu0 %v10258_v56, %s11423_s13  ;;  %v5177_v34 = vpop.f32.mrf.mxu0  ;;  %v4973_v56 = vpop.f32.mrf.mxu1 }
 0x899   : > { %v10406_v27 = vpop.permute.xlu0 %5391  ;;  %v10408_v31 = vpop.permute.xlu1 %5285 }
 0x89a   : > { %11545 = vst [vmem:[#allocation30_spill] sm:$0xff] %v10406_v27  ;;  %11546 = vst [vmem:[#allocation28_spill] sm:$0xff] %v10408_v31 }
 0x89b   : > { %5629 = vrot.lane.b32.xlu1 %v4959_v22, %s11313_s16  ;;  %5793 = vrot.lane.b32.xlu0 %v5174_v0, %s11325_s17  ;;  %v4975_v22 = vpop.f32.mrf.mxu1 }
 0x89d   : > { %v10416_v41 = vpop.permute.xlu0 %5351  ;;  %v10418_v35 = vpop.permute.xlu1 %5349 }
 0x89e   : > { %11547 = vst [vmem:[#allocation8_spill] sm:$0xff] %v10416_v41  ;;  %11548 = vst [vmem:[#allocation50_spill] sm:$0xff] %v10418_v35 }
 0x89f   : > { %5633 = vrot.lane.b32.xlu1 %v10395_v26, %s11313_s16  ;;  %5799 = vrot.lane.b32.xlu0 %v5177_v34, %s11325_s17  ;;  %v4977_v34 = vpop.f32.mrf.mxu1 }
 0x8a1   : > { %v10423_v12 = vpop.permute.xlu0 %5379  ;;  %v10425_v23 = vpop.permute.xlu1 %5373 }
 0x8a2   : > { %11549 = vst [vmem:[#allocation32_spill] sm:$0xff] %v10423_v12 }
 0x8a3   : > { %5635 = vrot.lane.b32.xlu1 %v4965_v47, %s11313_s16  ;;  %5543 = vrot.lane.b32.xlu0 %v10332_v3, %s11422_s30  ;;  %v4979_v47 = vpop.f32.mrf.mxu1 }
 0x8a5   : > { %v10430_v0 = vpop.permute.xlu0 %5293  ;;  %v10432_v51 = vpop.permute.xlu1 %5291 }
 0x8a6   : > { %v4983_v1 = vpop.f32.mrf.mxu1 }
 0x8a7   : > { %5641 = vrot.lane.b32.xlu1 %v4969_v28, %s11313_s16  ;;  %5583 = vrot.lane.b32.xlu0 %v10332_v3, %s11345_s18 }
 0x8a8   : > { %v4985_v46 = vpop.f32.mrf.mxu1 }
 0x8a9   : > { %v10437_v53 = vpop.permute.xlu0 %5299  ;;  %v10439_v4 = vpop.permute.xlu1 %5437 }
 0x8aa   : > { %v10461_v12 = vpop.f32.mrf.mxu1 }
 0x8ab   : > { %5705 = vrot.lane.b32.xlu1 %v4973_v56, %s11319_s19  ;;  %5555 = vrot.lane.b32.xlu0 %v10357_v19, %s11422_s30 }
 0x8ad   : > { %v10444_v7 = vpop.permute.xlu0 %5439  ;;  %v10446_v9 = vpop.permute.xlu1 %5469 }
 0x8ae   : > { %11550 = vst [vmem:[#allocation11_spill] sm:$0xff] %v10444_v7 }
 0x8af   : > { %5587 = vrot.lane.b32.xlu0 %v10357_v19, %s11345_s18  ;;  %5749 = vrot.lane.b32.xlu1 %v4973_v56, %s11349_s15 }
 0x8b1   : > { %v10451_v3 = vpop.permute.xlu0 %5475  ;;  %v10453_v28 = vpop.permute.xlu1 %5433 }
 0x8b2   : > { %11551 = vst [vmem:[#allocation53_spill] sm:$0xff] %v10451_v3  ;;  %11552 = vst [vmem:[#allocation5_spill] sm:$0xff] %v10453_v28  ;;  %v4989_v28 = vpop.f32.mrf.mxu1 }
 0x8b3   : > { %5627 = vrot.lane.b32.xlu0 %v4957_v20, %s11313_s16  ;;  %5707 = vrot.lane.b32.xlu1 %v4975_v22, %s11319_s19 }
 0x8b4   : > { %v4993_v21 = vpop.f32.mrf.mxu1 }
 0x8b5   : > { %v10457_v29 = vpop.permute.xlu0 %5435  ;;  %v10459_v41 = vpop.permute.xlu1 %5457 }
 0x8b6   : > { %11553 = vst [vmem:[#allocation24_spill] sm:$0xff] %v10457_v29 }
 0x8b7   : > { %5667 = vrot.lane.b32.xlu0 %v4957_v20, %s11346_s14  ;;  %5713 = vrot.lane.b32.xlu1 %v4979_v47, %s11319_s19 }
 0x8b9   : > { %v10465_v19 = vpop.permute.xlu0 %5463  ;;  %v10467_v56 = vpop.permute.xlu1 %5297 }
 0x8ba   : > { %11554 = vst [vmem:[#allocation52_spill] sm:$0xff] %v10465_v19  ;;  %v4995_v19 = vpop.f32.mrf.mxu1 }
 0x8bb   : > { %5639 = vrot.lane.b32.xlu0 %v10412_v18, %s11313_s16  ;;  %5719 = vrot.lane.b32.xlu1 %v4985_v46, %s11319_s19 }
 0x8bc   : > { %v4997_v35 = vpop.f32.mrf.mxu1 }
 0x8bd   : > { %v10472_v22 = vpop.permute.xlu0 %5305  ;;  %v10474_v29 = vpop.permute.xlu1 %5303 }
 0x8be   : > { %v4999_v14 = vpop.f32.mrf.mxu1 }
 0x8bf   : > { %5711 = vrot.lane.b32.xlu0 %v4977_v34, %s11319_s19  ;;  %5789 = vrot.lane.b32.xlu1 %v4993_v21, %s11325_s17 }
 0x8c0   : > { %v5003_v39 = vpop.f32.mrf.mxu1 }
 0x8c1   : > { %v5372_v20 = vpop.permute.xlu0 %5371  ;;  %v10478_v47 = vpop.permute.xlu1 %5369 }
 0x8c2   : > { %v5394_v40 = vsel %vm1215_vm4, %v5372_v20, %v10425_v23  ;;  %v5393_v33 = vsel %vm1215_vm4, %v10478_v47, %v5372_v20 }
 0x8c3   : > { %5751 = vrot.lane.b32.xlu0 %v4977_v34, %s11349_s15  ;;  %5833 = vrot.lane.b32.xlu1 %v4993_v21, %s11186_s20 }
 0x8c5   : > { %v10482_v13 = vpop.permute.xlu0 %5377  ;;  %v10484_v46 = vpop.permute.xlu1 %5375 }
 0x8c7   : > { %5795 = vrot.lane.b32.xlu0 %v4997_v35, %s11325_s17  ;;  %5791 = vrot.lane.b32.xlu1 %v4995_v19, %s11325_s17  ;;  %v5864_v19 = vld [vmem:[%s11052_s10 + $0x18] sm:$0xff] }
 0x8c9   : > { %v10488_v15 = vpop.permute.xlu0 %5553  ;;  %v10490_v43 = vpop.permute.xlu1 %5381 }
 0x8cb   : > { %5835 = vrot.lane.b32.xlu0 %v4997_v35, %s11186_s20  ;;  %5797 = vrot.lane.b32.xlu1 %v4999_v14, %s11325_s17 }
 0x8cd   : > { %v5542_v34 = vpop.permute.xlu0 %5541  ;;  %v10494_v21 = vpop.permute.xlu1 %5387 }
 0x8cf   : > { %5727 = vrot.lane.b32.xlu0 %v10380_v61, %s11319_s19  ;;  %5725 = vrot.lane.b32.xlu1 %v4989_v28, %s11319_s19 }
 0x8d1   : > { %v10505_v7 = vpop.permute.xlu0 %5383  ;;  %v10507_v35 = vpop.permute.xlu1 %5453 }
 0x8d3   : > { %5882 = vperm.xlu0 %7031, %v5864_v19   ;;  %5877 = vperm.xlu1 %7032, %v5863_v8  }
 0x8d5   : > { %v10509_v14 = vpop.permute.xlu0 %5559  ;;  %v10511_v16 = vpop.permute.xlu1 %5459 }
 0x8d6   : > { %11555 = vst [vmem:[#allocation29_spill] sm:$0xff] %v10509_v14 }
 0x8d7   : > { %5671 = vrot.lane.b32.xlu0 %v10412_v18, %s11346_s14  ;;  %5669 = vrot.lane.b32.xlu1 %v10395_v26, %s11346_s14  ;;  %v5005_v26 = vpop.f32.mrf.mxu1 }
 0x8d9   : > { %v10517_v61 = vpop.permute.xlu0 %5547  ;;  %v10519_v28 = vpop.permute.xlu1 %5465 }
 0x8da   : > { %v5007_v3 = vpop.f32.mrf.mxu1 }
 0x8db   : > { %5723 = vrot.lane.b32.xlu0 %v10461_v12, %s11319_s19  ;;  %5717 = vrot.lane.b32.xlu1 %v4983_v1, %s11319_s19 }
 0x8dd   : > { %v10524_v8 = vpop.permute.xlu0 %5389  ;;  %v10526_v19 = vpop.permute.xlu1 %5471 }
 0x8df   : > { %5805 = vrot.lane.b32.xlu0 %v10393_v54, %s11325_s17  ;;  %5753 = vrot.lane.b32.xlu1 %v4983_v1, %s11349_s15  ;;  %v5309_v54 = vsel %vm1130_vm3, %v10408_v31, %v10389_v48  ;;  %v5009_v31 = vpop.f32.mrf.mxu1 }
 0x8e1   : > { %v10531_v18 = vpop.permute.xlu0 %5637  ;;  %v10533_v50 = vpop.permute.xlu1 %5537 }
 0x8e2   : > { %11556 = vst [vmem:[#allocation33_spill] sm:$0xff] %v10531_v18  ;;  %11557 = vst [vmem:[#allocation47_spill] sm:$0xff] %v10533_v50  ;;  %v5237_v50 = vsel %vm1057_vm2, %v10321_v44, %v10305_v42 }
 0x8e3   : > { %5811 = vrot.lane.b32.xlu0 %v10410_v38, %s11325_s17  ;;  %5801 = vrot.lane.b32.xlu1 %v5003_v39, %s11325_s17  ;;  %v5238_v38 = vsel %vm1057_vm2, %v10305_v42, %v10336_v24  ;;  %v5334_v48 = vadd.f32 %v5309_v54, %v5237_v50 }
 0x8e4   : > { %v5335_v18 = vadd.f32 %v5310_v25, %v5238_v38  ;;  %v5242_v38 = vsel %vm1057_vm2, %v10347_v62, %v10315_v58  ;;  %v5398_v58 = vsel %vm1215_vm4, %v10505_v7, %v10401_v45 }
 0x8e5   : > { %v10544_v1 = vpop.permute.xlu0 %5625  ;;  %v5582_v27 = vpop.permute.xlu1 %5581  ;;  %v5418_v44 = vadd.f32 %v5393_v33, %v5334_v48 }
 0x8e6   : > { %v5419_v55 = vadd.f32 %v5394_v40, %v5335_v18 }
 0x8e7   : > { %5755 = vrot.lane.b32.xlu0 %v10461_v12, %s11349_s15  ;;  %5803 = vrot.lane.b32.xlu1 %v5005_v26, %s11325_s17  ;;  %v5593_v26 = vsel %vm1418_vm14, %v5542_v34, %v5582_v27 }
 0x8e9   : > { %v5456_v17 = vpop.permute.xlu0 %5455  ;;  %v10559_v14 = vpop.permute.xlu1 %5539 }
 0x8ea   : > { %v5477_v42 = vsel %vm1300_vm5, %v10507_v35, %v5456_v17  ;;  %v5478_v23 = vsel %vm1300_vm5, %v5456_v17, %v10459_v41  ;;  %v5562_v18 = vsel %vm11558_vm13, %v10559_v14, %v5542_v34  ;;  %vm11563_vm13 = vmmov %vm11562_vm0 }
 0x8eb   : > { %v5502_v24 = vadd.f32 %v5477_v42, %v5418_v44  ;;  %v5503_v25 = vadd.f32 %v5478_v23, %v5419_v55  ;;  %5809 = vrot.lane.b32.xlu1 %v5009_v31, %s11325_s17  ;;  %5807 = vrot.lane.b32.xlu0 %v5007_v3, %s11325_s17  ;;  %v5241_v42 = vsel %vm1057_vm2, %v10376_v10, %v10347_v62 }
 0x8ec   : > { %v5239_v62 = vsel %vm1057_vm2, %v10342_v57, %v10340_v5 }
 0x8ed   : > { %v5515_v12 = vadd.f32 %v5503_v25, %v10267_v49  ;;  %v5514_v50 = vadd.f32 %v5502_v24, %v10273_v36  ;;  %v10569_v40 = vpop.permute.xlu0 %5643  ;;  %v10571_v20 = vpop.permute.xlu1 %5545  ;;  %v6425_v49 = vld [vmem:[%s11053_s11] sm:$0xff] }
 0x8ee   : > { %v7107_v25 = vld [vmem:[%s11048_s6 + $0x4] ss:$8 sps:$4 sm:$0xff]  }
 0x8ef   : > { %v10576_v17 = vadd.f32 %v5562_v18, %v5514_v50  ;;  %5837 = vrot.lane.b32.xlu1 %v5003_v39, %s11186_s20  ;;  %5839 = vrot.lane.b32.xlu0 %v5007_v3, %s11186_s20  ;;  %v5599_v44 = vadd.f32 %v5593_v26, %v5515_v12  ;;  %v5314_v39 = vsel %vm1130_vm3, %v10437_v53, %v10355_v52 }
 0x8f0   : > { %v5313_v3 = vsel %vm1130_vm3, %v10467_v56, %v10437_v53  ;;  %v5311_v52 = vsel %vm1130_vm3, %v10432_v51, %v10430_v0  ;;  %v5397_v53 = vsel %vm1215_vm4, %v10490_v43, %v10505_v7  ;;  %v5341_v23 = vadd.f32 %v5314_v39, %v5242_v38  ;;  %6733 = vmatprep.mubr.msk.bf16.mxu1 %vm11560_vm9, %v7107_v25  ;;  %vm11572_vm9 = vmmov %vm11562_vm0 }
 0x8f1   : > { %v10583_v36 = vpop.permute.xlu0 %5631  ;;  %v5550_v55 = vpop.permute.xlu1 %5549  ;;  %v5340_v24 = vadd.f32 %v5313_v3, %v5241_v42  ;;  %v5395_v12 = vsel %vm1215_vm4, %v10484_v46, %v10482_v13  ;;  %v5337_v50 = vadd.f32 %v5311_v52, %v5239_v62  ;;  %6728 = vmatprep.mubr.msk.bf16.mxu0 %vm11561_vm7, %v7107_v25  ;;  %v5315_v52 = vsel %vm1130_vm3, %v10474_v29, %v10472_v22  ;;  %vm11594_vm7 = vmmov %vm11562_vm0 }
 0x8f2   : > { %v5425_v18 = vadd.f32 %v5398_v58, %v5341_v23 }
 0x8f3   : > { %6428 = vperm.xlu1 %7032, %v6425_v49   ;;  %v5424_v26 = vadd.f32 %v5397_v53, %v5340_v24  ;;  %v5421_v3 = vadd.f32 %v5395_v12, %v5337_v50  ;;  %v5243_v53 = vsel %vm1057_vm2, %v10384_v63, %v10382_v6 }
 0x8f5   : > { %v10585_v31 = vpop.permute.xlu0 %5461  ;;  %v5586_v27 = vpop.permute.xlu1 %5585 }
 0x8f6   : > { %v5479_v7 = vsel %vm1300_vm5, %v10511_v16, %v10585_v31  ;;  %v5595_v12 = vsel %vm1418_vm14, %v10488_v15, %v5586_v27 }
 0x8f7   : > { %v5505_v58 = vadd.f32 %v5479_v7, %v5421_v3  ;;  %v5331_v7 = vsel %vm1130_vm3, %v10349_v37, %v10467_v56 }
 0x8f9   : > { %v10587_v41 = vpop.permute.xlu0 %5721  ;;  %v5552_v34 = vpop.permute.xlu1 %5551 }
 0x8fa   : > { %v10590_v54 = vsel %vm11559_vm6, %v5550_v55, %v5552_v34  ;;  %v5566_v50 = vsel %vm11562_vm0, %v5552_v34, %v10488_v15  ;;  %v5259_v15 = vsel %vm1057_vm2, %v10307_v60, %v10376_v10  ;;  %v5499_v60 = vsel %vm1300_vm5, %v10439_v4, %v10519_v28  ;;  %vm11565_vm6 = vmmov %vm11562_vm0 }
 0x8fb   : > { %v5339_v56 = vadd.f32 %v5331_v7, %v5259_v15 }
 0x8fd   : > { %v10601_v33 = vpop.permute.xlu0 %5709  ;;  %v10603_v48 = vpop.permute.xlu1 %5557 }
 0x901   : > { %v5468_v49 = vpop.permute.xlu0 %5467  ;;  %v10626_v55 = vpop.permute.xlu1 %5621 }
 0x902   : > { %v5481_v45 = vsel %vm1300_vm5, %v10519_v28, %v5468_v49  ;;  %v5482_v39 = vsel %vm1300_vm5, %v5468_v49, %v10446_v9  ;;  %v5399_v9 = vsel %vm1215_vm4, %v10494_v21, %v10524_v8 }
 0x903   : > { %v5508_v38 = vadd.f32 %v5481_v45, %v5424_v26  ;;  %v5509_v42 = vadd.f32 %v5482_v39, %v5425_v18  ;;  %v5343_v18 = vadd.f32 %v5315_v52, %v5243_v53  ;;  %v5517_v39 = vadd.f32 %v5505_v58, %v10286_v2  ;;  %v11564_v53 = vld [vmem:[#allocation29_spill] sm:$0xff] }
 0x905   : > { %v5520_v23 = vadd.f32 %v5508_v38, %v10294_v32  ;;  %v5521_v24 = vadd.f32 %v10260_v30, %v5509_v42  ;;  %v10645_v25 = vpop.permute.xlu0 %5715  ;;  %v5666_v62 = vpop.permute.xlu1 %5665  ;;  %v5427_v45 = vadd.f32 %v5399_v9, %v5343_v18  ;;  %v11567_v18 = vld [vmem:[#allocation46_spill] sm:$0xff] }
 0x906   : > { %v5677_v26 = vsel %vm1504_vm15, %v10544_v1, %v5666_v62  ;;  %v11566_v62 = vld [vmem:[#allocation9_spill] sm:$0xff]  ;;  %v5316_v7 = vsel %vm1130_vm3, %v10472_v22, %v11567_v18  ;;  %v11575_v18 = vld [vmem:[#allocation14_spill] sm:$0xff] }
 0x907   : > { %v10656_v32 = vadd.f32 %v5677_v26, %v5599_v44  ;;  %v5604_v30 = vadd.f32 %v5566_v50, %v5520_v23  ;;  %v10658_v49 = vadd.f32 %v5595_v12, %v5521_v24  ;;  %v5415_v44 = vsel %vm1215_vm4, %v10391_v59, %v10490_v43 }
 0x908   : > { %v5564_v43 = vsel %vm11563_vm13, %v10571_v20, %v10517_v61  ;;  %v5423_v10 = vadd.f32 %v5415_v44, %v5339_v56  ;;  %v11570_v56 = vld [vmem:[#allocation30_spill] sm:$0xff]  ;;  %vm11598_vm13 = vcmask 900096  }
 0x909   : > { %v5474_v27 = vpop.permute.xlu0 %5473  ;;  %v10664_v3 = vpop.permute.xlu1 %5623  ;;  %v5601_v52 = vadd.f32 %v5564_v43, %v5517_v39  ;;  %v11568_v39 = vld [vmem:[#allocation33_spill] sm:$0xff] }
 0x90a   : > { %v5483_v34 = vsel %vm1300_vm5, %v10526_v19, %v5474_v27  ;;  %v5646_v37 = vsel %vm1471_vm8, %v10664_v3, %v10544_v1  ;;  %v5507_v28 = vadd.f32 %v5499_v60, %v5423_v10  ;;  %v11571_v10 = vld [vmem:[#allocation53_spill] sm:$0xff] }
 0x90b   : > { %v5511_v2 = vadd.f32 %v5483_v34, %v5427_v45  ;;  %v10678_v38 = vadd.f32 %v5646_v37, %v10576_v17  ;;  %v5568_v17 = vsel %vm11565_vm6, %v10603_v48, %v11564_v53  ;;  %v11569_v37 = vld [vmem:[#allocation38_spill] sm:$0xff]  ;;  %vm11599_vm6 = vmmov %vm11598_vm13 }
 0x90c   : > { %v5519_v9 = vadd.f32 %v5507_v28, %v11566_v62 }
 0x90d   : > { %v5523_v59 = vadd.f32 %v5511_v2, %v10311_v11  ;;  %v10687_v42 = vpop.permute.xlu0 %5793  ;;  %v10689_v1 = vpop.permute.xlu1 %5629  ;;  %v5400_v2 = vsel %vm1215_vm4, %v10524_v8, %v11570_v56  ;;  %v11573_v8 = vld [vmem:[#allocation6_spill] sm:$0xff] }
 0x90e   : > { %v5648_v4 = vsel %vm1471_vm8, %v10689_v1, %v10583_v36  ;;  %v5603_v12 = vadd.f32 %v10590_v54, %v5519_v9  ;;  %v5244_v54 = vsel %vm1057_vm2, %v10382_v6, %v11569_v37  ;;  %v5332_v62 = vsel %vm1130_vm3, %v11573_v8, %v10474_v29  ;;  %v11574_v9 = vld [vmem:[#allocation43_spill] sm:$0xff] }
 0x90f   : > { %v10697_v58 = vadd.f32 %v5648_v4, %v5601_v52  ;;  %v5607_v23 = vadd.f32 %v5568_v17, %v5523_v59  ;;  %v5344_v60 = vadd.f32 %v5316_v7, %v5244_v54  ;;  %v5484_v59 = vsel %vm1300_vm5, %v5474_v27, %v11571_v10  ;;  %v11577_v29 = vld [vmem:[#allocation11_spill] sm:$0xff]  ;;  %v11578_v10 = vld [vmem:[#allocation28_spill] sm:$0xff] }
 0x910   : > { %v5260_v7 = vsel %vm1057_vm2, %v11575_v18, %v10384_v63  ;;  %v5500_v54 = vsel %vm1300_vm5, %v11577_v29, %v10526_v19  ;;  %v11583_v8 = vld [vmem:[#allocation15_spill] sm:$0xff]  ;;  %v11585_v18 = vld [vmem:[#allocation10_spill] sm:$0xff] }
 0x911   : > { %v10699_v24 = vpop.permute.xlu0 %5799  ;;  %v5634_v11 = vpop.permute.xlu1 %5633  ;;  %v5330_v19 = vsel %vm1130_vm3, %v11583_v8, %v10432_v51  ;;  %v11588_v51 = vld [vmem:[#allocation8_spill] sm:$0xff] }
 0x912   : > { %v5414_v29 = vsel %vm1215_vm4, %v11588_v51, %v10484_v46 }
 0x915   : > { %v10703_v50 = vpop.permute.xlu0 %5543  ;;  %v5636_v26 = vpop.permute.xlu1 %5635 }
 0x916   : > { %v5649_v45 = vsel %vm1471_vm8, %v5634_v11, %v5636_v26  ;;  %v5650_v15 = vsel %vm1471_vm8, %v5636_v26, %v11568_v39 }
 0x917   : > { %v10711_v44 = vadd.f32 %v5649_v45, %v5603_v12  ;;  %v10713_v34 = vadd.f32 %v5650_v15, %v5604_v30  ;;  %v5428_v30 = vadd.f32 %v5400_v2, %v5344_v60 }
 0x919   : > { %v10721_v43 = vpop.permute.xlu0 %5583  ;;  %v5642_v22 = vpop.permute.xlu1 %5641  ;;  %v5512_v4 = vadd.f32 %v5484_v59, %v5428_v30  ;;  %v11579_v59 = vld [vmem:[#allocation48_spill] sm:$0xff] }
 0x91a   : > { %v5652_v52 = vsel %vm1471_vm8, %v5642_v22, %v10569_v40  ;;  %v5329_v63 = vsel %vm1130_vm3, %v11579_v59, %v11578_v10  ;;  %v11580_v30 = vld [vmem:[#allocation12_spill] sm:$0xff] }
 0x91b   : > { %v10727_v17 = vadd.f32 %v5652_v52, %v5607_v23  ;;  %v5524_v12 = vadd.f32 %v11574_v9, %v5512_v4  ;;  %v11576_v23 = vld [vmem:[#allocation40_spill] sm:$0xff] }
 0x91c   : > { %v5416_v45 = vsel %vm1215_vm4, %v11576_v23, %v10494_v21  ;;  %v11581_v21 = vld [vmem:[#allocation16_spill] sm:$0xff]  ;;  %v11586_v23 = vld [vmem:[#allocation51_spill] sm:$0xff] }
 0x91d   : > { %v5556_v28 = vpop.permute.xlu0 %5555  ;;  %v5706_v6 = vpop.permute.xlu1 %5705  ;;  %v5257_v4 = vsel %vm1057_vm2, %v11581_v21, %v11580_v30  ;;  %v11592_v21 = vld [vmem:[#allocation52_spill] sm:$0xff] }
 0x91e   : > { %v5567_v11 = vsel %vm11572_vm9, %v5556_v28, %v10603_v48  ;;  %v5342_v48 = vadd.f32 %v5332_v62, %v5260_v7  ;;  %v11584_v62 = vld [vmem:[#allocation50_spill] sm:$0xff]  ;;  %v5240_v7 = vsel %vm1057_vm2, %v10340_v5, %v11585_v18  ;;  %v11593_v18 = vld [vmem:[#allocation47_spill] sm:$0xff]  ;;  %vm11600_vm9 = vmmov %vm11599_vm6 }
 0x91f   : > { %v5413_v9 = vsel %vm1215_vm4, %v11584_v62, %v10478_v47  ;;  %v11589_v47 = vld [vmem:[#allocation5_spill] sm:$0xff] }
 0x920   : > { %v5426_v56 = vadd.f32 %v5416_v45, %v5342_v48  ;;  %v5258_v45 = vsel %vm1057_vm2, %v11586_v23, %v10342_v57  ;;  %v11591_v57 = vld [vmem:[#allocation24_spill] sm:$0xff] }
 0x921   : > { %v5588_v26 = vpop.permute.xlu0 %5587  ;;  %v5750_v27 = vpop.permute.xlu1 %5749  ;;  %v5336_v59 = vadd.f32 %v5330_v19, %v5258_v45 }
 0x922   : > { %v5596_v15 = vsel %vm1418_vm14, %v11564_v53, %v5588_v26  ;;  %v5510_v52 = vadd.f32 %v5500_v54, %v5426_v56  ;;  %v11582_v53 = vld [vmem:[#allocation17_spill] sm:$0xff]  ;;  %v5497_v54 = vsel %vm1300_vm5, %v11589_v47, %v10507_v35  ;;  %v11590_v56 = vld [vmem:[#allocation4_spill] sm:$0xff]  ;;  %v5761_v45 = vsel %vm1590_vm11, %v10601_v33, %v5750_v27 }
 0x923   : > { %v10743_v37 = vadd.f32 %v5596_v15, %v5524_v12  ;;  %v5312_v28 = vsel %vm1130_vm3, %v10430_v0, %v11582_v53  ;;  %v5333_v15 = vadd.f32 %v5329_v63, %v5257_v4  ;;  %v11587_v0 = vld [vmem:[#allocation32_spill] sm:$0xff]  ;;  %v5498_v63 = vsel %vm1300_vm5, %v11591_v57, %v10511_v16  ;;  %v11602_v57 = vld [vmem:[#allocation49_spill] sm:$0xff] }
 0x924   : > { %v5396_v48 = vsel %vm1215_vm4, %v10482_v13, %v11587_v0  ;;  %v5522_v10 = vadd.f32 %v5510_v52, %v11590_v56  ;;  %v5338_v5 = vadd.f32 %v5312_v28, %v5240_v7  ;;  %v5480_v13 = vsel %vm1300_vm5, %v10585_v31, %v11592_v21  ;;  %v11595_v31 = vld [vmem:[#allocation41_spill] sm:$0xff] }
 0x925   : > { %v5628_v2 = vpop.permute.xlu0 %5627  ;;  %v5708_v60 = vpop.permute.xlu1 %5707  ;;  %v5417_v30 = vadd.f32 %v5413_v9, %v5333_v15  ;;  %v5420_v62 = vadd.f32 %v5414_v29, %v5336_v59  ;;  %v5561_v16 = vsel %vm11594_vm7, %v11593_v18, %v10559_v14  ;;  %v5645_v15 = vsel %vm1471_vm8, %v10626_v55, %v10664_v3  ;;  %v11597_v29 = vld [vmem:[#allocation20_spill] sm:$0xff]  ;;  %vm11601_vm7 = vmmov %vm11599_vm6  ;;  %v11603_v18 = vld [vmem:[#allocation37_spill] sm:$0xff] }
 0x926   : > { %v5606_v4 = vadd.f32 %v5567_v11, %v5522_v10  ;;  %v5422_v8 = vadd.f32 %v5396_v48, %v5338_v5  ;;  %v11596_v48 = vld [vmem:[#allocation42_spill] sm:$0xff]  ;;  %v5594_v47 = vsel %vm1418_vm14, %v10517_v61, %v10721_v43  ;;  %v5647_v27 = vsel %vm1471_vm8, %v5628_v2, %v10689_v1 }
 0x927   : > { %v5501_v35 = vadd.f32 %v5497_v54, %v5417_v30  ;;  %v5504_v19 = vadd.f32 %v5498_v63, %v5420_v62  ;;  %v5767_v54 = vadd.f32 %v5761_v45, %v10656_v32  ;;  %v5729_v55 = vsel %vm11598_vm13, %v5706_v6, %v5708_v60 }
 0x928   : > { %v5506_v9 = vadd.f32 %v5480_v13, %v5422_v8 }
 0x929   : > { %v5668_v12 = vpop.permute.xlu0 %5667  ;;  %v5714_v26 = vpop.permute.xlu1 %5713  ;;  %v5513_v11 = vadd.f32 %v5501_v35, %v11595_v31  ;;  %v5516_v51 = vadd.f32 %v5504_v19, %v11596_v48  ;;  %v11604_v48 = vld [vmem:[#allocation27_spill] sm:$0xff] }
 0x92a   : > { %v5518_v14 = vadd.f32 %v5506_v9, %v11597_v29  ;;  %v5678_v61 = vsel %vm1504_vm15, %v10583_v36, %v5668_v12  ;;  %v5732_v6 = vsel %vm11600_vm9, %v5714_v26, %v10645_v25  ;;  %v11605_v29 = vld [vmem:[#allocation21_spill] sm:$0xff] }
 0x92b   : > { %v5597_v0 = vadd.f32 %v5561_v16, %v5513_v11  ;;  %v5769_v8 = vadd.f32 %v5732_v6, %v10697_v58 }
 0x92c   : > { %v5602_v32 = vadd.f32 %v5594_v47, %v5518_v14  ;;  %v11606_v47 = vld [vmem:[#allocation3_spill] sm:$0xff] }
 0x92d   : > { %v5640_v53 = vpop.permute.xlu0 %5639  ;;  %v10785_v46 = vpop.permute.xlu1 %5719  ;;  %v5681_v10 = vadd.f32 %v5645_v15, %v5597_v0 }
 0x92e   : > { %v5651_v52 = vsel %vm1471_vm8, %v5640_v53, %v5642_v22  ;;  %v5563_v22 = vsel %vm11562_vm0, %v10703_v50, %v10571_v20  ;;  %v5730_v50 = vsel %vm11599_vm6, %v5708_v60, %v10601_v33  ;;  %v5686_v21 = vadd.f32 %v5678_v61, %v5602_v32 }
 0x92f   : > { %v10788_v28 = vadd.f32 %v5651_v52, %v5606_v4  ;;  %v5600_v20 = vadd.f32 %v5563_v22, %v5516_v51  ;;  %v5765_v30 = vadd.f32 %v5729_v55, %v5681_v10  ;;  %v5766_v1 = vadd.f32 %v5730_v50, %v10678_v38 }
 0x931   : > { %v5712_v7 = vpop.permute.xlu0 %5711  ;;  %v5790_v23 = vpop.permute.xlu1 %5789  ;;  %v5684_v59 = vadd.f32 %v5647_v27, %v5600_v20 }
 0x932   : > { %v5731_v2 = vsel %vm11601_vm7, %v5712_v7, %v5714_v26 }
 0x933   : > { %v5768_v26 = vadd.f32 %v5731_v2, %v5684_v59  ;;  %v5997_v59 = vld [vmem:[#allocation2 + $0x140] sm:$0xff]  ;;  %v5994_v2 = vld [vmem:[#allocation2 + $0x128] sm:$0xff] }
 0x935   : > { %v5752_v3 = vpop.permute.xlu0 %5751  ;;  %v5834_v56 = vpop.permute.xlu1 %5833 }
 0x936   : > { %v5845_v5 = vsel %vm1676_vm12, %v10687_v42, %v5834_v56  ;;  %v5762_v13 = vsel %vm1590_vm11, %v10645_v25, %v5752_v3 }
 0x937   : > { %v5851_v43 = vadd.f32 %v5845_v5, %v5767_v54  ;;  %v5770_v62 = vadd.f32 %v5762_v13, %v5686_v21  ;;  %v5993_v13 = vld [vmem:[#allocation2 + $0x120] sm:$0xff] }
 0x939   : > { %v5887_v63 = vadd.f32 %v11602_v57, %v5851_v43  ;;  %v5796_v33 = vpop.permute.xlu0 %5795  ;;  %v5792_v60 = vpop.permute.xlu1 %5791 }
 0x93a   : > { %v5813_v36 = vsel %vm1643_vm10, %v5790_v23, %v5792_v60  ;;  %v5814_v12 = vsel %vm1643_vm10, %v5792_v60, %v10687_v42 }
 0x93b   : > { %vm5899_vm0 = vcmp.ge.f32.partialorder %v5887_v63, 0.0  ;;  %v5911_v38 = vmul.f32 0.01, %v5887_v63  ;;  %v5849_v4 = vadd.f32 %v5813_v36, %v5765_v30  ;;  %v5850_v53 = vadd.f32 %v5814_v12, %v5766_v1  ;;  %v5988_v12 = vld [vmem:[#allocation2 + $0xf8] sm:$0xff] }
 0x93d   : > { %v5923_v35 = vsel %vm5899_vm0, %v5887_v63, %v5911_v38  ;;  %v5885_v52 = vadd.f32 %v11602_v57, %v5849_v4  ;;  %v5886_v19 = vadd.f32 %v11602_v57, %v5850_v53  ;;  %v5836_v9 = vpop.permute.xlu0 %5835  ;;  %v5798_v25 = vpop.permute.xlu1 %5797  ;;  %v6030_v57 = vpack.c.bf16 %v5997_v59, %v5994_v2  ;;  %v5996_v63 = vld [vmem:[#allocation2 + $0x138] sm:$0xff]  ;;  %v5967_v2 = vld [vmem:[#allocation2 + $0x50] sm:$0xff] }
 0x93e   : > { %v5935_v16 = vmul.f32 %v5923_v35, %v11603_v18  ;;  %v5846_v42 = vsel %vm1676_vm12, %v10699_v24, %v5836_v9  ;;  %v5815_v7 = vsel %vm1643_vm10, %v5796_v33, %v5798_v25  ;;  %v5816_v23 = vsel %vm1643_vm10, %v5798_v25, %v10699_v24  ;;  %v5991_v33 = vld [vmem:[#allocation2 + $0x110] sm:$0xff] }
 0x93f   : > { %vm5897_vm13 = vcmp.ge.f32.partialorder %v5885_v52, 0.0  ;;  %vm5898_vm6 = vcmp.ge.f32.partialorder %v5886_v19, 0.0  ;;  %v5909_v58 = vmul.f32 0.01, %v5885_v52  ;;  %v5910_v31 = vmul.f32 0.01, %v5886_v19 }
 0x940   : > { %5947 = vst.msk [vmem:[#allocation2 + $0x160] sm:$0xff] %vm424_vm1, %v5935_v16  ;;  %v5854_v11 = vadd.f32 %v5846_v42, %v5770_v62  ;;  %v5852_v45 = vadd.f32 %v5815_v7, %v5768_v26  ;;  %v5853_v15 = vadd.f32 %v5816_v23, %v5769_v8  ;;  %v6029_v36 = vpack.c.bf16 %v5996_v63, %v5993_v13  ;;  %v5990_v8 = vld [vmem:[#allocation2 + $0x108] sm:$0xff]  ;;  %v5985_v62 = vld [vmem:[#allocation2 + $0xe0] sm:$0xff]  ;;  %v5987_v9 = vld [vmem:[#allocation2 + $0xf0] sm:$0xff] }
 0x941   : > { %v5921_v22 = vsel %vm5897_vm13, %v5885_v52, %v5909_v58  ;;  %v5922_v0 = vsel %vm5898_vm6, %v5886_v19, %v5910_v31  ;;  %v10846_v30 = vpop.permute.xlu0 %5727  ;;  %v10848_v1 = vpop.permute.xlu1 %5725  ;;  %v6027_v53 = vpack.c.bf16 %v5991_v33, %v5988_v12  ;;  %v5998_v19 = vld [vmem:[#allocation2 + $0x148] sm:$0xff]  ;;  %v6026_v25 = vpack.c.bf16 %v5990_v8, %v5987_v9  ;;  %v5995_v7 = vld [vmem:[#allocation2 + $0x130] sm:$0xff]  ;;  %v5984_v58 = vld [vmem:[#allocation2 + $0xd8] sm:$0xff] }
 0x942   : > { %v5933_v51 = vmul.f32 %v5921_v22, %v11604_v48  ;;  %v5934_v14 = vmul.f32 %v5922_v0, %v11605_v29  ;;  %v5890_v54 = vadd.f32 %v11606_v47, %v5854_v11  ;;  %v5888_v27 = vadd.f32 %v11606_v47, %v5852_v45  ;;  %v5982_v16 = vld [vmem:[#allocation2 + $0xc8] sm:$0xff]  ;;  %v5979_v11 = vld [vmem:[#allocation2 + $0xb0] sm:$0xff]  ;;  %v5992_v22 = vld [vmem:[#allocation2 + $0x118] sm:$0xff] }
 0x943   : > { %v5889_v24 = vadd.f32 %v11606_v47, %v5853_v15  ;;  %v11607_v42 = vmov 0   ;;  %v6024_v23 = vpack.c.bf16 %v5985_v62, %v5982_v16  ;;  %v6031_v31 = vpack.c.bf16 %v5998_v19, %v5995_v7  ;;  %v5981_v0 = vld [vmem:[#allocation2 + $0xc0] sm:$0xff]  ;;  %v5980_v33 = vld [vmem:[#allocation2 + $0xb8] sm:$0xff]  ;;  %v5958_v8 = vld [vmem:[#allocation2 + $0x8] sm:$0xff] }
 0x944   : > { %vm5902_vm9 = vcmp.ge.f32.partialorder %v5890_v54, 0.0  ;;  %v5914_v55 = vmul.f32 0.01, %v5890_v54  ;;  %vm5900_vm7 = vcmp.ge.f32.partialorder %v5888_v27, 0.0  ;;  %v5912_v3 = vmul.f32 0.01, %v5888_v27 }
 0x945   : > { %vm5901_vm0 = vcmp.ge.f32.partialorder %v5889_v24, 0.0  ;;  %v5913_v56 = vmul.f32 0.01, %v5889_v24  ;;  %v5989_v47 = vld [vmem:[#allocation2 + $0x100] sm:$0xff]  ;;  %vm11608_vm13 = vcmask 900096   ;;  %v5971_v19 = vld [vmem:[#allocation2 + $0x70] sm:$0xff] }
 0x946   : > { %v5926_v10 = vsel %vm5902_vm9, %v5890_v54, %v5914_v55  ;;  %v5924_v20 = vsel %vm5900_vm7, %v5888_v27, %v5912_v3  ;;  %v5978_v27 = vld [vmem:[#allocation2 + $0xa8] sm:$0xff]  ;;  %v5973_v55 = vld [vmem:[#allocation2 + $0x80] sm:$0xff]  ;;  %v5734_v12 = vsel %vm11608_vm13, %v10785_v46, %v10587_v41  ;;  %vm11609_vm6 = vmmov %vm11608_vm13 }
 0x947   : > { %v5938_v50 = vmul.f32 %v5926_v10, %v11603_v18  ;;  %v5925_v5 = vsel %vm5901_vm0, %v5889_v24, %v5913_v56  ;;  %v5936_v61 = vmul.f32 %v5924_v20, %v11604_v48  ;;  %v6001_v38 = vld [vmem:[#allocation2 + $0x160] sm:$0xff]  ;;  %v6028_v24 = vpack.c.bf16 %v5992_v22, %v5989_v47  ;;  %v5986_v10 = vld [vmem:[#allocation2 + $0xe8] sm:$0xff]  ;;  %v5975_v20 = vld [vmem:[#allocation2 + $0x90] sm:$0xff] }
 0x948   : > { %v5937_v43 = vmul.f32 %v5925_v5, %v11605_v29  ;;  %v5970_v5 = vld [vmem:[#allocation2 + $0x68] sm:$0xff]  ;;  %v5969_v13 = vld [vmem:[#allocation2 + $0x60] sm:$0xff]  ;;  %vm11610_vm9 = vmmov %vm11609_vm6 }
 0x949   : > { %5950 = vst.msk [vmem:[#allocation2 + $0x178] sm:$0xff] %vm424_vm1, %v5938_v50  ;;  %v6032_v32 = vpack.c.bf16 %v5936_v61, %v5933_v51  ;;  %v6023_v51 = vpack.c.bf16 %v5984_v58, %v5981_v0  ;;  %v6020_v50 = vpack.c.bf16 %v5978_v27, %v5975_v20  ;;  %v5983_v61 = vld [vmem:[#allocation2 + $0xd0] sm:$0xff]  ;;  %v5977_v62 = vld [vmem:[#allocation2 + $0xa0] sm:$0xff]  ;;  %v5974_v9 = vld [vmem:[#allocation2 + $0x88] sm:$0xff]  ;;  %v5736_v47 = vsel %vm11610_vm9, %v10848_v1, %v10846_v30 }
 0x94a   : > { %v6033_v6 = vpack.c.bf16 %v5937_v43, %v5934_v14  ;;  %v5976_v14 = vld [vmem:[#allocation2 + $0x98] sm:$0xff]  ;;  %v6018_v43 = vpack.c.bf16 %v5973_v55, %v5970_v5  ;;  %v6025_v59 = vpack.c.bf16 %v5986_v10, %v5983_v61  ;;  %v6022_v16 = vpack.c.bf16 %v5980_v33, %v5977_v62  ;;  %v5965_v7 = vld [vmem:[#allocation2 + $0x40] sm:$0xff]  ;;  %vm11611_vm7 = vmmov %vm11609_vm6 }
 0x94b   : > { %v6021_v54 = vpack.c.bf16 %v5979_v11, %v5976_v14  ;;  %v5957_v58 = vld [vmem:[#allocation2] sm:$0xff]  ;;  %v5960_v0 = vld [vmem:[#allocation2 + $0x18] sm:$0xff]  ;;  %v5962_v14 = vld [vmem:[#allocation2 + $0x28] sm:$0xff]  ;;  %v6019_v10 = vpack.c.bf16 %v5974_v9, %v5971_v19  ;;  %v5775_v61 = vadd.f32 %v5736_v47, %v10727_v17 }
 0x94c   : > { %6104 = vmatprep.subr.bf16.mxu0 %v6033_v6  ;;  %v5964_v6 = vld [vmem:[#allocation2 + $0x38] sm:$0xff] }
 0x94d   : > { %6105 = vmatpush1.bf16.msra.mxu0 %v6032_v32  ;;  %v5972_v32 = vld [vmem:[#allocation2 + $0x78] sm:$0xff] }
 0x94e   : > { %v10850_v60 = vpop.permute.xlu0 %5882  ;;  %v10852_v21 = vpop.permute.xlu1 %5877  ;;  %6106 = vmatprep.subr.bf16.mxu0 %v6030_v57 }
 0x950   : > { %v6004_v4 = vld [vmem:[#allocation2 + $0x178] sm:$0xff] }
 0x951   : > { %v6034_v26 = vpack.c.bf16 %v6004_v4, %v6001_v38  ;;  %6107 = vmatpush1.bf16.msra.mxu0 %v6029_v36  ;;  %v5966_v36 = vld [vmem:[#allocation2 + $0x48] sm:$0xff]  ;;  %v6017_v4 = vpack.c.bf16 %v5972_v32, %v5969_v13 }
 0x952   : > { %v10854_v35 = vpop.permute.xlu0 %5671  ;;  %v10856_v52 = vpop.permute.xlu1 %5669  ;;  %6108 = vmatprep.subr.bf16.mxu0 %v6027_v53  ;;  %v5963_v53 = vld [vmem:[#allocation2 + $0x30] sm:$0xff] }
 0x953   : > { %6186 = vmatpush1.bf16.msra.mxu1 %v6034_v26  ;;  %v5961_v26 = vld [vmem:[#allocation2 + $0x20] sm:$0xff]  ;;  %v6014_v27 = vpack.c.bf16 %v5966_v36, %v5963_v53 }
 0x954   : > { %6187 = vmatprep.subr.bf16.mxu1 %v11607_v42  ;;  %v6012_v22 = vpack.c.bf16 %v5961_v26, %v5958_v8 }
 0x955   : > { %6109 = vmatpush1.bf16.msra.mxu0 %v6026_v25  ;;  %v6015_v25 = vpack.c.bf16 %v5967_v2, %v5964_v6  ;;  %v5679_v6 = vsel %vm1504_vm15, %v11568_v39, %v10856_v52 }
 0x956   : > { %v10859_v45 = vpop.permute.xlu0 %5723  ;;  %v5718_v15 = vpop.permute.xlu1 %5717  ;;  %6110 = vmatprep.subr.bf16.mxu0 %v6024_v23  ;;  %v5968_v23 = vld [vmem:[#allocation2 + $0x58] sm:$0xff]  ;;  %v5689_v36 = vadd.f32 %v5679_v6, %v10658_v49 }
 0x957   : > { %6188 = vmatpush1.bf16.msra.mxu1 %v6031_v31  ;;  %v5733_v38 = vsel %vm11609_vm6, %v5718_v15, %v10785_v46  ;;  %v5772_v31 = vadd.f32 %v5734_v12, %v10713_v34  ;;  %v6016_v20 = vpack.c.bf16 %v5968_v23, %v5965_v7 }
 0x958   : > { %6189 = vmatprep.subr.bf16.mxu1 %v11607_v42  ;;  %v5771_v46 = vadd.f32 %v5733_v38, %v10711_v44  ;;  %v5735_v44 = vsel %vm11611_vm7, %v10859_v45, %v10848_v1 }
 0x959   : > { %6111 = vmatpush1.bf16.msra.mxu0 %v6023_v51  ;;  %v10877_v51 = vld [vmem:[#allocation2 + $0x10] sm:$0xff]  ;;  %v5774_v2 = vadd.f32 %v5735_v44, %v10788_v28 }
 0x95a   : > { %v10862_v3 = vpop.permute.xlu0 %5805  ;;  %v10864_v56 = vpop.permute.xlu1 %5753  ;;  %6112 = vmatprep.subr.bf16.mxu0 %v6021_v54  ;;  %v6013_v5 = vpack.c.bf16 %v5962_v14, %v10877_v51  ;;  %v7110_v44 = vld [vmem:[%s11048_s6 + $0x10] ss:$8 sps:$4 sm:$0xff]  }
 0x95b   : > { %6190 = vmatpush1.bf16.msra.mxu1 %v6028_v24  ;;  %v5763_v33 = vsel %vm1590_vm11, %v10587_v41, %v10864_v56 }
 0x95c   : > { %6191 = vmatprep.subr.bf16.mxu1 %v11607_v42 }
 0x95d   : > { %6113 = vmatpush1.bf16.msra.mxu0 %v6020_v50  ;;  %v6011_v50 = vpack.c.bf16 %v5960_v0, %v5957_v58 }
 0x95e   : > { %v10867_v57 = vpop.permute.xlu0 %5811  ;;  %v5802_v63 = vpop.permute.xlu1 %5801  ;;  %6114 = vmatprep.subr.bf16.mxu0 %v6018_v43  ;;  %v5680_v43 = vsel %vm1504_vm15, %v10569_v40, %v10854_v35 }
 0x95f   : > { %6192 = vmatpush1.bf16.msra.mxu1 %v6025_v59  ;;  %v5692_v13 = vadd.f32 %v5680_v43, %v10743_v37 }
 0x960   : > { %6193 = vmatprep.subr.bf16.mxu1 %v11607_v42 }
 0x961   : > { %6115 = vmatpush1.bf16.msra.mxu0 %v6017_v4 }
 0x962   : > { %v5756_v11 = vpop.permute.xlu0 %5755  ;;  %v5804_v15 = vpop.permute.xlu1 %5803  ;;  %6116 = vmatprep.subr.bf16.mxu0 %v6015_v25 }
 0x963   : > { %6194 = vmatpush1.bf16.msra.mxu1 %v6022_v16  ;;  %v5817_v54 = vsel %vm1643_vm10, %v5802_v63, %v5804_v15  ;;  %v5818_v34 = vsel %vm1643_vm10, %v5804_v15, %v10862_v3  ;;  %v5764_v39 = vsel %vm1590_vm11, %v10846_v30, %v5756_v11  ;;  %v5773_v30 = vadd.f32 %v5763_v33, %v5689_v36 }
 0x964   : > { %v5855_v24 = vadd.f32 %v5817_v54, %v5771_v46  ;;  %v5856_v55 = vadd.f32 %v5818_v34, %v5772_v31  ;;  %6195 = vmatprep.subr.bf16.mxu1 %v11607_v42  ;;  %v5776_v62 = vadd.f32 %v5764_v39, %v5692_v13  ;;  %v7111_v34 = vld [vmem:[%s11048_s6 + $0x24] ss:$8 sps:$4 sm:$0xff]  }
 0x965   : > { %6117 = vmatpush1.bf16.msra.mxu0 %v6014_v27 }
 0x966   : > { %v5891_v32 = vadd.f32 %v10852_v21, %v5855_v24  ;;  %v5892_v1 = vadd.f32 %v10852_v21, %v5856_v55  ;;  %v5808_v45 = vpop.permute.xlu0 %5807  ;;  %v5810_v59 = vpop.permute.xlu1 %5809  ;;  %6118 = vmatprep.subr.bf16.mxu0 %v6012_v22  ;;  %v7113_v24 = vld [vmem:[%s11048_s6 + $0x20] ss:$8 sps:$4 sm:$0xff]   ;;  %v7114_v55 = vld [vmem:[%s11048_s6 + $0x34] ss:$8 sps:$4 sm:$0xff]  }
 0x967   : > { %6196 = vmatpush1.bf16.msra.mxu1 %v6019_v10  ;;  %v5819_v17 = vsel %vm1643_vm10, %v5808_v45, %v5810_v59  ;;  %v5820_v63 = vsel %vm1643_vm10, %v5810_v59, %v10867_v57  ;;  %v6046_v10 = vld [vmem:[%s11048_s6 + $0x40] sm:$0xff] }
 0x968   : > { %vm5903_vm0 = vcmp.ge.f32.partialorder %v5891_v32, 0.0  ;;  %vm5904_vm13 = vcmp.ge.f32.partialorder %v5892_v1, 0.0  ;;  %v5915_v40 = vmul.f32 0.01, %v5891_v32  ;;  %v5916_v35 = vmul.f32 0.01, %v5892_v1  ;;  %6197 = vmatprep.subr.bf16.mxu1 %v11607_v42 }
 0x969   : > { %v5858_v28 = vadd.f32 %v5819_v17, %v5774_v2  ;;  %v5859_v52 = vadd.f32 %v5820_v63, %v5775_v61  ;;  %6119 = vmatpush1.bf16.msra.mxu0 %v6011_v50  ;;  %v6727_v50 = vcombine.high %v6046_v10, %v6046_v10 }
 0x96a   : > { %v5927_v12 = vsel %vm5903_vm0, %v5891_v32, %v5915_v40  ;;  %v5928_v38 = vsel %vm5904_vm13, %v5892_v1, %v5916_v35  ;;  %v5840_v4 = vpop.permute.xlu0 %5839  ;;  %v5838_v53 = vpop.permute.xlu1 %5837  ;;  %vm11612_vm13 = vcmask 130048  }
 0x96b   : > { %v5939_v8 = vmul.f32 %v5927_v12, %v11604_v48  ;;  %v5940_v26 = vmul.f32 %v5928_v38, %v11605_v29  ;;  %v5894_v41 = vadd.f32 %v10850_v60, %v5858_v28  ;;  %v5895_v56 = vadd.f32 %v10850_v60, %v5859_v52  ;;  %6198 = vmatpush1.bf16.msra.mxu1 %v6016_v20  ;;  %v7116_v20 = vld [vmem:[%s11048_s6 + $0x30] ss:$8 sps:$4 sm:$0xff]  }
 0x96c   : > { %v5848_v37 = vsel %vm1676_vm12, %v10867_v57, %v5840_v4  ;;  %v5847_v49 = vsel %vm1676_vm12, %v10862_v3, %v5838_v53  ;;  %6199 = vmatprep.subr.bf16.mxu1 %v11607_v42 }
 0x96d   : > { %vm5906_vm6 = vcmp.ge.f32.partialorder %v5894_v41, 0.0  ;;  %vm5907_vm9 = vcmp.ge.f32.partialorder %v5895_v56, 0.0  ;;  %v5918_v19 = vmul.f32 0.01, %v5894_v41  ;;  %v5919_v9 = vmul.f32 0.01, %v5895_v56 }
 0x96e   : > { %v5860_v25 = vadd.f32 %v5848_v37, %v5776_v62  ;;  %v5857_v16 = vadd.f32 %v5847_v49, %v5773_v30 }
 0x96f   : > { %v5930_v7 = vsel %vm5906_vm6, %v5894_v41, %v5918_v19  ;;  %v5931_v23 = vsel %vm5907_vm9, %v5895_v56, %v5919_v9  ;;  %6200 = vmatpush1.bf16.msra.mxu1 %v6013_v5  ;;  %vm11613_vm6 = vmmov %vm11612_vm13  ;;  %v6726_v5 = vcombine.low %v6046_v10, %v6046_v10 }
 0x970   : > { %v5942_v58 = vmul.f32 %v5930_v7, %v11604_v48  ;;  %v5943_v31 = vmul.f32 %v5931_v23, %v11605_v29  ;;  %v5896_v57 = vadd.f32 %v10850_v60, %v5860_v25  ;;  %v5893_v46 = vadd.f32 %v10852_v21, %v5857_v16  ;;  %6215 = vmatprep.subr.bf16.mxu1 %v11607_v42  ;;  %v7105_v60 = vld [vmem:[%s11048_s6] ss:$8 sps:$4 sm:$0xff]   ;;  %v7108_v21 = vld [vmem:[%s11048_s6 + $0x14] ss:$8 sps:$4 sm:$0xff]   ;;  %vm11614_vm9 = vmmov %vm11613_vm6 }
 0x972   : > { %vm5908_vm7 = vcmp.ge.f32.partialorder %v5896_v57, 0.0  ;;  %v5920_v3 = vmul.f32 0.01, %v5896_v57  ;;  %vm5905_vm0 = vcmp.ge.f32.partialorder %v5893_v46, 0.0  ;;  %v5917_v11 = vmul.f32 0.01, %v5893_v46 }
 0x973   : > { %v6036_v15 = vpack.c.bf16 %v5943_v31, %v5940_v26  ;;  %v6035_v22 = vpack.c.bf16 %v5942_v58, %v5939_v8 }
 0x974   : > { %v5932_v0 = vsel %vm5908_vm7, %v5896_v57, %v5920_v3  ;;  %v5929_v51 = vsel %vm5905_vm0, %v5893_v46, %v5917_v11  ;;  %vm11615_vm7 = vmmov %vm11613_vm6  ;;  %v10999_v3 = vpop.permute.xlu1 %6428 }
 0x975   : > { %v5944_v14 = vmul.f32 %v5932_v0, %v11603_v18  ;;  %v5941_v47 = vmul.f32 %v5929_v51, %v11603_v18  ;;  %6134 = vmatprep.subr.bf16.mxu0 %v6036_v15  ;;  %vm11616_vm0 = vmmov %vm11613_vm6 }
 0x976   : > { %6135 = vmatpush2.bf16.msra.mxu0 %v6035_v22 }
 0x977   : > { %5956 = vst.msk [vmem:[#allocation2 + $0x1a8] sm:$0xff] %vm424_vm1, %v5944_v14  ;;  %5953 = vst.msk [vmem:[#allocation2 + $0x190] sm:$0xff] %vm424_vm1, %v5941_v47 }
 0x979   : > { %6137 = vmatmul.mubr.bf16.vlgmr.msra.gmra.mxu0 %v7105_v60 }
 0x97a   : > { %6729 = vmatprep.mubr.msk.bf16.mxu0 %vm11612_vm13, %v7108_v21  ;;  %vm11617_vm13 = vmmov %vm11616_vm0 }
 0x97e   : > { %v6007_v42 = vld [vmem:[#allocation2 + $0x190] sm:$0xff]  ;;  %v6010_v54 = vld [vmem:[#allocation2 + $0x1a8] sm:$0xff] }
 0x97f   : > { %v6037_v27 = vpack.c.bf16 %v6010_v54, %v6007_v42 }
 0x981   : > { %6216 = vmatpush2.bf16.msra.mxu1 %v6037_v27  ;;  %6147 = vmatmul.mubr.bf16.gmra.mxu0 %v7110_v44 }
 0x982   : > { %6730 = vmatprep.mubr.msk.bf16.mxu0 %vm11613_vm6, %v7111_v34  ;;  %vm11618_vm6 = vmmov %vm11616_vm0 }
 0x984   : > { %6218 = vmatmul.mubr.bf16.vlgmr.msra.gmra.mxu1 %v7105_v60 }
 0x985   : > { %6734 = vmatprep.mubr.msk.bf16.mxu1 %vm11614_vm9, %v7108_v21  ;;  %vm11619_vm9 = vmmov %vm11616_vm0 }
 0x989   : > { %6157 = vmatmul.mubr.bf16.gmra.mxu0 %v7113_v24 }
 0x98a   : > { %6731 = vmatprep.mubr.msk.bf16.mxu0 %vm11615_vm7, %v7114_v55 }
 0x98c   : > { %6226 = vmatmul.mubr.bf16.gmra.mxu1 %v7110_v44 }
 0x98d   : > { %6735 = vmatprep.mubr.msk.bf16.mxu1 %vm11616_vm0, %v7111_v34 }
 0x991   : > { %6167 = vmatmul.mubr.bf16.gmra.mxu0 %v7116_v20 }
 0x992   : > { %6732 = vmatprep.mubr.msk.bf16.mxu0 %vm11617_vm13, %v6727_v50 }
 0x994   : > { %6234 = vmatmul.mubr.bf16.gmra.mxu1 %v7113_v24 }
 0x995   : > { %6736 = vmatprep.mubr.msk.bf16.mxu1 %vm11618_vm6, %v7114_v55 }
 0x999   : > { %6177 = vmatmul.mubr.bf16.gmra.mxu0 %v6726_v5 }
 0x99c   : > { %6242 = vmatmul.mubr.bf16.gmra.mxu1 %v7116_v20 }
 0x99d   : > { %6737 = vmatprep.mubr.msk.bf16.mxu1 %vm11619_vm9, %v6727_v50 }
 0x9a4   : > { %6250 = vmatmul.mubr.bf16.gmra.mxu1 %v6726_v5 }
 0xa39   : > { %v6138_v61 = vpop.f32.mrf.mxu0 }
 0xa3b   : > { %v6140_v43 = vpop.f32.mrf.mxu0 }
 0xa3d   : > { %v6142_v32 = vpop.f32.mrf.mxu0 }
 0xa3f   : > { %v6144_v1 = vpop.f32.mrf.mxu0 }
 0xa41   : > { %v6148_v45 = vpop.f32.mrf.mxu0 }
 0xa43   : > { %v6150_v59 = vpop.f32.mrf.mxu0 }
 0xa44   : > { %v6219_v6 = vpop.f32.mrf.mxu1 }
 0xa45   : > { %6267 = vrot.lane.b32.xlu0 %v6219_v6, %s11522_s0  ;;  %6258 = vrot.lane.b32.xlu1 %v6219_v6, %s11523_s23  ;;  %v6152_v2 = vpop.f32.mrf.mxu0 }
 0xa46   : > { %v6221_v17 = vpop.f32.mrf.mxu1 }
 0xa47   : > { %v6154_v63 = vpop.f32.mrf.mxu0 }
 0xa48   : > { %v6222_v40 = vpop.f32.mrf.mxu1 }
 0xa49   : > { %6263 = vrot.lane.b32.xlu0 %v6138_v61, %s11522_s0  ;;  %6276 = vrot.lane.b32.xlu1 %v6222_v40, %s11524_s24  ;;  %v10965_v35 = vpop.f32.mrf.mxu0 }
 0xa4a   : > { %v6224_v33 = vpop.f32.mrf.mxu1 }
 0xa4b   : > { %v10967_v39 = vpop.f32.mrf.mxu0 }
 0xa4c   : > { %v6227_v28 = vpop.f32.mrf.mxu1 }
 0xa4d   : > { %6285 = vrot.lane.b32.xlu0 %v6222_v40, %s11407_s27  ;;  %6265 = vrot.lane.b32.xlu1 %v6140_v43, %s11522_s0  ;;  %v6162_v52 = vpop.f32.mrf.mxu0 }
 0xa4e   : > { %v6229_v13 = vpop.f32.mrf.mxu1 }
 0xa4f   : > { %v6164_v36 = vpop.f32.mrf.mxu0 }
 0xa50   : > { %v6230_v12 = vpop.f32.mrf.mxu1 }
 0xa51   : > { %6281 = vrot.lane.b32.xlu0 %v6142_v32, %s11407_s27  ;;  %6297 = vrot.lane.b32.xlu1 %v6227_v28, %s11406_s26  ;;  %v6168_v38 = vpop.f32.mrf.mxu0 }
 0xa52   : > { %v6232_v4 = vpop.f32.mrf.mxu1 }
 0xa53   : > { %v6170_v53 = vpop.f32.mrf.mxu0 }
 0xa54   : > { %v10973_v8 = vpop.f32.mrf.mxu1 }
 0xa55   : > { %6306 = vrot.lane.b32.xlu0 %v6227_v28, %s11417_s29  ;;  %6283 = vrot.lane.b32.xlu1 %v6144_v1, %s11407_s27  ;;  %v6172_v26 = vpop.f32.mrf.mxu0 }
 0xa56   : > { %v6237_v41 = vpop.f32.mrf.mxu1 }
 0xa57   : > { %v6174_v56 = vpop.f32.mrf.mxu0 }
 0xa58   : > { %v6238_v30 = vpop.f32.mrf.mxu1 }
 0xa59   : > { %6302 = vrot.lane.b32.xlu0 %v6148_v45, %s11417_s29  ;;  %6318 = vrot.lane.b32.xlu1 %v6230_v12, %s11410_s28  ;;  %v6178_v62 = vpop.f32.mrf.mxu0 }
 0xa5a   : > { %v6240_v37 = vpop.f32.mrf.mxu1 }
 0xa5b   : > { %v6180_v49 = vpop.f32.mrf.mxu0 }
 0xa5c   : > { %v6243_v19 = vpop.f32.mrf.mxu1 }
 0xa5d   : > { %6327 = vrot.lane.b32.xlu0 %v6230_v12, %s11423_s13  ;;  %6304 = vrot.lane.b32.xlu1 %v6150_v59, %s11417_s29  ;;  %v6182_v9 = vpop.f32.mrf.mxu0 }
 0xa5e   : > { %v6245_v25 = vpop.f32.mrf.mxu1 }
 0xa5f   : > { %v6183_v16 = vpop.f32.mrf.mxu0 }
 0xa60   : > { %v6246_v7 = vpop.f32.mrf.mxu1 }
 0xa61   : > { %6323 = vrot.lane.b32.xlu0 %v6152_v2, %s11423_s13  ;;  %6325 = vrot.lane.b32.xlu1 %v6154_v63, %s11423_s13 }
 0xa62   : > { %v6248_v23 = vpop.f32.mrf.mxu1 }
 0xa64   : > { %v6251_v58 = vpop.f32.mrf.mxu1 }
 0xa65   : > { %6355 = vrot.lane.b32.xlu0 %v6162_v52, %s11345_s18  ;;  %6348 = vrot.lane.b32.xlu1 %v6238_v30, %s11422_s30 }
 0xa66   : > { %v6253_v31 = vpop.f32.mrf.mxu1 }
 0xa68   : > { %v6254_v57 = vpop.f32.mrf.mxu1 }
 0xa69   : > { %6346 = vrot.lane.b32.xlu0 %v6164_v36, %s11422_s30  ;;  %6344 = vrot.lane.b32.xlu1 %v6162_v52, %s11422_s30 }
 0xa6a   : > { %v6255_v46 = vpop.f32.mrf.mxu1 }
 0xa6d   : > { %6376 = vrot.lane.b32.xlu0 %v6168_v38, %s11346_s14  ;;  %6369 = vrot.lane.b32.xlu1 %v6243_v19, %s11313_s16 }
 0xa71   : > { %6367 = vrot.lane.b32.xlu0 %v6170_v53, %s11313_s16  ;;  %6365 = vrot.lane.b32.xlu1 %v6168_v38, %s11313_s16 }
 0xa75   : > { %6397 = vrot.lane.b32.xlu0 %v6172_v26, %s11349_s15  ;;  %6390 = vrot.lane.b32.xlu1 %v6246_v7, %s11319_s19 }
 0xa79   : > { %6388 = vrot.lane.b32.xlu0 %v6174_v56, %s11319_s19  ;;  %6386 = vrot.lane.b32.xlu1 %v6172_v26, %s11319_s19 }
 0xa7d   : > { %6407 = vrot.lane.b32.xlu0 %v6178_v62, %s11325_s17  ;;  %6409 = vrot.lane.b32.xlu1 %v6180_v49, %s11325_s17 }
 0xa81   : > { %6418 = vrot.lane.b32.xlu1 %v6178_v62, %s11620_s5  ;;  %6411 = vrot.lane.b32.xlu0 %v6251_v58, %s11325_s17  ;;  %s413_s17 = scalar_lea.vmem %s11054_s12, %s7005_s7 }
 0xab7   : > { %v6268_v11 = vpop.permute.xlu0 %6267  ;;  %v6259_v15 = vpop.permute.xlu1 %6258 }
 0xabb   : > { %v6264_v22 = vpop.permute.xlu0 %6263  ;;  %v6277_v0 = vpop.permute.xlu1 %6276 }
 0xabc   : > { %v6274_v1 = vsel %vm1057_vm2, %v6259_v15, %v6264_v22 }
 0xabf   : > { %v6286_v51 = vpop.permute.xlu0 %6285  ;;  %v6266_v14 = vpop.permute.xlu1 %6265 }
 0xac0   : > { %v6270_v2 = vsel %vm1057_vm2, %v6266_v14, %v6268_v11  ;;  %v6269_v36 = vsel %vm1057_vm2, %v6264_v22, %v6266_v14 }
 0xac3   : > { %v6282_v47 = vpop.permute.xlu0 %6281  ;;  %v6298_v60 = vpop.permute.xlu1 %6297 }
 0xac4   : > { %v6292_v61 = vsel %vm1130_vm3, %v6277_v0, %v6282_v47 }
 0xac5   : > { %v6293_v6 = vadd.f32 %v6292_v61, %v6274_v1 }
 0xac7   : > { %v6307_v21 = vpop.permute.xlu0 %6306  ;;  %v6284_v42 = vpop.permute.xlu1 %6283 }
 0xac8   : > { %v6288_v45 = vsel %vm1130_vm3, %v6284_v42, %v6286_v51  ;;  %v6287_v17 = vsel %vm1130_vm3, %v6282_v47, %v6284_v42  ;;  %vm11621_vm3 = vcmask 1039360  }
 0xac9   : > { %v6295_v33 = vadd.f32 %v6288_v45, %v6270_v2  ;;  %v6294_v4 = vadd.f32 %v6287_v17, %v6269_v36  ;;  %vm11622_vm2 = vmmov %vm11621_vm3 }
 0xacb   : > { %v6303_v54 = vpop.permute.xlu0 %6302  ;;  %v6319_v34 = vpop.permute.xlu1 %6318 }
 0xacc   : > { %v6313_v59 = vsel %vm1215_vm4, %v6298_v60, %v6303_v54 }
 0xacd   : > { %v6314_v28 = vadd.f32 %v6313_v59, %v6293_v6 }
 0xacf   : > { %v6328_v27 = vpop.permute.xlu0 %6327  ;;  %v6305_v44 = vpop.permute.xlu1 %6304 }
 0xad0   : > { %v6309_v63 = vsel %vm1215_vm4, %v6305_v44, %v6307_v21  ;;  %v6308_v12 = vsel %vm1215_vm4, %v6303_v54, %v6305_v44  ;;  %vm11623_vm4 = vcmask 900096  }
 0xad1   : > { %v6316_v53 = vadd.f32 %v6309_v63, %v6295_v33  ;;  %v6315_v56 = vadd.f32 %v6308_v12, %v6294_v4 }
 0xad3   : > { %v6324_v24 = vpop.permute.xlu0 %6323  ;;  %v6326_v55 = vpop.permute.xlu1 %6325 }
 0xad4   : > { %v6334_v40 = vsel %vm1300_vm5, %v6319_v34, %v6324_v24  ;;  %v6330_v38 = vsel %vm1300_vm5, %v6326_v55, %v6328_v27  ;;  %v6329_v41 = vsel %vm1300_vm5, %v6324_v24, %v6326_v55  ;;  %vm11624_vm5 = vmmov %vm11623_vm4 }
 0xad5   : > { %v6335_v26 = vadd.f32 %v6334_v40, %v6314_v28  ;;  %v6337_v30 = vadd.f32 %v6330_v38, %v6316_v53  ;;  %v6336_v19 = vadd.f32 %v6329_v41, %v6315_v56 }
 0xad7   : > { %v6356_v10 = vpop.permute.xlu0 %6355  ;;  %v6349_v20 = vpop.permute.xlu1 %6348  ;;  %v6338_v9 = vadd.f32 %v6335_v26, %v10965_v35  ;;  %v6340_v16 = vadd.f32 %v6337_v30, %v10973_v8  ;;  %v6339_v11 = vadd.f32 %v6336_v19, %v10967_v39 }
 0xad8   : > { %v6358_v31 = vsel %vm1418_vm14, %v6349_v20, %v6356_v10 }
 0xad9   : > { %v6361_v0 = vadd.f32 %v6358_v31, %v6340_v16 }
 0xadb   : > { %v6347_v50 = vpop.permute.xlu0 %6346  ;;  %v6345_v5 = vpop.permute.xlu1 %6344 }
 0xadc   : > { %v6350_v49 = vsel %vm11621_vm3, %v6345_v5, %v6347_v50  ;;  %v6351_v57 = vsel %vm11622_vm2, %v6347_v50, %v6349_v20 }
 0xadd   : > { %v6359_v7 = vadd.f32 %v6350_v49, %v6338_v9  ;;  %v6360_v51 = vadd.f32 %v6351_v57, %v6339_v11 }
 0xadf   : > { %v6377_v43 = vpop.permute.xlu0 %6376  ;;  %v6370_v32 = vpop.permute.xlu1 %6369 }
 0xae0   : > { %v6379_v22 = vsel %vm1504_vm15, %v6370_v32, %v6377_v43 }
 0xae1   : > { %v6382_v54 = vadd.f32 %v6379_v22, %v6361_v0 }
 0xae3   : > { %v6368_v52 = vpop.permute.xlu0 %6367  ;;  %v6366_v13 = vpop.permute.xlu1 %6365 }
 0xae4   : > { %v6371_v25 = vsel %vm1471_vm8, %v6366_v13, %v6368_v52  ;;  %v6372_v35 = vsel %vm1471_vm8, %v6368_v52, %v6370_v32 }
 0xae5   : > { %v6380_v15 = vadd.f32 %v6371_v25, %v6359_v7  ;;  %v6381_v34 = vadd.f32 %v6372_v35, %v6360_v51 }
 0xae7   : > { %v6398_v62 = vpop.permute.xlu0 %6397  ;;  %v6391_v37 = vpop.permute.xlu1 %6390 }
 0xae8   : > { %v6400_v60 = vsel %vm1590_vm11, %v6391_v37, %v6398_v62 }
 0xae9   : > { %v6403_v27 = vadd.f32 %v6400_v60, %v6382_v54 }
 0xaeb   : > { %v6389_v23 = vpop.permute.xlu0 %6388  ;;  %v6387_v58 = vpop.permute.xlu1 %6386 }
 0xaec   : > { %v6392_v46 = vsel %vm11623_vm4, %v6387_v58, %v6389_v23  ;;  %v6393_v21 = vsel %vm11624_vm5, %v6389_v23, %v6391_v37 }
 0xaed   : > { %v6401_v8 = vadd.f32 %v6392_v46, %v6380_v15  ;;  %v6402_v44 = vadd.f32 %v6393_v21, %v6381_v34 }
 0xaef   : > { %v6408_v14 = vpop.permute.xlu0 %6407  ;;  %v6410_v47 = vpop.permute.xlu1 %6409 }
 0xaf0   : > { %v6413_v42 = vsel %vm1643_vm10, %v6408_v14, %v6410_v47 }
 0xaf1   : > { %v6422_v39 = vadd.f32 %v6413_v42, %v6401_v8 }
 0xaf3   : > { %v6431_v24 = vadd.f32 %v10999_v3, %v6422_v39  ;;  %v6412_v55 = vpop.permute.xlu0 %6411  ;;  %v6419_v10 = vpop.permute.xlu1 %6418 }
 0xaf4   : > { %v6414_v20 = vsel %vm1643_vm10, %v6410_v47, %v6412_v55  ;;  %v6421_v50 = vsel %vm1676_vm12, %v6412_v55, %v6419_v10 }
 0xaf5   : > { %v6434_v5 = vmul.f32 %v6431_v24, %v11604_v48  ;;  %v6423_v61 = vadd.f32 %v6414_v20, %v6402_v44  ;;  %v6424_v43 = vadd.f32 %v6421_v50, %v6403_v27 }
 0xaf7   : > { %6437 = vst [vmem:[%s413_s17] sm:$0xff] %v6434_v5  ;;  %v6432_v32 = vadd.f32 %v10999_v3, %v6423_v61  ;;  %v6433_v1 = vadd.f32 %v10999_v3, %v6424_v43 }
 0xaf9   : > { %v6435_v45 = vmul.f32 %v6432_v32, %v11605_v29  ;;  %v6436_v59 = vmul.f32 %v6433_v1, %v11603_v18 }
 0xafb   : > { %6438 = vst [vmem:[%s413_s17 + $0x8] sm:$0xff] %v6435_v45  ;;  %6439 = vst.msk [vmem:[%s413_s17 + $0x10] sm:$0xff] %vm424_vm1, %v6436_v59 }
 0xafc PF: > { %s22_s21 = sadd.s32 1, %s7125_s21  }
 0xafd   : > { %p19_p4 = scmp.ge.s32.totalorder %s22_s21, 4  }
 0xaff   :  { %21 = sbr.rel (!%p19_p4) target bundleno = 8 (0x8), region = 98 }

</bundles_post_ra>
